<compile_context>
chip_gen: v7x
topology: tpu7x:2x2x1
jax: 0.10.0
libtpu: 0.0.40
codegen_flags: <defaults>
</compile_context>

<pallas_src>
import jax
import jax.numpy as jnp
import numpy as np
from jax.experimental import pallas as pl
from jax.experimental.pallas import tpu as pltpu

CH = 256          # fixed by the PyTorch module
EPS = 2e-5
KH = KW = 3
NTAPS = KH * KW


# ------------------------- sizing helpers -------------------------

def _pick_image_block(N, H, W):
    """Smallest divisor B of N with B*H*W >= 128 (fills MXU rows)."""
    hw = H * W
    for cand in range(1, N + 1):
        if N % cand == 0 and cand * hw >= 128:
            return cand
    return N


def _row_chunk(m):
    """Row-chunk size for the stats/writeback pass (bounds live vregs)."""
    if m <= 512:
        return m
    for c in (512, 256, 128, 64):
        if m % c == 0:
            return c
    return m


def _conv_step_bytes(B, H, W, C, in_elt_bytes):
    m = B * H * W
    return (2 * NTAPS * C * C * 2              # weight block (double-buffered)
            + 2 * m * C * in_elt_bytes         # input block
            + 2 * m * C * 2                    # bf16 output block
            + B * (H + 2) * (W + 2) * C * 2    # halo scratch
            + m * C * 4                        # f32 accumulator scratch
            + 8 * C * 4)                       # stats / affine vectors


def _compiler_params(step_bytes):
    limit = int(min(max(2 * step_bytes + (16 << 20), 32 << 20), 64 << 20))
    return pltpu.CompilerParams(dimension_semantics=("parallel",),
                                vmem_limit_bytes=limit)


# ------------------------- kernel building blocks -------------------------

def _zero_halo_border(pad_ref, B, H, W, C):
    """Zero only the 1-pixel halo border (interior is overwritten anyway)."""
    zrow = jnp.zeros((B, 1, W + 2, C), jnp.bfloat16)
    zcol = jnp.zeros((B, H + 2, 1, C), jnp.bfloat16)
    pad_ref[:, 0:1, :, :] = zrow
    pad_ref[:, H + 1:H + 2, :, :] = zrow
    pad_ref[:, :, 0:1, :] = zcol
    pad_ref[:, :, W + 1:W + 2, :] = zcol


def _accumulate_taps(pad_ref, w_ref, acc_ref, B, H, W, C):
    """9 per-tap MXU matmuls accumulating into the f32 VMEM scratch."""
    m = B * H * W
    for dy in range(KH):
        for dx in range(KW):
            k = dy * KW + dx
            lhs = pad_ref[:, dy:dy + H, dx:dx + W, :].reshape(m, C)
            tap = jnp.dot(lhs, w_ref[k * C:(k + 1) * C, :],
                          preferred_element_type=jnp.float32)
            if k == 0:
                acc_ref[...] = tap
            else:
                acc_ref[...] += tap


def _store_and_stats(acc_ref, z_ref, stats_ref, m, C, rcs):
    """Chunked bf16 writeback + per-step BN (sum, sumsq) partials."""
    s = jnp.zeros((1, C), jnp.float32)
    ss = jnp.zeros((1, C), jnp.float32)
    for r0 in range(0, m, rcs):
        a = acc_ref[r0:r0 + rcs, :]
        z_ref[r0:r0 + rcs, :] = a.astype(z_ref.dtype)
        s = s + jnp.sum(a, axis=0, keepdims=True)
        ss = ss + jnp.sum(a * a, axis=0, keepdims=True)
    stats_ref[0, :, :] = jnp.concatenate([s, ss], axis=0)   # one (2,C) store


# ------------------------- Pallas kernels -------------------------

def _make_conv1_kernel(B, H, W, C):
    """conv3x3(x) for B images + per-step (sum, sumsq) BN partials."""
    m = B * H * W
    rcs = _row_chunk(m)

    def kernel(x_ref, w_ref, z_ref, stats_ref, xpad_ref, acc_ref):
        _zero_halo_border(xpad_ref, B, H, W, C)
        xpad_ref[:, 1:H + 1, 1:W + 1, :] = x_ref[...].astype(jnp.bfloat16)
        _accumulate_taps(xpad_ref, w_ref, acc_ref, B, H, W, C)
        _store_and_stats(acc_ref, z_ref, stats_ref, m, C, rcs)

    return kernel


def _make_conv2_kernel(B, H, W, C):
    """Fused BN1-affine + ReLU + conv3x3 for B images + BN2 partials."""
    m = B * H * W
    hw = H * W
    rcs = _row_chunk(m)

    def kernel(z1_ref, s1_ref, t1_ref, w_ref, z2_ref, stats_ref,
               hpad_ref, acc_ref):
        _zero_halo_border(hpad_ref, B, H, W, C)
        scale = s1_ref[0]
        shift = t1_ref[0]
        # h1 = relu(BN1(conv1)) applied on the fly per image (never hits HBM).
        for b in range(B):
            zb = z1_ref[b * hw:(b + 1) * hw, :].astype(jnp.float32)
            hb = jnp.maximum(zb * scale + shift, 0.0)
            hpad_ref[b, 1:H + 1, 1:W + 1, :] = (
                hb.reshape(H, W, C).astype(jnp.bfloat16))
        _accumulate_taps(hpad_ref, w_ref, acc_ref, B, H, W, C)
        _store_and_stats(acc_ref, z2_ref, stats_ref, m, C, rcs)

    return kernel


def _epilogue_kernel(x_ref, z2_ref, s2_ref, t2_ref, out_ref):
    """out = relu(x + BN2_affine(conv2)), tiled elementwise over rows."""
    y = z2_ref[...].astype(jnp.float32) * s2_ref[0] + t2_ref[0]
    out_ref[...] = jnp.maximum(x_ref[...] + y, 0.0)


# ------------------------- pallas_call wrappers -------------------------

def _run_conv1(x, w1m, B):
    N, H, W, C = x.shape
    steps = N // B
    m = B * H * W
    return pl.pallas_call(
        _make_conv1_kernel(B, H, W, C),
        grid=(steps,),
        in_specs=[
            pl.BlockSpec((B, H, W, C), lambda n: (n, 0, 0, 0)),
            pl.BlockSpec((NTAPS * C, C), lambda n: (0, 0)),      # resident
        ],
        out_specs=[
            pl.BlockSpec((m, C), lambda n: (n, 0)),
            pl.BlockSpec((1, 2, C), lambda n: (n, 0, 0)),
        ],
        out_shape=[
            jax.ShapeDtypeStruct((N * H * W, C), jnp.bfloat16),  # raw conv1
            jax.ShapeDtypeStruct((steps, 2, C), jnp.float32),    # BN partials
        ],
        scratch_shapes=[
            pltpu.VMEM((B, H + 2, W + 2, C), jnp.bfloat16),      # padded halo
            pltpu.VMEM((m, C), jnp.float32),                     # f32 acc
        ],
        compiler_params=_compiler_params(_conv_step_bytes(B, H, W, C, 4)),
    )(x, w1m)


def _run_conv2(z1, s1, t1, w2m, N, H, W, B):
    C = z1.shape[-1]
    steps = N // B
    m = B * H * W
    return pl.pallas_call(
        _make_conv2_kernel(B, H, W, C),
        grid=(steps,),
        in_specs=[
            pl.BlockSpec((m, C), lambda n: (n, 0)),
            pl.BlockSpec((1, C), lambda n: (0, 0)),
            pl.BlockSpec((1, C), lambda n: (0, 0)),
            pl.BlockSpec((NTAPS * C, C), lambda n: (0, 0)),      # resident
        ],
        out_specs=[
            pl.BlockSpec((m, C), lambda n: (n, 0)),
            pl.BlockSpec((1, 2, C), lambda n: (n, 0, 0)),
        ],
        out_shape=[
            jax.ShapeDtypeStruct((N * H * W, C), jnp.bfloat16),  # raw conv2
            jax.ShapeDtypeStruct((steps, 2, C), jnp.float32),    # BN partials
        ],
        scratch_shapes=[
            pltpu.VMEM((B, H + 2, W + 2, C), jnp.bfloat16),
            pltpu.VMEM((m, C), jnp.float32),
        ],
        compiler_params=_compiler_params(_conv_step_bytes(B, H, W, C, 2)),
    )(z1, s1, t1, w2m)


def _run_epilogue(x2d, z2d, s2, t2):
    M, C = x2d.shape
    tm = min(M, 1024)   # large lane-dense tiles; ragged last tile via cdiv
    return pl.pallas_call(
        _epilogue_kernel,
        grid=(pl.cdiv(M, tm),),
        in_specs=[
            pl.BlockSpec((tm, C), lambda i: (i, 0)),
            pl.BlockSpec((tm, C), lambda i: (i, 0)),
            pl.BlockSpec((1, C), lambda i: (0, 0)),
            pl.BlockSpec((1, C), lambda i: (0, 0)),
        ],
        out_specs=pl.BlockSpec((tm, C), lambda i: (i, 0)),
        out_shape=jax.ShapeDtypeStruct((M, C), jnp.float32),
        compiler_params=pltpu.CompilerParams(
            dimension_semantics=("parallel",)),
    )(x2d, z2d, s2, t2)


# ------------------------- glue -------------------------

def _oihw_to_kmat(w_oihw):
    # (O, I, 3, 3) -> (9*I, O), row index = (dy*3+dx)*I + i (matches tap order).
    c_out, c_in = w_oihw.shape[0], w_oihw.shape[1]
    return (jnp.transpose(w_oihw, (2, 3, 1, 0))
            .reshape(NTAPS * c_in, c_out).astype(jnp.bfloat16))


def _bn_affine(stats, gamma, beta, count):
    """Fold training-mode BN into per-channel scale/shift from partials."""
    # TODO(synk): E[x^2]-mean^2 can cancel for data with large mean/std ratio;
    # fine for this test, use shifted/Welford accumulation for real data.
    tot = jnp.sum(stats, axis=0)                            # (2, C) f32
    mean = tot[0] / count
    var = jnp.maximum(tot[1] / count - mean * mean, 0.0)    # biased variance
    scale = gamma.astype(jnp.float32) * jax.lax.rsqrt(var + EPS)
    shift = beta.astype(jnp.float32) - mean * scale
    return scale[None, :], shift[None, :]                   # (1, C) each


@jax.jit
def block_forward(x_nchw, w1m, g1, b1, w2m, g2, b2):
    x = jnp.transpose(x_nchw, (0, 2, 3, 1)).astype(jnp.float32)  # NCHW -> NHWC
    N, H, W, C = x.shape
    M = N * H * W
    B = _pick_image_block(N, H, W)

    z1, st1 = _run_conv1(x, w1m, B)                 # raw conv1 + BN1 partials
    s1, t1 = _bn_affine(st1, g1, b1, float(M))
    z2, st2 = _run_conv2(z1, s1, t1, w2m, N, H, W, B)   # BN1+relu fused in
    s2, t2 = _bn_affine(st2, g2, b2, float(M))
    out2d = _run_epilogue(x.reshape(M, C), z2, s2, t2)
    return jnp.transpose(out2d.reshape(N, H, W, C), (0, 3, 1, 2))  # -> NCHW


# ------------------------- pure-JAX reference -------------------------

def ref_forward(x, w1, g1, b1, w2, g2, b2):
    def conv(a, wgt):
        return jax.lax.conv_general_dilated(
            a, wgt, (1, 1), ((1, 1), (1, 1)),
            dimension_numbers=("NCHW", "OIHW", "NCHW"),
            precision=jax.lax.Precision.HIGHEST)

    def bn(a, g, b):
        mean = jnp.mean(a, axis=(0, 2, 3), keepdims=True)
        var = jnp.mean((a - mean) ** 2, axis=(0, 2, 3), keepdims=True)
        return ((a - mean) * jax.lax.rsqrt(var + EPS)
                * g.reshape(1, -1, 1, 1) + b.reshape(1, -1, 1, 1))

    h1 = jax.nn.relu(bn(conv(x, w1), g1, b1))
    h2 = bn(conv(h1, w2), g2, b2)
    return jax.nn.relu(x + h2)


# ------------------------- main -------------------------

if __name__ == "__main__":
    key = jax.random.PRNGKey(0)
    k_x, k_w1, k_w2, k_g1, k_b1, k_g2, k_b2 = jax.random.split(key, 7)

    N, H, W = 2, 8, 8  # small spatial; channels fixed at 256 by the module
    x = jax.random.normal(k_x, (N, CH, H, W), dtype=jnp.float32)

    w_std = float(np.sqrt(2.0 / (KH * KW * CH)))  # kaiming-like, deterministic
    w1 = jax.random.normal(k_w1, (CH, CH, KH, KW), jnp.float32) * w_std
    w2 = jax.random.normal(k_w2, (CH, CH, KH, KW), jnp.float32) * w_std
    g1 = 1.0 + 0.1 * jax.random.normal(k_g1, (CH,), jnp.float32)
    b1 = 0.1 * jax.random.normal(k_b1, (CH,), jnp.float32)
    g2 = 1.0 + 0.1 * jax.random.normal(k_g2, (CH,), jnp.float32)
    b2 = 0.1 * jax.random.normal(k_b2, (CH,), jnp.float32)

    # Weight relayout (OIHW -> K-major bf16) hoisted out of the forward pass.
    w1m = jax.block_until_ready(_oihw_to_kmat(w1))
    w2m = jax.block_until_ready(_oihw_to_kmat(w2))

    out = jax.block_until_ready(block_forward(x, w1m, g1, b1, w2m, g2, b2))
    assert out.shape == (N, CH, H, W) and out.dtype == jnp.float32

    ref = jax.block_until_ready(ref_forward(x, w1, g1, b1, w2, g2, b2))
    # Tolerance accounts for bf16 MXU operands (reference is f32 HIGHEST).
    np.testing.assert_allclose(np.asarray(out), np.asarray(ref),
                               atol=1e-1, rtol=1e-1)

    print("KERNEL_OK")
</pallas_src>

<mosaic_0001>
module attributes {stable_mosaic.version = 11 : i64} {
  func.func @kernel(%arg0: i32, %arg1: memref<128x256xbf16, #tpu.memory_space<vmem>>, %arg2: memref<1x256xf32, #tpu.memory_space<vmem>>, %arg3: memref<1x256xf32, #tpu.memory_space<vmem>>, %arg4: memref<2304x256xbf16, #tpu.memory_space<vmem>>, %arg5: memref<128x256xbf16, #tpu.memory_space<vmem>>, %arg6: memref<1x2x256xf32, #tpu.memory_space<vmem>>, %arg7: memref<2x10x10x256xbf16, #tpu.memory_space<vmem>>, %arg8: memref<128x256xf32, #tpu.memory_space<vmem>>) attributes {dimension_semantics = [#tpu.dimension_semantics<parallel>], iteration_bounds = array<i64: 1>, scalar_prefetch = 0 : i64, scratch_operands = 2 : i64, tpu.core_type = #tpu.core_type<tc>, window_params = [{transform_indices = @transform_0, window_bounds = array<i64: 128, 256>}, {pipeline_mode = #tpu.pipeline_mode<synchronous>, transform_indices = @transform_1, window_bounds = array<i64: 1, 256>}, {pipeline_mode = #tpu.pipeline_mode<synchronous>, transform_indices = @transform_2, window_bounds = array<i64: 1, 256>}, {pipeline_mode = #tpu.pipeline_mode<synchronous>, transform_indices = @transform_3, window_bounds = array<i64: 2304, 256>}, {transform_indices = @transform_4, window_bounds = array<i64: 128, 256>}, {transform_indices = @transform_5, window_bounds = array<i64: 1, 2, 256>}]} {
    %cst = arith.constant 0.000000e+00 : bf16
    %0 = vector.broadcast %cst : bf16 to vector<2x1x10x256xbf16>
    %cst_0 = arith.constant 0.000000e+00 : bf16
    %1 = vector.broadcast %cst_0 : bf16 to vector<2x10x1x256xbf16>
    %c0 = arith.constant 0 : index
    %c0_1 = arith.constant 0 : index
    %c0_2 = arith.constant 0 : index
    %c0_3 = arith.constant 0 : index
    %2 = vector.load %arg7[%c0, %c0_1, %c0_2, %c0_3] : memref<2x10x10x256xbf16, #tpu.memory_space<vmem>>, vector<2x1x10x256xbf16>
    tpu.vector_store %arg7[%c0, %c0_1, %c0_2, %c0_3], %0 {strides = array<i32>} : memref<2x10x10x256xbf16, #tpu.memory_space<vmem>>, vector<2x1x10x256xbf16>,
    %c0_4 = arith.constant 0 : index
    %c9 = arith.constant 9 : index
    %c0_5 = arith.constant 0 : index
    %c0_6 = arith.constant 0 : index
    %3 = vector.load %arg7[%c0_4, %c9, %c0_5, %c0_6] : memref<2x10x10x256xbf16, #tpu.memory_space<vmem>>, vector<2x1x10x256xbf16>
    tpu.vector_store %arg7[%c0_4, %c9, %c0_5, %c0_6], %0 {strides = array<i32>} : memref<2x10x10x256xbf16, #tpu.memory_space<vmem>>, vector<2x1x10x256xbf16>,
    %c0_7 = arith.constant 0 : index
    %c0_8 = arith.constant 0 : index
    %c0_9 = arith.constant 0 : index
    %c0_10 = arith.constant 0 : index
    %4 = vector.load %arg7[%c0_7, %c0_8, %c0_9, %c0_10] : memref<2x10x10x256xbf16, #tpu.memory_space<vmem>>, vector<2x10x1x256xbf16>
    tpu.vector_store %arg7[%c0_7, %c0_8, %c0_9, %c0_10], %1 {strides = array<i32>} : memref<2x10x10x256xbf16, #tpu.memory_space<vmem>>, vector<2x10x1x256xbf16>,
    %c0_11 = arith.constant 0 : index
    %c0_12 = arith.constant 0 : index
    %c9_13 = arith.constant 9 : index
    %c0_14 = arith.constant 0 : index
    %5 = vector.load %arg7[%c0_11, %c0_12, %c9_13, %c0_14] : memref<2x10x10x256xbf16, #tpu.memory_space<vmem>>, vector<2x10x1x256xbf16>
    tpu.vector_store %arg7[%c0_11, %c0_12, %c9_13, %c0_14], %1 {strides = array<i32>} : memref<2x10x10x256xbf16, #tpu.memory_space<vmem>>, vector<2x10x1x256xbf16>,
    %c0_15 = arith.constant 0 : index
    %c0_16 = arith.constant 0 : index
    %6 = vector.load %arg2[%c0_15, %c0_16] : memref<1x256xf32, #tpu.memory_space<vmem>>, vector<1x256xf32>
    %7 = vector.shape_cast %6 : vector<1x256xf32> to vector<256xf32>
    %c0_17 = arith.constant 0 : index
    %c0_18 = arith.constant 0 : index
    %8 = vector.load %arg3[%c0_17, %c0_18] : memref<1x256xf32, #tpu.memory_space<vmem>>, vector<1x256xf32>
    %9 = vector.shape_cast %8 : vector<1x256xf32> to vector<256xf32>
    %c0_19 = arith.constant 0 : index
    %c0_20 = arith.constant 0 : index
    %10 = vector.load %arg1[%c0_19, %c0_20] : memref<128x256xbf16, #tpu.memory_space<vmem>>, vector<64x256xbf16>
    %11 = arith.extf %10 : vector<64x256xbf16> to vector<64x256xf32>
    %12 = vector.shape_cast %7 : vector<256xf32> to vector<1x256xf32>
    %13 = vector.broadcast %12 : vector<1x256xf32> to vector<64x256xf32>
    %14 = arith.mulf %11, %13 : vector<64x256xf32>
    %15 = vector.shape_cast %9 : vector<256xf32> to vector<1x256xf32>
    %16 = vector.broadcast %15 : vector<1x256xf32> to vector<64x256xf32>
    %17 = arith.addf %14, %16 : vector<64x256xf32>
    %cst_21 = arith.constant 0.000000e+00 : f32
    %18 = vector.broadcast %cst_21 : f32 to vector<64x256xf32>
    %19 = arith.maximumf %17, %18 : vector<64x256xf32>
    %20 = vector.shape_cast %19 : vector<64x256xf32> to vector<8x8x256xf32>
    %21 = arith.truncf %20 : vector<8x8x256xf32> to vector<8x8x256xbf16>
    %c0_22 = arith.constant 0 : index
    %c1 = arith.constant 1 : index
    %c1_23 = arith.constant 1 : index
    %c0_24 = arith.constant 0 : index
    %22 = vector.load %arg7[%c0_22, %c1, %c1_23, %c0_24] : memref<2x10x10x256xbf16, #tpu.memory_space<vmem>>, vector<1x8x8x256xbf16>
    %23 = vector.shape_cast %22 : vector<1x8x8x256xbf16> to vector<8x8x256xbf16>
    %24 = vector.shape_cast %21 : vector<8x8x256xbf16> to vector<1x8x8x256xbf16>
    tpu.vector_store %arg7[%c0_22, %c1, %c1_23, %c0_24], %24 {strides = array<i32>} : memref<2x10x10x256xbf16, #tpu.memory_space<vmem>>, vector<1x8x8x256xbf16>,
    %c64 = arith.constant 64 : index
    %c0_25 = arith.constant 0 : index
    %25 = vector.load %arg1[%c64, %c0_25] : memref<128x256xbf16, #tpu.memory_space<vmem>>, vector<64x256xbf16>
    %26 = arith.extf %25 : vector<64x256xbf16> to vector<64x256xf32>
    %27 = vector.shape_cast %7 : vector<256xf32> to vector<1x256xf32>
    %28 = vector.broadcast %27 : vector<1x256xf32> to vector<64x256xf32>
    %29 = arith.mulf %26, %28 : vector<64x256xf32>
    %30 = vector.shape_cast %9 : vector<256xf32> to vector<1x256xf32>
    %31 = vector.broadcast %30 : vector<1x256xf32> to vector<64x256xf32>
    %32 = arith.addf %29, %31 : vector<64x256xf32>
    %cst_26 = arith.constant 0.000000e+00 : f32
    %33 = vector.broadcast %cst_26 : f32 to vector<64x256xf32>
    %34 = arith.maximumf %32, %33 : vector<64x256xf32>
    %35 = vector.shape_cast %34 : vector<64x256xf32> to vector<8x8x256xf32>
    %36 = arith.truncf %35 : vector<8x8x256xf32> to vector<8x8x256xbf16>
    %c1_27 = arith.constant 1 : index
    %c1_28 = arith.constant 1 : index
    %c1_29 = arith.constant 1 : index
    %c0_30 = arith.constant 0 : index
    %37 = vector.load %arg7[%c1_27, %c1_28, %c1_29, %c0_30] : memref<2x10x10x256xbf16, #tpu.memory_space<vmem>>, vector<1x8x8x256xbf16>
    %38 = vector.shape_cast %37 : vector<1x8x8x256xbf16> to vector<8x8x256xbf16>
    %39 = vector.shape_cast %36 : vector<8x8x256xbf16> to vector<1x8x8x256xbf16>
    tpu.vector_store %arg7[%c1_27, %c1_28, %c1_29, %c0_30], %39 {strides = array<i32>} : memref<2x10x10x256xbf16, #tpu.memory_space<vmem>>, vector<1x8x8x256xbf16>,
    %c0_31 = arith.constant 0 : index
    %c0_32 = arith.constant 0 : index
    %c0_33 = arith.constant 0 : index
    %c0_34 = arith.constant 0 : index
    %40 = vector.load %arg7[%c0_31, %c0_32, %c0_33, %c0_34] : memref<2x10x10x256xbf16, #tpu.memory_space<vmem>>, vector<2x8x8x256xbf16>
    %41 = vector.shape_cast %40 : vector<2x8x8x256xbf16> to vector<128x256xbf16>
    %c0_35 = arith.constant 0 : index
    %c0_36 = arith.constant 0 : index
    %42 = vector.load %arg4[%c0_35, %c0_36] : memref<2304x256xbf16, #tpu.memory_space<vmem>>, vector<256x256xbf16>
    %cst_37 = arith.constant dense<0.000000e+00> : vector<128x256xf32>
    %43 = tpu.matmul %41, %42, %cst_37 {dimension_numbers = #tpu.dot_dimension_numbers<[1], [0], [0], [1], [0, 0, 1, 1], [], []>} : vector<128x256xbf16>, vector<256x256xbf16>, vector<128x256xf32> -> vector<128x256xf32>
    %c0_38 = arith.constant 0 : index
    %c0_39 = arith.constant 0 : index
    %44 = vector.load %arg8[%c0_38, %c0_39] : memref<128x256xf32, #tpu.memory_space<vmem>>, vector<128x256xf32>
    tpu.vector_store %arg8[%c0_38, %c0_39], %43 {strides = array<i32>} : memref<128x256xf32, #tpu.memory_space<vmem>>, vector<128x256xf32>,
    %c0_40 = arith.constant 0 : index
    %c0_41 = arith.constant 0 : index
    %c1_42 = arith.constant 1 : index
    %c0_43 = arith.constant 0 : index
    %45 = vector.load %arg7[%c0_40, %c0_41, %c1_42, %c0_43] : memref<2x10x10x256xbf16, #tpu.memory_space<vmem>>, vector<2x8x8x256xbf16>
    %46 = vector.shape_cast %45 : vector<2x8x8x256xbf16> to vector<128x256xbf16>
    %c256 = arith.constant 256 : index
    %c0_44 = arith.constant 0 : index
    %47 = vector.load %arg4[%c256, %c0_44] : memref<2304x256xbf16, #tpu.memory_space<vmem>>, vector<256x256xbf16>
    %cst_45 = arith.constant dense<0.000000e+00> : vector<128x256xf32>
    %48 = tpu.matmul %46, %47, %cst_45 {dimension_numbers = #tpu.dot_dimension_numbers<[1], [0], [0], [1], [0, 0, 1, 1], [], []>} : vector<128x256xbf16>, vector<256x256xbf16>, vector<128x256xf32> -> vector<128x256xf32>
    %c0_46 = arith.constant 0 : index
    %c0_47 = arith.constant 0 : index
    %49 = vector.load %arg8[%c0_46, %c0_47] : memref<128x256xf32, #tpu.memory_space<vmem>>, vector<128x256xf32>
    %50 = arith.addf %49, %48 : vector<128x256xf32>
    %c0_48 = arith.constant 0 : index
    %c0_49 = arith.constant 0 : index
    %51 = vector.load %arg8[%c0_48, %c0_49] : memref<128x256xf32, #tpu.memory_space<vmem>>, vector<128x256xf32>
    tpu.vector_store %arg8[%c0_48, %c0_49], %50 {strides = array<i32>} : memref<128x256xf32, #tpu.memory_space<vmem>>, vector<128x256xf32>,
    %c0_50 = arith.constant 0 : index
    %c0_51 = arith.constant 0 : index
    %c2 = arith.constant 2 : index
    %c0_52 = arith.constant 0 : index
    %52 = vector.load %arg7[%c0_50, %c0_51, %c2, %c0_52] : memref<2x10x10x256xbf16, #tpu.memory_space<vmem>>, vector<2x8x8x256xbf16>
    %53 = vector.shape_cast %52 : vector<2x8x8x256xbf16> to vector<128x256xbf16>
    %c512 = arith.constant 512 : index
    %c0_53 = arith.constant 0 : index
    %54 = vector.load %arg4[%c512, %c0_53] : memref<2304x256xbf16, #tpu.memory_space<vmem>>, vector<256x256xbf16>
    %cst_54 = arith.constant dense<0.000000e+00> : vector<128x256xf32>
    %55 = tpu.matmul %53, %54, %cst_54 {dimension_numbers = #tpu.dot_dimension_numbers<[1], [0], [0], [1], [0, 0, 1, 1], [], []>} : vector<128x256xbf16>, vector<256x256xbf16>, vector<128x256xf32> -> vector<128x256xf32>
    %c0_55 = arith.constant 0 : index
    %c0_56 = arith.constant 0 : index
    %56 = vector.load %arg8[%c0_55, %c0_56] : memref<128x256xf32, #tpu.memory_space<vmem>>, vector<128x256xf32>
    %57 = arith.addf %56, %55 : vector<128x256xf32>
    %c0_57 = arith.constant 0 : index
    %c0_58 = arith.constant 0 : index
    %58 = vector.load %arg8[%c0_57, %c0_58] : memref<128x256xf32, #tpu.memory_space<vmem>>, vector<128x256xf32>
    tpu.vector_store %arg8[%c0_57, %c0_58], %57 {strides = array<i32>} : memref<128x256xf32, #tpu.memory_space<vmem>>, vector<128x256xf32>,
    %c0_59 = arith.constant 0 : index
    %c1_60 = arith.constant 1 : index
    %c0_61 = arith.constant 0 : index
    %c0_62 = arith.constant 0 : index
    %59 = vector.load %arg7[%c0_59, %c1_60, %c0_61, %c0_62] : memref<2x10x10x256xbf16, #tpu.memory_space<vmem>>, vector<2x8x8x256xbf16>
    %60 = vector.shape_cast %59 : vector<2x8x8x256xbf16> to vector<128x256xbf16>
    %c768 = arith.constant 768 : index
    %c0_63 = arith.constant 0 : index
    %61 = vector.load %arg4[%c768, %c0_63] : memref<2304x256xbf16, #tpu.memory_space<vmem>>, vector<256x256xbf16>
    %cst_64 = arith.constant dense<0.000000e+00> : vector<128x256xf32>
    %62 = tpu.matmul %60, %61, %cst_64 {dimension_numbers = #tpu.dot_dimension_numbers<[1], [0], [0], [1], [0, 0, 1, 1], [], []>} : vector<128x256xbf16>, vector<256x256xbf16>, vector<128x256xf32> -> vector<128x256xf32>
    %c0_65 = arith.constant 0 : index
    %c0_66 = arith.constant 0 : index
    %63 = vector.load %arg8[%c0_65, %c0_66] : memref<128x256xf32, #tpu.memory_space<vmem>>, vector<128x256xf32>
    %64 = arith.addf %63, %62 : vector<128x256xf32>
    %c0_67 = arith.constant 0 : index
    %c0_68 = arith.constant 0 : index
    %65 = vector.load %arg8[%c0_67, %c0_68] : memref<128x256xf32, #tpu.memory_space<vmem>>, vector<128x256xf32>
    tpu.vector_store %arg8[%c0_67, %c0_68], %64 {strides = array<i32>} : memref<128x256xf32, #tpu.memory_space<vmem>>, vector<128x256xf32>,
    %c0_69 = arith.constant 0 : index
    %c1_70 = arith.constant 1 : index
    %c1_71 = arith.constant 1 : index
    %c0_72 = arith.constant 0 : index
    %66 = vector.load %arg7[%c0_69, %c1_70, %c1_71, %c0_72] : memref<2x10x10x256xbf16, #tpu.memory_space<vmem>>, vector<2x8x8x256xbf16>
    %67 = vector.shape_cast %66 : vector<2x8x8x256xbf16> to vector<128x256xbf16>
    %c1024 = arith.constant 1024 : index
    %c0_73 = arith.constant 0 : index
    %68 = vector.load %arg4[%c1024, %c0_73] : memref<2304x256xbf16, #tpu.memory_space<vmem>>, vector<256x256xbf16>
    %cst_74 = arith.constant dense<0.000000e+00> : vector<128x256xf32>
    %69 = tpu.matmul %67, %68, %cst_74 {dimension_numbers = #tpu.dot_dimension_numbers<[1], [0], [0], [1], [0, 0, 1, 1], [], []>} : vector<128x256xbf16>, vector<256x256xbf16>, vector<128x256xf32> -> vector<128x256xf32>
    %c0_75 = arith.constant 0 : index
    %c0_76 = arith.constant 0 : index
    %70 = vector.load %arg8[%c0_75, %c0_76] : memref<128x256xf32, #tpu.memory_space<vmem>>, vector<128x256xf32>
    %71 = arith.addf %70, %69 : vector<128x256xf32>
    %c0_77 = arith.constant 0 : index
    %c0_78 = arith.constant 0 : index
    %72 = vector.load %arg8[%c0_77, %c0_78] : memref<128x256xf32, #tpu.memory_space<vmem>>, vector<128x256xf32>
    tpu.vector_store %arg8[%c0_77, %c0_78], %71 {strides = array<i32>} : memref<128x256xf32, #tpu.memory_space<vmem>>, vector<128x256xf32>,
    %c0_79 = arith.constant 0 : index
    %c1_80 = arith.constant 1 : index
    %c2_81 = arith.constant 2 : index
    %c0_82 = arith.constant 0 : index
    %73 = vector.load %arg7[%c0_79, %c1_80, %c2_81, %c0_82] : memref<2x10x10x256xbf16, #tpu.memory_space<vmem>>, vector<2x8x8x256xbf16>
    %74 = vector.shape_cast %73 : vector<2x8x8x256xbf16> to vector<128x256xbf16>
    %c1280 = arith.constant 1280 : index
    %c0_83 = arith.constant 0 : index
    %75 = vector.load %arg4[%c1280, %c0_83] : memref<2304x256xbf16, #tpu.memory_space<vmem>>, vector<256x256xbf16>
    %cst_84 = arith.constant dense<0.000000e+00> : vector<128x256xf32>
    %76 = tpu.matmul %74, %75, %cst_84 {dimension_numbers = #tpu.dot_dimension_numbers<[1], [0], [0], [1], [0, 0, 1, 1], [], []>} : vector<128x256xbf16>, vector<256x256xbf16>, vector<128x256xf32> -> vector<128x256xf32>
    %c0_85 = arith.constant 0 : index
    %c0_86 = arith.constant 0 : index
    %77 = vector.load %arg8[%c0_85, %c0_86] : memref<128x256xf32, #tpu.memory_space<vmem>>, vector<128x256xf32>
    %78 = arith.addf %77, %76 : vector<128x256xf32>
    %c0_87 = arith.constant 0 : index
    %c0_88 = arith.constant 0 : index
    %79 = vector.load %arg8[%c0_87, %c0_88] : memref<128x256xf32, #tpu.memory_space<vmem>>, vector<128x256xf32>
    tpu.vector_store %arg8[%c0_87, %c0_88], %78 {strides = array<i32>} : memref<128x256xf32, #tpu.memory_space<vmem>>, vector<128x256xf32>,
    %c0_89 = arith.constant 0 : index
    %c2_90 = arith.constant 2 : index
    %c0_91 = arith.constant 0 : index
    %c0_92 = arith.constant 0 : index
    %80 = vector.load %arg7[%c0_89, %c2_90, %c0_91, %c0_92] : memref<2x10x10x256xbf16, #tpu.memory_space<vmem>>, vector<2x8x8x256xbf16>
    %81 = vector.shape_cast %80 : vector<2x8x8x256xbf16> to vector<128x256xbf16>
    %c1536 = arith.constant 1536 : index
    %c0_93 = arith.constant 0 : index
    %82 = vector.load %arg4[%c1536, %c0_93] : memref<2304x256xbf16, #tpu.memory_space<vmem>>, vector<256x256xbf16>
    %cst_94 = arith.constant dense<0.000000e+00> : vector<128x256xf32>
    %83 = tpu.matmul %81, %82, %cst_94 {dimension_numbers = #tpu.dot_dimension_numbers<[1], [0], [0], [1], [0, 0, 1, 1], [], []>} : vector<128x256xbf16>, vector<256x256xbf16>, vector<128x256xf32> -> vector<128x256xf32>
    %c0_95 = arith.constant 0 : index
    %c0_96 = arith.constant 0 : index
    %84 = vector.load %arg8[%c0_95, %c0_96] : memref<128x256xf32, #tpu.memory_space<vmem>>, vector<128x256xf32>
    %85 = arith.addf %84, %83 : vector<128x256xf32>
    %c0_97 = arith.constant 0 : index
    %c0_98 = arith.constant 0 : index
    %86 = vector.load %arg8[%c0_97, %c0_98] : memref<128x256xf32, #tpu.memory_space<vmem>>, vector<128x256xf32>
    tpu.vector_store %arg8[%c0_97, %c0_98], %85 {strides = array<i32>} : memref<128x256xf32, #tpu.memory_space<vmem>>, vector<128x256xf32>,
    %c0_99 = arith.constant 0 : index
    %c2_100 = arith.constant 2 : index
    %c1_101 = arith.constant 1 : index
    %c0_102 = arith.constant 0 : index
    %87 = vector.load %arg7[%c0_99, %c2_100, %c1_101, %c0_102] : memref<2x10x10x256xbf16, #tpu.memory_space<vmem>>, vector<2x8x8x256xbf16>
    %88 = vector.shape_cast %87 : vector<2x8x8x256xbf16> to vector<128x256xbf16>
    %c1792 = arith.constant 1792 : index
    %c0_103 = arith.constant 0 : index
    %89 = vector.load %arg4[%c1792, %c0_103] : memref<2304x256xbf16, #tpu.memory_space<vmem>>, vector<256x256xbf16>
    %cst_104 = arith.constant dense<0.000000e+00> : vector<128x256xf32>
    %90 = tpu.matmul %88, %89, %cst_104 {dimension_numbers = #tpu.dot_dimension_numbers<[1], [0], [0], [1], [0, 0, 1, 1], [], []>} : vector<128x256xbf16>, vector<256x256xbf16>, vector<128x256xf32> -> vector<128x256xf32>
    %c0_105 = arith.constant 0 : index
    %c0_106 = arith.constant 0 : index
    %91 = vector.load %arg8[%c0_105, %c0_106] : memref<128x256xf32, #tpu.memory_space<vmem>>, vector<128x256xf32>
    %92 = arith.addf %91, %90 : vector<128x256xf32>
    %c0_107 = arith.constant 0 : index
    %c0_108 = arith.constant 0 : index
    %93 = vector.load %arg8[%c0_107, %c0_108] : memref<128x256xf32, #tpu.memory_space<vmem>>, vector<128x256xf32>
    tpu.vector_store %arg8[%c0_107, %c0_108], %92 {strides = array<i32>} : memref<128x256xf32, #tpu.memory_space<vmem>>, vector<128x256xf32>,
    %c0_109 = arith.constant 0 : index
    %c2_110 = arith.constant 2 : index
    %c2_111 = arith.constant 2 : index
    %c0_112 = arith.constant 0 : index
    %94 = vector.load %arg7[%c0_109, %c2_110, %c2_111, %c0_112] : memref<2x10x10x256xbf16, #tpu.memory_space<vmem>>, vector<2x8x8x256xbf16>
    %95 = vector.shape_cast %94 : vector<2x8x8x256xbf16> to vector<128x256xbf16>
    %c2048 = arith.constant 2048 : index
    %c0_113 = arith.constant 0 : index
    %96 = vector.load %arg4[%c2048, %c0_113] : memref<2304x256xbf16, #tpu.memory_space<vmem>>, vector<256x256xbf16>
    %cst_114 = arith.constant dense<0.000000e+00> : vector<128x256xf32>
    %97 = tpu.matmul %95, %96, %cst_114 {dimension_numbers = #tpu.dot_dimension_numbers<[1], [0], [0], [1], [0, 0, 1, 1], [], []>} : vector<128x256xbf16>, vector<256x256xbf16>, vector<128x256xf32> -> vector<128x256xf32>
    %c0_115 = arith.constant 0 : index
    %c0_116 = arith.constant 0 : index
    %98 = vector.load %arg8[%c0_115, %c0_116] : memref<128x256xf32, #tpu.memory_space<vmem>>, vector<128x256xf32>
    %99 = arith.addf %98, %97 : vector<128x256xf32>
    %c0_117 = arith.constant 0 : index
    %c0_118 = arith.constant 0 : index
    %100 = vector.load %arg8[%c0_117, %c0_118] : memref<128x256xf32, #tpu.memory_space<vmem>>, vector<128x256xf32>
    tpu.vector_store %arg8[%c0_117, %c0_118], %99 {strides = array<i32>} : memref<128x256xf32, #tpu.memory_space<vmem>>, vector<128x256xf32>,
    %cst_119 = arith.constant 0.000000e+00 : f32
    %101 = vector.broadcast %cst_119 : f32 to vector<1x256xf32>
    %cst_120 = arith.constant 0.000000e+00 : f32
    %102 = vector.broadcast %cst_120 : f32 to vector<1x256xf32>
    %c0_121 = arith.constant 0 : index
    %c0_122 = arith.constant 0 : index
    %103 = vector.load %arg8[%c0_121, %c0_122] : memref<128x256xf32, #tpu.memory_space<vmem>>, vector<128x256xf32>
    %104 = arith.truncf %103 : vector<128x256xf32> to vector<128x256xbf16>
    %c0_123 = arith.constant 0 : index
    %c0_124 = arith.constant 0 : index
    %105 = vector.load %arg5[%c0_123, %c0_124] : memref<128x256xbf16, #tpu.memory_space<vmem>>, vector<128x256xbf16>
    tpu.vector_store %arg5[%c0_123, %c0_124], %104 {strides = array<i32>} : memref<128x256xbf16, #tpu.memory_space<vmem>>, vector<128x256xbf16>,
    %cst_125 = arith.constant dense<0.000000e+00> : vector<256xf32>
    %106 = vector.multi_reduction <add>, %103, %cst_125 [0] : vector<128x256xf32> to vector<256xf32>
    %107 = vector.shape_cast %106 : vector<256xf32> to vector<1x256xf32>
    %108 = arith.addf %101, %107 : vector<1x256xf32>
    %109 = arith.mulf %103, %103 : vector<128x256xf32>
    %cst_126 = arith.constant dense<0.000000e+00> : vector<256xf32>
    %110 = vector.multi_reduction <add>, %109, %cst_126 [0] : vector<128x256xf32> to vector<256xf32>
    %111 = vector.shape_cast %110 : vector<256xf32> to vector<1x256xf32>
    %112 = arith.addf %102, %111 : vector<1x256xf32>
    %113 = tpu.concatenate %108, %112 in 0 : vector<1x256xf32>, vector<1x256xf32> -> vector<2x256xf32>
    %c0_127 = arith.constant 0 : index
    %c0_128 = arith.constant 0 : index
    %c0_129 = arith.constant 0 : index
    %114 = vector.load %arg6[%c0_127, %c0_128, %c0_129] : memref<1x2x256xf32, #tpu.memory_space<vmem>>, vector<1x2x256xf32>
    %115 = vector.shape_cast %114 : vector<1x2x256xf32> to vector<2x256xf32>
    %116 = vector.shape_cast %113 : vector<2x256xf32> to vector<1x2x256xf32>
    tpu.vector_store %arg6[%c0_127, %c0_128, %c0_129], %116 {strides = array<i32>} : memref<1x2x256xf32, #tpu.memory_space<vmem>>, vector<1x2x256xf32>,
    return
  }
  func.func @transform_0(%arg0: i32) -> (i32, i32) {
    %c0_i32 = arith.constant 0 : i32
    %c0_i32_0 = arith.constant 0 : i32
    return %arg0, %c0_i32 : i32, i32
  }
  func.func @transform_1(%arg0: i32) -> (i32, i32) {
    %c0_i32 = arith.constant 0 : i32
    %c0_i32_0 = arith.constant 0 : i32
    %c0_i32_1 = arith.constant 0 : i32
    return %c0_i32, %c0_i32_0 : i32, i32
  }
  func.func @transform_2(%arg0: i32) -> (i32, i32) {
    %c0_i32 = arith.constant 0 : i32
    %c0_i32_0 = arith.constant 0 : i32
    %c0_i32_1 = arith.constant 0 : i32
    return %c0_i32, %c0_i32_0 : i32, i32
  }
  func.func @transform_3(%arg0: i32) -> (i32, i32) {
    %c0_i32 = arith.constant 0 : i32
    %c0_i32_0 = arith.constant 0 : i32
    %c0_i32_1 = arith.constant 0 : i32
    return %c0_i32, %c0_i32_0 : i32, i32
  }
  func.func @transform_4(%arg0: i32) -> (i32, i32) {
    %c0_i32 = arith.constant 0 : i32
    %c0_i32_0 = arith.constant 0 : i32
    return %arg0, %c0_i32 : i32, i32
  }
  func.func @transform_5(%arg0: i32) -> (i32, i32, i32) {
    %c0_i32 = arith.constant 0 : i32
    %c0_i32_0 = arith.constant 0 : i32
    %c0_i32_1 = arith.constant 0 : i32
    return %arg0, %c0_i32, %c0_i32_0 : i32, i32, i32
  }
}

module attributes {stable_mosaic.version = 11 : i64} {
  func.func @kernel(%arg0: i32, %arg1: memref<2x8x8x256xf32, #tpu.memory_space<vmem>>, %arg2: memref<2304x256xbf16, #tpu.memory_space<vmem>>, %arg3: memref<128x256xbf16, #tpu.memory_space<vmem>>, %arg4: memref<1x2x256xf32, #tpu.memory_space<vmem>>, %arg5: memref<2x10x10x256xbf16, #tpu.memory_space<vmem>>, %arg6: memref<128x256xf32, #tpu.memory_space<vmem>>) attributes {dimension_semantics = [#tpu.dimension_semantics<parallel>], iteration_bounds = array<i64: 1>, scalar_prefetch = 0 : i64, scratch_operands = 2 : i64, tpu.core_type = #tpu.core_type<tc>, window_params = [{transform_indices = @transform_0, window_bounds = array<i64: 2, 8, 8, 256>}, {pipeline_mode = #tpu.pipeline_mode<synchronous>, transform_indices = @transform_1, window_bounds = array<i64: 2304, 256>}, {transform_indices = @transform_2, window_bounds = array<i64: 128, 256>}, {transform_indices = @transform_3, window_bounds = array<i64: 1, 2, 256>}]} {
    %cst = arith.constant 0.000000e+00 : bf16
    %0 = vector.broadcast %cst : bf16 to vector<2x1x10x256xbf16>
    %cst_0 = arith.constant 0.000000e+00 : bf16
    %1 = vector.broadcast %cst_0 : bf16 to vector<2x10x1x256xbf16>
    %c0 = arith.constant 0 : index
    %c0_1 = arith.constant 0 : index
    %c0_2 = arith.constant 0 : index
    %c0_3 = arith.constant 0 : index
    %2 = vector.load %arg5[%c0, %c0_1, %c0_2, %c0_3] : memref<2x10x10x256xbf16, #tpu.memory_space<vmem>>, vector<2x1x10x256xbf16>
    tpu.vector_store %arg5[%c0, %c0_1, %c0_2, %c0_3], %0 {strides = array<i32>} : memref<2x10x10x256xbf16, #tpu.memory_space<vmem>>, vector<2x1x10x256xbf16>,
    %c0_4 = arith.constant 0 : index
    %c9 = arith.constant 9 : index
    %c0_5 = arith.constant 0 : index
    %c0_6 = arith.constant 0 : index
    %3 = vector.load %arg5[%c0_4, %c9, %c0_5, %c0_6] : memref<2x10x10x256xbf16, #tpu.memory_space<vmem>>, vector<2x1x10x256xbf16>
    tpu.vector_store %arg5[%c0_4, %c9, %c0_5, %c0_6], %0 {strides = array<i32>} : memref<2x10x10x256xbf16, #tpu.memory_space<vmem>>, vector<2x1x10x256xbf16>,
    %c0_7 = arith.constant 0 : index
    %c0_8 = arith.constant 0 : index
    %c0_9 = arith.constant 0 : index
    %c0_10 = arith.constant 0 : index
    %4 = vector.load %arg5[%c0_7, %c0_8, %c0_9, %c0_10] : memref<2x10x10x256xbf16, #tpu.memory_space<vmem>>, vector<2x10x1x256xbf16>
    tpu.vector_store %arg5[%c0_7, %c0_8, %c0_9, %c0_10], %1 {strides = array<i32>} : memref<2x10x10x256xbf16, #tpu.memory_space<vmem>>, vector<2x10x1x256xbf16>,
    %c0_11 = arith.constant 0 : index
    %c0_12 = arith.constant 0 : index
    %c9_13 = arith.constant 9 : index
    %c0_14 = arith.constant 0 : index
    %5 = vector.load %arg5[%c0_11, %c0_12, %c9_13, %c0_14] : memref<2x10x10x256xbf16, #tpu.memory_space<vmem>>, vector<2x10x1x256xbf16>
    tpu.vector_store %arg5[%c0_11, %c0_12, %c9_13, %c0_14], %1 {strides = array<i32>} : memref<2x10x10x256xbf16, #tpu.memory_space<vmem>>, vector<2x10x1x256xbf16>,
    %c0_15 = arith.constant 0 : index
    %c0_16 = arith.constant 0 : index
    %c0_17 = arith.constant 0 : index
    %c0_18 = arith.constant 0 : index
    %6 = vector.load %arg1[%c0_15, %c0_16, %c0_17, %c0_18] : memref<2x8x8x256xf32, #tpu.memory_space<vmem>>, vector<2x8x8x256xf32>
    %7 = arith.truncf %6 : vector<2x8x8x256xf32> to vector<2x8x8x256xbf16>
    %c0_19 = arith.constant 0 : index
    %c1 = arith.constant 1 : index
    %c1_20 = arith.constant 1 : index
    %c0_21 = arith.constant 0 : index
    %8 = vector.load %arg5[%c0_19, %c1, %c1_20, %c0_21] : memref<2x10x10x256xbf16, #tpu.memory_space<vmem>>, vector<2x8x8x256xbf16>
    tpu.vector_store %arg5[%c0_19, %c1, %c1_20, %c0_21], %7 {strides = array<i32>} : memref<2x10x10x256xbf16, #tpu.memory_space<vmem>>, vector<2x8x8x256xbf16>,
    %c0_22 = arith.constant 0 : index
    %c0_23 = arith.constant 0 : index
    %c0_24 = arith.constant 0 : index
    %c0_25 = arith.constant 0 : index
    %9 = vector.load %arg5[%c0_22, %c0_23, %c0_24, %c0_25] : memref<2x10x10x256xbf16, #tpu.memory_space<vmem>>, vector<2x8x8x256xbf16>
    %10 = vector.shape_cast %9 : vector<2x8x8x256xbf16> to vector<128x256xbf16>
    %c0_26 = arith.constant 0 : index
    %c0_27 = arith.constant 0 : index
    %11 = vector.load %arg2[%c0_26, %c0_27] : memref<2304x256xbf16, #tpu.memory_space<vmem>>, vector<256x256xbf16>
    %cst_28 = arith.constant dense<0.000000e+00> : vector<128x256xf32>
    %12 = tpu.matmul %10, %11, %cst_28 {dimension_numbers = #tpu.dot_dimension_numbers<[1], [0], [0], [1], [0, 0, 1, 1], [], []>} : vector<128x256xbf16>, vector<256x256xbf16>, vector<128x256xf32> -> vector<128x256xf32>
    %c0_29 = arith.constant 0 : index
    %c0_30 = arith.constant 0 : index
    %13 = vector.load %arg6[%c0_29, %c0_30] : memref<128x256xf32, #tpu.memory_space<vmem>>, vector<128x256xf32>
    tpu.vector_store %arg6[%c0_29, %c0_30], %12 {strides = array<i32>} : memref<128x256xf32, #tpu.memory_space<vmem>>, vector<128x256xf32>,
    %c0_31 = arith.constant 0 : index
    %c0_32 = arith.constant 0 : index
    %c1_33 = arith.constant 1 : index
    %c0_34 = arith.constant 0 : index
    %14 = vector.load %arg5[%c0_31, %c0_32, %c1_33, %c0_34] : memref<2x10x10x256xbf16, #tpu.memory_space<vmem>>, vector<2x8x8x256xbf16>
    %15 = vector.shape_cast %14 : vector<2x8x8x256xbf16> to vector<128x256xbf16>
    %c256 = arith.constant 256 : index
    %c0_35 = arith.constant 0 : index
    %16 = vector.load %arg2[%c256, %c0_35] : memref<2304x256xbf16, #tpu.memory_space<vmem>>, vector<256x256xbf16>
    %cst_36 = arith.constant dense<0.000000e+00> : vector<128x256xf32>
    %17 = tpu.matmul %15, %16, %cst_36 {dimension_numbers = #tpu.dot_dimension_numbers<[1], [0], [0], [1], [0, 0, 1, 1], [], []>} : vector<128x256xbf16>, vector<256x256xbf16>, vector<128x256xf32> -> vector<128x256xf32>
    %c0_37 = arith.constant 0 : index
    %c0_38 = arith.constant 0 : index
    %18 = vector.load %arg6[%c0_37, %c0_38] : memref<128x256xf32, #tpu.memory_space<vmem>>, vector<128x256xf32>
    %19 = arith.addf %18, %17 : vector<128x256xf32>
    %c0_39 = arith.constant 0 : index
    %c0_40 = arith.constant 0 : index
    %20 = vector.load %arg6[%c0_39, %c0_40] : memref<128x256xf32, #tpu.memory_space<vmem>>, vector<128x256xf32>
    tpu.vector_store %arg6[%c0_39, %c0_40], %19 {strides = array<i32>} : memref<128x256xf32, #tpu.memory_space<vmem>>, vector<128x256xf32>,
    %c0_41 = arith.constant 0 : index
    %c0_42 = arith.constant 0 : index
    %c2 = arith.constant 2 : index
    %c0_43 = arith.constant 0 : index
    %21 = vector.load %arg5[%c0_41, %c0_42, %c2, %c0_43] : memref<2x10x10x256xbf16, #tpu.memory_space<vmem>>, vector<2x8x8x256xbf16>
    %22 = vector.shape_cast %21 : vector<2x8x8x256xbf16> to vector<128x256xbf16>
    %c512 = arith.constant 512 : index
    %c0_44 = arith.constant 0 : index
    %23 = vector.load %arg2[%c512, %c0_44] : memref<2304x256xbf16, #tpu.memory_space<vmem>>, vector<256x256xbf16>
    %cst_45 = arith.constant dense<0.000000e+00> : vector<128x256xf32>
    %24 = tpu.matmul %22, %23, %cst_45 {dimension_numbers = #tpu.dot_dimension_numbers<[1], [0], [0], [1], [0, 0, 1, 1], [], []>} : vector<128x256xbf16>, vector<256x256xbf16>, vector<128x256xf32> -> vector<128x256xf32>
    %c0_46 = arith.constant 0 : index
    %c0_47 = arith.constant 0 : index
    %25 = vector.load %arg6[%c0_46, %c0_47] : memref<128x256xf32, #tpu.memory_space<vmem>>, vector<128x256xf32>
    %26 = arith.addf %25, %24 : vector<128x256xf32>
    %c0_48 = arith.constant 0 : index
    %c0_49 = arith.constant 0 : index
    %27 = vector.load %arg6[%c0_48, %c0_49] : memref<128x256xf32, #tpu.memory_space<vmem>>, vector<128x256xf32>
    tpu.vector_store %arg6[%c0_48, %c0_49], %26 {strides = array<i32>} : memref<128x256xf32, #tpu.memory_space<vmem>>, vector<128x256xf32>,
    %c0_50 = arith.constant 0 : index
    %c1_51 = arith.constant 1 : index
    %c0_52 = arith.constant 0 : index
    %c0_53 = arith.constant 0 : index
    %28 = vector.load %arg5[%c0_50, %c1_51, %c0_52, %c0_53] : memref<2x10x10x256xbf16, #tpu.memory_space<vmem>>, vector<2x8x8x256xbf16>
    %29 = vector.shape_cast %28 : vector<2x8x8x256xbf16> to vector<128x256xbf16>
    %c768 = arith.constant 768 : index
    %c0_54 = arith.constant 0 : index
    %30 = vector.load %arg2[%c768, %c0_54] : memref<2304x256xbf16, #tpu.memory_space<vmem>>, vector<256x256xbf16>
    %cst_55 = arith.constant dense<0.000000e+00> : vector<128x256xf32>
    %31 = tpu.matmul %29, %30, %cst_55 {dimension_numbers = #tpu.dot_dimension_numbers<[1], [0], [0], [1], [0, 0, 1, 1], [], []>} : vector<128x256xbf16>, vector<256x256xbf16>, vector<128x256xf32> -> vector<128x256xf32>
    %c0_56 = arith.constant 0 : index
    %c0_57 = arith.constant 0 : index
    %32 = vector.load %arg6[%c0_56, %c0_57] : memref<128x256xf32, #tpu.memory_space<vmem>>, vector<128x256xf32>
    %33 = arith.addf %32, %31 : vector<128x256xf32>
    %c0_58 = arith.constant 0 : index
    %c0_59 = arith.constant 0 : index
    %34 = vector.load %arg6[%c0_58, %c0_59] : memref<128x256xf32, #tpu.memory_space<vmem>>, vector<128x256xf32>
    tpu.vector_store %arg6[%c0_58, %c0_59], %33 {strides = array<i32>} : memref<128x256xf32, #tpu.memory_space<vmem>>, vector<128x256xf32>,
    %c0_60 = arith.constant 0 : index
    %c1_61 = arith.constant 1 : index
    %c1_62 = arith.constant 1 : index
    %c0_63 = arith.constant 0 : index
    %35 = vector.load %arg5[%c0_60, %c1_61, %c1_62, %c0_63] : memref<2x10x10x256xbf16, #tpu.memory_space<vmem>>, vector<2x8x8x256xbf16>
    %36 = vector.shape_cast %35 : vector<2x8x8x256xbf16> to vector<128x256xbf16>
    %c1024 = arith.constant 1024 : index
    %c0_64 = arith.constant 0 : index
    %37 = vector.load %arg2[%c1024, %c0_64] : memref<2304x256xbf16, #tpu.memory_space<vmem>>, vector<256x256xbf16>
    %cst_65 = arith.constant dense<0.000000e+00> : vector<128x256xf32>
    %38 = tpu.matmul %36, %37, %cst_65 {dimension_numbers = #tpu.dot_dimension_numbers<[1], [0], [0], [1], [0, 0, 1, 1], [], []>} : vector<128x256xbf16>, vector<256x256xbf16>, vector<128x256xf32> -> vector<128x256xf32>
    %c0_66 = arith.constant 0 : index
    %c0_67 = arith.constant 0 : index
    %39 = vector.load %arg6[%c0_66, %c0_67] : memref<128x256xf32, #tpu.memory_space<vmem>>, vector<128x256xf32>
    %40 = arith.addf %39, %38 : vector<128x256xf32>
    %c0_68 = arith.constant 0 : index
    %c0_69 = arith.constant 0 : index
    %41 = vector.load %arg6[%c0_68, %c0_69] : memref<128x256xf32, #tpu.memory_space<vmem>>, vector<128x256xf32>
    tpu.vector_store %arg6[%c0_68, %c0_69], %40 {strides = array<i32>} : memref<128x256xf32, #tpu.memory_space<vmem>>, vector<128x256xf32>,
    %c0_70 = arith.constant 0 : index
    %c1_71 = arith.constant 1 : index
    %c2_72 = arith.constant 2 : index
    %c0_73 = arith.constant 0 : index
    %42 = vector.load %arg5[%c0_70, %c1_71, %c2_72, %c0_73] : memref<2x10x10x256xbf16, #tpu.memory_space<vmem>>, vector<2x8x8x256xbf16>
    %43 = vector.shape_cast %42 : vector<2x8x8x256xbf16> to vector<128x256xbf16>
    %c1280 = arith.constant 1280 : index
    %c0_74 = arith.constant 0 : index
    %44 = vector.load %arg2[%c1280, %c0_74] : memref<2304x256xbf16, #tpu.memory_space<vmem>>, vector<256x256xbf16>
    %cst_75 = arith.constant dense<0.000000e+00> : vector<128x256xf32>
    %45 = tpu.matmul %43, %44, %cst_75 {dimension_numbers = #tpu.dot_dimension_numbers<[1], [0], [0], [1], [0, 0, 1, 1], [], []>} : vector<128x256xbf16>, vector<256x256xbf16>, vector<128x256xf32> -> vector<128x256xf32>
    %c0_76 = arith.constant 0 : index
    %c0_77 = arith.constant 0 : index
    %46 = vector.load %arg6[%c0_76, %c0_77] : memref<128x256xf32, #tpu.memory_space<vmem>>, vector<128x256xf32>
    %47 = arith.addf %46, %45 : vector<128x256xf32>
    %c0_78 = arith.constant 0 : index
    %c0_79 = arith.constant 0 : index
    %48 = vector.load %arg6[%c0_78, %c0_79] : memref<128x256xf32, #tpu.memory_space<vmem>>, vector<128x256xf32>
    tpu.vector_store %arg6[%c0_78, %c0_79], %47 {strides = array<i32>} : memref<128x256xf32, #tpu.memory_space<vmem>>, vector<128x256xf32>,
    %c0_80 = arith.constant 0 : index
    %c2_81 = arith.constant 2 : index
    %c0_82 = arith.constant 0 : index
    %c0_83 = arith.constant 0 : index
    %49 = vector.load %arg5[%c0_80, %c2_81, %c0_82, %c0_83] : memref<2x10x10x256xbf16, #tpu.memory_space<vmem>>, vector<2x8x8x256xbf16>
    %50 = vector.shape_cast %49 : vector<2x8x8x256xbf16> to vector<128x256xbf16>
    %c1536 = arith.constant 1536 : index
    %c0_84 = arith.constant 0 : index
    %51 = vector.load %arg2[%c1536, %c0_84] : memref<2304x256xbf16, #tpu.memory_space<vmem>>, vector<256x256xbf16>
    %cst_85 = arith.constant dense<0.000000e+00> : vector<128x256xf32>
    %52 = tpu.matmul %50, %51, %cst_85 {dimension_numbers = #tpu.dot_dimension_numbers<[1], [0], [0], [1], [0, 0, 1, 1], [], []>} : vector<128x256xbf16>, vector<256x256xbf16>, vector<128x256xf32> -> vector<128x256xf32>
    %c0_86 = arith.constant 0 : index
    %c0_87 = arith.constant 0 : index
    %53 = vector.load %arg6[%c0_86, %c0_87] : memref<128x256xf32, #tpu.memory_space<vmem>>, vector<128x256xf32>
    %54 = arith.addf %53, %52 : vector<128x256xf32>
    %c0_88 = arith.constant 0 : index
    %c0_89 = arith.constant 0 : index
    %55 = vector.load %arg6[%c0_88, %c0_89] : memref<128x256xf32, #tpu.memory_space<vmem>>, vector<128x256xf32>
    tpu.vector_store %arg6[%c0_88, %c0_89], %54 {strides = array<i32>} : memref<128x256xf32, #tpu.memory_space<vmem>>, vector<128x256xf32>,
    %c0_90 = arith.constant 0 : index
    %c2_91 = arith.constant 2 : index
    %c1_92 = arith.constant 1 : index
    %c0_93 = arith.constant 0 : index
    %56 = vector.load %arg5[%c0_90, %c2_91, %c1_92, %c0_93] : memref<2x10x10x256xbf16, #tpu.memory_space<vmem>>, vector<2x8x8x256xbf16>
    %57 = vector.shape_cast %56 : vector<2x8x8x256xbf16> to vector<128x256xbf16>
    %c1792 = arith.constant 1792 : index
    %c0_94 = arith.constant 0 : index
    %58 = vector.load %arg2[%c1792, %c0_94] : memref<2304x256xbf16, #tpu.memory_space<vmem>>, vector<256x256xbf16>
    %cst_95 = arith.constant dense<0.000000e+00> : vector<128x256xf32>
    %59 = tpu.matmul %57, %58, %cst_95 {dimension_numbers = #tpu.dot_dimension_numbers<[1], [0], [0], [1], [0, 0, 1, 1], [], []>} : vector<128x256xbf16>, vector<256x256xbf16>, vector<128x256xf32> -> vector<128x256xf32>
    %c0_96 = arith.constant 0 : index
    %c0_97 = arith.constant 0 : index
    %60 = vector.load %arg6[%c0_96, %c0_97] : memref<128x256xf32, #tpu.memory_space<vmem>>, vector<128x256xf32>
    %61 = arith.addf %60, %59 : vector<128x256xf32>
    %c0_98 = arith.constant 0 : index
    %c0_99 = arith.constant 0 : index
    %62 = vector.load %arg6[%c0_98, %c0_99] : memref<128x256xf32, #tpu.memory_space<vmem>>, vector<128x256xf32>
    tpu.vector_store %arg6[%c0_98, %c0_99], %61 {strides = array<i32>} : memref<128x256xf32, #tpu.memory_space<vmem>>, vector<128x256xf32>,
    %c0_100 = arith.constant 0 : index
    %c2_101 = arith.constant 2 : index
    %c2_102 = arith.constant 2 : index
    %c0_103 = arith.constant 0 : index
    %63 = vector.load %arg5[%c0_100, %c2_101, %c2_102, %c0_103] : memref<2x10x10x256xbf16, #tpu.memory_space<vmem>>, vector<2x8x8x256xbf16>
    %64 = vector.shape_cast %63 : vector<2x8x8x256xbf16> to vector<128x256xbf16>
    %c2048 = arith.constant 2048 : index
    %c0_104 = arith.constant 0 : index
    %65 = vector.load %arg2[%c2048, %c0_104] : memref<2304x256xbf16, #tpu.memory_space<vmem>>, vector<256x256xbf16>
    %cst_105 = arith.constant dense<0.000000e+00> : vector<128x256xf32>
    %66 = tpu.matmul %64, %65, %cst_105 {dimension_numbers = #tpu.dot_dimension_numbers<[1], [0], [0], [1], [0, 0, 1, 1], [], []>} : vector<128x256xbf16>, vector<256x256xbf16>, vector<128x256xf32> -> vector<128x256xf32>
    %c0_106 = arith.constant 0 : index
    %c0_107 = arith.constant 0 : index
    %67 = vector.load %arg6[%c0_106, %c0_107] : memref<128x256xf32, #tpu.memory_space<vmem>>, vector<128x256xf32>
    %68 = arith.addf %67, %66 : vector<128x256xf32>
    %c0_108 = arith.constant 0 : index
    %c0_109 = arith.constant 0 : index
    %69 = vector.load %arg6[%c0_108, %c0_109] : memref<128x256xf32, #tpu.memory_space<vmem>>, vector<128x256xf32>
    tpu.vector_store %arg6[%c0_108, %c0_109], %68 {strides = array<i32>} : memref<128x256xf32, #tpu.memory_space<vmem>>, vector<128x256xf32>,
    %cst_110 = arith.constant 0.000000e+00 : f32
    %70 = vector.broadcast %cst_110 : f32 to vector<1x256xf32>
    %cst_111 = arith.constant 0.000000e+00 : f32
    %71 = vector.broadcast %cst_111 : f32 to vector<1x256xf32>
    %c0_112 = arith.constant 0 : index
    %c0_113 = arith.constant 0 : index
    %72 = vector.load %arg6[%c0_112, %c0_113] : memref<128x256xf32, #tpu.memory_space<vmem>>, vector<128x256xf32>
    %73 = arith.truncf %72 : vector<128x256xf32> to vector<128x256xbf16>
    %c0_114 = arith.constant 0 : index
    %c0_115 = arith.constant 0 : index
    %74 = vector.load %arg3[%c0_114, %c0_115] : memref<128x256xbf16, #tpu.memory_space<vmem>>, vector<128x256xbf16>
    tpu.vector_store %arg3[%c0_114, %c0_115], %73 {strides = array<i32>} : memref<128x256xbf16, #tpu.memory_space<vmem>>, vector<128x256xbf16>,
    %cst_116 = arith.constant dense<0.000000e+00> : vector<256xf32>
    %75 = vector.multi_reduction <add>, %72, %cst_116 [0] : vector<128x256xf32> to vector<256xf32>
    %76 = vector.shape_cast %75 : vector<256xf32> to vector<1x256xf32>
    %77 = arith.addf %70, %76 : vector<1x256xf32>
    %78 = arith.mulf %72, %72 : vector<128x256xf32>
    %cst_117 = arith.constant dense<0.000000e+00> : vector<256xf32>
    %79 = vector.multi_reduction <add>, %78, %cst_117 [0] : vector<128x256xf32> to vector<256xf32>
    %80 = vector.shape_cast %79 : vector<256xf32> to vector<1x256xf32>
    %81 = arith.addf %71, %80 : vector<1x256xf32>
    %82 = tpu.concatenate %77, %81 in 0 : vector<1x256xf32>, vector<1x256xf32> -> vector<2x256xf32>
    %c0_118 = arith.constant 0 : index
    %c0_119 = arith.constant 0 : index
    %c0_120 = arith.constant 0 : index
    %83 = vector.load %arg4[%c0_118, %c0_119, %c0_120] : memref<1x2x256xf32, #tpu.memory_space<vmem>>, vector<1x2x256xf32>
    %84 = vector.shape_cast %83 : vector<1x2x256xf32> to vector<2x256xf32>
    %85 = vector.shape_cast %82 : vector<2x256xf32> to vector<1x2x256xf32>
    tpu.vector_store %arg4[%c0_118, %c0_119, %c0_120], %85 {strides = array<i32>} : memref<1x2x256xf32, #tpu.memory_space<vmem>>, vector<1x2x256xf32>,
    return
  }
  func.func @transform_0(%arg0: i32) -> (i32, i32, i32, i32) {
    %c0_i32 = arith.constant 0 : i32
    %c0_i32_0 = arith.constant 0 : i32
    %c0_i32_1 = arith.constant 0 : i32
    %c0_i32_2 = arith.constant 0 : i32
    return %arg0, %c0_i32, %c0_i32_0, %c0_i32_1 : i32, i32, i32, i32
  }
  func.func @transform_1(%arg0: i32) -> (i32, i32) {
    %c0_i32 = arith.constant 0 : i32
    %c0_i32_0 = arith.constant 0 : i32
    %c0_i32_1 = arith.constant 0 : i32
    return %c0_i32, %c0_i32_0 : i32, i32
  }
  func.func @transform_2(%arg0: i32) -> (i32, i32) {
    %c0_i32 = arith.constant 0 : i32
    %c0_i32_0 = arith.constant 0 : i32
    return %arg0, %c0_i32 : i32, i32
  }
  func.func @transform_3(%arg0: i32) -> (i32, i32, i32) {
    %c0_i32 = arith.constant 0 : i32
    %c0_i32_0 = arith.constant 0 : i32
    %c0_i32_1 = arith.constant 0 : i32
    return %arg0, %c0_i32, %c0_i32_0 : i32, i32, i32
  }
}

module attributes {stable_mosaic.version = 11 : i64} {
  func.func @_epilogue_kernel(%arg0: i32, %arg1: memref<128x256xf32, #tpu.memory_space<vmem>>, %arg2: memref<128x256xbf16, #tpu.memory_space<vmem>>, %arg3: memref<1x256xf32, #tpu.memory_space<vmem>>, %arg4: memref<1x256xf32, #tpu.memory_space<vmem>>, %arg5: memref<128x256xf32, #tpu.memory_space<vmem>>) attributes {dimension_semantics = [#tpu.dimension_semantics<parallel>], iteration_bounds = array<i64: 1>, scalar_prefetch = 0 : i64, scratch_operands = 0 : i64, tpu.core_type = #tpu.core_type<tc>, window_params = [{transform_indices = @transform_0, window_bounds = array<i64: 128, 256>}, {transform_indices = @transform_1, window_bounds = array<i64: 128, 256>}, {pipeline_mode = #tpu.pipeline_mode<synchronous>, transform_indices = @transform_2, window_bounds = array<i64: 1, 256>}, {pipeline_mode = #tpu.pipeline_mode<synchronous>, transform_indices = @transform_3, window_bounds = array<i64: 1, 256>}, {transform_indices = @transform_4, window_bounds = array<i64: 128, 256>}]} {
    %c0 = arith.constant 0 : index
    %c0_0 = arith.constant 0 : index
    %0 = vector.load %arg2[%c0, %c0_0] : memref<128x256xbf16, #tpu.memory_space<vmem>>, vector<128x256xbf16>
    %1 = arith.extf %0 : vector<128x256xbf16> to vector<128x256xf32>
    %c0_1 = arith.constant 0 : index
    %c0_2 = arith.constant 0 : index
    %2 = vector.load %arg3[%c0_1, %c0_2] : memref<1x256xf32, #tpu.memory_space<vmem>>, vector<1x256xf32>
    %3 = vector.shape_cast %2 : vector<1x256xf32> to vector<256xf32>
    %4 = vector.shape_cast %3 : vector<256xf32> to vector<1x256xf32>
    %5 = vector.broadcast %4 : vector<1x256xf32> to vector<128x256xf32>
    %6 = arith.mulf %1, %5 : vector<128x256xf32>
    %c0_3 = arith.constant 0 : index
    %c0_4 = arith.constant 0 : index
    %7 = vector.load %arg4[%c0_3, %c0_4] : memref<1x256xf32, #tpu.memory_space<vmem>>, vector<1x256xf32>
    %8 = vector.shape_cast %7 : vector<1x256xf32> to vector<256xf32>
    %9 = vector.shape_cast %8 : vector<256xf32> to vector<1x256xf32>
    %10 = vector.broadcast %9 : vector<1x256xf32> to vector<128x256xf32>
    %11 = arith.addf %6, %10 : vector<128x256xf32>
    %c0_5 = arith.constant 0 : index
    %c0_6 = arith.constant 0 : index
    %12 = vector.load %arg1[%c0_5, %c0_6] : memref<128x256xf32, #tpu.memory_space<vmem>>, vector<128x256xf32>
    %13 = arith.addf %12, %11 : vector<128x256xf32>
    %cst = arith.constant 0.000000e+00 : f32
    %14 = vector.broadcast %cst : f32 to vector<128x256xf32>
    %15 = arith.maximumf %13, %14 : vector<128x256xf32>
    %c0_7 = arith.constant 0 : index
    %c0_8 = arith.constant 0 : index
    %16 = vector.load %arg5[%c0_7, %c0_8] : memref<128x256xf32, #tpu.memory_space<vmem>>, vector<128x256xf32>
    tpu.vector_store %arg5[%c0_7, %c0_8], %15 {strides = array<i32>} : memref<128x256xf32, #tpu.memory_space<vmem>>, vector<128x256xf32>,
    return
  }
  func.func @transform_0(%arg0: i32) -> (i32, i32) {
    %c0_i32 = arith.constant 0 : i32
    %c0_i32_0 = arith.constant 0 : i32
    return %arg0, %c0_i32 : i32, i32
  }
  func.func @transform_1(%arg0: i32) -> (i32, i32) {
    %c0_i32 = arith.constant 0 : i32
    %c0_i32_0 = arith.constant 0 : i32
    return %arg0, %c0_i32 : i32, i32
  }
  func.func @transform_2(%arg0: i32) -> (i32, i32) {
    %c0_i32 = arith.constant 0 : i32
    %c0_i32_0 = arith.constant 0 : i32
    %c0_i32_1 = arith.constant 0 : i32
    return %c0_i32, %c0_i32_0 : i32, i32
  }
  func.func @transform_3(%arg0: i32) -> (i32, i32) {
    %c0_i32 = arith.constant 0 : i32
    %c0_i32_0 = arith.constant 0 : i32
    %c0_i32_1 = arith.constant 0 : i32
    return %c0_i32, %c0_i32_0 : i32, i32
  }
  func.func @transform_4(%arg0: i32) -> (i32, i32) {
    %c0_i32 = arith.constant 0 : i32
    %c0_i32_0 = arith.constant 0 : i32
    return %arg0, %c0_i32 : i32, i32
  }
}

</mosaic_0001>

<bundles_post_ra>
// kernel: block_forward.5
= control target key start
LH: loop header
LB: loop body
LE: loop exit
PB: predicated region body
PF: predicated region fallthrough
CT: control target
= control target key end

     0   :  { %v68_v1 = vlaneseq  ;;  %s595_s0 = inlined_call_operand.vmem [shape: f32[128,256], index: 0, kind: input, shape index: {}]   ;;  %s596_s1 = inlined_call_operand.vmem [shape: bf16[128,256], index: 1, kind: input, shape index: {}]   ;;  %s597_s2 = inlined_call_operand.vmem [shape: f32[1,256], index: 2, kind: input, shape index: {}]   ;;  %s598_s3 = inlined_call_operand.vmem [shape: f32[1,256], index: 3, kind: input, shape index: {}]   ;;  %s599_s4 = inlined_call_operand.hbm [shape: f32[128,256], index: 4, kind: output, shape index: {}]  }
   0x1   :  { %v18_v0 = vld [vmem:[%s596_s1] sm:$0xff]  ;;  %v19_v2 = vld [vmem:[%s596_s1 + $0x8] sm:$0xff]  ;;  %v20_v4 = vld [vmem:[%s596_s1 + $0x10] sm:$0xff] }
   0x2   :  { %v69_v3 = vshrl.u32 %v68_v1, 7  ;;  %v34_v5 = vunpack.c.l.bf16 %v18_v0  ;;  %v66_v6 = vld [vmem:[%s597_s2] sm:$0x3]  ;;  %v35_v8 = vunpack.c.h.bf16 %v18_v0  ;;  %v36_v9 = vunpack.c.l.bf16 %v19_v2  ;;  %v21_v11 = vld [vmem:[%s596_s1 + $0x18] sm:$0xff]  ;;  %v23_v21 = vld [vmem:[%s596_s1 + $0x28] sm:$0xff] }
   0x3   :  { %v110_v7 = vld [vmem:[%s598_s3] sm:$0x3]  ;;  %v37_v10 = vunpack.c.h.bf16 %v19_v2  ;;  %v38_v14 = vunpack.c.l.bf16 %v20_v4  ;;  %v39_v15 = vunpack.c.h.bf16 %v20_v4  ;;  %v40_v17 = vunpack.c.l.bf16 %v21_v11  ;;  %v392_v26 = vld [vmem:[%s596_s1 + $0x30] sm:$0xff]  ;;  %v155_v34 = vld [vmem:[%s595_s0 + $0x8] sm:$0xff] }
   0x4   :  { %v70_v12 = vsub.s32 0, %v69_v3  ;;  %v74_v13 = vsub.s32 1, %v69_v3  ;;  %v374_v16 = vld [vmem:[%s596_s1 + $0x20] sm:$0xff]  ;;  %v41_v18 = vunpack.c.h.bf16 %v21_v11  ;;  %v44_v27 = vunpack.c.l.bf16 %v23_v21  ;;  %v156_v37 = vld [vmem:[%s595_s0 + $0x10] sm:$0xff]  ;;  %v157_v38 = vld [vmem:[%s595_s0 + $0x18] sm:$0xff] }
   0x5   :  { %v42_v19 = vunpack.c.l.bf16 %v374_v16  ;;  %v43_v20 = vunpack.c.h.bf16 %v374_v16  ;;  %v45_v28 = vunpack.c.h.bf16 %v23_v21  ;;  %v46_v29 = vunpack.c.l.bf16 %v392_v26  ;;  %v154_v32 = vld [vmem:[%s595_s0] sm:$0xff]  ;;  %v159_v48 = vld [vmem:[%s595_s0 + $0x28] sm:$0xff]  ;;  %v160_v49 = vld [vmem:[%s595_s0 + $0x30] sm:$0xff] }
   0x6   :  { %v381_v22 = vrot.slane %v66_v6, %v70_v12  ;;  %v383_v23 = vrot.slane %v110_v7, %v70_v12  ;;  %v385_v24 = vrot.slane %v66_v6, %v74_v13  ;;  %v387_v25 = vrot.slane %v110_v7, %v74_v13  ;;  %v158_v40 = vld [vmem:[%s595_s0 + $0x20] sm:$0xff]  ;;  %v161_v50 = vld [vmem:[%s595_s0 + $0x38] sm:$0xff]  ;;  %v163_v11 = vld [vmem:[%s595_s0 + $0x48] sm:$0xff] }
   0x7   :  { %v47_v30 = vunpack.c.h.bf16 %v392_v26  ;;  %v25_v3 = vld [vmem:[%s596_s1 + $0x38] sm:$0xff] }
   0x8   :  { %v78_v31 = vmul.f32 %v381_v22, %v34_v5  ;;  %v79_v33 = vmul.f32 %v385_v24, %v35_v8  ;;  %v80_v35 = vmul.f32 %v381_v22, %v36_v9  ;;  %v81_v36 = vmul.f32 %v385_v24, %v37_v10  ;;  %v162_v9 = vld [vmem:[%s595_s0 + $0x40] sm:$0xff] }
   0x9   :  { %v82_v39 = vmul.f32 %v381_v22, %v38_v14  ;;  %v83_v41 = vmul.f32 %v385_v24, %v39_v15  ;;  %v84_v42 = vmul.f32 %v381_v22, %v40_v17  ;;  %v85_v43 = vmul.f32 %v385_v24, %v41_v18  ;;  %v164_v14 = vld [vmem:[%s595_s0 + $0x50] sm:$0xff]  ;;  %v165_v15 = vld [vmem:[%s595_s0 + $0x58] sm:$0xff] }
   0xa   :  { %v122_v44 = vadd.f32 %v383_v23, %v78_v31  ;;  %v123_v45 = vadd.f32 %v387_v25, %v79_v33  ;;  %v124_v46 = vadd.f32 %v383_v23, %v80_v35  ;;  %v125_v47 = vadd.f32 %v387_v25, %v81_v36 }
   0xb   :  { %v126_v51 = vadd.f32 %v383_v23, %v82_v39  ;;  %v127_v52 = vadd.f32 %v387_v25, %v83_v41  ;;  %v128_v53 = vadd.f32 %v383_v23, %v84_v42  ;;  %v129_v54 = vadd.f32 %v387_v25, %v85_v43 }
   0xc   :  { %v186_v55 = vadd.f32 %v154_v32, %v122_v44  ;;  %v187_v56 = vadd.f32 %v155_v34, %v123_v45  ;;  %v188_v57 = vadd.f32 %v156_v37, %v124_v46  ;;  %v189_v58 = vadd.f32 %v157_v38, %v125_v47 }
   0xd   :  { %v190_v59 = vadd.f32 %v158_v40, %v126_v51  ;;  %v191_v60 = vadd.f32 %v159_v48, %v127_v52  ;;  %v192_v61 = vadd.f32 %v160_v49, %v128_v53  ;;  %v193_v62 = vadd.f32 %v161_v50, %v129_v54 }
   0xe   :  { %v218_v63 = vmax.f32 %v186_v55, 0.0  ;;  %v219_v0 = vmax.f32 %v187_v56, 0.0  ;;  %v220_v1 = vmax.f32 %v188_v57, 0.0  ;;  %v221_v2 = vmax.f32 %v189_v58, 0.0 }
   0xf   :  { %v222_v4 = vmax.f32 %v190_v59, 0.0  ;;  %v223_v5 = vmax.f32 %v191_v60, 0.0  ;;  %v224_v6 = vmax.f32 %v192_v61, 0.0  ;;  %v225_v7 = vmax.f32 %v193_v62, 0.0 }
  0x10   :  { %250 = vst [vmem:[#allocation2] sm:$0xff] %v218_v63  ;;  %251 = vst [vmem:[#allocation2 + $0x8] sm:$0xff] %v219_v0  ;;  %v86_v8 = vmul.f32 %v381_v22, %v42_v19  ;;  %v87_v10 = vmul.f32 %v385_v24, %v43_v20  ;;  %v88_v12 = vmul.f32 %v381_v22, %v44_v27  ;;  %v48_v18 = vunpack.c.l.bf16 %v25_v3 }
  0x11   :  { %252 = vst [vmem:[#allocation2 + $0x10] sm:$0xff] %v220_v1  ;;  %253 = vst [vmem:[#allocation2 + $0x18] sm:$0xff] %v221_v2  ;;  %v89_v13 = vmul.f32 %v385_v24, %v45_v28  ;;  %v90_v16 = vmul.f32 %v381_v22, %v46_v29  ;;  %v91_v17 = vmul.f32 %v385_v24, %v47_v30  ;;  %v49_v19 = vunpack.c.h.bf16 %v25_v3 }
  0x12   :  { %254 = vst [vmem:[#allocation2 + $0x20] sm:$0xff] %v222_v4  ;;  %255 = vst [vmem:[#allocation2 + $0x28] sm:$0xff] %v223_v5 }
  0x13   :  { %256 = vst [vmem:[#allocation2 + $0x30] sm:$0xff] %v224_v6  ;;  %257 = vst [vmem:[#allocation2 + $0x38] sm:$0xff] %v225_v7 }
  0x14   :  { %9 = vsyncpa [#allocation3], 0  ;;  %v130_v20 = vadd.f32 %v383_v23, %v86_v8  ;;  %v131_v21 = vadd.f32 %v387_v25, %v87_v10  ;;  %v132_v26 = vadd.f32 %v383_v23, %v88_v12  ;;  %v133_v27 = vadd.f32 %v387_v25, %v89_v13  ;;  %v166_v28 = vld [vmem:[%s595_s0 + $0x60] sm:$0xff]  ;;  %v167_v29 = vld [vmem:[%s595_s0 + $0x68] sm:$0xff]  ;;  %s325_s3 = smov [#allocation2]  }
  0x15   :  { %v134_v30 = vadd.f32 %v383_v23, %v90_v16  ;;  %v135_v31 = vadd.f32 %v387_v25, %v91_v17  ;;  %v92_v32 = vmul.f32 %v381_v22, %v48_v18  ;;  %v93_v33 = vmul.f32 %v385_v24, %v49_v19  ;;  %v168_v38 = vld [vmem:[%s595_s0 + $0x70] sm:$0xff]  ;;  %v169_v39 = vld [vmem:[%s595_s0 + $0x78] sm:$0xff]  ;;  %v26_v44 = vld [vmem:[%s596_s1 + $0x40] sm:$0xff]  ;;  %s287_s29 = sshll.u32 %s325_s3, 4  ;;  %s288_s29 = int_to_ptr.vmem [resolvable:$true] %s287_s29 }
  0x16   :  { %v194_v34 = vadd.f32 %v162_v9, %v130_v20  ;;  %v195_v35 = vadd.f32 %v163_v11, %v131_v21  ;;  %v196_v36 = vadd.f32 %v164_v14, %v132_v26  ;;  %v197_v37 = vadd.f32 %v165_v15, %v133_v27  ;;  %v27_v45 = vld [vmem:[%s596_s1 + $0x48] sm:$0xff]  ;;  %v28_v50 = vld [vmem:[%s596_s1 + $0x50] sm:$0xff]  ;;  %v29_v59 = vld [vmem:[%s596_s1 + $0x58] sm:$0xff]  ;;  %p306_p1 = scmp.lt.s32.totalorder %s288_s29, %s288_s29 }
  0x17   :  { %v198_v40 = vadd.f32 %v166_v28, %v134_v30  ;;  %v199_v41 = vadd.f32 %v167_v29, %v135_v31  ;;  %v136_v42 = vadd.f32 %v383_v23, %v92_v32  ;;  %v137_v43 = vadd.f32 %v387_v25, %v93_v33  ;;  %v170_v1 = vld [vmem:[%s595_s0 + $0x80] sm:$0xff]  ;;  %v171_v5 = vld [vmem:[%s595_s0 + $0x88] sm:$0xff]  ;;  %v172_v6 = vld [vmem:[%s595_s0 + $0x90] sm:$0xff] }
  0x18   :  { %v226_v46 = vmax.f32 %v194_v34, 0.0  ;;  %v227_v47 = vmax.f32 %v195_v35, 0.0  ;;  %v228_v48 = vmax.f32 %v196_v36, 0.0  ;;  %v229_v49 = vmax.f32 %v197_v37, 0.0  ;;  %v173_v7 = vld [vmem:[%s595_s0 + $0x98] sm:$0xff]  ;;  %v174_v16 = vld [vmem:[%s595_s0 + $0xa0] sm:$0xff] }
  0x19   :  { %v230_v51 = vmax.f32 %v198_v40, 0.0  ;;  %v231_v52 = vmax.f32 %v199_v41, 0.0  ;;  %v200_v53 = vadd.f32 %v168_v38, %v136_v42  ;;  %v201_v54 = vadd.f32 %v169_v39, %v137_v43  ;;  %v175_v17 = vld [vmem:[%s595_s0 + $0xa8] sm:$0xff]  ;;  %v176_v30 = vld [vmem:[%s595_s0 + $0xb0] sm:$0xff]  ;;  %v177_v31 = vld [vmem:[%s595_s0 + $0xb8] sm:$0xff] }
  0x1a   :  { %258 = vst [vmem:[#allocation2 + $0x40] sm:$0xff] %v226_v46  ;;  %259 = vst [vmem:[#allocation2 + $0x48] sm:$0xff] %v227_v47  ;;  %v50_v55 = vunpack.c.l.bf16 %v26_v44  ;;  %v51_v56 = vunpack.c.h.bf16 %v26_v44  ;;  %v52_v57 = vunpack.c.l.bf16 %v27_v45  ;;  %v53_v58 = vunpack.c.h.bf16 %v27_v45  ;;  %v30_v36 = vld [vmem:[%s596_s1 + $0x60] sm:$0xff]  ;;  %v31_v37 = vld [vmem:[%s596_s1 + $0x68] sm:$0xff] }
  0x1b   :  { %260 = vst [vmem:[#allocation2 + $0x50] sm:$0xff] %v228_v48  ;;  %261 = vst [vmem:[#allocation2 + $0x58] sm:$0xff] %v229_v49  ;;  %v232_v60 = vmax.f32 %v200_v53, 0.0  ;;  %v233_v61 = vmax.f32 %v201_v54, 0.0  ;;  %v54_v62 = vunpack.c.l.bf16 %v28_v50  ;;  %v55_v63 = vunpack.c.h.bf16 %v28_v50  ;;  %v32_v42 = vld [vmem:[%s596_s1 + $0x70] sm:$0xff] }
  0x1c   :  { %262 = vst [vmem:[#allocation2 + $0x60] sm:$0xff] %v230_v51  ;;  %263 = vst [vmem:[#allocation2 + $0x68] sm:$0xff] %v231_v52  ;;  %v94_v0 = vmul.f32 %v381_v22, %v50_v55  ;;  %v95_v2 = vmul.f32 %v385_v24, %v51_v56  ;;  %v96_v3 = vmul.f32 %v381_v22, %v52_v57  ;;  %v56_v10 = vunpack.c.l.bf16 %v29_v59  ;;  %v33_v51 = vld [vmem:[%s596_s1 + $0x78] sm:$0xff]  ;;  %v178_v57 = vld [vmem:[%s595_s0 + $0xc0] sm:$0xff] }
  0x1d   :  { %v97_v4 = vmul.f32 %v385_v24, %v53_v58  ;;  %264 = vst [vmem:[#allocation2 + $0x70] sm:$0xff] %v232_v60  ;;  %265 = vst [vmem:[#allocation2 + $0x78] sm:$0xff] %v233_v61  ;;  %v98_v8 = vmul.f32 %v381_v22, %v54_v62  ;;  %v99_v9 = vmul.f32 %v385_v24, %v55_v63  ;;  %v57_v11 = vunpack.c.h.bf16 %v29_v59  ;;  %v179_v61 = vld [vmem:[%s595_s0 + $0xc8] sm:$0xff]  ;;  %v180_v62 = vld [vmem:[%s595_s0 + $0xd0] sm:$0xff] }
  0x1e   :  { %v138_v12 = vadd.f32 %v383_v23, %v94_v0  ;;  %v139_v13 = vadd.f32 %v387_v25, %v95_v2  ;;  %v140_v14 = vadd.f32 %v383_v23, %v96_v3  ;;  %v100_v20 = vmul.f32 %v381_v22, %v56_v10  ;;  %v181_v63 = vld [vmem:[%s595_s0 + $0xd8] sm:$0xff] }
  0x1f   :  { %v141_v15 = vadd.f32 %v387_v25, %v97_v4  ;;  %v142_v18 = vadd.f32 %v383_v23, %v98_v8  ;;  %v143_v19 = vadd.f32 %v387_v25, %v99_v9  ;;  %v101_v21 = vmul.f32 %v385_v24, %v57_v11  ;;  %v182_v8 = vld [vmem:[%s595_s0 + $0xe0] sm:$0xff]  ;;  %v183_v9 = vld [vmem:[%s595_s0 + $0xe8] sm:$0xff] }
  0x20   :  { %v202_v26 = vadd.f32 %v170_v1, %v138_v12  ;;  %v203_v27 = vadd.f32 %v171_v5, %v139_v13  ;;  %v204_v28 = vadd.f32 %v172_v6, %v140_v14  ;;  %v144_v34 = vadd.f32 %v383_v23, %v100_v20 }
  0x21   :  { %v205_v29 = vadd.f32 %v173_v7, %v141_v15  ;;  %v206_v32 = vadd.f32 %v174_v16, %v142_v18  ;;  %v207_v33 = vadd.f32 %v175_v17, %v143_v19  ;;  %v145_v35 = vadd.f32 %v387_v25, %v101_v21  ;;  %v184_v18 = vld [vmem:[%s595_s0 + $0xf0] sm:$0xff]  ;;  %v185_v19 = vld [vmem:[%s595_s0 + $0xf8] sm:$0xff]  ;;  %s301_s0 = scalar_lea.vmem %s288_s29, 4096 }
  0x22   :  { %v234_v38 = vmax.f32 %v202_v26, 0.0  ;;  %v235_v39 = vmax.f32 %v203_v27, 0.0  ;;  %v236_v40 = vmax.f32 %v204_v28, 0.0  ;;  %v208_v45 = vadd.f32 %v176_v30, %v144_v34  ;;  %p302_p0 = scmp.ne.s32.totalorder %s288_s29, %s301_s0  ;;  %p307_p2 = scmp.lt.s32.totalorder %s301_s0, %s301_s0 }
  0x23   :  { %v237_v41 = vmax.f32 %v205_v29, 0.0  ;;  %v238_v43 = vmax.f32 %v206_v32, 0.0  ;;  %v239_v44 = vmax.f32 %v207_v33, 0.0  ;;  %v209_v46 = vadd.f32 %v177_v31, %v145_v35 }
  0x24   :  { %266 = vst [vmem:[#allocation2 + $0x80] sm:$0xff] %v234_v38  ;;  %267 = vst [vmem:[#allocation2 + $0x88] sm:$0xff] %v235_v39  ;;  %v58_v47 = vunpack.c.l.bf16 %v30_v36  ;;  %v59_v48 = vunpack.c.h.bf16 %v30_v36  ;;  %v60_v49 = vunpack.c.l.bf16 %v31_v37  ;;  %v61_v50 = vunpack.c.h.bf16 %v31_v37  ;;  %p308_p3 = por %p307_p2, %p306_p1 }
  0x25   :  { %268 = vst [vmem:[#allocation2 + $0x90] sm:$0xff] %v236_v40  ;;  %269 = vst [vmem:[#allocation2 + $0x98] sm:$0xff] %v237_v41  ;;  %v240_v52 = vmax.f32 %v208_v45, 0.0  ;;  %v241_v53 = vmax.f32 %v209_v46, 0.0  ;;  %v62_v54 = vunpack.c.l.bf16 %v32_v42  ;;  %v63_v55 = vunpack.c.h.bf16 %v32_v42 }
  0x26   :  { %270 = vst [vmem:[#allocation2 + $0xa0] sm:$0xff] %v238_v43  ;;  %271 = vst [vmem:[#allocation2 + $0xa8] sm:$0xff] %v239_v44  ;;  %v102_v56 = vmul.f32 %v381_v22, %v58_v47  ;;  %v103_v58 = vmul.f32 %v385_v24, %v59_v48  ;;  %v104_v59 = vmul.f32 %v381_v22, %v60_v49  ;;  %v64_v2 = vunpack.c.l.bf16 %v33_v51  ;;  %p309_p4 = pnand %p308_p3, %p302_p0 }
  0x27   :  { %v105_v60 = vmul.f32 %v385_v24, %v61_v50  ;;  %272 = vst [vmem:[#allocation2 + $0xb0] sm:$0xff] %v240_v52  ;;  %273 = vst [vmem:[#allocation2 + $0xb8] sm:$0xff] %v241_v53  ;;  %v106_v0 = vmul.f32 %v381_v22, %v62_v54  ;;  %v107_v1 = vmul.f32 %v385_v24, %v63_v55  ;;  %v65_v3 = vunpack.c.h.bf16 %v33_v51 }
  0x28   :  { %v146_v4 = vadd.f32 %v383_v23, %v102_v56  ;;  %v147_v5 = vadd.f32 %v387_v25, %v103_v58  ;;  %v148_v6 = vadd.f32 %v383_v23, %v104_v59  ;;  %v108_v12 = vmul.f32 %v381_v22, %v64_v2 }
  0x29   :  { %v149_v7 = vadd.f32 %v387_v25, %v105_v60  ;;  %v150_v10 = vadd.f32 %v383_v23, %v106_v0  ;;  %v151_v11 = vadd.f32 %v387_v25, %v107_v1  ;;  %v109_v13 = vmul.f32 %v385_v24, %v65_v3 }
  0x2a   :  { %v210_v14 = vadd.f32 %v178_v57, %v146_v4  ;;  %v211_v15 = vadd.f32 %v179_v61, %v147_v5  ;;  %v212_v16 = vadd.f32 %v180_v62, %v148_v6  ;;  %v152_v26 = vadd.f32 %v383_v23, %v108_v12 }
  0x2b   :  { %v213_v17 = vadd.f32 %v181_v63, %v149_v7  ;;  %v214_v20 = vadd.f32 %v182_v8, %v150_v10  ;;  %v215_v21 = vadd.f32 %v183_v9, %v151_v11  ;;  %v153_v22 = vadd.f32 %v387_v25, %v109_v13 }
  0x2c   :  { %v242_v27 = vmax.f32 %v210_v14, 0.0  ;;  %v243_v24 = vmax.f32 %v211_v15, 0.0  ;;  %v244_v28 = vmax.f32 %v212_v16, 0.0  ;;  %v216_v32 = vadd.f32 %v184_v18, %v152_v26 }
  0x2d   :  { %v245_v29 = vmax.f32 %v213_v17, 0.0  ;;  %v246_v30 = vmax.f32 %v214_v20, 0.0  ;;  %v247_v31 = vmax.f32 %v215_v21, 0.0  ;;  %v217_v33 = vadd.f32 %v185_v19, %v153_v22 }
  0x2e   :  { %274 = vst [vmem:[#allocation2 + $0xc0] sm:$0xff] %v242_v27  ;;  %275 = vst [vmem:[#allocation2 + $0xc8] sm:$0xff] %v243_v24  ;;  %v248_v34 = vmax.f32 %v216_v32, 0.0 }
  0x2f   :  { %276 = vst [vmem:[#allocation2 + $0xd0] sm:$0xff] %v244_v28  ;;  %277 = vst [vmem:[#allocation2 + $0xd8] sm:$0xff] %v245_v29  ;;  %v249_v23 = vmax.f32 %v217_v33, 0.0 }
  0x30   :  { %278 = vst [vmem:[#allocation2 + $0xe0] sm:$0xff] %v246_v30  ;;  %279 = vst [vmem:[#allocation2 + $0xe8] sm:$0xff] %v247_v31 }
  0x31   :  { %280 = vst [vmem:[#allocation2 + $0xf0] sm:$0xff] %v248_v34  ;;  %281 = vst [vmem:[#allocation2 + $0xf8] sm:$0xff] %v249_v23 }
  0x32   :  { %312 = shalt.err (!%p309_p4)
}
  0x33   :  { %s313_s6 = scalar_lea.hbm %s599_s4, 4096 }
  0x34   :  { %p314_p5 = scmp.ne.s32.totalorder %s599_s4, %s313_s6  ;;  %p317_p6 = scmp.lt.u32.totalorder %s313_s6, %s599_s4 }
  0x36   :  { %p319_p7 = pnand %p317_p6, %p314_p5 }
  0x38   :  { %322 = shalt.err (!%p319_p7)
}
  0x39   :  { %s326_s11 = smov 256   ;;  %s327_s12 = smov 16  }
  0x3a   :  { %293 = dma.vmem_to_hbm [thread:$0]  %s288_s29, 4096, %s599_s4, [#allocation3], %s326_s11, %s326_s11, %s327_s12  }
  0x3b   :  { %323 = dma.done.wait [#allocation3], 4096  }
  0x3c   :  { %324 = vsyncadd [#allocation3], 4294963200 }
  0x3d   :  { %297 = vsyncpa [#allocation3], 1 }

// kernel: block_forward.4
= control target key start
LH: loop header
LB: loop body
LE: loop exit
PB: predicated region body
PF: predicated region fallthrough
CT: control target
= control target key end

     0   :  { %v7665_v1 = vmov 0   ;;  %v188_v39 = vlaneseq  ;;  %vm30_vm0 = vsmask.f32 256  ;;  %vm29_vm1 = vcmask 1040384   ;;  %v39_v56 = vld [vmem:[#allocation2 + $0x10] sm:$0x11]  ;;  %s9879_s3 = inlined_call_operand.vmem [shape: bf16[2304,256], index: 3, kind: input, shape index: {}]   ;;  %s9880_s1 = inlined_call_operand.vmem [shape: f32[1,256], index: 1, kind: input, shape index: {}]   ;;  %s9881_s2 = inlined_call_operand.vmem [shape: f32[1,256], index: 2, kind: input, shape index: {}]   ;;  %s9882_s0 = inlined_call_operand.vmem [shape: bf16[128,256], index: 0, kind: input, shape index: {}]   ;;  %s9883_s4 = inlined_call_operand.vmem [shape: bf16[128,256], index: 4, kind: output, shape index: {0}]   ;;  %s9884_s5 = inlined_call_operand.vmem [shape: f32[1,2,256], index: 5, kind: output, shape index: {1}]  }
   0x1   :  { %v7201_v0 = vld [vmem:[%s9879_s3 + $0x4] ss:$8 sps:$4 sm:$0xff]   ;;  %20 = vst [vmem:[#allocation2] sm:$0xff] %v7665_v1  ;;  %21 = vst [vmem:[#allocation2 + $0x8] sm:$0x11] %v7665_v1  ;;  %vm32_vm2 = vcmask 1044484  }
   0x2   :  { %22 = vst [vmem:[#allocation2 + $0xa0] sm:$0xff] %v7665_v1  ;;  %23 = vst [vmem:[#allocation2 + $0xa8] sm:$0x11] %v7665_v1  ;;  %v7203_v2 = vld [vmem:[%s9879_s3 + $0x404] ss:$8 sps:$4 sm:$0xff]   ;;  %992 = vmatprep.subr.bf16.mxu1 %v7201_v0  ;;  %v189_v44 = vshrl.u32 %v188_v39, 7 }
   0x3   :  { %25 = vst [vmem:[#allocation2 + $0x90] sm:$0xff] %v7665_v1  ;;  %26 = vst [vmem:[#allocation2 + $0x98] sm:$0x11] %v7665_v1  ;;  %v7205_v3 = vld [vmem:[%s9879_s3] ss:$8 sps:$4 sm:$0xff]   ;;  %3466 = vmatprep.subr.bf16.mxu0 %v7203_v2  ;;  %vm394_vm12 = vcmask 1043456  }
   0x4   :  { %27 = vst [vmem:[#allocation2 + $0x130] sm:$0xff] %v7665_v1  ;;  %28 = vst [vmem:[#allocation2 + $0x138] sm:$0x11] %v7665_v1  ;;  %v7206_v4 = vld [vmem:[%s9879_s3 + $0x400] ss:$8 sps:$4 sm:$0xff]   ;;  %993 = vmatpush1.bf16.msra.mxu1 %v7205_v3  ;;  %v190_v49 = vsub.s32 0, %v189_v44 }
   0x5   :  { %v7207_v5 = vld [vmem:[%s9879_s3 + $0x14] ss:$8 sps:$4 sm:$0xff]   ;;  %3467 = vmatpush1.bf16.msra.mxu0 %v7206_v4  ;;  %v7211_v7 = vld [vmem:[%s9879_s3 + $0x10] ss:$8 sps:$4 sm:$0xff]   ;;  %v7213_v9 = vld [vmem:[%s9879_s3 + $0x24] ss:$8 sps:$4 sm:$0xff]  }
   0x6   :  { %v7209_v6 = vld [vmem:[%s9879_s3 + $0x414] ss:$8 sps:$4 sm:$0xff]   ;;  %994 = vmatprep.subr.bf16.mxu1 %v7207_v5  ;;  %v7212_v8 = vld [vmem:[%s9879_s3 + $0x410] ss:$8 sps:$4 sm:$0xff]   ;;  %v7215_v10 = vld [vmem:[%s9879_s3 + $0x424] ss:$8 sps:$4 sm:$0xff]  }
   0x7   :  { %3468 = vmatprep.subr.bf16.mxu0 %v7209_v6  ;;  %v7217_v11 = vld [vmem:[%s9879_s3 + $0x20] ss:$8 sps:$4 sm:$0xff]   ;;  %v7219_v13 = vld [vmem:[%s9879_s3 + $0x34] ss:$8 sps:$4 sm:$0xff]   ;;  %v7223_v15 = vld [vmem:[%s9879_s3 + $0x30] ss:$8 sps:$4 sm:$0xff]  }
   0x8   :  { %v7218_v12 = vld [vmem:[%s9879_s3 + $0x420] ss:$8 sps:$4 sm:$0xff]   ;;  %995 = vmatpush1.bf16.msra.mxu1 %v7211_v7  ;;  %v7221_v14 = vld [vmem:[%s9879_s3 + $0x434] ss:$8 sps:$4 sm:$0xff]   ;;  %v7224_v16 = vld [vmem:[%s9879_s3 + $0x430] ss:$8 sps:$4 sm:$0xff]  }
   0x9   :  { %3469 = vmatpush1.bf16.msra.mxu0 %v7212_v8  ;;  %996 = vmatprep.subr.bf16.mxu1 %v7213_v9  ;;  %v7225_v17 = vld [vmem:[%s9879_s3 + $0x44] ss:$8 sps:$4 sm:$0xff]   ;;  %v7229_v19 = vld [vmem:[%s9879_s3 + $0x40] ss:$8 sps:$4 sm:$0xff]   ;;  %v7231_v21 = vld [vmem:[%s9879_s3 + $0x54] ss:$8 sps:$4 sm:$0xff]  }
   0xa   :  { %3470 = vmatprep.subr.bf16.mxu0 %v7215_v10  ;;  %v7227_v18 = vld [vmem:[%s9879_s3 + $0x444] ss:$8 sps:$4 sm:$0xff]   ;;  %v7230_v20 = vld [vmem:[%s9879_s3 + $0x440] ss:$8 sps:$4 sm:$0xff]   ;;  %v7233_v22 = vld [vmem:[%s9879_s3 + $0x454] ss:$8 sps:$4 sm:$0xff]  }
   0xb   :  { %v7235_v23 = vld [vmem:[%s9879_s3 + $0x50] ss:$8 sps:$4 sm:$0xff]   ;;  %v7237_v25 = vld [vmem:[%s9879_s3 + $0x64] ss:$8 sps:$4 sm:$0xff]   ;;  %v7241_v27 = vld [vmem:[%s9879_s3 + $0x60] ss:$8 sps:$4 sm:$0xff]  }
   0xc   :  { %997 = vmatpush1.bf16.msra.mxu1 %v7217_v11  ;;  %v7236_v24 = vld [vmem:[%s9879_s3 + $0x450] ss:$8 sps:$4 sm:$0xff]   ;;  %v7239_v26 = vld [vmem:[%s9879_s3 + $0x464] ss:$8 sps:$4 sm:$0xff]   ;;  %v7242_v28 = vld [vmem:[%s9879_s3 + $0x460] ss:$8 sps:$4 sm:$0xff]  }
   0xd   :  { %3471 = vmatpush1.bf16.msra.mxu0 %v7218_v12  ;;  %998 = vmatprep.subr.bf16.mxu1 %v7219_v13  ;;  %v7243_v29 = vld [vmem:[%s9879_s3 + $0x74] ss:$8 sps:$4 sm:$0xff]   ;;  %v7247_v31 = vld [vmem:[%s9879_s3 + $0x70] ss:$8 sps:$4 sm:$0xff]   ;;  %v7249_v33 = vld [vmem:[%s9879_s3 + $0x84] ss:$8 sps:$4 sm:$0xff]  }
   0xe   :  { %3472 = vmatprep.subr.bf16.mxu0 %v7221_v14  ;;  %v7245_v30 = vld [vmem:[%s9879_s3 + $0x474] ss:$8 sps:$4 sm:$0xff]   ;;  %v7248_v32 = vld [vmem:[%s9879_s3 + $0x470] ss:$8 sps:$4 sm:$0xff]   ;;  %v7251_v34 = vld [vmem:[%s9879_s3 + $0x484] ss:$8 sps:$4 sm:$0xff]  }
   0xf   :  { %v7253_v35 = vld [vmem:[%s9879_s3 + $0x80] ss:$8 sps:$4 sm:$0xff]   ;;  %v7255_v37 = vld [vmem:[%s9879_s3 + $0x94] ss:$8 sps:$4 sm:$0xff]   ;;  %v7259_v40 = vld [vmem:[%s9879_s3 + $0x90] ss:$8 sps:$4 sm:$0xff]  }
  0x10   :  { %999 = vmatpush1.bf16.msra.mxu1 %v7223_v15  ;;  %v7254_v36 = vld [vmem:[%s9879_s3 + $0x480] ss:$8 sps:$4 sm:$0xff]   ;;  %v7257_v38 = vld [vmem:[%s9879_s3 + $0x494] ss:$8 sps:$4 sm:$0xff]   ;;  %v7260_v41 = vld [vmem:[%s9879_s3 + $0x490] ss:$8 sps:$4 sm:$0xff]  }
  0x11   :  { %3473 = vmatpush1.bf16.msra.mxu0 %v7224_v16  ;;  %1000 = vmatprep.subr.bf16.mxu1 %v7225_v17  ;;  %v7261_v42 = vld [vmem:[%s9879_s3 + $0xa4] ss:$8 sps:$4 sm:$0xff]   ;;  %v7265_v45 = vld [vmem:[%s9879_s3 + $0xa0] ss:$8 sps:$4 sm:$0xff]   ;;  %v7267_v47 = vld [vmem:[%s9879_s3 + $0xb4] ss:$8 sps:$4 sm:$0xff]  }
  0x12   :  { %3474 = vmatprep.subr.bf16.mxu0 %v7227_v18  ;;  %v7263_v43 = vld [vmem:[%s9879_s3 + $0x4a4] ss:$8 sps:$4 sm:$0xff]   ;;  %v7266_v46 = vld [vmem:[%s9879_s3 + $0x4a0] ss:$8 sps:$4 sm:$0xff]   ;;  %vm33_vm3 = vsmask.f32 4352  ;;  %vm31_vm4 = vmand %vm29_vm1, %vm30_vm0 }
  0x13   :  { %v7269_v48 = vld [vmem:[%s9879_s3 + $0x4b4] ss:$8 sps:$4 sm:$0xff]   ;;  %v194_v50 = vsub.s32 1, %v189_v44  ;;  %v7271_v51 = vld [vmem:[%s9879_s3 + $0xb0] ss:$8 sps:$4 sm:$0xff]   ;;  %vm34_vm6 = vmand %vm32_vm2, %vm33_vm3  ;;  %vm396_vm13 = vcmask 1047556  }
  0x14   :  { %1001 = vmatpush1.bf16.msra.mxu1 %v7229_v19  ;;  %v7272_v52 = vld [vmem:[%s9879_s3 + $0x4b0] ss:$8 sps:$4 sm:$0xff]   ;;  %vm96_vm5 = vsmask.f32 7938  ;;  %v7273_v53 = vld [vmem:[%s9879_s3 + $0xc4] ss:$8 sps:$4 sm:$0xff]   ;;  %vm7850_vm8 = vmor %vm34_vm6, %vm31_vm4 }
  0x15   :  { %3475 = vmatpush1.bf16.msra.mxu0 %v7230_v20  ;;  %1002 = vmatprep.subr.bf16.mxu1 %v7231_v21  ;;  %v7275_v54 = vld [vmem:[%s9879_s3 + $0x4c4] ss:$8 sps:$4 sm:$0xff]   ;;  %vm98_vm7 = vsmask.f32 7954  ;;  %v161_v58 = vld [vmem:[%s9880_s1] sm:$0x3]  ;;  %vm7866_vm9 = vmand %vm29_vm1, %vm96_vm5 }
  0x16   :  { %3476 = vmatprep.subr.bf16.mxu0 %v7233_v22  ;;  %v36_v55 = vld [vmem:[#allocation2] sm:$0x11]  ;;  %v40_v61 = vsel %vm7850_vm8, 0, %v39_v56  ;;  %v7873_v0 = vrot.slane %v161_v58, %v190_v49  ;;  %v7875_v1 = vrot.slane %v161_v58, %v194_v50  ;;  %vm99_vm10 = vmand %vm32_vm2, %vm98_vm7  ;;  %v104_v8 = vld [vmem:[#allocation2 + $0x18] sm:$0x11]  ;;  %vm1926_vm6 = vcmask 1046532  }
  0x17   :  { %v162_v59 = vld [vmem:[%s9881_s2] sm:$0x3]  ;;  %v37_v60 = vsel %vm7850_vm8, 0, %v36_v55  ;;  %41 = vst [vmem:[#allocation2 + $0x10] sm:$0x11] %v40_v61  ;;  %vm7888_vm11 = vmor %vm99_vm10, %vm7866_vm9  ;;  %v164_v12 = vld [vmem:[%s9882_s0 + $0x8] sm:$0xff] }
  0x18   :  { %1003 = vmatpush1.bf16.msra.mxu1 %v7235_v23  ;;  %v163_v63 = vld [vmem:[%s9882_s0] sm:$0xff]  ;;  %38 = vst [vmem:[#allocation2] sm:$0x11] %v37_v60  ;;  %v7882_v6 = vrot.slane %v162_v59, %v190_v49  ;;  %v7884_v7 = vrot.slane %v162_v59, %v194_v50  ;;  %v107_v9 = vld [vmem:[#allocation2 + $0x28] sm:$0x11]  ;;  %v105_v16 = vsel %vm7888_vm11, 0, %v104_v8  ;;  %v173_v20 = vunpack.c.l.bf16 %v164_v12  ;;  %vm7938_vm14 = vmand %vm394_vm12, %vm96_vm5 }
  0x19   :  { %3477 = vmatpush1.bf16.msra.mxu0 %v7236_v24  ;;  %1004 = vmatprep.subr.bf16.mxu1 %v7237_v25  ;;  %v42_v2 = vld [vmem:[#allocation2 + $0x20] sm:$0x11]  ;;  %v171_v4 = vunpack.c.l.bf16 %v163_v63  ;;  %v172_v5 = vunpack.c.h.bf16 %v163_v63  ;;  %v108_v17 = vsel %vm7888_vm11, 0, %v107_v9  ;;  %v7279_v18 = vld [vmem:[%s9879_s3 + $0xd4] ss:$8 sps:$4 sm:$0xff]   ;;  %v174_v21 = vunpack.c.h.bf16 %v164_v12  ;;  %vm7953_vm15 = vmand %vm396_vm13, %vm98_vm7 }
  0x1a   :  { %3478 = vmatprep.subr.bf16.mxu0 %v7239_v26  ;;  %v7277_v3 = vld [vmem:[%s9879_s3 + $0xc0] ss:$8 sps:$4 sm:$0xff]   ;;  %v43_v11 = vsel %vm7850_vm8, 0, %v42_v2  ;;  %v7281_v19 = vld [vmem:[%s9879_s3 + $0x4d4] ss:$8 sps:$4 sm:$0xff]   ;;  %v200_v25 = vmul.f32 %v7873_v0, %v173_v20  ;;  %vm7976_vm0 = vmor %vm7953_vm15, %vm7938_vm14  ;;  %vm1925_vm5 = vcmask 1042432  }
  0x1b   :  { %v7278_v13 = vld [vmem:[%s9879_s3 + $0x4c0] ss:$8 sps:$4 sm:$0xff]   ;;  %v198_v14 = vmul.f32 %v7873_v0, %v171_v4  ;;  %v199_v15 = vmul.f32 %v7875_v1, %v172_v5  ;;  %44 = vst [vmem:[#allocation2 + $0x20] sm:$0x11] %v43_v11  ;;  %106 = vst [vmem:[#allocation2 + $0x18] sm:$0x11] %v105_v16  ;;  %v201_v26 = vmul.f32 %v7875_v1, %v174_v21 }
  0x1c   :  { %1005 = vmatpush1.bf16.msra.mxu1 %v7241_v27  ;;  %109 = vst [vmem:[#allocation2 + $0x28] sm:$0x11] %v108_v17  ;;  %v7283_v24 = vld [vmem:[%s9879_s3 + $0xd0] ss:$8 sps:$4 sm:$0xff]   ;;  %v113_v62 = vld [vmem:[#allocation2 + $0x48] sm:$0x11]  ;;  %vm8497_vm7 = vmor %vm1925_vm5, %vm1926_vm6 }
  0x1d   :  { %3479 = vmatpush1.bf16.msra.mxu0 %v7242_v28  ;;  %1006 = vmatprep.subr.bf16.mxu1 %v7243_v29  ;;  %v225_v22 = vadd.f32 %v7882_v6, %v198_v14  ;;  %v226_v23 = vadd.f32 %v7884_v7, %v199_v15  ;;  %v7284_v27 = vld [vmem:[%s9879_s3 + $0x4d0] ss:$8 sps:$4 sm:$0xff]   ;;  %v7299_v5 = vld [vmem:[%s9879_s3 + $0x104] ss:$8 sps:$4 sm:$0xff]   ;;  %v114_v9 = vsel %vm7888_vm11, 0, %v113_v62 }
  0x1e   :  { %3480 = vmatprep.subr.bf16.mxu0 %v7245_v30  ;;  %v7285_v30 = vld [vmem:[%s9879_s3 + $0xe4] ss:$8 sps:$4 sm:$0xff]   ;;  %v399_v49 = vld [vmem:[#allocation2 + $0x10] sm:$0xff]  ;;  %115 = vst [vmem:[#allocation2 + $0x48] sm:$0x11] %v114_v9 }
  0x1f   :  { %v241_v28 = vmax.f32 %v225_v22, 0.0  ;;  %v242_v29 = vmax.f32 %v226_v23, 0.0  ;;  %v7295_v55 = vld [vmem:[%s9879_s3 + $0xf0] ss:$8 sps:$4 sm:$0xff]   ;;  %vm1169_vm2 = vsmask.f32 3328 }
  0x20   :  { %1007 = vmatpush1.bf16.msra.mxu1 %v7247_v31  ;;  %v7287_v31 = vld [vmem:[%s9879_s3 + $0x4e4] ss:$8 sps:$4 sm:$0xff]   ;;  %v7296_v56 = vld [vmem:[%s9879_s3 + $0x4f0] ss:$8 sps:$4 sm:$0xff]   ;;  %vm1170_vm3 = vsmask.f32 7440 }
  0x21   :  { %3481 = vmatpush1.bf16.msra.mxu0 %v7248_v32  ;;  %1008 = vmatprep.subr.bf16.mxu1 %v7249_v33  ;;  %v227_v32 = vadd.f32 %v7882_v6, %v200_v25  ;;  %v228_v33 = vadd.f32 %v7884_v7, %v201_v26  ;;  %vm8031_vm4 = vmor %vm1169_vm2, %vm1170_vm3  ;;  %v9384_v10 = vld [vmem:[%s9879_s3 + $0x850] ss:$8 sps:$4 sm:$0xff]  }
  0x22   :  { %3482 = vmatprep.subr.bf16.mxu0 %v7251_v34  ;;  %v7289_v34 = vld [vmem:[%s9879_s3 + $0xe0] ss:$8 sps:$4 sm:$0xff]   ;;  %v402_v4 = vld [vmem:[#allocation2 + $0x18] sm:$0x11] }
  0x23   :  { %v244_v39 = vmax.f32 %v228_v33, 0.0  ;;  %v405_v17 = vld [vmem:[#allocation2 + $0x20] sm:$0xff]  ;;  %v408_v23 = vld [vmem:[#allocation2 + $0x28] sm:$0x11] }
  0x24   :  { %1009 = vmatpush1.bf16.msra.mxu1 %v7253_v35  ;;  %v7290_v35 = vld [vmem:[%s9879_s3 + $0x4e0] ss:$8 sps:$4 sm:$0xff]  }
  0x25   :  { %3483 = vmatpush1.bf16.msra.mxu0 %v7254_v36  ;;  %1010 = vmatprep.subr.bf16.mxu1 %v7255_v37  ;;  %v6880_v36 = vpack.c.bf16 %v242_v29, %v241_v28 }
  0x26   :  { %3484 = vmatprep.subr.bf16.mxu0 %v7257_v38  ;;  %v243_v38 = vmax.f32 %v227_v32, 0.0  ;;  %v7297_v32 = vld [vmem:[%s9879_s3 + $0x100] ss:$8 sps:$4 sm:$0xff]  }
  0x27   :  { %v314_v44 = vshrl.u32 %v6880_v36, 16 }
  0x28   :  { %1011 = vmatpush1.bf16.msra.mxu1 %v7259_v40  ;;  %v45_v40 = vld [vmem:[#allocation2 + $0x30] sm:$0x11]  ;;  %v6881_v50 = vpack.c.bf16 %v244_v39, %v243_v38 }
  0x29   :  { %3485 = vmatpush1.bf16.msra.mxu0 %v7260_v41  ;;  %1012 = vmatprep.subr.bf16.mxu1 %v7261_v42  ;;  %v165_v41 = vld [vmem:[%s9882_s0 + $0x10] sm:$0xff]  ;;  %v316_v58 = vrot.slane %v314_v44, 7 }
  0x2a   :  { %3486 = vmatprep.subr.bf16.mxu0 %v7263_v43  ;;  %v7291_v42 = vld [vmem:[%s9879_s3 + $0xf4] ss:$8 sps:$4 sm:$0xff]   ;;  %v322_v2 = vshrl.u32 %v6881_v50, 16 }
  0x2b   :  { %v7293_v43 = vld [vmem:[%s9879_s3 + $0x4f4] ss:$8 sps:$4 sm:$0xff]   ;;  %v320_v12 = vrot.slane %v316_v58, 4 }
  0x2c   :  { %1013 = vmatpush1.bf16.msra.mxu1 %v7265_v45  ;;  %v317_v45 = vshll.u32 %v6880_v36, 16  ;;  %v324_v16 = vrot.slane %v322_v2, 7  ;;  %v7305_v38 = vld [vmem:[%s9879_s3 + $0x114] ss:$8 sps:$4 sm:$0xff]  }
  0x2d   :  { %3487 = vmatpush1.bf16.msra.mxu0 %v7266_v46  ;;  %1014 = vmatprep.subr.bf16.mxu1 %v7267_v47  ;;  %v175_v47 = vunpack.c.l.bf16 %v165_v41  ;;  %v403_v22 = vsel %vm7850_vm8, %v320_v12, %v402_v4  ;;  %v7303_v46 = vld [vmem:[%s9879_s3 + $0x110] ss:$8 sps:$4 sm:$0xff]  }
  0x2e   :  { %3488 = vmatprep.subr.bf16.mxu0 %v7269_v48  ;;  %v176_v48 = vunpack.c.h.bf16 %v165_v41  ;;  %v319_v11 = vor.u32 %v317_v45, %v316_v58  ;;  %v328_v29 = vrot.slane %v324_v16, 4  ;;  %404 = vst [vmem:[#allocation2 + $0x18] sm:$0x11] %v403_v22  ;;  %v167_v41 = vld [vmem:[%s9882_s0 + $0x20] sm:$0xff]  ;;  %v116_v58 = vld [vmem:[#allocation2 + $0x58] sm:$0x11] }
  0x2f   :  { %v202_v59 = vmul.f32 %v7873_v0, %v175_v47  ;;  %v180_v62 = vunpack.c.h.bf16 %v167_v41  ;;  %v117_v22 = vsel %vm7888_vm11, 0, %v116_v58 }
  0x30   :  { %1015 = vmatpush1.bf16.msra.mxu1 %v7271_v51  ;;  %v46_v51 = vsel %vm7850_vm8, 0, %v45_v40  ;;  %v203_v60 = vmul.f32 %v7875_v1, %v176_v48  ;;  %v400_v21 = vsel %vm7976_vm0, %v319_v11, %v399_v49  ;;  %v409_v37 = vsel %vm7850_vm8, %v328_v29, %v408_v23  ;;  %118 = vst [vmem:[#allocation2 + $0x58] sm:$0x11] %v117_v22  ;;  %v7314_v22 = vld [vmem:[%s9879_s3 + $0x524] ss:$8 sps:$4 sm:$0xff]  }
  0x31   :  { %3489 = vmatpush1.bf16.msra.mxu0 %v7272_v52  ;;  %1016 = vmatprep.subr.bf16.mxu1 %v7273_v53  ;;  %v48_v52 = vld [vmem:[#allocation2 + $0x40] sm:$0x11]  ;;  %v110_v53 = vld [vmem:[#allocation2 + $0x38] sm:$0x11]  ;;  %47 = vst [vmem:[#allocation2 + $0x30] sm:$0x11] %v46_v51  ;;  %v229_v14 = vadd.f32 %v7882_v6, %v202_v59 }
  0x32   :  { %3490 = vmatprep.subr.bf16.mxu0 %v7275_v54  ;;  %v166_v54 = vld [vmem:[%s9882_s0 + $0x18] sm:$0xff]  ;;  %v49_v61 = vsel %vm7850_vm8, 0, %v48_v52  ;;  %v111_v8 = vsel %vm7888_vm11, 0, %v110_v53  ;;  %v230_v15 = vadd.f32 %v7884_v7, %v203_v60  ;;  %401 = vst [vmem:[#allocation2 + $0x10] sm:$0xff] %v400_v21  ;;  %410 = vst [vmem:[#allocation2 + $0x28] sm:$0x11] %v409_v37 }
  0x33   :  { %50 = vst [vmem:[#allocation2 + $0x40] sm:$0x11] %v49_v61  ;;  %112 = vst [vmem:[#allocation2 + $0x38] sm:$0x11] %v111_v8  ;;  %v178_v20 = vunpack.c.h.bf16 %v166_v54  ;;  %v54_v51 = vld [vmem:[#allocation2 + $0x60] sm:$0x11] }
  0x34   :  { %1017 = vmatpush1.bf16.msra.mxu1 %v7277_v3  ;;  %v325_v3 = vshll.u32 %v6881_v50, 16  ;;  %v246_v25 = vmax.f32 %v230_v15, 0.0  ;;  %v55_v9 = vsel %vm7850_vm8, 0, %v54_v51 }
  0x35   :  { %3491 = vmatpush1.bf16.msra.mxu0 %v7278_v13  ;;  %1018 = vmatprep.subr.bf16.mxu1 %v7279_v18  ;;  %v704_v13 = vld [vmem:[#allocation2] sm:$0xff]  ;;  %v205_v39 = vmul.f32 %v7875_v1, %v178_v20  ;;  %v2955_v2 = vld [vmem:[#allocation2 + $0x18] sm:$0x11]  ;;  %56 = vst [vmem:[#allocation2 + $0x60] sm:$0x11] %v55_v9  ;;  %v207_v20 = vmul.f32 %v7875_v1, %v180_v62 }
  0x36   :  { %3492 = vmatprep.subr.bf16.mxu0 %v7281_v19  ;;  %v7302_v18 = vld [vmem:[%s9879_s3 + $0x504] ss:$8 sps:$4 sm:$0xff]   ;;  %v177_v19 = vunpack.c.l.bf16 %v166_v54  ;;  %v6383_v26 = vcombine.low %v704_v13, %v400_v21  ;;  %v327_v28 = vor.u32 %v325_v3, %v324_v16  ;;  %v2996_v11 = vshll.u32 %v2955_v2, 16  ;;  %v7329_v9 = vld [vmem:[%s9879_s3 + $0x154] ss:$8 sps:$4 sm:$0xff]  }
  0x37   :  { %v232_v50 = vadd.f32 %v7884_v7, %v205_v39  ;;  %v168_v39 = vld [vmem:[%s9882_s0 + $0x28] sm:$0xff] }
  0x38   :  { %1019 = vmatpush1.bf16.msra.mxu1 %v7283_v24  ;;  %v245_v24 = vmax.f32 %v229_v14, 0.0  ;;  %v8002_v36 = vsel %vm7976_vm0, %v327_v28, %v405_v17 }
  0x39   :  { %3493 = vmatpush1.bf16.msra.mxu0 %v7284_v27  ;;  %1020 = vmatprep.subr.bf16.mxu1 %v7285_v30  ;;  %v6384_v27 = vcombine.high %v704_v13, %v400_v21  ;;  %v2987_v30 = vshrl.u32 %v400_v21, 16  ;;  %407 = vst [vmem:[#allocation2 + $0x20] sm:$0xff] %v8002_v36  ;;  %v3001_v44 = vshrl.u32 %v8002_v36, 16  ;;  %v3004_v45 = vshll.u32 %v8002_v36, 16  ;;  %v2957_v23 = vld [vmem:[#allocation2 + $0x28] sm:$0x11] }
  0x3a   :  { %3494 = vmatprep.subr.bf16.mxu0 %v7287_v31  ;;  %v2990_v31 = vshll.u32 %v400_v21, 16  ;;  %v6882_v33 = vpack.c.bf16 %v246_v25, %v245_v24  ;;  %v248_v61 = vmax.f32 %v232_v50, 0.0  ;;  %v414_v15 = vld [vmem:[#allocation2 + $0x38] sm:$0x11]  ;;  %v2998_v24 = vrot.slane %v2996_v11, 5 }
  0x3b   :  { %1024 = vmatprep.mubr.bf16.mxu1 %v6384_v27  ;;  %v3003_v53 = vrot.slane %v3001_v44, 4  ;;  %v3006_v54 = vrot.slane %v3004_v45, 5  ;;  %v3010_v28 = vshll.u32 %v2957_v23, 16  ;;  %v234_v44 = vadd.f32 %v7884_v7, %v207_v20  ;;  %v7306_v11 = vld [vmem:[%s9879_s3 + $0x510] ss:$8 sps:$4 sm:$0xff]  }
  0x3c   :  { %1021 = vmatpush1.bf16.msra.mxu1 %v7289_v34  ;;  %v204_v34 = vmul.f32 %v7873_v0, %v177_v19  ;;  %v330_v47 = vshrl.u32 %v6882_v33, 16  ;;  %v333_v48 = vshll.u32 %v6882_v33, 16  ;;  %v7317_v19 = vld [vmem:[%s9879_s3 + $0x134] ss:$8 sps:$4 sm:$0xff]  }
  0x3d   :  { %3495 = vmatpush1.bf16.msra.mxu0 %v7290_v35  ;;  %1022 = vmatprep.subr.bf16.mxu1 %v7291_v42  ;;  %v51_v35 = vld [vmem:[#allocation2 + $0x50] sm:$0x11]  ;;  %v2989_v42 = vrot.slane %v2987_v30, 4  ;;  %v3007_v4 = vor.u32 %v3006_v54, %v3003_v53  ;;  %v250_v51 = vmax.f32 %v234_v44, 0.0  ;;  %v182_v53 = vunpack.c.h.bf16 %v168_v39 }
  0x3e   :  { %3496 = vmatprep.subr.bf16.mxu0 %v7293_v43  ;;  %v52_v40 = vsel %vm7850_vm8, 0, %v51_v35  ;;  %v2992_v43 = vrot.slane %v2990_v31, 5  ;;  %v231_v49 = vadd.f32 %v7882_v6, %v204_v34  ;;  %v332_v59 = vrot.slane %v330_v47, 7  ;;  %v57_v54 = vld [vmem:[#allocation2 + $0x70] sm:$0x11] }
  0x3f   :  { %53 = vst [vmem:[#allocation2 + $0x50] sm:$0x11] %v52_v40  ;;  %v3008_v17 = vrot.slane %v3007_v4, 4  ;;  %v3012_v40 = vrot.slane %v3010_v28, 5 }
  0x40   :  { %1023 = vmatpush1.bf16.msra.mxu1 %v7295_v55  ;;  %v2993_v52 = vor.u32 %v2992_v43, %v2989_v42  ;;  %v7311_v55 = vld [vmem:[%s9879_s3 + $0x124] ss:$8 sps:$4 sm:$0xff]   ;;  %v247_v60 = vmax.f32 %v231_v49, 0.0  ;;  %v335_v12 = vor.u32 %v333_v48, %v332_v59  ;;  %v336_v13 = vrot.slane %v332_v59, 4  ;;  %v7300_v59 = vld [vmem:[%s9879_s3 + $0x500] ss:$8 sps:$4 sm:$0xff]  }
  0x41   :  { %3497 = vmatpush1.bf16.msra.mxu0 %v7296_v56  ;;  %1652 = vmatprep.subr.bf16.mxu1 %v7299_v5  ;;  %v179_v56 = vunpack.c.l.bf16 %v167_v41  ;;  %v411_v5 = vld [vmem:[#allocation2 + $0x30] sm:$0xff]  ;;  %v417_v41 = vld [vmem:[#allocation2 + $0x40] sm:$0xff]  ;;  %v420_v42 = vld [vmem:[#allocation2 + $0x48] sm:$0x11]  ;;  %v3013_v50 = vsel %vm8031_vm4, %v3008_v17, %v3012_v40 }
  0x42   :  { %4059 = vmatprep.subr.bf16.mxu0 %v7302_v18  ;;  %v2994_v3 = vrot.slane %v2993_v52, 4  ;;  %v6883_v14 = vpack.c.bf16 %v248_v61, %v247_v60  ;;  %v7309_v18 = vld [vmem:[%s9879_s3 + $0x120] ss:$8 sps:$4 sm:$0xff]   ;;  %v412_v25 = vsel %vm7976_vm0, %v335_v12, %v411_v5  ;;  %v415_v30 = vsel %vm7850_vm8, %v336_v13, %v414_v15  ;;  %v7323_v49 = vld [vmem:[%s9879_s3 + $0x144] ss:$8 sps:$4 sm:$0xff]  }
  0x43   :  { %1025 = vmatmul.mubr.bf16.vlgmr.msra.gmra.mrb[0].mxu1 %v6383_v26  ;;  %v206_v8 = vmul.f32 %v7873_v0, %v179_v56  ;;  %413 = vst [vmem:[#allocation2 + $0x30] sm:$0xff] %v412_v25  ;;  %v6386_v29 = vcombine.high %v8002_v36, %v412_v25  ;;  %v3015_v31 = vshrl.u32 %v412_v25, 16  ;;  %416 = vst [vmem:[#allocation2 + $0x38] sm:$0x11] %v415_v30  ;;  %v3018_v35 = vshll.u32 %v412_v25, 16 }
  0x44   :  { %1653 = vmatpush1.bf16.msra.mxu1 %v7297_v32  ;;  %v338_v26 = vshrl.u32 %v6883_v14, 16  ;;  %v341_v27 = vshll.u32 %v6883_v14, 16  ;;  %v119_v32 = vld [vmem:[#allocation2 + $0x68] sm:$0x11]  ;;  %v2999_v33 = vsel %vm8031_vm4, %v2994_v3, %v2998_v24  ;;  %v6385_v37 = vcombine.low %v8002_v36, %v412_v25  ;;  %v7308_v60 = vld [vmem:[%s9879_s3 + $0x514] ss:$8 sps:$4 sm:$0xff]  }
  0x45   :  { %1654 = vmatprep.subr.bf16.mxu1 %v7305_v38  ;;  %v233_v21 = vadd.f32 %v7882_v6, %v206_v8  ;;  %v7315_v38 = vld [vmem:[%s9879_s3 + $0x130] ss:$8 sps:$4 sm:$0xff]   ;;  %1034 = vmatprep.mubr.bf16.mxu1 %v6386_v29  ;;  %v3017_v43 = vrot.slane %v3015_v31, 4  ;;  %v3020_v36 = vrot.slane %v3018_v35, 5  ;;  %v120_v48 = vsel %vm7888_vm11, 0, %v119_v32 }
  0x46   :  { %v340_v34 = vrot.slane %v338_v26, 7  ;;  %121 = vst [vmem:[#allocation2 + $0x68] sm:$0x11] %v120_v48  ;;  %v181_v52 = vunpack.c.l.bf16 %v168_v39  ;;  %v6591_v56 = vcombine.low %v2999_v33, %v3013_v50  ;;  %v6592_v58 = vcombine.high %v2999_v33, %v3013_v50  ;;  %v7321_v8 = vld [vmem:[%s9879_s3 + $0x140] ss:$8 sps:$4 sm:$0xff]   ;;  %v423_v26 = vld [vmem:[#allocation2 + $0x50] sm:$0xff] }
  0x47   :  { %v249_v45 = vmax.f32 %v233_v21, 0.0  ;;  %v3021_v2 = vor.u32 %v3020_v36, %v3017_v43  ;;  %v209_v13 = vmul.f32 %v7875_v1, %v182_v53  ;;  %v58_v14 = vsel %vm7850_vm8, 0, %v57_v54  ;;  %v60_v17 = vld [vmem:[#allocation2 + $0x80] sm:$0x11]  ;;  %v7327_v29 = vld [vmem:[%s9879_s3 + $0x150] ss:$8 sps:$4 sm:$0xff]  }
  0x48   :  { %1655 = vmatpush1.bf16.msra.mxu1 %v7303_v46  ;;  %v343_v46 = vor.u32 %v341_v27, %v340_v34  ;;  %v344_v47 = vrot.slane %v340_v34, 4  ;;  %3498 = vmatprep.mubr.bf16.mxu0 %v6592_v58  ;;  %v208_v12 = vmul.f32 %v7873_v0, %v181_v52  ;;  %59 = vst [vmem:[#allocation2 + $0x70] sm:$0x11] %v58_v14  ;;  %v122_v30 = vld [vmem:[#allocation2 + $0x78] sm:$0x11]  ;;  %v61_v40 = vsel %vm7850_vm8, 0, %v60_v17 }
  0x49   :  { %1656 = vmatprep.subr.bf16.mxu1 %v7311_v55  ;;  %v169_v55 = vld [vmem:[%s9882_s0 + $0x30] sm:$0xff]  ;;  %v6884_v5 = vpack.c.bf16 %v250_v51, %v249_v45  ;;  %3499 = vmatmul.mubr.bf16.vlgmr.msra.gmra.mrb[0].mxu0 %v6591_v56  ;;  %v236_v28 = vadd.f32 %v7884_v7, %v209_v13  ;;  %v426_v33 = vld [vmem:[#allocation2 + $0x58] sm:$0x11]  ;;  %62 = vst [vmem:[#allocation2 + $0x80] sm:$0x11] %v61_v40  ;;  %v123_v50 = vsel %vm7888_vm11, 0, %v122_v30 }
  0x4a   :  { %v8078_v61 = vsel %vm7976_vm0, %v343_v46, %v417_v41  ;;  %v421_v62 = vsel %vm7850_vm8, %v344_v47, %v420_v42  ;;  %v183_v15 = vunpack.c.l.bf16 %v169_v55  ;;  %4060 = vmatpush1.bf16.msra.mxu0 %v7300_v59  ;;  %v235_v27 = vadd.f32 %v7882_v6, %v208_v12  ;;  %v7335_v41 = vld [vmem:[%s9879_s3 + $0x164] ss:$8 sps:$4 sm:$0xff]   ;;  %v7312_v36 = vld [vmem:[%s9879_s3 + $0x520] ss:$8 sps:$4 sm:$0xff]   ;;  %v7320_v52 = vld [vmem:[%s9879_s3 + $0x534] ss:$8 sps:$4 sm:$0xff]  }
  0x4b   :  { %1035 = vmatmul.mubr.bf16.gmra.mrb[4].mxu1 %v6385_v37  ;;  %419 = vst [vmem:[#allocation2 + $0x40] sm:$0xff] %v8078_v61  ;;  %422 = vst [vmem:[#allocation2 + $0x48] sm:$0x11] %v421_v62  ;;  %v3029_v3 = vshrl.u32 %v8078_v61, 16  ;;  %v3032_v4 = vshll.u32 %v8078_v61, 16  ;;  %v346_v23 = vshrl.u32 %v6884_v5, 16  ;;  %4061 = vmatprep.subr.bf16.mxu0 %v7308_v60  ;;  %v184_v34 = vunpack.c.h.bf16 %v169_v55 }
  0x4c   :  { %1657 = vmatpush1.bf16.msra.mxu1 %v7309_v18  ;;  %v2959_v18 = vld [vmem:[#allocation2 + $0x38] sm:$0x11]  ;;  %v349_v25 = vshll.u32 %v6884_v5, 16  ;;  %v210_v35 = vmul.f32 %v7873_v0, %v183_v15  ;;  %v252_v39 = vmax.f32 %v236_v28, 0.0  ;;  %124 = vst [vmem:[#allocation2 + $0x78] sm:$0x11] %v123_v50 }
  0x4d   :  { %1658 = vmatprep.subr.bf16.mxu1 %v7317_v19  ;;  %v3022_v19 = vrot.slane %v3021_v2, 4  ;;  %v3031_v20 = vrot.slane %v3029_v3, 4  ;;  %v3034_v21 = vrot.slane %v3032_v4, 5  ;;  %v3024_v24 = vshll.u32 %v2959_v18, 16  ;;  %v125_v56 = vld [vmem:[#allocation2 + $0x88] sm:$0x11] }
  0x4e   :  { %v348_v32 = vrot.slane %v346_v23, 7  ;;  %v211_v45 = vmul.f32 %v7875_v1, %v184_v34  ;;  %4062 = vmatpush1.bf16.msra.mxu0 %v7306_v11  ;;  %v7318_v58 = vld [vmem:[%s9879_s3 + $0x530] ss:$8 sps:$4 sm:$0xff]   ;;  %v7333_v4 = vld [vmem:[%s9879_s3 + $0x160] ss:$8 sps:$4 sm:$0xff]  }
  0x4f   :  { %v3035_v31 = vor.u32 %v3034_v21, %v3031_v20  ;;  %v3026_v37 = vrot.slane %v3024_v24, 5  ;;  %4063 = vmatprep.subr.bf16.mxu0 %v7314_v22  ;;  %v170_v3 = vld [vmem:[%s9882_s0 + $0x38] sm:$0xff]  ;;  %v7326_v12 = vld [vmem:[%s9879_s3 + $0x544] ss:$8 sps:$4 sm:$0xff]   ;;  %v126_v20 = vsel %vm7888_vm11, 0, %v125_v56 }
  0x50   :  { %1659 = vmatpush1.bf16.msra.mxu1 %v7315_v38  ;;  %v251_v38 = vmax.f32 %v235_v27, 0.0  ;;  %v351_v43 = vor.u32 %v349_v25, %v348_v32  ;;  %v352_v44 = vrot.slane %v348_v32, 4  ;;  %v238_v55 = vadd.f32 %v7884_v7, %v211_v45  ;;  %v7341_v14 = vld [vmem:[%s9879_s3 + $0x174] ss:$8 sps:$4 sm:$0xff]   ;;  %v432_v17 = vld [vmem:[#allocation2 + $0x68] sm:$0x11] }
  0x51   :  { %1660 = vmatprep.subr.bf16.mxu1 %v7323_v49  ;;  %v3036_v42 = vrot.slane %v3035_v31, 4  ;;  %v8115_v47 = vsel %vm8031_vm4, %v3022_v19, %v3026_v37  ;;  %v237_v49 = vadd.f32 %v7882_v6, %v210_v35  ;;  %127 = vst [vmem:[#allocation2 + $0x88] sm:$0x11] %v126_v20  ;;  %v185_v22 = vunpack.c.l.bf16 %v170_v3  ;;  %v66_v24 = vld [vmem:[#allocation2 + $0xa0] sm:$0x11] }
  0x52   :  { %v2961_v46 = vld [vmem:[#allocation2 + $0x48] sm:$0x11]  ;;  %v6885_v48 = vpack.c.bf16 %v252_v39, %v251_v38  ;;  %v424_v53 = vsel %vm7976_vm0, %v351_v43, %v423_v26  ;;  %v427_v54 = vsel %vm7850_vm8, %v352_v44, %v426_v33  ;;  %4064 = vmatpush1.bf16.msra.mxu0 %v7312_v36  ;;  %v254_v19 = vmax.f32 %v238_v55, 0.0  ;;  %v69_v25 = vld [vmem:[#allocation2 + $0xb0] sm:$0x11]  ;;  %v447_v43 = vld [vmem:[%s9882_s0 + $0x40] sm:$0xff] }
  0x53   :  { %v3038_v51 = vshll.u32 %v2961_v46, 16  ;;  %425 = vst [vmem:[#allocation2 + $0x50] sm:$0xff] %v424_v53  ;;  %v6388_v59 = vcombine.high %v8078_v61, %v424_v53  ;;  %428 = vst [vmem:[#allocation2 + $0x58] sm:$0x11] %v427_v54  ;;  %v3043_v2 = vshrl.u32 %v424_v53, 16  ;;  %v6387_v11 = vcombine.low %v8078_v61, %v424_v53  ;;  %4065 = vmatprep.subr.bf16.mxu0 %v7320_v52 }
  0x54   :  { %1661 = vmatpush1.bf16.msra.mxu1 %v7321_v8  ;;  %v354_v60 = vshrl.u32 %v6885_v48, 16  ;;  %v357_v62 = vshll.u32 %v6885_v48, 16  ;;  %v429_v8 = vld [vmem:[#allocation2 + $0x60] sm:$0xff]  ;;  %v253_v13 = vmax.f32 %v237_v49, 0.0  ;;  %v186_v23 = vunpack.c.h.bf16 %v170_v3  ;;  %v7339_v31 = vld [vmem:[%s9879_s3 + $0x170] ss:$8 sps:$4 sm:$0xff]  }
  0x55   :  { %1662 = vmatprep.subr.bf16.mxu1 %v7329_v9  ;;  %v3040_v5 = vrot.slane %v3038_v51, 5  ;;  %v3046_v9 = vshll.u32 %v424_v53, 16  ;;  %1044 = vmatprep.mubr.bf16.mxu1 %v6388_v59  ;;  %v3045_v18 = vrot.slane %v3043_v2, 4  ;;  %v7324_v30 = vld [vmem:[%s9879_s3 + $0x540] ss:$8 sps:$4 sm:$0xff]   ;;  %v212_v35 = vmul.f32 %v7873_v0, %v185_v22  ;;  %v435_v2 = vld [vmem:[#allocation2 + $0x70] sm:$0xff] }
  0x56   :  { %v356_v15 = vrot.slane %v354_v60, 7  ;;  %1045 = vmatmul.mubr.bf16.gmra.mrb[8].mxu1 %v6387_v11  ;;  %v7332_v33 = vld [vmem:[%s9879_s3 + $0x554] ss:$8 sps:$4 sm:$0xff]   ;;  %v6886_v34 = vpack.c.bf16 %v254_v19, %v253_v13  ;;  %v213_v37 = vmul.f32 %v7875_v1, %v186_v23  ;;  %v7347_v38 = vld [vmem:[%s9879_s3 + $0x184] ss:$8 sps:$4 sm:$0xff]   ;;  %4066 = vmatpush1.bf16.msra.mxu0 %v7318_v58  ;;  %v455_v60 = vunpack.c.l.bf16 %v447_v43 }
  0x57   :  { %v3041_v61 = vsel %vm8031_vm4, %v3036_v42, %v3040_v5  ;;  %v3048_v21 = vrot.slane %v3046_v9, 5  ;;  %v70_v42 = vsel %vm7850_vm8, 0, %v69_v25  ;;  %4067 = vmatprep.subr.bf16.mxu0 %v7326_v12  ;;  %v72_v48 = vld [vmem:[#allocation2 + $0xc0] sm:$0x11]  ;;  %v7330_v50 = vld [vmem:[%s9879_s3 + $0x550] ss:$8 sps:$4 sm:$0xff]   ;;  %v239_v52 = vadd.f32 %v7882_v6, %v212_v35 }
  0x58   :  { %1663 = vmatpush1.bf16.msra.mxu1 %v7327_v29  ;;  %v6594_v26 = vcombine.high %v8115_v47, %v3041_v61  ;;  %v6593_v27 = vcombine.low %v8115_v47, %v3041_v61  ;;  %v359_v28 = vor.u32 %v357_v62, %v356_v15  ;;  %v360_v29 = vrot.slane %v356_v15, 4  ;;  %71 = vst [vmem:[#allocation2 + $0xb0] sm:$0x11] %v70_v42  ;;  %v7345_v54 = vld [vmem:[%s9879_s3 + $0x180] ss:$8 sps:$4 sm:$0xff]  }
  0x59   :  { %1664 = vmatprep.subr.bf16.mxu1 %v7335_v41  ;;  %v3049_v32 = vor.u32 %v3048_v21, %v3045_v18  ;;  %v67_v41 = vsel %vm7850_vm8, 0, %v66_v24  ;;  %v362_v36 = vshrl.u32 %v6886_v34, 16  ;;  %v365_v51 = vshll.u32 %v6886_v34, 16  ;;  %v7353_v55 = vld [vmem:[%s9879_s3 + $0x194] ss:$8 sps:$4 sm:$0xff]  }
  0x5a   :  { %3508 = vmatprep.mubr.bf16.mxu0 %v6594_v26  ;;  %v8170_v39 = vsel %vm7976_vm0, %v359_v28, %v429_v8  ;;  %v433_v40 = vsel %vm7850_vm8, %v360_v29, %v432_v17  ;;  %v2963_v44 = vld [vmem:[#allocation2 + $0x58] sm:$0x11]  ;;  %68 = vst [vmem:[#allocation2 + $0xa0] sm:$0x11] %v67_v41  ;;  %v240_v53 = vadd.f32 %v7884_v7, %v213_v37  ;;  %v255_v3 = vmax.f32 %v239_v52, 0.0  ;;  %v441_v37 = vld [vmem:[#allocation2 + $0x80] sm:$0xff] }
  0x5b   :  { %3509 = vmatmul.mubr.bf16.gmra.mrb[4].mxu0 %v6593_v27  ;;  %431 = vst [vmem:[#allocation2 + $0x60] sm:$0xff] %v8170_v39  ;;  %434 = vst [vmem:[#allocation2 + $0x68] sm:$0x11] %v433_v40  ;;  %v3050_v45 = vrot.slane %v3049_v32, 4  ;;  %v3057_v46 = vshrl.u32 %v8170_v39, 16  ;;  %v3060_v47 = vshll.u32 %v8170_v39, 16  ;;  %v456_v8 = vunpack.c.h.bf16 %v447_v43 }
  0x5c   :  { %1665 = vmatpush1.bf16.msra.mxu1 %v7333_v4  ;;  %v3052_v49 = vshll.u32 %v2963_v44, 16  ;;  %v364_v59 = vrot.slane %v362_v36, 7  ;;  %4068 = vmatpush1.bf16.msra.mxu0 %v7324_v30  ;;  %v256_v4 = vmax.f32 %v240_v53, 0.0  ;;  %v438_v5 = vld [vmem:[#allocation2 + $0x78] sm:$0x11]  ;;  %v73_v20 = vsel %vm7850_vm8, 0, %v72_v48 }
  0x5d   :  { %1666 = vmatprep.subr.bf16.mxu1 %v7341_v14  ;;  %v3059_v56 = vrot.slane %v3057_v46, 4  ;;  %v3062_v58 = vrot.slane %v3060_v47, 5  ;;  %4069 = vmatprep.subr.bf16.mxu0 %v7332_v33  ;;  %v7338_v13 = vld [vmem:[%s9879_s3 + $0x564] ss:$8 sps:$4 sm:$0xff]   ;;  %v471_v14 = vmul.f32 %v455_v60, %v7873_v0  ;;  %v7336_v18 = vld [vmem:[%s9879_s3 + $0x560] ss:$8 sps:$4 sm:$0xff]   ;;  %v472_v19 = vmul.f32 %v456_v8, %v7875_v1 }
  0x5e   :  { %v3054_v62 = vrot.slane %v3052_v49, 5  ;;  %v367_v11 = vor.u32 %v365_v51, %v364_v59  ;;  %v368_v12 = vrot.slane %v364_v59, 4  ;;  %v6887_v17 = vpack.c.bf16 %v256_v4, %v255_v3  ;;  %v7351_v61 = vld [vmem:[%s9879_s3 + $0x190] ss:$8 sps:$4 sm:$0xff]   ;;  %v7344_v24 = vld [vmem:[%s9879_s3 + $0x574] ss:$8 sps:$4 sm:$0xff]  }
  0x5f   :  { %v3063_v9 = vor.u32 %v3062_v58, %v3059_v56  ;;  %v487_v25 = vadd.f32 %v471_v14, %v7882_v6  ;;  %74 = vst [vmem:[#allocation2 + $0xc0] sm:$0x11] %v73_v20  ;;  %v134_v26 = vld [vmem:[#allocation2 + $0xb8] sm:$0x11]  ;;  %v137_v27 = vld [vmem:[#allocation2 + $0xc8] sm:$0x11]  ;;  %v488_v41 = vadd.f32 %v472_v19, %v7884_v7 }
  0x60   :  { %1667 = vmatpush1.bf16.msra.mxu1 %v7339_v31  ;;  %v8201_v15 = vsel %vm8031_vm4, %v3050_v45, %v3054_v62  ;;  %v436_v22 = vsel %vm7976_vm0, %v367_v11, %v435_v2  ;;  %v439_v23 = vsel %vm7850_vm8, %v368_v12, %v438_v5  ;;  %4070 = vmatpush1.bf16.msra.mxu0 %v7330_v50  ;;  %v370_v30 = vshrl.u32 %v6887_v17, 16  ;;  %v448_v33 = vld [vmem:[%s9882_s0 + $0x48] sm:$0xff]  ;;  %v75_v34 = vld [vmem:[#allocation2 + $0xd0] sm:$0x11] }
  0x61   :  { %1668 = vmatprep.subr.bf16.mxu1 %v7347_v38  ;;  %v3064_v21 = vrot.slane %v3063_v9, 4  ;;  %437 = vst [vmem:[#allocation2 + $0x70] sm:$0xff] %v436_v22  ;;  %v6390_v29 = vcombine.high %v8170_v39, %v436_v22  ;;  %v373_v31 = vshll.u32 %v6887_v17, 16  ;;  %440 = vst [vmem:[#allocation2 + $0x78] sm:$0x11] %v439_v23  ;;  %v3071_v32 = vshrl.u32 %v436_v22, 16  ;;  %4071 = vmatprep.subr.bf16.mxu0 %v7338_v13 }
  0x62   :  { %v2965_v28 = vld [vmem:[#allocation2 + $0x68] sm:$0x11]  ;;  %v3074_v38 = vshll.u32 %v436_v22, 16  ;;  %v6389_v40 = vcombine.low %v8170_v39, %v436_v22  ;;  %v372_v43 = vrot.slane %v370_v30, 7  ;;  %v503_v45 = vmax.f32 %v487_v25, 0.0  ;;  %v449_v9 = vld [vmem:[%s9882_s0 + $0x50] sm:$0xff] }
  0x63   :  { %v3066_v35 = vshll.u32 %v2965_v28, 16  ;;  %v7357_v42 = vld [vmem:[%s9879_s3 + $0x1a0] ss:$8 sps:$4 sm:$0xff]   ;;  %1054 = vmatprep.mubr.bf16.mxu1 %v6390_v29  ;;  %v3073_v44 = vrot.slane %v3071_v32, 4  ;;  %v135_v46 = vsel %vm7888_vm11, 0, %v134_v26  ;;  %v504_v49 = vmax.f32 %v488_v41, 0.0 }
  0x64   :  { %1669 = vmatpush1.bf16.msra.mxu1 %v7345_v54  ;;  %v7359_v47 = vld [vmem:[%s9879_s3 + $0x1a4] ss:$8 sps:$4 sm:$0xff]   ;;  %v3076_v48 = vrot.slane %v3074_v38, 5  ;;  %136 = vst [vmem:[#allocation2 + $0xb8] sm:$0x11] %v135_v46  ;;  %v138_v50 = vsel %vm7888_vm11, 0, %v137_v27  ;;  %v375_v51 = vor.u32 %v373_v31, %v372_v43  ;;  %4072 = vmatpush1.bf16.msra.mxu0 %v7336_v18  ;;  %v457_v54 = vunpack.c.l.bf16 %v448_v33 }
  0x65   :  { %1670 = vmatprep.subr.bf16.mxu1 %v7353_v55  ;;  %v3068_v39 = vrot.slane %v3066_v35, 5  ;;  %v444_v36 = vld [vmem:[#allocation2 + $0x88] sm:$0x11]  ;;  %1055 = vmatmul.mubr.bf16.gmra.mrb[12].mxu1 %v6389_v40  ;;  %v376_v52 = vrot.slane %v372_v43, 4  ;;  %v7342_v53 = vld [vmem:[%s9879_s3 + $0x570] ss:$8 sps:$4 sm:$0xff]   ;;  %v458_v55 = vunpack.c.h.bf16 %v448_v33  ;;  %v6888_v59 = vpack.c.bf16 %v504_v49, %v503_v45 }
  0x66   :  { %139 = vst [vmem:[#allocation2 + $0xc8] sm:$0x11] %v138_v50  ;;  %v3077_v58 = vor.u32 %v3076_v48, %v3073_v44  ;;  %4073 = vmatprep.subr.bf16.mxu0 %v7344_v24  ;;  %v7350_v60 = vld [vmem:[%s9879_s3 + $0x584] ss:$8 sps:$4 sm:$0xff]   ;;  %v76_v62 = vsel %vm7850_vm8, 0, %v75_v34  ;;  %v442_v5 = vsel %vm7976_vm0, %v375_v51, %v441_v37  ;;  %v473_v20 = vmul.f32 %v457_v54, %v7873_v0  ;;  %v656_v28 = vld [vmem:[#allocation2 + $0xb0] sm:$0xff] }
  0x67   :  { %v3069_v56 = vsel %vm8031_vm4, %v3064_v21, %v3068_v39  ;;  %v7365_v2 = vld [vmem:[%s9879_s3 + $0x1b4] ss:$8 sps:$4 sm:$0xff]   ;;  %v445_v8 = vsel %vm7850_vm8, %v376_v52, %v444_v36  ;;  %77 = vst [vmem:[#allocation2 + $0xd0] sm:$0x11] %v76_v62  ;;  %v7363_v11 = vld [vmem:[%s9879_s3 + $0x1b0] ss:$8 sps:$4 sm:$0xff]   ;;  %v459_v26 = vunpack.c.l.bf16 %v449_v9  ;;  %v460_v32 = vunpack.c.h.bf16 %v449_v9 }
  0x68   :  { %1671 = vmatpush1.bf16.msra.mxu1 %v7351_v61  ;;  %v6596_v3 = vcombine.high %v8201_v15, %v3069_v56  ;;  %v6595_v4 = vcombine.low %v8201_v15, %v3069_v56  ;;  %443 = vst [vmem:[#allocation2 + $0x80] sm:$0xff] %v442_v5  ;;  %446 = vst [vmem:[#allocation2 + $0x88] sm:$0x11] %v445_v8  ;;  %v2967_v12 = vld [vmem:[#allocation2 + $0x78] sm:$0x11]  ;;  %v3078_v13 = vrot.slane %v3077_v58, 4  ;;  %4074 = vmatpush1.bf16.msra.mxu0 %v7342_v53 }
  0x69   :  { %1672 = vmatprep.subr.bf16.mxu1 %v7359_v47  ;;  %v3085_v14 = vshrl.u32 %v442_v5, 16  ;;  %v3088_v15 = vshll.u32 %v442_v5, 16  ;;  %v576_v17 = vshrl.u32 %v6888_v59, 16  ;;  %v3080_v18 = vshll.u32 %v2967_v12, 16  ;;  %v7348_v21 = vld [vmem:[%s9879_s3 + $0x580] ss:$8 sps:$4 sm:$0xff]   ;;  %4075 = vmatprep.subr.bf16.mxu0 %v7350_v60 }
  0x6a   :  { %3518 = vmatprep.mubr.bf16.mxu0 %v6596_v3  ;;  %v579_v19 = vshll.u32 %v6888_v59, 16  ;;  %v474_v61 = vmul.f32 %v458_v55, %v7875_v1  ;;  %v7356_v25 = vld [vmem:[%s9879_s3 + $0x594] ss:$8 sps:$4 sm:$0xff]   ;;  %v489_v29 = vadd.f32 %v473_v20, %v7882_v6  ;;  %v712_v37 = vld [vmem:[#allocation2 + $0xa0] sm:$0xff]  ;;  %v7354_v38 = vld [vmem:[%s9879_s3 + $0x590] ss:$8 sps:$4 sm:$0xff]   ;;  %v475_v40 = vmul.f32 %v459_v26, %v7873_v0 }
  0x6b   :  { %3519 = vmatmul.mubr.bf16.gmra.mrb[8].mxu0 %v6595_v4  ;;  %v3087_v22 = vrot.slane %v3085_v14, 4  ;;  %v3090_v23 = vrot.slane %v3088_v15, 5  ;;  %v578_v24 = vrot.slane %v576_v17, 7  ;;  %v3082_v27 = vrot.slane %v3080_v18, 5  ;;  %v659_v31 = vld [vmem:[#allocation2 + $0xb8] sm:$0x11] }
  0x6c   :  { %1673 = vmatpush1.bf16.msra.mxu1 %v7357_v42  ;;  %v490_v30 = vadd.f32 %v474_v61, %v7884_v7  ;;  %v505_v42 = vmax.f32 %v489_v29, 0.0  ;;  %4076 = vmatpush1.bf16.msra.mxu0 %v7348_v21  ;;  %v476_v44 = vmul.f32 %v460_v32, %v7875_v1  ;;  %v78_v45 = vld [vmem:[#allocation2 + $0xe0] sm:$0x11]  ;;  %v140_v46 = vld [vmem:[#allocation2 + $0xd8] sm:$0x11]  ;;  %v491_v48 = vadd.f32 %v475_v40, %v7882_v6 }
  0x6d   :  { %1674 = vmatprep.subr.bf16.mxu1 %v7365_v2  ;;  %v3091_v33 = vor.u32 %v3090_v23, %v3087_v22  ;;  %v581_v34 = vor.u32 %v579_v19, %v578_v24  ;;  %v582_v35 = vrot.slane %v578_v24, 4  ;;  %v8277_v41 = vsel %vm8031_vm4, %v3078_v13, %v3082_v27  ;;  %4077 = vmatprep.subr.bf16.mxu0 %v7356_v25  ;;  %v143_v49 = vld [vmem:[#allocation2 + $0xe8] sm:$0x11]  ;;  %v8288_v50 = vld [vmem:[%s9882_s0 + $0x58] sm:$0xff]  ;;  %v81_v13 = vld [vmem:[#allocation2 + $0xf0] sm:$0x11] }
  0x6e   :  { %v506_v43 = vmax.f32 %v490_v30, 0.0  ;;  %v7362_v51 = vld [vmem:[%s9879_s3 + $0x5a4] ss:$8 sps:$4 sm:$0xff]   ;;  %v7360_v59 = vld [vmem:[%s9879_s3 + $0x5a0] ss:$8 sps:$4 sm:$0xff]   ;;  %v492_v3 = vadd.f32 %v476_v44, %v7884_v7  ;;  %v507_v4 = vmax.f32 %v491_v48, 0.0  ;;  %v461_v22 = vunpack.c.l.bf16 %v8288_v50 }
  0x6f   :  { %v3092_v47 = vrot.slane %v3091_v33, 4  ;;  %v657_v39 = vsel %vm7976_vm0, %v581_v34, %v656_v28  ;;  %v660_v36 = vsel %vm7850_vm8, %v582_v35, %v659_v31  ;;  %v7371_v52 = vld [vmem:[%s9879_s3 + $0x1c4] ss:$8 sps:$4 sm:$0xff]   ;;  %v7369_v60 = vld [vmem:[%s9879_s3 + $0x1c0] ss:$8 sps:$4 sm:$0xff]   ;;  %v79_v17 = vsel %vm7850_vm8, 0, %v78_v45 }
  0x70   :  { %1675 = vmatpush1.bf16.msra.mxu1 %v7363_v11  ;;  %v2969_v53 = vld [vmem:[#allocation2 + $0x88] sm:$0x11]  ;;  %658 = vst [vmem:[#allocation2 + $0xb0] sm:$0xff] %v657_v39  ;;  %v6392_v54 = vcombine.high %v712_v37, %v657_v39  ;;  %v6889_v55 = vpack.c.bf16 %v506_v43, %v505_v42  ;;  %661 = vst [vmem:[#allocation2 + $0xb8] sm:$0x11] %v660_v36  ;;  %v3099_v56 = vshrl.u32 %v657_v39, 16  ;;  %4078 = vmatpush1.bf16.msra.mxu0 %v7354_v38 }
  0x71   :  { %v3102_v58 = vshll.u32 %v657_v39, 16  ;;  %v3094_v62 = vshll.u32 %v2969_v53, 16  ;;  %v6391_v2 = vcombine.low %v712_v37, %v657_v39  ;;  %v7368_v5 = vld [vmem:[%s9879_s3 + $0x5b4] ss:$8 sps:$4 sm:$0xff]   ;;  %1676 = vmatprep.subr.bf16.mxu1 %v7371_v52  ;;  %v508_v15 = vmax.f32 %v492_v3, 0.0  ;;  %4079 = vmatprep.subr.bf16.mxu0 %v7362_v51  ;;  %v662_v25 = vld [vmem:[#allocation2 + $0xc0] sm:$0xff] }
  0x72   :  { %1064 = vmatprep.mubr.bf16.mxu1 %v6392_v54  ;;  %v584_v8 = vshrl.u32 %v6889_v55, 16  ;;  %v587_v9 = vshll.u32 %v6889_v55, 16  ;;  %v3101_v11 = vrot.slane %v3099_v56, 4  ;;  %v141_v18 = vsel %vm7888_vm11, 0, %v140_v46  ;;  %v7377_v19 = vld [vmem:[%s9879_s3 + $0x1d4] ss:$8 sps:$4 sm:$0xff]  }
  0x73   :  { %v3104_v12 = vrot.slane %v3102_v58, 5  ;;  %v3096_v14 = vrot.slane %v3094_v62, 5  ;;  %1065 = vmatmul.mubr.bf16.gmra.mrb[16].mxu1 %v6391_v2  ;;  %80 = vst [vmem:[#allocation2 + $0xe0] sm:$0x11] %v79_v17  ;;  %142 = vst [vmem:[#allocation2 + $0xd8] sm:$0x11] %v141_v18  ;;  %v6890_v27 = vpack.c.bf16 %v508_v15, %v507_v4  ;;  %v462_v28 = vunpack.c.h.bf16 %v8288_v50 }
  0x74   :  { %v586_v20 = vrot.slane %v584_v8, 7  ;;  %v144_v21 = vsel %vm7888_vm11, 0, %v143_v49  ;;  %1677 = vmatpush1.bf16.msra.mxu1 %v7369_v60  ;;  %v7375_v23 = vld [vmem:[%s9879_s3 + $0x1d0] ss:$8 sps:$4 sm:$0xff]   ;;  %v665_v26 = vld [vmem:[#allocation2 + $0xc8] sm:$0x11]  ;;  %4080 = vmatpush1.bf16.msra.mxu0 %v7360_v59  ;;  %v477_v43 = vmul.f32 %v461_v22, %v7873_v0 }
  0x75   :  { %v3105_v61 = vor.u32 %v3104_v12, %v3101_v11  ;;  %v3097_v24 = vsel %vm8031_vm4, %v3092_v47, %v3096_v14  ;;  %145 = vst [vmem:[#allocation2 + $0xe8] sm:$0x11] %v144_v21  ;;  %v82_v29 = vsel %vm7850_vm8, 0, %v81_v13  ;;  %1678 = vmatprep.subr.bf16.mxu1 %v7377_v19  ;;  %v7366_v34 = vld [vmem:[%s9879_s3 + $0x5b0] ss:$8 sps:$4 sm:$0xff]   ;;  %v451_v35 = vld [vmem:[%s9882_s0 + $0x60] sm:$0xff]  ;;  %4081 = vmatprep.subr.bf16.mxu0 %v7368_v5 }
  0x76   :  { %v6598_v30 = vcombine.high %v8277_v41, %v3097_v24  ;;  %v6597_v31 = vcombine.low %v8277_v41, %v3097_v24  ;;  %v589_v32 = vor.u32 %v587_v9, %v586_v20  ;;  %v590_v33 = vrot.slane %v586_v20, 4  ;;  %83 = vst [vmem:[#allocation2 + $0xf0] sm:$0x11] %v82_v29  ;;  %v7374_v37 = vld [vmem:[%s9879_s3 + $0x5c4] ss:$8 sps:$4 sm:$0xff]   ;;  %v668_v47 = vld [vmem:[#allocation2 + $0xd0] sm:$0xff] }
  0x77   :  { %v2971_v38 = vld [vmem:[#allocation2 + $0xb8] sm:$0x11]  ;;  %v3106_v40 = vrot.slane %v3105_v61, 4  ;;  %v592_v42 = vshrl.u32 %v6890_v27, 16  ;;  %v595_v41 = vshll.u32 %v6890_v27, 16  ;;  %v478_v39 = vmul.f32 %v462_v28, %v7875_v1 }
  0x78   :  { %3528 = vmatprep.mubr.bf16.mxu0 %v6598_v30  ;;  %v8338_v44 = vsel %vm7976_vm0, %v589_v32, %v662_v25  ;;  %v666_v45 = vsel %vm7850_vm8, %v590_v33, %v665_v26  ;;  %v3108_v46 = vshll.u32 %v2971_v38, 16  ;;  %1679 = vmatpush1.bf16.msra.mxu1 %v7375_v23  ;;  %v7381_v36 = vld [vmem:[%s9879_s3 + $0x1e0] ss:$8 sps:$4 sm:$0xff]   ;;  %v493_v51 = vadd.f32 %v477_v43, %v7882_v6  ;;  %v7383_v52 = vld [vmem:[%s9879_s3 + $0x1e4] ss:$8 sps:$4 sm:$0xff]  }
  0x79   :  { %3529 = vmatmul.mubr.bf16.gmra.mrb[12].mxu0 %v6597_v31  ;;  %664 = vst [vmem:[#allocation2 + $0xc0] sm:$0xff] %v8338_v44  ;;  %667 = vst [vmem:[#allocation2 + $0xc8] sm:$0x11] %v666_v45  ;;  %v3113_v48 = vshrl.u32 %v8338_v44, 16  ;;  %v3116_v49 = vshll.u32 %v8338_v44, 16  ;;  %v594_v50 = vrot.slane %v592_v42, 7  ;;  %v494_v54 = vadd.f32 %v478_v39, %v7884_v7  ;;  %1680 = vmatprep.subr.bf16.mxu1 %v7383_v52 }
  0x7a   :  { %v3110_v53 = vrot.slane %v3108_v46, 5  ;;  %4082 = vmatpush1.bf16.msra.mxu0 %v7366_v34  ;;  %v463_v55 = vunpack.c.l.bf16 %v451_v35  ;;  %v464_v56 = vunpack.c.h.bf16 %v451_v35  ;;  %v7372_v58 = vld [vmem:[%s9879_s3 + $0x5c0] ss:$8 sps:$4 sm:$0xff]   ;;  %v7380_v59 = vld [vmem:[%s9879_s3 + $0x5d4] ss:$8 sps:$4 sm:$0xff]   ;;  %v509_v8 = vmax.f32 %v493_v51, 0.0 }
  0x7b   :  { %v3115_v60 = vrot.slane %v3113_v48, 4  ;;  %v3118_v62 = vrot.slane %v3116_v49, 5  ;;  %v597_v2 = vor.u32 %v595_v41, %v594_v50  ;;  %v598_v3 = vrot.slane %v594_v50, 4  ;;  %v671_v4 = vld [vmem:[#allocation2 + $0xd8] sm:$0x11]  ;;  %4083 = vmatprep.subr.bf16.mxu0 %v7374_v37  ;;  %v8386_v30 = vld [vmem:[%s9882_s0 + $0x68] sm:$0xff] }
  0x7c   :  { %v8362_v5 = vsel %vm8031_vm4, %v3106_v40, %v3110_v53  ;;  %v510_v9 = vmax.f32 %v494_v54, 0.0  ;;  %v479_v11 = vmul.f32 %v463_v55, %v7873_v0  ;;  %v84_v12 = vld [vmem:[#allocation2 + $0x100] sm:$0x11]  ;;  %1681 = vmatpush1.bf16.msra.mxu1 %v7381_v36  ;;  %v480_v17 = vmul.f32 %v464_v56, %v7875_v1  ;;  %v146_v18 = vld [vmem:[#allocation2 + $0xf8] sm:$0x11] }
  0x7d   :  { %v3119_v13 = vor.u32 %v3118_v62, %v3115_v60  ;;  %v669_v14 = vsel %vm7976_vm0, %v597_v2, %v668_v47  ;;  %v672_v15 = vsel %vm7850_vm8, %v598_v3, %v671_v4  ;;  %v149_v19 = vld [vmem:[#allocation2 + $0x108] sm:$0x11]  ;;  %v7387_v20 = vld [vmem:[%s9879_s3 + $0x1f0] ss:$8 sps:$4 sm:$0xff]   ;;  %v7389_v61 = vld [vmem:[%s9879_s3 + $0x1f4] ss:$8 sps:$4 sm:$0xff]   ;;  %v465_v51 = vunpack.c.l.bf16 %v8386_v30 }
  0x7e   :  { %670 = vst [vmem:[#allocation2 + $0xd0] sm:$0xff] %v669_v14  ;;  %v6394_v21 = vcombine.high %v8338_v44, %v669_v14  ;;  %v6891_v22 = vpack.c.bf16 %v510_v9, %v509_v8  ;;  %673 = vst [vmem:[#allocation2 + $0xd8] sm:$0x11] %v672_v15  ;;  %v3127_v23 = vshrl.u32 %v669_v14, 16  ;;  %v3130_v24 = vshll.u32 %v669_v14, 16  ;;  %4084 = vmatpush1.bf16.msra.mxu0 %v7372_v58  ;;  %v674_v46 = vld [vmem:[#allocation2 + $0xe0] sm:$0xff] }
  0x7f   :  { %v7378_v25 = vld [vmem:[%s9879_s3 + $0x5d0] ss:$8 sps:$4 sm:$0xff]   ;;  %v3120_v26 = vrot.slane %v3119_v13, 4  ;;  %v6393_v27 = vcombine.low %v8338_v44, %v669_v14  ;;  %v495_v28 = vadd.f32 %v479_v11, %v7882_v6  ;;  %v496_v29 = vadd.f32 %v480_v17, %v7884_v7  ;;  %4085 = vmatprep.subr.bf16.mxu0 %v7380_v59  ;;  %v7386_v32 = vld [vmem:[%s9879_s3 + $0x5e4] ss:$8 sps:$4 sm:$0xff]   ;;  %1682 = vmatprep.subr.bf16.mxu1 %v7389_v61 }
  0x80   :  { %v87_v31 = vld [vmem:[#allocation2 + $0x110] sm:$0x11]  ;;  %v2973_v33 = vld [vmem:[#allocation2 + $0xc8] sm:$0x11]  ;;  %1074 = vmatprep.mubr.bf16.mxu1 %v6394_v21  ;;  %v600_v34 = vshrl.u32 %v6891_v22, 16  ;;  %v603_v35 = vshll.u32 %v6891_v22, 16  ;;  %1683 = vmatpush1.bf16.msra.mxu1 %v7387_v20  ;;  %v466_v52 = vunpack.c.h.bf16 %v8386_v30  ;;  %v481_v3 = vmul.f32 %v465_v51, %v7873_v0 }
  0x81   :  { %v3129_v37 = vrot.slane %v3127_v23, 4  ;;  %v3132_v38 = vrot.slane %v3130_v24, 5  ;;  %v7384_v40 = vld [vmem:[%s9879_s3 + $0x5e0] ss:$8 sps:$4 sm:$0xff]   ;;  %v3122_v42 = vshll.u32 %v2973_v33, 16  ;;  %1075 = vmatmul.mubr.bf16.gmra.mrb[20].mxu1 %v6393_v27  ;;  %v511_v41 = vmax.f32 %v495_v28, 0.0 }
  0x82   :  { %v512_v43 = vmax.f32 %v496_v29, 0.0  ;;  %v85_v44 = vsel %vm7850_vm8, 0, %v84_v12  ;;  %v602_v45 = vrot.slane %v600_v34, 7  ;;  %v147_v39 = vsel %vm7888_vm11, 0, %v146_v18  ;;  %4086 = vmatpush1.bf16.msra.mxu0 %v7378_v25  ;;  %v677_v49 = vld [vmem:[#allocation2 + $0xe8] sm:$0x11] }
  0x83   :  { %v3133_v47 = vor.u32 %v3132_v38, %v3129_v37  ;;  %86 = vst [vmem:[#allocation2 + $0x100] sm:$0x11] %v85_v44  ;;  %v150_v36 = vsel %vm7888_vm11, 0, %v149_v19  ;;  %v3124_v48 = vrot.slane %v3122_v42, 5  ;;  %148 = vst [vmem:[#allocation2 + $0xf8] sm:$0x11] %v147_v39  ;;  %4087 = vmatprep.subr.bf16.mxu0 %v7386_v32  ;;  %v482_v61 = vmul.f32 %v466_v52, %v7875_v1 }
  0x84   :  { %v6892_v50 = vpack.c.bf16 %v512_v43, %v511_v41  ;;  %151 = vst [vmem:[#allocation2 + $0x108] sm:$0x11] %v150_v36  ;;  %v7392_v53 = vld [vmem:[%s9879_s3 + $0x5f4] ss:$8 sps:$4 sm:$0xff]   ;;  %v605_v54 = vor.u32 %v603_v35, %v602_v45  ;;  %v606_v55 = vrot.slane %v602_v45, 4  ;;  %v88_v58 = vsel %vm7850_vm8, 0, %v87_v31 }
  0x85   :  { %v3134_v56 = vrot.slane %v3133_v47, 4  ;;  %v3125_v59 = vsel %vm8031_vm4, %v3120_v26, %v3124_v48  ;;  %v2975_v60 = vld [vmem:[#allocation2 + $0xd8] sm:$0x11]  ;;  %89 = vst [vmem:[#allocation2 + $0x110] sm:$0x11] %v88_v58  ;;  %v453_v4 = vld [vmem:[%s9882_s0 + $0x70] sm:$0xff]  ;;  %v497_v21 = vadd.f32 %v481_v3, %v7882_v6  ;;  %v498_v29 = vadd.f32 %v482_v61, %v7884_v7 }
  0x86   :  { %v608_v62 = vshrl.u32 %v6892_v50, 16  ;;  %v611_v2 = vshll.u32 %v6892_v50, 16  ;;  %v6600_v8 = vcombine.high %v8362_v5, %v3125_v59  ;;  %v6599_v9 = vcombine.low %v8362_v5, %v3125_v59  ;;  %4088 = vmatpush1.bf16.msra.mxu0 %v7384_v40  ;;  %v7390_v13 = vld [vmem:[%s9879_s3 + $0x5f0] ss:$8 sps:$4 sm:$0xff]   ;;  %v7395_v14 = vld [vmem:[%s9879_s3 + $0x204] ss:$8 sps:$4 sm:$0xff]  }
  0x87   :  { %v675_v11 = vsel %vm7976_vm0, %v605_v54, %v674_v46  ;;  %v678_v12 = vsel %vm7850_vm8, %v606_v55, %v677_v49  ;;  %v3136_v15 = vshll.u32 %v2975_v60, 16  ;;  %4089 = vmatprep.subr.bf16.mxu0 %v7392_v53  ;;  %v7398_v19 = vld [vmem:[%s9879_s3 + $0x604] ss:$8 sps:$4 sm:$0xff]   ;;  %v680_v20 = vld [vmem:[#allocation2 + $0xf0] sm:$0xff]  ;;  %v467_v22 = vunpack.c.l.bf16 %v453_v4  ;;  %2248 = vmatprep.subr.bf16.mxu1 %v7395_v14  ;;  %v152_v44 = vld [vmem:[#allocation2 + $0x118] sm:$0x11] }
  0x88   :  { %676 = vst [vmem:[#allocation2 + $0xe0] sm:$0xff] %v675_v11  ;;  %679 = vst [vmem:[#allocation2 + $0xe8] sm:$0x11] %v678_v12  ;;  %v3141_v17 = vshrl.u32 %v675_v11, 16  ;;  %v3144_v5 = vshll.u32 %v675_v11, 16  ;;  %v610_v18 = vrot.slane %v608_v62, 7  ;;  %3538 = vmatprep.mubr.bf16.mxu0 %v6600_v8  ;;  %v468_v23 = vunpack.c.h.bf16 %v453_v4 }
  0x89   :  { %3539 = vmatmul.mubr.bf16.gmra.mrb[16].mxu0 %v6599_v9  ;;  %v3138_v24 = vrot.slane %v3136_v15, 5  ;;  %v513_v30 = vmax.f32 %v497_v21, 0.0  ;;  %v483_v32 = vmul.f32 %v467_v22, %v7873_v0  ;;  %v90_v38 = vld [vmem:[#allocation2 + $0x120] sm:$0x11]  ;;  %v514_v42 = vmax.f32 %v498_v29, 0.0  ;;  %v454_v48 = vld [vmem:[%s9882_s0 + $0x78] sm:$0xff] }
  0x8a   :  { %v3143_v25 = vrot.slane %v3141_v17, 4  ;;  %v3146_v26 = vrot.slane %v3144_v5, 5  ;;  %v613_v27 = vor.u32 %v611_v2, %v610_v18  ;;  %v614_v28 = vrot.slane %v610_v18, 4  ;;  %v683_v31 = vld [vmem:[#allocation2 + $0xf8] sm:$0x11]  ;;  %4090 = vmatpush1.bf16.msra.mxu0 %v7390_v13  ;;  %v1137_v60 = vld [vmem:[#allocation2] sm:$0xff] }
  0x8b   :  { %v8434_v33 = vsel %vm8031_vm4, %v3134_v56, %v3138_v24  ;;  %v484_v37 = vmul.f32 %v468_v23, %v7875_v1  ;;  %4557 = vmatprep.subr.bf16.mxu0 %v7398_v19  ;;  %v499_v39 = vadd.f32 %v483_v32, %v7882_v6  ;;  %v155_v36 = vld [vmem:[#allocation2 + $0x128] sm:$0x11]  ;;  %v6893_v50 = vpack.c.bf16 %v514_v42, %v513_v30  ;;  %v686_v18 = vld [vmem:[#allocation2 + $0x100] sm:$0xff] }
  0x8c   :  { %v3147_v34 = vor.u32 %v3146_v26, %v3143_v25  ;;  %v681_v35 = vsel %vm7976_vm0, %v613_v27, %v680_v20  ;;  %v684_v41 = vsel %vm7850_vm8, %v614_v28, %v683_v31  ;;  %v91_v53 = vsel %vm7850_vm8, 0, %v90_v38  ;;  %v101_v54 = vld [vmem:[#allocation2 + $0x8] sm:$0x11]  ;;  %v1139_v31 = vld [vmem:[#allocation2 + $0x10] sm:$0xff] }
  0x8d   :  { %682 = vst [vmem:[#allocation2 + $0xf0] sm:$0xff] %v681_v35  ;;  %v6396_v40 = vcombine.high %v675_v11, %v681_v35  ;;  %v3155_v43 = vshrl.u32 %v681_v35, 16  ;;  %685 = vst [vmem:[#allocation2 + $0xf8] sm:$0x11] %v684_v41  ;;  %v3158_v46 = vshll.u32 %v681_v35, 16  ;;  %v6395_v47 = vcombine.low %v675_v11, %v681_v35 }
  0x8e   :  { %v3148_v45 = vrot.slane %v3147_v34, 4  ;;  %v500_v52 = vadd.f32 %v484_v37, %v7884_v7  ;;  %v515_v58 = vmax.f32 %v499_v39, 0.0  ;;  %92 = vst [vmem:[#allocation2 + $0x120] sm:$0x11] %v91_v53  ;;  %v153_v59 = vsel %vm7888_vm11, 0, %v152_v44 }
  0x8f   :  { %v2977_v49 = vld [vmem:[#allocation2 + $0xe8] sm:$0x11]  ;;  %1084 = vmatprep.mubr.bf16.mxu1 %v6396_v40  ;;  %v3157_v51 = vrot.slane %v3155_v43, 4  ;;  %v3160_v56 = vrot.slane %v3158_v46, 5  ;;  %v616_v62 = vshrl.u32 %v6893_v50, 16  ;;  %v619_v2 = vshll.u32 %v6893_v50, 16 }
  0x90   :  { %v3150_v55 = vshll.u32 %v2977_v49, 16  ;;  %1085 = vmatmul.mubr.bf16.gmra.mrb[24].mxu1 %v6395_v47  ;;  %v516_v3 = vmax.f32 %v500_v52, 0.0  ;;  %154 = vst [vmem:[#allocation2 + $0x118] sm:$0x11] %v153_v59  ;;  %v156_v4 = vsel %vm7888_vm11, 0, %v155_v36  ;;  %v469_v11 = vunpack.c.l.bf16 %v454_v48  ;;  %v692_v40 = vld [vmem:[#allocation2 + $0x110] sm:$0xff] }
  0x91   :  { %v3161_v9 = vor.u32 %v3160_v56, %v3157_v51  ;;  %157 = vst [vmem:[#allocation2 + $0x128] sm:$0x11] %v156_v4  ;;  %v470_v12 = vunpack.c.h.bf16 %v454_v48  ;;  %v618_v13 = vrot.slane %v616_v62, 7  ;;  %v102_v15 = vsel %vm7888_vm11, 0, %v101_v54  ;;  %v689_v19 = vld [vmem:[#allocation2 + $0x108] sm:$0x11] }
  0x92   :  { %v3152_v8 = vrot.slane %v3150_v55, 5  ;;  %v6894_v14 = vpack.c.bf16 %v516_v3, %v515_v58  ;;  %v1173_v17 = vshrl.u32 %v1137_v60, 16  ;;  %v485_v61 = vmul.f32 %v469_v11, %v7873_v0  ;;  %103 = vst [vmem:[#allocation2 + $0x8] sm:$0x11] %v102_v15 }
  0x93   :  { %v3162_v20 = vrot.slane %v3161_v9, 4  ;;  %v486_v21 = vmul.f32 %v470_v12, %v7875_v1  ;;  %v621_v24 = vor.u32 %v619_v2, %v618_v13  ;;  %v622_v25 = vrot.slane %v618_v13, 4 }
  0x94   :  { %v3153_v5 = vsel %vm8031_vm4, %v3148_v45, %v3152_v8  ;;  %v2979_v26 = vld [vmem:[#allocation2 + $0xf8] sm:$0x11]  ;;  %v624_v28 = vshrl.u32 %v6894_v14, 16  ;;  %v627_v29 = vshll.u32 %v6894_v14, 16  ;;  %v501_v30 = vadd.f32 %v485_v61, %v7882_v6 }
  0x95   :  { %v6602_v22 = vcombine.high %v8434_v33, %v3153_v5  ;;  %v6601_v23 = vcombine.low %v8434_v33, %v3153_v5  ;;  %v3164_v27 = vshll.u32 %v2979_v26, 16  ;;  %v687_v0 = vsel %vm7976_vm0, %v621_v24, %v686_v18  ;;  %v698_v2 = vld [vmem:[#allocation2 + $0x120] sm:$0xff]  ;;  %v3675_v26 = vld [vmem:[#allocation2 + $0x10] sm:$0xee] }
  0x96   :  { %v690_v1 = vsel %vm7850_vm8, %v622_v25, %v689_v19  ;;  %v502_v32 = vadd.f32 %v486_v21, %v7884_v7  ;;  %v1175_v34 = vrot.slane %v1173_v17, 4  ;;  %688 = vst [vmem:[#allocation2 + $0x100] sm:$0xff] %v687_v0  ;;  %v3169_v35 = vshrl.u32 %v687_v0, 16 }
  0x97   :  { %3548 = vmatprep.mubr.bf16.mxu0 %v6602_v22  ;;  %691 = vst [vmem:[#allocation2 + $0x108] sm:$0x11] %v690_v1  ;;  %v3166_v33 = vrot.slane %v3164_v27, 5  ;;  %v3172_v37 = vshll.u32 %v687_v0, 16  ;;  %v626_v38 = vrot.slane %v624_v28, 7  ;;  %v517_v6 = vmax.f32 %v501_v30, 0.0 }
  0x98   :  { %3549 = vmatmul.mubr.bf16.gmra.mrb[20].mxu0 %v6601_v23  ;;  %v518_v42 = vmax.f32 %v502_v32, 0.0  ;;  %v1176_v41 = vshll.u32 %v1137_v60, 16  ;;  %v1187_v43 = vshrl.u32 %v1139_v31, 16  ;;  %v3171_v45 = vrot.slane %v3169_v35, 4  ;;  %v695_v47 = vld [vmem:[#allocation2 + $0x118] sm:$0x11] }
  0x99   :  { %v8468_v44 = vsel %vm8031_vm4, %v3162_v20, %v3166_v33  ;;  %v3174_v46 = vrot.slane %v3172_v37, 5  ;;  %v629_v7 = vor.u32 %v627_v29, %v626_v38  ;;  %v630_v39 = vrot.slane %v626_v38, 4  ;;  %v1138_v48 = vld [vmem:[#allocation2 + $0x8] sm:$0x11]  ;;  %v1140_v60 = vld [vmem:[#allocation2 + $0x18] sm:$0x11] }
  0x9a   :  { %v6895_v36 = vpack.c.bf16 %v518_v42, %v517_v6  ;;  %v1178_v49 = vrot.slane %v1176_v41, 5  ;;  %v1189_v50 = vrot.slane %v1187_v43, 4  ;;  %v1182_v53 = vshll.u32 %v1138_v48, 16  ;;  %v701_v17 = vld [vmem:[#allocation2 + $0x128] sm:$0x11]  ;;  %v8489_v42 = vld [vmem:[#allocation2 + $0x20] sm:$0xff] }
  0x9b   :  { %v3175_v51 = vor.u32 %v3174_v46, %v3171_v45  ;;  %v693_v52 = vsel %vm7976_vm0, %v629_v7, %v692_v40  ;;  %v1190_v54 = vshll.u32 %v1139_v31, 16  ;;  %v696_v59 = vsel %vm7850_vm8, %v630_v39, %v695_v47  ;;  %v3676_v27 = vld [vmem:[#allocation2 + $0x18] sm:$0x11]  ;;  %v3678_v1 = vld [vmem:[#allocation2 + $0x28] sm:$0x11]  ;;  %v8494_v47 = vld [vmem:[#allocation2 + $0x30] sm:$0xff] }
  0x9c   :  { %694 = vst [vmem:[#allocation2 + $0x110] sm:$0xff] %v693_v52  ;;  %v6398_v55 = vcombine.high %v687_v0, %v693_v52  ;;  %v632_v56 = vshrl.u32 %v6895_v36, 16  ;;  %v635_v58 = vshll.u32 %v6895_v36, 16  ;;  %697 = vst [vmem:[#allocation2 + $0x118] sm:$0x11] %v696_v59  ;;  %v3183_v3 = vshrl.u32 %v693_v52, 16 }
  0x9d   :  { %v3176_v62 = vrot.slane %v3175_v51, 4  ;;  %v3186_v4 = vshll.u32 %v693_v52, 16  ;;  %v6397_v8 = vcombine.low %v687_v0, %v693_v52  ;;  %v1179_v12 = vor.u32 %v1178_v49, %v1175_v34  ;;  %v3677_v0 = vld [vmem:[#allocation2 + $0x20] sm:$0xee]  ;;  %v7401_v7 = vld [vmem:[%s9879_s3 + $0x214] ss:$8 sps:$4 sm:$0xff]  }
  0x9e   :  { %v2981_v9 = vld [vmem:[#allocation2 + $0x108] sm:$0x11]  ;;  %1094 = vmatprep.mubr.bf16.mxu1 %v6398_v55  ;;  %v634_v11 = vrot.slane %v632_v56, 7  ;;  %v1184_v13 = vrot.slane %v1182_v53, 5  ;;  %v1192_v14 = vrot.slane %v1190_v54, 5  ;;  %v3185_v5 = vrot.slane %v3183_v3, 4 }
  0x9f   :  { %v3178_v15 = vshll.u32 %v2981_v9, 16  ;;  %v3188_v18 = vrot.slane %v3186_v4, 5  ;;  %1095 = vmatmul.mubr.bf16.gmra.mrb[28].mxu1 %v6397_v8  ;;  %v1196_v19 = vshll.u32 %v1140_v60, 16  ;;  %v1180_v21 = vrot.slane %v1179_v12, 4  ;;  %v7393_v6 = vld [vmem:[%s9879_s3 + $0x200] ss:$8 sps:$4 sm:$0xff]  }
  0xa0   :  { %v637_v20 = vor.u32 %v635_v58, %v634_v11  ;;  %v638_v61 = vrot.slane %v634_v11, 4  ;;  %v1193_v22 = vor.u32 %v1192_v14, %v1189_v50  ;;  %v6639_v48 = vrot.slane %v3675_v26, 9  ;;  %v1144_v51 = vld [vmem:[#allocation2 + $0x38] sm:$0x11]  ;;  %v3679_v56 = vld [vmem:[#allocation2 + $0x30] sm:$0xee] }
  0xa1   :  { %v3180_v23 = vrot.slane %v3178_v15, 5  ;;  %v3189_v24 = vor.u32 %v3188_v18, %v3185_v5  ;;  %v1198_v25 = vrot.slane %v1196_v19, 5  ;;  %v1185_v30 = vsel %vm8031_vm4, %v1180_v21, %v1184_v13  ;;  %v7399_v58 = vld [vmem:[%s9879_s3 + $0x210] ss:$8 sps:$4 sm:$0xff]   ;;  %v3681_v8 = vld [vmem:[#allocation2 + $0x40] sm:$0xee] }
  0xa2   :  { %v699_v28 = vsel %vm7976_vm0, %v637_v20, %v698_v2  ;;  %v702_v29 = vsel %vm7850_vm8, %v638_v61, %v701_v17  ;;  %v1194_v31 = vrot.slane %v1193_v22, 4  ;;  %v3741_v49 = vrot.slane %v3676_v27, 5  ;;  %v3682_v9 = vld [vmem:[#allocation2 + $0x48] sm:$0x11]  ;;  %v8521_v61 = vld [vmem:[#allocation2 + $0x40] sm:$0xff] }
  0xa3   :  { %v3181_v32 = vsel %vm8031_vm4, %v3176_v62, %v3180_v23  ;;  %700 = vst [vmem:[#allocation2 + $0x120] sm:$0xff] %v699_v28  ;;  %703 = vst [vmem:[#allocation2 + $0x128] sm:$0x11] %v702_v29  ;;  %v3190_v34 = vrot.slane %v3189_v24, 4  ;;  %v3197_v33 = vshrl.u32 %v699_v28, 16  ;;  %v3200_v35 = vshll.u32 %v699_v28, 16 }
  0xa4   :  { %v6604_v63 = vcombine.high %v8468_v44, %v3181_v32  ;;  %v6603_v37 = vcombine.low %v8468_v44, %v3181_v32  ;;  %v2983_v38 = vld [vmem:[#allocation2 + $0x118] sm:$0x11]  ;;  %v1199_v40 = vsel %vm8031_vm4, %v1194_v31, %v1198_v25  ;;  %v1142_v44 = vld [vmem:[#allocation2 + $0x28] sm:$0x11]  ;;  %v6640_v50 = vrot.slane %v3677_v0, 9 }
  0xa5   :  { %v3192_v41 = vshll.u32 %v2983_v38, 16  ;;  %v3199_v43 = vrot.slane %v3197_v33, 4  ;;  %v3202_v45 = vrot.slane %v3200_v35, 5  ;;  %v6431_v46 = vcombine.low %v1185_v30, %v1199_v40  ;;  %v3680_v62 = vld [vmem:[#allocation2 + $0x38] sm:$0x11] }
  0xa6   :  { %3558 = vmatprep.mubr.bf16.mxu0 %v6604_v63  ;;  %v6432_v39 = vcombine.high %v1185_v30, %v1199_v40  ;;  %v3745_v54 = vrot.slane %v3678_v1, 5  ;;  %v1201_v55 = vshrl.u32 %v8489_v42, 16  ;;  %v1204_v59 = vshll.u32 %v8489_v42, 16  ;;  %v7407_v17 = vld [vmem:[%s9879_s3 + $0x224] ss:$8 sps:$4 sm:$0xff]  }
  0xa7   :  { %3559 = vmatmul.mubr.bf16.gmra.mrb[24].mxu0 %v6603_v37  ;;  %v3194_v52 = vrot.slane %v3192_v41, 5  ;;  %v3203_v53 = vor.u32 %v3202_v45, %v3199_v43  ;;  %v1215_v60 = vshrl.u32 %v8494_v47, 16  ;;  %v8509_v2 = vsel %vm8497_vm7, %v6639_v48, %v3741_v49  ;;  %v1146_v25 = vld [vmem:[#allocation2 + $0x48] sm:$0x11]  ;;  %v7413_v1 = vld [vmem:[%s9879_s3 + $0x234] ss:$8 sps:$4 sm:$0xff]  }
  0xa8   :  { %1684 = vmatprep.mubr.bf16.mxu1 %v6432_v39  ;;  %v1203_v3 = vrot.slane %v1201_v55, 4  ;;  %v1210_v4 = vshll.u32 %v1142_v44, 16  ;;  %v8515_v14 = vsel %vm8497_vm7, %v6640_v50, %v3745_v54  ;;  %v1206_v15 = vrot.slane %v1204_v59, 5  ;;  %v7405_v30 = vld [vmem:[%s9879_s3 + $0x220] ss:$8 sps:$4 sm:$0xff]   ;;  %v8535_v37 = vld [vmem:[#allocation2 + $0x50] sm:$0xff] }
  0xa9   :  { %1685 = vmatmul.mubr.bf16.vlgmr.msra.gmra.mrb[0].mxu1 %v6431_v46  ;;  %v3195_v12 = vsel %vm8031_vm4, %v3190_v34, %v3194_v52  ;;  %v3204_v13 = vrot.slane %v3203_v53, 4  ;;  %v1217_v18 = vrot.slane %v1215_v60, 4  ;;  %v1218_v19 = vshll.u32 %v8494_v47, 16  ;;  %v1148_v38 = vld [vmem:[#allocation2 + $0x58] sm:$0x11] }
  0xaa   :  { %v2985_v11 = vld [vmem:[#allocation2 + $0x128] sm:$0x11]  ;;  %2249 = vmatpush1.bf16.msra.mxu1 %v7393_v6  ;;  %v1224_v20 = vshll.u32 %v1144_v51, 16  ;;  %v1207_v21 = vor.u32 %v1206_v15, %v1203_v3  ;;  %v6641_v22 = vrot.slane %v3679_v56, 9  ;;  %v3749_v23 = vrot.slane %v3680_v62, 5 }
  0xab   :  { %v3206_v5 = vshll.u32 %v2985_v11, 16  ;;  %2250 = vmatprep.subr.bf16.mxu1 %v7401_v7  ;;  %v6642_v24 = vrot.slane %v3681_v8, 9  ;;  %v1212_v27 = vrot.slane %v1210_v4, 5  ;;  %v1220_v28 = vrot.slane %v1218_v19, 5  ;;  %v7411_v46 = vld [vmem:[%s9879_s3 + $0x230] ss:$8 sps:$4 sm:$0xff]  }
  0xac   :  { %v3753_v29 = vrot.slane %v3682_v9, 5  ;;  %v6656_v31 = vcombine.high %v8509_v2, %v8515_v14  ;;  %v1208_v0 = vrot.slane %v1207_v21, 4  ;;  %v1229_v32 = vshrl.u32 %v8521_v61, 16  ;;  %v3683_v7 = vld [vmem:[#allocation2 + $0x50] sm:$0xee]  ;;  %v8563_v4 = vld [vmem:[#allocation2 + $0x60] sm:$0xff] }
  0xad   :  { %v3208_v26 = vrot.slane %v3206_v5, 5  ;;  %v1232_v34 = vshll.u32 %v8521_v61, 16  ;;  %v1221_v35 = vor.u32 %v1220_v28, %v1217_v18  ;;  %v1226_v63 = vrot.slane %v1224_v20, 5  ;;  %v3684_v44 = vld [vmem:[#allocation2 + $0x58] sm:$0x11] }
  0xae   :  { %2251 = vmatpush1.bf16.msra.mxu1 %v7399_v58  ;;  %v1238_v40 = vshll.u32 %v1146_v25, 16  ;;  %v8539_v43 = vsel %vm8497_vm7, %v6641_v22, %v3749_v23  ;;  %v8543_v45 = vsel %vm8497_vm7, %v6642_v24, %v3753_v29  ;;  %v1213_v39 = vsel %vm8031_vm4, %v1208_v0, %v1212_v27  ;;  %v8554_v55 = vld [vmem:[#allocation2 + $0x60] sm:$0xee]  ;;  %v3686_v62 = vld [vmem:[#allocation2 + $0x68] sm:$0x11] }
  0xaf   :  { %v3209_v33 = vsel %vm8031_vm4, %v3204_v13, %v3208_v26  ;;  %2252 = vmatprep.subr.bf16.mxu1 %v7407_v17  ;;  %v1222_v48 = vrot.slane %v1221_v35, 4  ;;  %v1231_v49 = vrot.slane %v1229_v32, 4  ;;  %v1234_v50 = vrot.slane %v1232_v34, 5  ;;  %v7419_v3 = vld [vmem:[%s9879_s3 + $0x244] ss:$8 sps:$4 sm:$0xff]   ;;  %v8568_v17 = vld [vmem:[#allocation2 + $0x70] sm:$0xff] }
  0xb0   :  { %v6606_v6 = vcombine.high %v3195_v12, %v3209_v33  ;;  %v6605_v41 = vcombine.low %v3195_v12, %v3209_v33  ;;  %v6655_v51 = vcombine.low %v8509_v2, %v8515_v14  ;;  %v1243_v52 = vshrl.u32 %v8535_v37, 16  ;;  %v7417_v13 = vld [vmem:[%s9879_s3 + $0x240] ss:$8 sps:$4 sm:$0xff]   ;;  %v7425_v21 = vld [vmem:[%s9879_s3 + $0x254] ss:$8 sps:$4 sm:$0xff]  }
  0xb1   :  { %v1246_v53 = vshll.u32 %v8535_v37, 16  ;;  %v1252_v54 = vshll.u32 %v1148_v38, 16  ;;  %v1227_v56 = vsel %vm8031_vm4, %v1222_v48, %v1226_v63  ;;  %v6658_v58 = vcombine.high %v8539_v43, %v8543_v45  ;;  %v1150_v15 = vld [vmem:[#allocation2 + $0x68] sm:$0x11]  ;;  %v1152_v22 = vld [vmem:[#allocation2 + $0x78] sm:$0x11] }
  0xb2   :  { %3568 = vmatprep.mubr.bf16.mxu0 %v6606_v6  ;;  %2253 = vmatpush1.bf16.msra.mxu1 %v7405_v30  ;;  %v1235_v59 = vor.u32 %v1234_v50, %v1231_v49  ;;  %v1240_v60 = vrot.slane %v1238_v40, 5  ;;  %v6434_v8 = vcombine.high %v1213_v39, %v1227_v56  ;;  %v6433_v9 = vcombine.low %v1213_v39, %v1227_v56  ;;  %v7396_v23 = vld [vmem:[%s9879_s3 + $0x600] ss:$8 sps:$4 sm:$0xff]   ;;  %v8579_v28 = vld [vmem:[#allocation2 + $0x70] sm:$0xee] }
  0xb3   :  { %3569 = vmatmul.mubr.bf16.gmra.mrb[28].mxu0 %v6605_v41  ;;  %2254 = vmatprep.subr.bf16.mxu1 %v7413_v1  ;;  %v1245_v11 = vrot.slane %v1243_v52, 4  ;;  %v1248_v12 = vrot.slane %v1246_v53, 5  ;;  %v1254_v18 = vrot.slane %v1252_v54, 5  ;;  %v6643_v19 = vrot.slane %v3683_v7, 9  ;;  %v7404_v29 = vld [vmem:[%s9879_s3 + $0x614] ss:$8 sps:$4 sm:$0xff]  }
  0xb4   :  { %4091 = vmatprep.mubr.bf16.mxu0 %v6656_v31  ;;  %v1236_v5 = vrot.slane %v1235_v59, 4  ;;  %v3757_v20 = vrot.slane %v3684_v44, 5  ;;  %1694 = vmatprep.mubr.bf16.mxu1 %v6434_v8  ;;  %v6644_v25 = vrot.slane %v8554_v55, 9  ;;  %v1257_v26 = vshrl.u32 %v8563_v4, 16  ;;  %v8586_v32 = vld [vmem:[#allocation2 + $0x78] sm:$0x11] }
  0xb5   :  { %v1249_v24 = vor.u32 %v1248_v12, %v1245_v11  ;;  %v1260_v27 = vshll.u32 %v8563_v4, 16  ;;  %1695 = vmatmul.mubr.bf16.gmra.mrb[4].mxu1 %v6433_v9  ;;  %v3761_v30 = vrot.slane %v3686_v62, 5  ;;  %v1266_v31 = vshll.u32 %v1150_v15, 16  ;;  %v7423_v35 = vld [vmem:[%s9879_s3 + $0x250] ss:$8 sps:$4 sm:$0xff]   ;;  %v1153_v54 = vld [vmem:[#allocation2 + $0xa0] sm:$0xff] }
  0xb6   :  { %2255 = vmatpush1.bf16.msra.mxu1 %v7411_v46  ;;  %v1271_v0 = vshrl.u32 %v8568_v17, 16  ;;  %v1274_v1 = vshll.u32 %v8568_v17, 16  ;;  %v1241_v34 = vsel %vm8031_vm4, %v1236_v5, %v1240_v60  ;;  %v1259_v63 = vrot.slane %v1257_v26, 4  ;;  %v8593_v40 = vld [vmem:[#allocation2 + $0x80] sm:$0xee]  ;;  %v1155_v62 = vld [vmem:[#allocation2 + $0xb0] sm:$0xff] }
  0xb7   :  { %2256 = vmatprep.subr.bf16.mxu1 %v7419_v3  ;;  %v1250_v33 = vrot.slane %v1249_v24, 4  ;;  %v1262_v38 = vrot.slane %v1260_v27, 5  ;;  %v8597_v6 = vsel %vm8497_vm7, %v6643_v19, %v3757_v20  ;;  %v1268_v41 = vrot.slane %v1266_v31, 5  ;;  %v8599_v7 = vld [vmem:[#allocation2 + $0x88] sm:$0x11]  ;;  %v8655_v31 = vld [vmem:[#allocation2 + $0xc0] sm:$0xff] }
  0xb8   :  { %v1273_v46 = vrot.slane %v1271_v0, 4  ;;  %v7431_v44 = vld [vmem:[%s9879_s3 + $0x264] ss:$8 sps:$4 sm:$0xff]   ;;  %v7402_v39 = vld [vmem:[%s9879_s3 + $0x610] ss:$8 sps:$4 sm:$0xff]   ;;  %v1276_v50 = vrot.slane %v1274_v1, 5  ;;  %v8614_v56 = vsel %vm8497_vm7, %v6644_v25, %v3761_v30 }
  0xb9   :  { %v1255_v48 = vsel %vm8031_vm4, %v1250_v33, %v1254_v18  ;;  %v1263_v49 = vor.u32 %v1262_v38, %v1259_v63  ;;  %v1280_v52 = vshll.u32 %v1152_v22, 16  ;;  %v131_v53 = vld [vmem:[#allocation2 + $0xa8] sm:$0x11]  ;;  %v6645_v60 = vrot.slane %v8579_v28, 9  ;;  %v1156_v14 = vld [vmem:[#allocation2 + $0xb8] sm:$0x11] }
  0xba   :  { %2257 = vmatpush1.bf16.msra.mxu1 %v7417_v13  ;;  %v6436_v55 = vcombine.high %v1241_v34, %v1255_v48  ;;  %v6435_v59 = vcombine.low %v1241_v34, %v1255_v48  ;;  %v1277_v8 = vor.u32 %v1276_v50, %v1273_v46  ;;  %v3765_v2 = vrot.slane %v8586_v32, 5  ;;  %v7408_v15 = vld [vmem:[%s9879_s3 + $0x620] ss:$8 sps:$4 sm:$0xff]   ;;  %v7437_v24 = vld [vmem:[%s9879_s3 + $0x274] ss:$8 sps:$4 sm:$0xff]  }
  0xbb   :  { %4092 = vmatmul.mubr.bf16.vlgmr.msra.gmra.mrb[0].mxu0 %v6655_v51  ;;  %2258 = vmatprep.subr.bf16.mxu1 %v7425_v21  ;;  %v1264_v3 = vrot.slane %v1263_v49, 4  ;;  %v1282_v9 = vrot.slane %v1280_v52, 5  ;;  %v7410_v51 = vld [vmem:[%s9879_s3 + $0x624] ss:$8 sps:$4 sm:$0xff]   ;;  %v6646_v11 = vrot.slane %v8593_v40, 9  ;;  %v3769_v12 = vrot.slane %v8599_v7, 5 }
  0xbc   :  { %4558 = vmatpush1.bf16.msra.mxu0 %v7396_v23  ;;  %4101 = vmatprep.mubr.bf16.mxu0 %v6658_v58  ;;  %v132_v13 = vsel %vm7888_vm11, 0, %v131_v53  ;;  %v1285_v58 = vshrl.u32 %v1153_v54, 16  ;;  %v1278_v18 = vrot.slane %v1277_v8, 4  ;;  %v7429_v19 = vld [vmem:[%s9879_s3 + $0x260] ss:$8 sps:$4 sm:$0xff]   ;;  %v1288_v20 = vshll.u32 %v1153_v54, 16 }
  0xbd   :  { %4559 = vmatprep.subr.bf16.mxu0 %v7404_v29  ;;  %1704 = vmatprep.mubr.bf16.mxu1 %v6436_v55  ;;  %v8633_v5 = vsel %vm8031_vm4, %v1264_v3, %v1268_v41  ;;  %133 = vst [vmem:[#allocation2 + $0xa8] sm:$0x11] %v132_v13  ;;  %v1299_v21 = vshrl.u32 %v1155_v62, 16  ;;  %v6657_v22 = vcombine.low %v8539_v43, %v8543_v45  ;;  %v7416_v23 = vld [vmem:[%s9879_s3 + $0x634] ss:$8 sps:$4 sm:$0xff]   ;;  %v1302_v26 = vshll.u32 %v1155_v62, 16 }
  0xbe   :  { %2259 = vmatpush1.bf16.msra.mxu1 %v7423_v35  ;;  %v1287_v25 = vrot.slane %v1285_v58, 4  ;;  %v1308_v27 = vshll.u32 %v1156_v14, 16  ;;  %v6660_v28 = vcombine.high %v8597_v6, %v8614_v56  ;;  %v1283_v43 = vsel %vm8031_vm4, %v1278_v18, %v1282_v9  ;;  %v7435_v45 = vld [vmem:[%s9879_s3 + $0x270] ss:$8 sps:$4 sm:$0xff]   ;;  %v1158_v33 = vld [vmem:[#allocation2 + $0xc8] sm:$0x11] }
  0xbf   :  { %1705 = vmatmul.mubr.bf16.gmra.mrb[8].mxu1 %v6435_v59  ;;  %2260 = vmatprep.subr.bf16.mxu1 %v7431_v44  ;;  %v1290_v29 = vrot.slane %v1288_v20, 5  ;;  %v8653_v30 = vld [vmem:[#allocation2 + $0xb0] sm:$0xee]  ;;  %v6438_v0 = vcombine.high %v8633_v5, %v1283_v43  ;;  %v1301_v1 = vrot.slane %v1299_v21, 4  ;;  %v1304_v32 = vrot.slane %v1302_v26, 5 }
  0xc0   :  { %4560 = vmatpush1.bf16.msra.mxu0 %v7402_v39  ;;  %v3692_v34 = vld [vmem:[#allocation2 + $0xb8] sm:$0x11]  ;;  %v8663_v63 = vsel %vm8497_vm7, %v6645_v60, %v3765_v2  ;;  %v8667_v38 = vsel %vm8497_vm7, %v6646_v11, %v3769_v12  ;;  %v8669_v41 = vld [vmem:[#allocation2 + $0xc0] sm:$0xee]  ;;  %v8671_v46 = vld [vmem:[#allocation2 + $0xc8] sm:$0x11]  ;;  %v6437_v48 = vcombine.low %v8633_v5, %v1283_v43  ;;  %v6659_v3 = vcombine.low %v8597_v6, %v8614_v56 }
  0xc1   :  { %4561 = vmatprep.subr.bf16.mxu0 %v7410_v51  ;;  %v7414_v35 = vld [vmem:[%s9879_s3 + $0x630] ss:$8 sps:$4 sm:$0xff]   ;;  %v1291_v40 = vor.u32 %v1290_v29, %v1287_v25  ;;  %v7443_v7 = vld [vmem:[%s9879_s3 + $0x284] ss:$8 sps:$4 sm:$0xff]   ;;  %1714 = vmatprep.mubr.bf16.mxu1 %v6438_v0  ;;  %v1305_v49 = vor.u32 %v1304_v32, %v1301_v1  ;;  %v1310_v50 = vrot.slane %v1308_v27, 5  ;;  %v1313_v53 = vshrl.u32 %v8655_v31, 16 }
  0xc2   :  { %2261 = vmatpush1.bf16.msra.mxu1 %v7429_v19  ;;  %v8676_v44 = vld [vmem:[#allocation2 + $0xd0] sm:$0xff]  ;;  %v7422_v39 = vld [vmem:[%s9879_s3 + $0x644] ss:$8 sps:$4 sm:$0xff]   ;;  %v1160_v52 = vld [vmem:[#allocation2 + $0xd8] sm:$0x11]  ;;  %v6647_v54 = vrot.slane %v8653_v30, 9  ;;  %v6662_v12 = vcombine.high %v8663_v63, %v8667_v38 }
  0xc3   :  { %4102 = vmatmul.mubr.bf16.gmra.mrb[4].mxu0 %v6657_v22  ;;  %v3773_v55 = vrot.slane %v3692_v34, 5  ;;  %v7441_v59 = vld [vmem:[%s9879_s3 + $0x280] ss:$8 sps:$4 sm:$0xff]   ;;  %v1316_v60 = vshll.u32 %v8655_v31, 16  ;;  %v1322_v62 = vshll.u32 %v1158_v33, 16  ;;  %2262 = vmatprep.subr.bf16.mxu1 %v7437_v24  ;;  %v1306_v9 = vrot.slane %v1305_v49, 4 }
  0xc4   :  { %4562 = vmatpush1.bf16.msra.mxu0 %v7408_v15  ;;  %4111 = vmatprep.mubr.bf16.mxu0 %v6660_v28  ;;  %v1154_v8 = vld [vmem:[#allocation2 + $0xa8] sm:$0x11]  ;;  %v7449_v2 = vld [vmem:[%s9879_s3 + $0x294] ss:$8 sps:$4 sm:$0xff]   ;;  %v1315_v14 = vrot.slane %v1313_v53, 4  ;;  %v1327_v51 = vshrl.u32 %v8676_v44, 16 }
  0xc5   :  { %4563 = vmatprep.subr.bf16.mxu0 %v7416_v23  ;;  %v7420_v11 = vld [vmem:[%s9879_s3 + $0x640] ss:$8 sps:$4 sm:$0xff]   ;;  %v1292_v13 = vrot.slane %v1291_v40, 4  ;;  %v1294_v6 = vshll.u32 %v1154_v8, 16  ;;  %v1318_v56 = vrot.slane %v1316_v60, 5  ;;  %v6648_v5 = vrot.slane %v8669_v41, 9 }
  0xc6   :  { %2263 = vmatpush1.bf16.msra.mxu1 %v7435_v45  ;;  %v8699_v58 = vld [vmem:[#allocation2 + $0xd0] sm:$0xee]  ;;  %v3777_v18 = vrot.slane %v8671_v46, 5  ;;  %v1329_v19 = vrot.slane %v1327_v51, 4  ;;  %v1330_v20 = vshll.u32 %v8676_v44, 16  ;;  %v1311_v23 = vsel %vm8031_vm4, %v1306_v9, %v1310_v50 }
  0xc7   :  { %v7428_v15 = vld [vmem:[%s9879_s3 + $0x654] ss:$8 sps:$4 sm:$0xff]   ;;  %1715 = vmatmul.mubr.bf16.gmra.mrb[12].mxu1 %v6437_v48  ;;  %2264 = vmatprep.subr.bf16.mxu1 %v7443_v7  ;;  %v1296_v22 = vrot.slane %v1294_v6, 5  ;;  %v7447_v24 = vld [vmem:[%s9879_s3 + $0x290] ss:$8 sps:$4 sm:$0xff]   ;;  %v1319_v25 = vor.u32 %v1318_v56, %v1315_v14  ;;  %v1336_v26 = vshll.u32 %v1160_v52, 16  ;;  %v8718_v28 = vsel %vm8497_vm7, %v6647_v54, %v3773_v55 }
  0xc8   :  { %v8707_v21 = vld [vmem:[#allocation2 + $0xd8] sm:$0x11]  ;;  %4564 = vmatpush1.bf16.msra.mxu0 %v7414_v35  ;;  %v8714_v27 = vld [vmem:[#allocation2 + $0xe0] sm:$0xee]  ;;  %v1324_v43 = vrot.slane %v1322_v62, 5  ;;  %v1332_v45 = vrot.slane %v1330_v20, 5  ;;  %v6703_v40 = vcombine.low %v8489_v42, %v8494_v47  ;;  %v8738_v50 = vsel %vm8497_vm7, %v6648_v5, %v3777_v18 }
  0xc9   :  { %4565 = vmatprep.subr.bf16.mxu0 %v7422_v39  ;;  %v3698_v29 = vld [vmem:[#allocation2 + $0xe8] sm:$0x11]  ;;  %v6649_v30 = vrot.slane %v8699_v58, 9  ;;  %v7426_v0 = vld [vmem:[%s9879_s3 + $0x650] ss:$8 sps:$4 sm:$0xff]   ;;  %v1297_v1 = vsel %vm8031_vm4, %v1292_v13, %v1296_v22  ;;  %v1320_v32 = vrot.slane %v1319_v25, 4 }
  0xca   :  { %2265 = vmatpush1.bf16.msra.mxu1 %v7441_v59  ;;  %v1338_v34 = vrot.slane %v1336_v26, 5  ;;  %v7455_v33 = vld [vmem:[%s9879_s3 + $0x2a4] ss:$8 sps:$4 sm:$0xff]   ;;  %v6440_v41 = vcombine.high %v1297_v1, %v1311_v23  ;;  %v6439_v46 = vcombine.low %v1297_v1, %v1311_v23  ;;  %v1333_v7 = vor.u32 %v1332_v45, %v1329_v19  ;;  %v8733_v48 = vld [vmem:[#allocation2 + $0xf0] sm:$0xff]  ;;  %v1164_v54 = vld [vmem:[#allocation2 + $0xf8] sm:$0x11] }
  0xcb   :  { %v8729_v35 = vld [vmem:[#allocation2 + $0xe0] sm:$0xff]  ;;  %4112 = vmatmul.mubr.bf16.gmra.mrb[8].mxu0 %v6659_v3  ;;  %2266 = vmatprep.subr.bf16.mxu1 %v7449_v2  ;;  %v1162_v39 = vld [vmem:[#allocation2 + $0xe8] sm:$0x11]  ;;  %v3781_v52 = vrot.slane %v8707_v21, 5  ;;  %v6650_v53 = vrot.slane %v8714_v27, 9  ;;  %v8748_v60 = vsel %vm8031_vm4, %v1320_v32, %v1324_v43  ;;  %v3785_v3 = vrot.slane %v3698_v29, 5 }
  0xcc   :  { %v1341_v49 = vshrl.u32 %v8729_v35, 16  ;;  %4566 = vmatpush1.bf16.msra.mxu0 %v7420_v11  ;;  %4121 = vmatprep.mubr.bf16.mxu0 %v6662_v12  ;;  %v1344_v55 = vshll.u32 %v8729_v35, 16  ;;  %v7434_v59 = vld [vmem:[%s9879_s3 + $0x664] ss:$8 sps:$4 sm:$0xff]   ;;  %v1334_v62 = vrot.slane %v1333_v7, 4  ;;  %v1350_v14 = vshll.u32 %v1162_v39, 16 }
  0xcd   :  { %4567 = vmatprep.subr.bf16.mxu0 %v7428_v15  ;;  %1724 = vmatprep.mubr.bf16.mxu1 %v6440_v41  ;;  %v7453_v9 = vld [vmem:[%s9879_s3 + $0x2a0] ss:$8 sps:$4 sm:$0xff]   ;;  %v1355_v51 = vshrl.u32 %v8733_v48, 16  ;;  %v1358_v11 = vshll.u32 %v8733_v48, 16  ;;  %v6661_v12 = vcombine.low %v8663_v63, %v8667_v38  ;;  %v7461_v6 = vld [vmem:[%s9879_s3 + $0x2b4] ss:$8 sps:$4 sm:$0xff]   ;;  %v6664_v63 = vcombine.high %v8718_v28, %v8738_v50 }
  0xce   :  { %v1343_v8 = vrot.slane %v1341_v49, 4  ;;  %2267 = vmatpush1.bf16.msra.mxu1 %v7447_v24  ;;  %v1346_v2 = vrot.slane %v1344_v55, 5  ;;  %v1339_v13 = vsel %vm8031_vm4, %v1334_v62, %v1338_v34  ;;  %v1364_v56 = vshll.u32 %v1164_v54, 16  ;;  %v7432_v58 = vld [vmem:[%s9879_s3 + $0x660] ss:$8 sps:$4 sm:$0xff]   ;;  %v8808_v39 = vld [vmem:[#allocation2 + $0x110] sm:$0xff] }
  0xcf   :  { %1725 = vmatmul.mubr.bf16.gmra.mrb[16].mxu1 %v6439_v46  ;;  %2268 = vmatprep.subr.bf16.mxu1 %v7455_v33  ;;  %v7440_v15 = vld [vmem:[%s9879_s3 + $0x674] ss:$8 sps:$4 sm:$0xff]   ;;  %v6442_v38 = vcombine.high %v8748_v60, %v1339_v13  ;;  %v8773_v18 = vsel %vm8497_vm7, %v6649_v30, %v3781_v52  ;;  %v1352_v19 = vrot.slane %v1350_v14, 5  ;;  %v1357_v20 = vrot.slane %v1355_v51, 4  ;;  %v7438_v22 = vld [vmem:[%s9879_s3 + $0x670] ss:$8 sps:$4 sm:$0xff]  }
  0xd0   :  { %4568 = vmatpush1.bf16.msra.mxu0 %v7426_v0  ;;  %v1347_v5 = vor.u32 %v1346_v2, %v1343_v8  ;;  %v1360_v21 = vrot.slane %v1358_v11, 5  ;;  %v8780_v23 = vsel %vm8497_vm7, %v6650_v53, %v3785_v3  ;;  %v6441_v24 = vcombine.low %v8748_v60, %v1339_v13  ;;  %v7459_v25 = vld [vmem:[%s9879_s3 + $0x2b0] ss:$8 sps:$4 sm:$0xff]   ;;  %v7446_v43 = vld [vmem:[%s9879_s3 + $0x684] ss:$8 sps:$4 sm:$0xff]  }
  0xd1   :  { %4569 = vmatprep.subr.bf16.mxu0 %v7434_v59  ;;  %1734 = vmatprep.mubr.bf16.mxu1 %v6442_v38  ;;  %v6704_v27 = vcombine.high %v8489_v42, %v8494_v47  ;;  %v1366_v29 = vrot.slane %v1364_v56, 5  ;;  %v8791_v30 = vld [vmem:[#allocation2 + $0xf0] sm:$0xee]  ;;  %v8793_v0 = vld [vmem:[#allocation2 + $0xf8] sm:$0x11]  ;;  %v6706_v32 = vcombine.high %v8521_v61, %v8535_v37  ;;  %v6705_v34 = vcombine.low %v8521_v61, %v8535_v37  ;;  %v8806_v46 = vld [vmem:[#allocation2 + $0x100] sm:$0xff] }
  0xd2   :  { %2269 = vmatpush1.bf16.msra.mxu1 %v7453_v9  ;;  %v1348_v26 = vrot.slane %v1347_v5, 4  ;;  %v1361_v45 = vor.u32 %v1360_v21, %v1357_v20  ;;  %v7467_v1 = vld [vmem:[%s9879_s3 + $0x2c4] ss:$8 sps:$4 sm:$0xff]   ;;  %v6663_v33 = vcombine.low %v8718_v28, %v8738_v50  ;;  %v6708_v49 = vcombine.high %v8563_v4, %v8568_v17  ;;  %v1168_v50 = vld [vmem:[#allocation2 + $0x118] sm:$0x11] }
  0xd3   :  { %4122 = vmatmul.mubr.bf16.gmra.mrb[12].mxu0 %v6661_v12  ;;  %2270 = vmatprep.subr.bf16.mxu1 %v7461_v6  ;;  %v8804_v41 = vld [vmem:[#allocation2 + $0x100] sm:$0xee]  ;;  %v1166_v7 = vld [vmem:[#allocation2 + $0x108] sm:$0x11]  ;;  %v6666_v52 = vcombine.high %v8773_v18, %v8780_v23  ;;  %v1369_v55 = vshrl.u32 %v8806_v46, 16  ;;  %v1372_v62 = vshll.u32 %v8806_v46, 16  ;;  %v6707_v13 = vcombine.low %v8563_v4, %v8568_v17 }
  0xd4   :  { %4570 = vmatpush1.bf16.msra.mxu0 %v7432_v58  ;;  %4131 = vmatprep.mubr.bf16.mxu0 %v6664_v63  ;;  %v8816_v53 = vsel %vm8031_vm4, %v1348_v26, %v1352_v19  ;;  %v1362_v54 = vrot.slane %v1361_v45, 4  ;;  %v3702_v28 = vld [vmem:[#allocation2 + $0x108] sm:$0x11]  ;;  %v1378_v3 = vshll.u32 %v1166_v7, 16  ;;  %v1383_v8 = vshrl.u32 %v8808_v39, 16 }
  0xd5   :  { %4571 = vmatprep.subr.bf16.mxu0 %v7440_v15  ;;  %v7444_v59 = vld [vmem:[%s9879_s3 + $0x680] ss:$8 sps:$4 sm:$0xff]   ;;  %v1386_v9 = vshll.u32 %v8808_v39, 16  ;;  %v7452_v2 = vld [vmem:[%s9879_s3 + $0x694] ss:$8 sps:$4 sm:$0xff]   ;;  %v1371_v11 = vrot.slane %v1369_v55, 4 }
  0xd6   :  { %2271 = vmatpush1.bf16.msra.mxu1 %v7459_v25  ;;  %v7465_v60 = vld [vmem:[%s9879_s3 + $0x2c0] ss:$8 sps:$4 sm:$0xff]   ;;  %v1367_v14 = vsel %vm8031_vm4, %v1362_v54, %v1366_v29  ;;  %v7473_v51 = vld [vmem:[%s9879_s3 + $0x2d4] ss:$8 sps:$4 sm:$0xff]   ;;  %v1392_v12 = vshll.u32 %v1168_v50, 16  ;;  %v6651_v56 = vrot.slane %v8791_v30, 9  ;;  %v6714_v54 = vcombine.high %v8729_v35, %v8733_v48 }
  0xd7   :  { %1735 = vmatmul.mubr.bf16.gmra.mrb[20].mxu1 %v6441_v24  ;;  %2272 = vmatprep.subr.bf16.mxu1 %v7467_v1  ;;  %v6444_v6 = vcombine.high %v8816_v53, %v1367_v14  ;;  %v3789_v58 = vrot.slane %v8793_v0, 5  ;;  %v1374_v15 = vrot.slane %v1372_v62, 5  ;;  %v6652_v63 = vrot.slane %v8804_v41, 9  ;;  %v7471_v5 = vld [vmem:[%s9879_s3 + $0x2d0] ss:$8 sps:$4 sm:$0xff]  }
  0xd8   :  { %4572 = vmatpush1.bf16.msra.mxu0 %v7438_v22  ;;  %v3793_v38 = vrot.slane %v3702_v28, 5  ;;  %v1385_v19 = vrot.slane %v1383_v8, 4  ;;  %v1388_v20 = vrot.slane %v1386_v9, 5  ;;  %v7450_v21 = vld [vmem:[%s9879_s3 + $0x690] ss:$8 sps:$4 sm:$0xff]   ;;  %v6443_v22 = vcombine.low %v8816_v53, %v1367_v14 }
  0xd9   :  { %4573 = vmatprep.subr.bf16.mxu0 %v7446_v43  ;;  %1744 = vmatprep.mubr.bf16.mxu1 %v6444_v6  ;;  %v1375_v24 = vor.u32 %v1374_v15, %v1371_v11  ;;  %v1380_v25 = vrot.slane %v1378_v3, 5  ;;  %v7458_v26 = vld [vmem:[%s9879_s3 + $0x6a4] ss:$8 sps:$4 sm:$0xff]   ;;  %v1394_v45 = vrot.slane %v1392_v12, 5  ;;  %v3703_v29 = vld [vmem:[#allocation2 + $0x110] sm:$0xee]  ;;  %v6712_v0 = vcombine.high %v8655_v31, %v8676_v44 }
  0xda   :  { %2273 = vmatpush1.bf16.msra.mxu1 %v7465_v60  ;;  %v1389_v43 = vor.u32 %v1388_v20, %v1385_v19  ;;  %v7479_v30 = vld [vmem:[%s9879_s3 + $0x2e4] ss:$8 sps:$4 sm:$0xff]   ;;  %v6711_v1 = vcombine.low %v8655_v31, %v8676_v44  ;;  %v3704_v41 = vld [vmem:[#allocation2 + $0x118] sm:$0x11]  ;;  %v8863_v28 = vsel %vm8497_vm7, %v6651_v56, %v3789_v58  ;;  %v8867_v50 = vsel %vm8497_vm7, %v6652_v63, %v3793_v38  ;;  %v7456_v3 = vld [vmem:[%s9879_s3 + $0x6a0] ss:$8 sps:$4 sm:$0xff]  }
  0xdb   :  { %4132 = vmatmul.mubr.bf16.gmra.mrb[16].mxu0 %v6663_v33  ;;  %2274 = vmatprep.subr.bf16.mxu1 %v7473_v51  ;;  %v1376_v33 = vrot.slane %v1375_v24, 4  ;;  %v3705_v7 = vld [vmem:[#allocation2 + $0x120] sm:$0xee]  ;;  %v3706_v53 = vld [vmem:[#allocation2 + $0x128] sm:$0x11]  ;;  %v6713_v60 = vcombine.low %v8729_v35, %v8733_v48  ;;  %v6665_v62 = vcombine.low %v8773_v18, %v8780_v23  ;;  %v6716_v51 = vcombine.high %v8806_v46, %v8808_v39 }
  0xdc   :  { %4574 = vmatpush1.bf16.msra.mxu0 %v7444_v59  ;;  %4141 = vmatprep.mubr.bf16.mxu0 %v6666_v52  ;;  %v1390_v55 = vrot.slane %v1389_v43, 4  ;;  %v7477_v52 = vld [vmem:[%s9879_s3 + $0x2e0] ss:$8 sps:$4 sm:$0xff]   ;;  %v7485_v59 = vld [vmem:[%s9879_s3 + $0x2f4] ss:$8 sps:$4 sm:$0xff]   ;;  %v6715_v11 = vcombine.low %v8806_v46, %v8808_v39  ;;  %v6668_v15 = vcombine.high %v8863_v28, %v8867_v50  ;;  %v6653_v38 = vrot.slane %v3703_v29, 9 }
  0xdd   :  { %4575 = vmatprep.subr.bf16.mxu0 %v7452_v2  ;;  %v1381_v8 = vsel %vm8031_vm4, %v1376_v33, %v1380_v25  ;;  %v1861_v9 = vld [vmem:[#allocation2] sm:$0xee]  ;;  %v1862_v2 = vld [vmem:[#allocation2 + $0x8] sm:$0x11]  ;;  %v1863_v14 = vld [vmem:[#allocation2 + $0x10] sm:$0xee] }
  0xde   :  { %2275 = vmatpush1.bf16.msra.mxu1 %v7471_v5  ;;  %v1395_v18 = vsel %vm8031_vm4, %v1390_v55, %v1394_v45  ;;  %v1864_v23 = vld [vmem:[#allocation2 + $0x18] sm:$0x11]  ;;  %v6479_v12 = vrot.slane %v1861_v9, 9  ;;  %v1930_v6 = vrot.slane %v1862_v2, 5  ;;  %v6480_v56 = vrot.slane %v1863_v14, 9  ;;  %v9193_v35 = vld [vmem:[#allocation2 + $0x120] sm:$0xff] }
  0xdf   :  { %1745 = vmatmul.mubr.bf16.gmra.mrb[24].mxu1 %v6443_v22  ;;  %2276 = vmatprep.subr.bf16.mxu1 %v7479_v30  ;;  %v7464_v58 = vld [vmem:[%s9879_s3 + $0x6b4] ss:$8 sps:$4 sm:$0xff]   ;;  %v6446_v63 = vcombine.high %v1381_v8, %v1395_v18  ;;  %v1934_v5 = vrot.slane %v1864_v23, 5  ;;  %v3797_v19 = vrot.slane %v3704_v41, 5  ;;  %v6654_v20 = vrot.slane %v3705_v7, 9 }
  0xe0   :  { %4576 = vmatpush1.bf16.msra.mxu0 %v7450_v21  ;;  %v3801_v22 = vrot.slane %v3706_v53, 5  ;;  %v1931_v24 = vsel %vm8497_vm7, %v6479_v12, %v1930_v6  ;;  %v7483_v21 = vld [vmem:[%s9879_s3 + $0x2f0] ss:$8 sps:$4 sm:$0xff]   ;;  %v6445_v43 = vcombine.low %v1381_v8, %v1395_v18  ;;  %v7470_v29 = vld [vmem:[%s9879_s3 + $0x6c4] ss:$8 sps:$4 sm:$0xff]  }
  0xe1   :  { %4577 = vmatprep.subr.bf16.mxu0 %v7458_v26  ;;  %1754 = vmatprep.mubr.bf16.mxu1 %v6446_v63  ;;  %v1935_v25 = vsel %vm8497_vm7, %v6480_v56, %v1934_v5  ;;  %v7493_v26 = vld [vmem:[%s9879_s3 + $0x304] ss:$8 sps:$4 sm:$0xff]   ;;  %v7462_v45 = vld [vmem:[%s9879_s3 + $0x6b0] ss:$8 sps:$4 sm:$0xff]   ;;  %v3798_v33 = vsel %vm8497_vm7, %v6653_v38, %v3797_v19  ;;  %v7468_v2 = vld [vmem:[%s9879_s3 + $0x6c0] ss:$8 sps:$4 sm:$0xff]  }
  0xe2   :  { %2277 = vmatpush1.bf16.msra.mxu1 %v7477_v52  ;;  %v6496_v30 = vcombine.high %v1931_v24, %v1935_v25  ;;  %v3802_v41 = vsel %vm8497_vm7, %v6654_v20, %v3801_v22  ;;  %v1865_v7 = vld [vmem:[#allocation2 + $0x20] sm:$0xee]  ;;  %v1866_v53 = vld [vmem:[#allocation2 + $0x28] sm:$0x11]  ;;  %v1867_v55 = vld [vmem:[#allocation2 + $0x30] sm:$0xee]  ;;  %v6667_v52 = vcombine.low %v8863_v28, %v8867_v50  ;;  %v6495_v23 = vcombine.low %v1931_v24, %v1935_v25 }
  0xe3   :  { %4142 = vmatmul.mubr.bf16.gmra.mrb[20].mxu0 %v6665_v62  ;;  %2278 = vmatprep.subr.bf16.mxu1 %v7485_v59  ;;  %v1868_v59 = vld [vmem:[#allocation2 + $0x38] sm:$0x11]  ;;  %v6481_v62 = vrot.slane %v1865_v7, 9  ;;  %v6482_v8 = vrot.slane %v1867_v55, 9  ;;  %v6670_v14 = vcombine.high %v3798_v33, %v3802_v41  ;;  %v7482_v18 = vld [vmem:[%s9879_s3 + $0x6e4] ss:$8 sps:$4 sm:$0xff]   ;;  %v6669_v25 = vcombine.low %v3798_v33, %v3802_v41 }
  0xe4   :  { %4578 = vmatpush1.bf16.msra.mxu0 %v7456_v3  ;;  %4151 = vmatprep.mubr.bf16.mxu0 %v6668_v15  ;;  %v1938_v3 = vrot.slane %v1866_v53, 5  ;;  %v1942_v9 = vrot.slane %v1868_v59, 5  ;;  %v7476_v28 = vld [vmem:[%s9879_s3 + $0x6d4] ss:$8 sps:$4 sm:$0xff]   ;;  %v7474_v50 = vld [vmem:[%s9879_s3 + $0x6d0] ss:$8 sps:$4 sm:$0xff]  }
  0xe5   :  { %4579 = vmatprep.subr.bf16.mxu0 %v7464_v58  ;;  %v7491_v12 = vld [vmem:[%s9879_s3 + $0x300] ss:$8 sps:$4 sm:$0xff]   ;;  %v7499_v6 = vld [vmem:[%s9879_s3 + $0x314] ss:$8 sps:$4 sm:$0xff]   ;;  %v7486_v33 = vld [vmem:[%s9879_s3 + $0x6f0] ss:$8 sps:$4 sm:$0xff]  }
  0xe6   :  { %2279 = vmatpush1.bf16.msra.mxu1 %v7483_v21  ;;  %v1939_v56 = vsel %vm8497_vm7, %v6481_v62, %v1938_v3  ;;  %v1943_v58 = vsel %vm8497_vm7, %v6482_v8, %v1942_v9  ;;  %v1869_v15 = vld [vmem:[#allocation2 + $0x40] sm:$0xee]  ;;  %v1870_v63 = vld [vmem:[#allocation2 + $0x48] sm:$0x11]  ;;  %v1871_v38 = vld [vmem:[#allocation2 + $0x50] sm:$0xee] }
  0xe7   :  { %1755 = vmatmul.mubr.bf16.gmra.mrb[28].mxu1 %v6445_v43  ;;  %2745 = vmatprep.subr.bf16.mxu1 %v7493_v26  ;;  %v1872_v5 = vld [vmem:[#allocation2 + $0x58] sm:$0x11]  ;;  %v6483_v19 = vrot.slane %v1869_v15, 9  ;;  %v1946_v20 = vrot.slane %v1870_v63, 5  ;;  %v6484_v22 = vrot.slane %v1871_v38, 9  ;;  %v6498_v24 = vcombine.high %v1939_v56, %v1943_v58 }
  0xe8   :  { %4580 = vmatpush1.bf16.msra.mxu0 %v7462_v45  ;;  %2280 = vmatprep.mubr.bf16.mxu1 %v6496_v30  ;;  %v1950_v21 = vrot.slane %v1872_v5, 5  ;;  %v7480_v43 = vld [vmem:[%s9879_s3 + $0x6e0] ss:$8 sps:$4 sm:$0xff]   ;;  %v7488_v26 = vld [vmem:[%s9879_s3 + $0x6f4] ss:$8 sps:$4 sm:$0xff]   ;;  %v6497_v53 = vcombine.low %v1939_v56, %v1943_v58 }
  0xe9   :  { %4581 = vmatprep.subr.bf16.mxu0 %v7470_v29  ;;  %v7497_v45 = vld [vmem:[%s9879_s3 + $0x310] ss:$8 sps:$4 sm:$0xff]   ;;  %v1947_v29 = vsel %vm8497_vm7, %v6483_v19, %v1946_v20  ;;  %v7506_v41 = vld [vmem:[%s9879_s3 + $0x324] ss:$8 sps:$4 sm:$0xff]   ;;  %v7504_v62 = vld [vmem:[%s9879_s3 + $0x320] ss:$8 sps:$4 sm:$0xff]  }
  0xea   :  { %v1951_v30 = vsel %vm8497_vm7, %v6484_v22, %v1950_v21  ;;  %v7496_v7 = vld [vmem:[%s9879_s3 + $0x704] ss:$8 sps:$4 sm:$0xff]   ;;  %v1875_v59 = vld [vmem:[#allocation2 + $0x70] sm:$0xee]  ;;  %v1876_v8 = vld [vmem:[#allocation2 + $0x78] sm:$0x11] }
  0xeb   :  { %4152 = vmatmul.mubr.bf16.gmra.mrb[24].mxu0 %v6667_v52  ;;  %v1873_v55 = vld [vmem:[#allocation2 + $0x60] sm:$0xee]  ;;  %v1874_v52 = vld [vmem:[#allocation2 + $0x68] sm:$0x11]  ;;  %v6500_v3 = vcombine.high %v1947_v29, %v1951_v30  ;;  %v7500_v15 = vld [vmem:[%s9879_s3 + $0x710] ss:$8 sps:$4 sm:$0xff]   ;;  %v6499_v19 = vcombine.low %v1947_v29, %v1951_v30 }
  0xec   :  { %4582 = vmatpush1.bf16.msra.mxu0 %v7468_v2  ;;  %4161 = vmatprep.mubr.bf16.mxu0 %v6670_v14  ;;  %v6485_v9 = vrot.slane %v1873_v55, 9  ;;  %v1954_v2 = vrot.slane %v1874_v52, 5  ;;  %v6486_v14 = vrot.slane %v1875_v59, 9  ;;  %v7520_v63 = vld [vmem:[%s9879_s3 + $0x344] ss:$8 sps:$4 sm:$0xff]  }
  0xed   :  { %4583 = vmatprep.subr.bf16.mxu0 %v7476_v28  ;;  %v1958_v28 = vrot.slane %v1876_v8, 5  ;;  %v1877_v38 = vld [vmem:[#allocation2 + $0xa0] sm:$0xee]  ;;  %v1878_v20 = vld [vmem:[#allocation2 + $0xa8] sm:$0x11] }
  0xee   :  { %v1955_v56 = vsel %vm8497_vm7, %v6485_v9, %v1954_v2  ;;  %v7510_v5 = vld [vmem:[%s9879_s3 + $0x724] ss:$8 sps:$4 sm:$0xff]   ;;  %v1879_v22 = vld [vmem:[#allocation2 + $0xb0] sm:$0xee]  ;;  %v7518_v21 = vld [vmem:[%s9879_s3 + $0x340] ss:$8 sps:$4 sm:$0xff]  }
  0xef   :  { %2281 = vmatmul.mubr.bf16.vlgmr.msra.gmra.mrb[0].mxu1 %v6495_v23  ;;  %v7494_v23 = vld [vmem:[%s9879_s3 + $0x700] ss:$8 sps:$4 sm:$0xff]   ;;  %v1959_v58 = vsel %vm8497_vm7, %v6486_v14, %v1958_v28  ;;  %v6487_v42 = vrot.slane %v1877_v38, 9  ;;  %v1962_v47 = vrot.slane %v1878_v20, 5  ;;  %v7525_v29 = vld [vmem:[%s9879_s3 + $0x350] ss:$8 sps:$4 sm:$0xff]  }
  0xf0   :  { %4584 = vmatpush1.bf16.msra.mxu0 %v7474_v50  ;;  %2746 = vmatpush1.bf16.msra.mxu1 %v7491_v12  ;;  %v63_v50 = vld [vmem:[#allocation2 + $0x90] sm:$0x11]  ;;  %v7534_v30 = vld [vmem:[%s9879_s3 + $0x364] ss:$8 sps:$4 sm:$0xff]   ;;  %v1883_v52 = vld [vmem:[#allocation2 + $0xd0] sm:$0xee] }
  0xf1   :  { %4585 = vmatprep.subr.bf16.mxu0 %v7482_v18  ;;  %2747 = vmatprep.subr.bf16.mxu1 %v7499_v6  ;;  %v7513_v18 = vld [vmem:[%s9879_s3 + $0x334] ss:$8 sps:$4 sm:$0xff]   ;;  %v7511_v6 = vld [vmem:[%s9879_s3 + $0x330] ss:$8 sps:$4 sm:$0xff]   ;;  %v1882_v55 = vld [vmem:[#allocation2 + $0xc8] sm:$0x11] }
  0xf2   :  { %2290 = vmatprep.mubr.bf16.mxu1 %v6498_v24  ;;  %v7502_v12 = vld [vmem:[%s9879_s3 + $0x714] ss:$8 sps:$4 sm:$0xff]   ;;  %v7524_v59 = vld [vmem:[%s9879_s3 + $0x744] ss:$8 sps:$4 sm:$0xff]   ;;  %v7532_v61 = vld [vmem:[%s9879_s3 + $0x360] ss:$8 sps:$4 sm:$0xff]  }
  0xf3   :  { %4162 = vmatmul.mubr.bf16.gmra.mrb[28].mxu0 %v6669_v25  ;;  %v1880_v24 = vld [vmem:[#allocation2 + $0xb8] sm:$0x11]  ;;  %v6502_v25 = vcombine.high %v1955_v56, %v1959_v58  ;;  %v1970_v2 = vrot.slane %v1882_v55, 5  ;;  %v6490_v14 = vrot.slane %v1883_v52, 9  ;;  %v7566_v31 = vld [vmem:[%s9879_s3 + $0x7a4] ss:$8 sps:$4 sm:$0xff]  }
  0xf4   :  { %4586 = vmatpush1.bf16.msra.mxu0 %v7480_v43  ;;  %4589 = vmatprep.mubr.bf16.mxu0 %v6704_v27  ;;  %v64_v27 = vsel %vm7850_vm8, 0, %v63_v50  ;;  %v1966_v43 = vrot.slane %v1880_v24, 5  ;;  %v1884_v8 = vld [vmem:[#allocation2 + $0xd8] sm:$0x11]  ;;  %v7574_v44 = vld [vmem:[%s9879_s3 + $0x3c0] ss:$8 sps:$4 sm:$0xff]  }
  0xf5   :  { %4587 = vmatprep.subr.bf16.mxu0 %v7488_v26  ;;  %2748 = vmatpush1.bf16.msra.mxu1 %v7497_v45  ;;  %65 = vst [vmem:[#allocation2 + $0x90] sm:$0x11] %v64_v27  ;;  %v7527_v26 = vld [vmem:[%s9879_s3 + $0x354] ss:$8 sps:$4 sm:$0xff]   ;;  %v1974_v28 = vrot.slane %v1884_v8, 5 }
  0xf6   :  { %2749 = vmatprep.subr.bf16.mxu1 %v7506_v41  ;;  %v7516_v45 = vld [vmem:[%s9879_s3 + $0x734] ss:$8 sps:$4 sm:$0xff]   ;;  %v9248_v46 = vld [vmem:[%s9879_s3 + $0x800] ss:$8 sps:$4 sm:$0xff]  }
  0xf7   :  { %2291 = vmatmul.mubr.bf16.gmra.mrb[4].mxu1 %v6497_v53  ;;  %v1881_v53 = vld [vmem:[#allocation2 + $0xc0] sm:$0xee]  ;;  %v7541_v50 = vld [vmem:[%s9879_s3 + $0x374] ss:$8 sps:$4 sm:$0xff]  }
  0xf8   :  { %4588 = vmatpush1.bf16.msra.mxu0 %v7486_v33  ;;  %2300 = vmatprep.mubr.bf16.mxu1 %v6500_v3  ;;  %v1963_v33 = vsel %vm8497_vm7, %v6487_v42, %v1962_v47  ;;  %v6501_v3 = vcombine.low %v1955_v56, %v1959_v58  ;;  %v1975_v56 = vsel %vm8497_vm7, %v6490_v14, %v1974_v28  ;;  %v1885_v58 = vld [vmem:[#allocation2 + $0xe0] sm:$0xee]  ;;  %v1888_v38 = vld [vmem:[#allocation2 + $0xf8] sm:$0x11] }
  0xf9   :  { %5278 = vmatprep.subr.bf16.mxu0 %v7496_v7  ;;  %2750 = vmatpush1.bf16.msra.mxu1 %v7504_v62  ;;  %v7514_v7 = vld [vmem:[%s9879_s3 + $0x730] ss:$8 sps:$4 sm:$0xff]   ;;  %v9031_v62 = vld [vmem:[#allocation2 + $0x80] sm:$0xff]  ;;  %v6491_v4 = vrot.slane %v1885_v58, 9  ;;  %v7558_v14 = vld [vmem:[%s9879_s3 + $0x794] ss:$8 sps:$4 sm:$0xff]  }
  0xfa   :  { %2751 = vmatprep.subr.bf16.mxu1 %v7513_v18  ;;  %v7530_v18 = vld [vmem:[%s9879_s3 + $0x754] ss:$8 sps:$4 sm:$0xff]   ;;  %v7536_v47 = vld [vmem:[%s9879_s3 + $0x760] ss:$8 sps:$4 sm:$0xff]   ;;  %v7556_v58 = vld [vmem:[%s9879_s3 + $0x790] ss:$8 sps:$4 sm:$0xff]  }
  0xfb   :  { %4590 = vmatmul.mubr.bf16.vlgmr.msra.gmra.mrb[0].mxu0 %v6703_v40  ;;  %v6488_v40 = vrot.slane %v1879_v22, 9  ;;  %v7546_v22 = vld [vmem:[%s9879_s3 + $0x380] ss:$8 sps:$4 sm:$0xff]  }
  0xfc   :  { %5279 = vmatpush1.bf16.msra.mxu0 %v7494_v23  ;;  %4599 = vmatprep.mubr.bf16.mxu0 %v6706_v32  ;;  %v7508_v32 = vld [vmem:[%s9879_s3 + $0x720] ss:$8 sps:$4 sm:$0xff]   ;;  %v9036_v9 = vld [vmem:[#allocation2 + $0x90] sm:$0xff] }
  0xfd   :  { %5280 = vmatprep.subr.bf16.mxu0 %v7502_v12  ;;  %2752 = vmatpush1.bf16.msra.mxu1 %v7511_v6  ;;  %v1967_v41 = vsel %vm8497_vm7, %v6488_v40, %v1966_v43  ;;  %v6710_v27 = vcombine.high %v9031_v62, %v9036_v9  ;;  %v7539_v23 = vld [vmem:[%s9879_s3 + $0x370] ss:$8 sps:$4 sm:$0xff]   ;;  %v7548_v12 = vld [vmem:[%s9879_s3 + $0x384] ss:$8 sps:$4 sm:$0xff]   ;;  %v6709_v42 = vcombine.low %v9031_v62, %v9036_v9  ;;  %v7544_v40 = vld [vmem:[%s9879_s3 + $0x774] ss:$8 sps:$4 sm:$0xff]  }
  0xfe   :  { %2753 = vmatprep.subr.bf16.mxu1 %v7520_v63  ;;  %v6504_v37 = vcombine.high %v1963_v33, %v1967_v41  ;;  %v1887_v63 = vld [vmem:[#allocation2 + $0xf0] sm:$0xee]  ;;  %v6503_v20 = vcombine.low %v1963_v33, %v1967_v41  ;;  %v1892_v41 = vld [vmem:[#allocation2 + $0x118] sm:$0x11]  ;;  %v9118_v28 = vld [vmem:[#allocation2 + $0x20] sm:$0xff] }
  0xff   :  { %2301 = vmatmul.mubr.bf16.gmra.mrb[8].mxu1 %v6499_v19  ;;  %v7538_v19 = vld [vmem:[%s9879_s3 + $0x764] ss:$8 sps:$4 sm:$0xff]   ;;  %v7553_v43 = vld [vmem:[%s9879_s3 + $0x390] ss:$8 sps:$4 sm:$0xff]  }
 0x100   :  { %5281 = vmatpush1.bf16.msra.mxu0 %v7500_v15  ;;  %2310 = vmatprep.mubr.bf16.mxu1 %v6502_v25  ;;  %v1886_v15 = vld [vmem:[#allocation2 + $0xe8] sm:$0x11]  ;;  %v7555_v25 = vld [vmem:[%s9879_s3 + $0x394] ss:$8 sps:$4 sm:$0xff]  }
 0x101   :  { %5282 = vmatprep.subr.bf16.mxu0 %v7510_v5  ;;  %2754 = vmatpush1.bf16.msra.mxu1 %v7518_v21  ;;  %v7528_v5 = vld [vmem:[%s9879_s3 + $0x750] ss:$8 sps:$4 sm:$0xff]   ;;  %v1978_v17 = vrot.slane %v1886_v15, 5  ;;  %v1982_v21 = vrot.slane %v1888_v38, 5  ;;  %v7583_v38 = vld [vmem:[%s9879_s3 + $0x3d4] ss:$8 sps:$4 sm:$0xff]  }
 0x102   :  { %2755 = vmatprep.subr.bf16.mxu1 %v7527_v26  ;;  %v7562_v26 = vld [vmem:[%s9879_s3 + $0x3a4] ss:$8 sps:$4 sm:$0xff]   ;;  %v1891_v33 = vld [vmem:[#allocation2 + $0x110] sm:$0xee] }
 0x103   :  { %4600 = vmatmul.mubr.bf16.gmra.mrb[4].mxu0 %v6705_v34  ;;  %v6489_v34 = vrot.slane %v1881_v53, 9  ;;  %v7542_v53 = vld [vmem:[%s9879_s3 + $0x770] ss:$8 sps:$4 sm:$0xff]  }
 0x104   :  { %5283 = vmatpush1.bf16.msra.mxu0 %v7508_v32  ;;  %4609 = vmatprep.mubr.bf16.mxu0 %v6708_v49  ;;  %v7522_v49 = vld [vmem:[%s9879_s3 + $0x740] ss:$8 sps:$4 sm:$0xff]  }
 0x105   :  { %5284 = vmatprep.subr.bf16.mxu0 %v7516_v45  ;;  %2756 = vmatpush1.bf16.msra.mxu1 %v7525_v29  ;;  %v1971_v6 = vsel %vm8497_vm7, %v6489_v34, %v1970_v2  ;;  %v1889_v32 = vld [vmem:[#allocation2 + $0x100] sm:$0xee]  ;;  %v1979_v45 = vsel %vm8497_vm7, %v6491_v4, %v1978_v17  ;;  %v1990_v34 = vrot.slane %v1892_v41, 5  ;;  %v9171_v17 = vld [vmem:[#allocation2 + $0x10] sm:$0xff] }
 0x106   :  { %2757 = vmatprep.subr.bf16.mxu1 %v7534_v30  ;;  %v6506_v24 = vcombine.high %v1971_v6, %v1975_v56  ;;  %v1890_v30 = vld [vmem:[#allocation2 + $0x108] sm:$0x11]  ;;  %v6505_v55 = vcombine.low %v1971_v6, %v1975_v56  ;;  %v4799_v6 = vshrl.u32 %v9118_v28, 16  ;;  %v4802_v56 = vshll.u32 %v9118_v28, 16  ;;  %v9169_v4 = vld [vmem:[#allocation2 + $0x40] sm:$0xff] }
 0x107   :  { %2311 = vmatmul.mubr.bf16.gmra.mrb[12].mxu1 %v6501_v3  ;;  %v7560_v3 = vld [vmem:[%s9879_s3 + $0x3a0] ss:$8 sps:$4 sm:$0xff]   ;;  %v1986_v57 = vrot.slane %v1890_v30, 5  ;;  %v6544_v48 = vcombine.high %v9171_v17, %v9118_v28 }
 0x108   :  { %5285 = vmatpush1.bf16.msra.mxu0 %v7514_v7  ;;  %2320 = vmatprep.mubr.bf16.mxu1 %v6504_v37  ;;  %v93_v7 = vld [vmem:[#allocation2 + $0x130] sm:$0x11]  ;;  %v6494_v37 = vrot.slane %v1891_v33, 9  ;;  %v7550_v2 = vld [vmem:[%s9879_s3 + $0x780] ss:$8 sps:$4 sm:$0xff]  }
 0x109   :  { %5286 = vmatprep.subr.bf16.mxu0 %v7524_v59  ;;  %2758 = vmatpush1.bf16.msra.mxu1 %v7532_v61  ;;  %v94_v52 = vsel %vm7850_vm8, 0, %v93_v7  ;;  %v7552_v59 = vld [vmem:[%s9879_s3 + $0x784] ss:$8 sps:$4 sm:$0xff]   ;;  %v6493_v61 = vrot.slane %v1889_v32, 9  ;;  %v7588_v7 = vld [vmem:[%s9879_s3 + $0x3e0] ss:$8 sps:$4 sm:$0xff]  }
 0x10a   :  { %2759 = vmatprep.subr.bf16.mxu1 %v7541_v50  ;;  %95 = vst [vmem:[#allocation2 + $0x130] sm:$0x11] %v94_v52  ;;  %v7567_v50 = vld [vmem:[%s9879_s3 + $0x3b0] ss:$8 sps:$4 sm:$0xff]   ;;  %v7578_v52 = vld [vmem:[%s9879_s3 + $0x7c0] ss:$8 sps:$4 sm:$0xff]  }
 0x10b   :  { %4610 = vmatmul.mubr.bf16.gmra.mrb[8].mxu0 %v6707_v13  ;;  %v6492_v13 = vrot.slane %v1887_v63, 9 }
 0x10c   :  { %5287 = vmatpush1.bf16.msra.mxu0 %v7522_v49  ;;  %4619 = vmatprep.mubr.bf16.mxu0 %v6710_v27  ;;  %v9125_v49 = vsel %vm8497_vm7, %v6493_v61, %v1986_v57  ;;  %v7576_v27 = vld [vmem:[%s9879_s3 + $0x3c4] ss:$8 sps:$4 sm:$0xff]  }
 0x10d   :  { %5288 = vmatprep.subr.bf16.mxu0 %v7530_v18  ;;  %2760 = vmatpush1.bf16.msra.mxu1 %v7539_v23  ;;  %v1983_v29 = vsel %vm8497_vm7, %v6492_v13, %v1982_v21  ;;  %v9129_v18 = vsel %vm8497_vm7, %v6494_v37, %v1990_v34  ;;  %v9134_v23 = vld [vmem:[#allocation2 + $0x30] sm:$0xff]  ;;  %v4771_v57 = vld [vmem:[#allocation2 + $0x48] sm:$0x11]  ;;  %v4773_v37 = vld [vmem:[#allocation2 + $0x58] sm:$0x11] }
 0x10e   :  { %2761 = vmatprep.subr.bf16.mxu1 %v7548_v12  ;;  %v6508_v8 = vcombine.high %v1979_v45, %v1983_v29  ;;  %v6507_v12 = vcombine.low %v1979_v45, %v1983_v29  ;;  %v6510_v15 = vcombine.high %v9125_v49, %v9129_v18  ;;  %v4816_v63 = vshll.u32 %v9134_v23, 16 }
 0x10f   :  { %2321 = vmatmul.mubr.bf16.gmra.mrb[16].mxu1 %v6503_v20  ;;  %v4804_v20 = vrot.slane %v4802_v56, 5  ;;  %v6509_v32 = vcombine.low %v9125_v49, %v9129_v18  ;;  %v4827_v29 = vshrl.u32 %v9169_v4, 16  ;;  %v128_v49 = vld [vmem:[#allocation2 + $0x98] sm:$0x11]  ;;  %v9226_v56 = vld [vmem:[%s9879_s3 + $0x804] ss:$8 sps:$4 sm:$0xff]  }
 0x110   :  { %5289 = vmatpush1.bf16.msra.mxu0 %v7528_v5  ;;  %2330 = vmatprep.mubr.bf16.mxu1 %v6506_v24  ;;  %v4767_v5 = vld [vmem:[#allocation2 + $0x28] sm:$0x11]  ;;  %v7581_v24 = vld [vmem:[%s9879_s3 + $0x3d0] ss:$8 sps:$4 sm:$0xff]   ;;  %v4818_v21 = vrot.slane %v4816_v63, 5 }
 0x111   :  { %5290 = vmatprep.subr.bf16.mxu0 %v7538_v19  ;;  %2762 = vmatpush1.bf16.msra.mxu1 %v7546_v22  ;;  %v4801_v19 = vrot.slane %v4799_v6, 4  ;;  %v7572_v22 = vld [vmem:[%s9879_s3 + $0x7b4] ss:$8 sps:$4 sm:$0xff]   ;;  %v4829_v34 = vrot.slane %v4827_v29, 4  ;;  %v129_v6 = vsel %vm7888_vm11, 0, %v128_v49  ;;  %v9326_v49 = vld [vmem:[#allocation2 + $0xc0] sm:$0xff] }
 0x112   :  { %2763 = vmatprep.subr.bf16.mxu1 %v7555_v25  ;;  %v9173_v25 = vld [vmem:[#allocation2 + $0x50] sm:$0xff]  ;;  %130 = vst [vmem:[#allocation2 + $0x98] sm:$0x11] %v129_v6  ;;  %v7594_v63 = vld [vmem:[%s9879_s3 + $0x7e4] ss:$8 sps:$4 sm:$0xff]  }
 0x113   :  { %4620 = vmatmul.mubr.bf16.gmra.mrb[12].mxu0 %v6709_v42  ;;  %v7590_v42 = vld [vmem:[%s9879_s3 + $0x3e4] ss:$8 sps:$4 sm:$0xff]   ;;  %v4805_v45 = vor.u32 %v4804_v20, %v4801_v19  ;;  %v4841_v30 = vshrl.u32 %v9173_v25, 16  ;;  %v4844_v33 = vshll.u32 %v9173_v25, 16  ;;  %v9200_v41 = vld [vmem:[#allocation2 + $0x130] sm:$0xff] }
 0x114   :  { %5291 = vmatpush1.bf16.msra.mxu0 %v7536_v47  ;;  %4629 = vmatprep.mubr.bf16.mxu0 %v6712_v0  ;;  %v7569_v0 = vld [vmem:[%s9879_s3 + $0x3b4] ss:$8 sps:$4 sm:$0xff]  }
 0x115   :  { %5292 = vmatprep.subr.bf16.mxu0 %v7544_v40  ;;  %2764 = vmatpush1.bf16.msra.mxu1 %v7553_v43  ;;  %v4769_v47 = vld [vmem:[#allocation2 + $0x38] sm:$0x11]  ;;  %v4808_v40 = vshll.u32 %v4767_v5, 16  ;;  %v4806_v61 = vrot.slane %v4805_v45, 4  ;;  %v4775_v45 = vld [vmem:[#allocation2 + $0x68] sm:$0x11] }
 0x116   :  { %2765 = vmatprep.subr.bf16.mxu1 %v7562_v26  ;;  %v7570_v43 = vld [vmem:[%s9879_s3 + $0x7b0] ss:$8 sps:$4 sm:$0xff]   ;;  %v7580_v26 = vld [vmem:[%s9879_s3 + $0x7c4] ss:$8 sps:$4 sm:$0xff]  }
 0x117   :  { %2331 = vmatmul.mubr.bf16.gmra.mrb[20].mxu1 %v6505_v55  ;;  %v4822_v55 = vshll.u32 %v4769_v47, 16 }
 0x118   :  { %5293 = vmatpush1.bf16.msra.mxu0 %v7542_v53  ;;  %2340 = vmatprep.mubr.bf16.mxu1 %v6508_v8  ;;  %v7595_v8 = vld [vmem:[%s9879_s3 + $0x3f0] ss:$8 sps:$4 sm:$0xff]  }
 0x119   :  { %5294 = vmatprep.subr.bf16.mxu0 %v7552_v59  ;;  %2766 = vmatpush1.bf16.msra.mxu1 %v7560_v3  ;;  %v4810_v59 = vrot.slane %v4808_v40, 5  ;;  %v7586_v3 = vld [vmem:[%s9879_s3 + $0x7d4] ss:$8 sps:$4 sm:$0xff]   ;;  %v9279_v40 = vld [vmem:[%s9879_s3 + $0x810] ss:$8 sps:$4 sm:$0xff]  }
 0x11a   :  { %2767 = vmatprep.subr.bf16.mxu1 %v7569_v0  ;;  %v6718_v0 = vcombine.high %v9193_v35, %v9200_v41 }
 0x11b   :  { %4630 = vmatmul.mubr.bf16.gmra.mrb[16].mxu0 %v6711_v1  ;;  %v4813_v1 = vshrl.u32 %v9134_v23, 16 }
 0x11c   :  { %5295 = vmatpush1.bf16.msra.mxu0 %v7550_v2  ;;  %4639 = vmatprep.mubr.bf16.mxu0 %v6714_v54  ;;  %v7564_v54 = vld [vmem:[%s9879_s3 + $0x7a0] ss:$8 sps:$4 sm:$0xff]  }
 0x11d   :  { %5296 = vmatprep.subr.bf16.mxu0 %v7558_v14  ;;  %2768 = vmatpush1.bf16.msra.mxu1 %v7567_v50  ;;  %v4815_v13 = vrot.slane %v4813_v1, 4  ;;  %v4843_v14 = vrot.slane %v4841_v30, 4  ;;  %v4846_v50 = vrot.slane %v4844_v33, 5  ;;  %v4850_v1 = vshll.u32 %v4773_v37, 16  ;;  %v9286_v33 = vld [vmem:[%s9879_s3 + $0x824] ss:$8 sps:$4 sm:$0xff]  }
 0x11e   :  { %2769 = vmatprep.subr.bf16.mxu1 %v7576_v27  ;;  %v4824_v27 = vrot.slane %v4822_v55, 5  ;;  %v4897_v55 = vshrl.u32 %v9036_v9, 16  ;;  %v9309_v37 = vld [vmem:[%s9879_s3 + $0x820] ss:$8 sps:$4 sm:$0xff]  }
 0x11f   :  { %2341 = vmatmul.mubr.bf16.gmra.mrb[24].mxu1 %v6507_v12  ;;  %v4819_v53 = vor.u32 %v4818_v21, %v4815_v13  ;;  %v9219_v12 = vld [vmem:[#allocation2 + $0x60] sm:$0xff]  ;;  %v7600_v21 = vld [vmem:[%s9879_s3 + $0x7f4] ss:$8 sps:$4 sm:$0xff]  }
 0x120   :  { %5297 = vmatpush1.bf16.msra.mxu0 %v7556_v58  ;;  %2350 = vmatprep.mubr.bf16.mxu1 %v6510_v15  ;;  %v9228_v58 = vld [vmem:[#allocation2 + $0x70] sm:$0xff]  ;;  %v4858_v5 = vshll.u32 %v9219_v12, 16  ;;  %v7592_v13 = vld [vmem:[%s9879_s3 + $0x7e0] ss:$8 sps:$4 sm:$0xff]   ;;  %v4899_v6 = vrot.slane %v4897_v55, 4 }
 0x121   :  { %5298 = vmatprep.subr.bf16.mxu0 %v7566_v31  ;;  %2770 = vmatpush1.bf16.msra.mxu1 %v7574_v44  ;;  %v4820_v18 = vrot.slane %v4819_v53, 4  ;;  %v7584_v15 = vld [vmem:[%s9879_s3 + $0x7d0] ss:$8 sps:$4 sm:$0xff]   ;;  %v6543_v31 = vcombine.low %v9171_v17, %v9118_v28  ;;  %v4836_v44 = vshll.u32 %v4771_v57, 16  ;;  %v4855_v28 = vshrl.u32 %v9219_v12, 16 }
 0x122   :  { %2771 = vmatprep.subr.bf16.mxu1 %v7583_v38  ;;  %v4869_v19 = vshrl.u32 %v9228_v58, 16  ;;  %v4872_v20 = vshll.u32 %v9228_v58, 16  ;;  %v6717_v17 = vcombine.low %v9193_v35, %v9200_v41  ;;  %v4886_v53 = vshll.u32 %v9031_v62, 16 }
 0x123   :  { %4640 = vmatmul.mubr.bf16.gmra.mrb[20].mxu0 %v6713_v60  ;;  %v4830_v60 = vshll.u32 %v9169_v4, 16  ;;  %v9253_v38 = vsel %vm8031_vm4, %v4820_v18, %v4824_v27  ;;  %v4857_v29 = vrot.slane %v4855_v28, 4  ;;  %v4781_v28 = vld [vmem:[#allocation2 + $0x98] sm:$0x11] }
 0x124   :  { %5299 = vmatpush1.bf16.msra.mxu0 %v7564_v54  ;;  %4649 = vmatprep.mubr.bf16.mxu0 %v6716_v51  ;;  %v7597_v51 = vld [vmem:[%s9879_s3 + $0x3f4] ss:$8 sps:$4 sm:$0xff]   ;;  %v9243_v54 = vsel %vm8031_vm4, %v4806_v61, %v4810_v59  ;;  %v4874_v30 = vrot.slane %v4872_v20, 5  ;;  %v4900_v61 = vshll.u32 %v9036_v9, 16  ;;  %v4888_v27 = vrot.slane %v4886_v53, 5  ;;  %v9377_v53 = vld [vmem:[#allocation2 + $0xe0] sm:$0xff] }
 0x125   :  { %5300 = vmatprep.subr.bf16.mxu0 %v7572_v22  ;;  %2772 = vmatpush1.bf16.msra.mxu1 %v7581_v24  ;;  %v4832_v2 = vrot.slane %v4830_v60, 5  ;;  %v9262_v22 = vld [vmem:[%s9879_s3 + $0x814] ss:$8 sps:$4 sm:$0xff]   ;;  %v6546_v24 = vcombine.high %v9134_v23, %v9169_v4  ;;  %v6752_v47 = vcombine.high %v9243_v54, %v9253_v38  ;;  %v4871_v60 = vrot.slane %v4869_v19, 4 }
 0x126   :  { %2773 = vmatprep.subr.bf16.mxu1 %v7590_v42  ;;  %v4838_v42 = vrot.slane %v4836_v44, 5  ;;  %v9315_v9 = vld [vmem:[%s9879_s3 + $0x834] ss:$8 sps:$4 sm:$0xff]   ;;  %v6547_v20 = vcombine.low %v9173_v25, %v9219_v12 }
 0x127   :  { %2351 = vmatmul.mubr.bf16.gmra.mrb[28].mxu1 %v6509_v32  ;;  %v4833_v39 = vor.u32 %v4832_v2, %v4829_v34  ;;  %v4852_v32 = vrot.slane %v4850_v1, 5 }
 0x128   :  { %5301 = vmatpush1.bf16.msra.mxu0 %v7570_v43  ;;  %2777 = vmatprep.mubr.bf16.mxu1 %v6544_v48  ;;  %v4860_v48 = vrot.slane %v4858_v5, 5 }
 0x129   :  { %5302 = vmatprep.subr.bf16.mxu0 %v7580_v26  ;;  %2774 = vmatpush1.bf16.msra.mxu1 %v7588_v7  ;;  %v4834_v43 = vrot.slane %v4833_v39, 4  ;;  %v4777_v7 = vld [vmem:[#allocation2 + $0x78] sm:$0x11]  ;;  %v9338_v39 = vld [vmem:[%s9879_s3 + $0x844] ss:$8 sps:$4 sm:$0xff]  }
 0x12a   :  { %2775 = vmatprep.subr.bf16.mxu1 %v7597_v51  ;;  %v4883_v51 = vshrl.u32 %v9031_v62, 16  ;;  %v4861_v34 = vor.u32 %v4860_v48, %v4857_v29  ;;  %v4878_v2 = vshll.u32 %v4777_v7, 16 }
 0x12b   :  { %4650 = vmatmul.mubr.bf16.gmra.mrb[24].mxu0 %v6715_v11  ;;  %v4847_v11 = vor.u32 %v4846_v50, %v4843_v14  ;;  %v9296_v59 = vsel %vm8031_vm4, %v4834_v43, %v4838_v42  ;;  %v9324_v14 = vld [vmem:[%s9879_s3 + $0x830] ss:$8 sps:$4 sm:$0xff]   ;;  %v6550_v43 = vcombine.high %v9228_v58, %v9031_v62 }
 0x12c   :  { %5303 = vmatpush1.bf16.msra.mxu0 %v7578_v52  ;;  %4659 = vmatprep.mubr.bf16.mxu0 %v6718_v0  ;;  %v7598_v52 = vld [vmem:[%s9879_s3 + $0x7f0] ss:$8 sps:$4 sm:$0xff]   ;;  %v4875_v0 = vor.u32 %v4874_v30, %v4871_v60  ;;  %v4885_v50 = vrot.slane %v4883_v51, 4  ;;  %v4862_v44 = vrot.slane %v4861_v34, 4 }
 0x12d   :  { %5304 = vmatprep.subr.bf16.mxu0 %v7586_v3  ;;  %2776 = vmatpush1.bf16.msra.mxu1 %v7595_v8  ;;  %v4848_v26 = vrot.slane %v4847_v11, 4  ;;  %v6545_v3 = vcombine.low %v9134_v23, %v9169_v4  ;;  %v4864_v8 = vshll.u32 %v4775_v45, 16  ;;  %v6548_v23 = vcombine.high %v9173_v25, %v9219_v12  ;;  %v4779_v11 = vld [vmem:[#allocation2 + $0x88] sm:$0x11]  ;;  %v158_v42 = vld [vmem:[#allocation2 + $0x138] sm:$0x11] }
 0x12e   :  { %6912 = vmatprep.subr.bf16.mxu1 %v9226_v56  ;;  %v6751_v4 = vcombine.low %v9243_v54, %v9253_v38  ;;  %v4880_v54 = vrot.slane %v4878_v2, 5  ;;  %v4911_v38 = vshrl.u32 %v9326_v49, 16  ;;  %v4892_v25 = vshll.u32 %v4779_v11, 16  ;;  %v4785_v51 = vld [vmem:[#allocation2 + $0xd8] sm:$0x11] }
 0x12f   :  { %v9304_v57 = vsel %vm8031_vm4, %v4848_v26, %v4852_v32  ;;  %v4866_v1 = vrot.slane %v4864_v8, 5  ;;  %v4906_v12 = vshll.u32 %v4781_v28, 16  ;;  %v4783_v26 = vld [vmem:[#allocation2 + $0xc8] sm:$0x11]  ;;  %v159_v32 = vsel %vm7888_vm11, 0, %v158_v42  ;;  %v9394_v8 = vld [vmem:[#allocation2 + $0xb0] sm:$0xff] }
 0x130   :  { %5305 = vmatpush1.bf16.msra.mxu0 %v7584_v15  ;;  %2778 = vmatmul.mubr.bf16.vlgmr.msra.gmra.mrb[0].mxu1 %v6543_v31  ;;  %v6754_v18 = vcombine.high %v9296_v59, %v9304_v57  ;;  %v4902_v15 = vrot.slane %v4900_v61, 5  ;;  %v9330_v31 = vld [vmem:[#allocation2 + $0xd0] sm:$0xff]  ;;  %v4913_v45 = vrot.slane %v4911_v38, 4  ;;  %160 = vst [vmem:[#allocation2 + $0x138] sm:$0x11] %v159_v32  ;;  %v4894_v55 = vrot.slane %v4892_v25, 5 }
 0x131   :  { %5306 = vmatprep.subr.bf16.mxu0 %v7594_v63  ;;  %6928 = vmatpush1.bf16.msra.mxu1 %v9248_v46  ;;  %v4876_v63 = vrot.slane %v4875_v0, 4  ;;  %v4925_v5 = vshrl.u32 %v9330_v31, 16  ;;  %v4928_v19 = vshll.u32 %v9330_v31, 16  ;;  %v4934_v34 = vshll.u32 %v4785_v51, 16  ;;  %v4787_v11 = vld [vmem:[#allocation2 + $0xe8] sm:$0x11] }
 0x132   :  { %6913 = vmatprep.subr.bf16.mxu1 %v9262_v22  ;;  %2787 = vmatprep.mubr.bf16.mxu1 %v6546_v24  ;;  %v9350_v24 = vld [vmem:[%s9879_s3 + $0x840] ss:$8 sps:$4 sm:$0xff]   ;;  %v4939_v0 = vshrl.u32 %v9377_v53, 16  ;;  %v6549_v2 = vcombine.low %v9228_v58, %v9031_v62  ;;  %v6554_v32 = vcombine.high %v9330_v31, %v9377_v53 }
 0x133   :  { %4660 = vmatmul.mubr.bf16.gmra.mrb[28].mxu0 %v6717_v17  ;;  %v4889_v17 = vor.u32 %v4888_v27, %v4885_v50  ;;  %v4927_v48 = vrot.slane %v4925_v5, 4  ;;  %v4930_v60 = vrot.slane %v4928_v19, 5  ;;  %v9416_v62 = vld [vmem:[%s9879_s3 + $0x860] ss:$8 sps:$4 sm:$0xff]   ;;  %v6552_v27 = vcombine.high %v9394_v8, %v9326_v49  ;;  %v9436_v5 = vld [vmem:[%s9879_s3 + $0x870] ss:$8 sps:$4 sm:$0xff]  }
 0x134   :  { %5307 = vmatpush1.bf16.msra.mxu0 %v7592_v13  ;;  %5310 = vmatprep.mubr.bf16.mxu0 %v6752_v47  ;;  %v4903_v13 = vor.u32 %v4902_v15, %v4899_v6  ;;  %v6753_v47 = vcombine.low %v9296_v59, %v9304_v57  ;;  %v9386_v59 = vld [vmem:[#allocation2 + $0xf0] sm:$0xff]  ;;  %v4789_v19 = vld [vmem:[#allocation2 + $0xf8] sm:$0x11] }
 0x135   :  { %5308 = vmatprep.subr.bf16.mxu0 %v7600_v21  ;;  %6929 = vmatpush1.bf16.msra.mxu1 %v9279_v40  ;;  %v9356_v21 = vsel %vm8031_vm4, %v4862_v44, %v4866_v1  ;;  %v4890_v7 = vrot.slane %v4889_v17, 4  ;;  %v4931_v57 = vor.u32 %v4930_v60, %v4927_v48  ;;  %v4956_v50 = vshll.u32 %v9386_v59, 16  ;;  %v9446_v17 = vld [vmem:[#allocation2 + $0x110] sm:$0xff] }
 0x136   :  { %6914 = vmatprep.subr.bf16.mxu1 %v9286_v33  ;;  %v4936_v1 = vrot.slane %v4934_v34, 5  ;;  %v4962_v42 = vshll.u32 %v4789_v19, 16  ;;  %v5009_v34 = vshrl.u32 %v9200_v41, 16  ;;  %v5503_v19 = vld [vmem:[#allocation2 + $0xc0] sm:$0xee] }
 0x137   :  { %v4932_v44 = vrot.slane %v4931_v57, 4  ;;  %v4995_v57 = vshrl.u32 %v9193_v35, 16 }
 0x138   :  { %5309 = vmatpush1.bf16.msra.mxu0 %v7598_v52  ;;  %2788 = vmatmul.mubr.bf16.gmra.mrb[4].mxu1 %v6545_v3  ;;  %v4904_v52 = vrot.slane %v4903_v13, 4  ;;  %v9392_v3 = vld [vmem:[%s9879_s3 + $0x864] ss:$8 sps:$4 sm:$0xff]   ;;  %v6551_v13 = vcombine.low %v9394_v8, %v9326_v49  ;;  %v4964_v51 = vrot.slane %v4962_v42, 5 }
 0x139   :  { %5871 = vmatprep.subr.bf16.mxu0 %v9226_v56  ;;  %6930 = vmatpush1.bf16.msra.mxu1 %v9309_v37  ;;  %v4914_v56 = vshll.u32 %v9326_v49, 16 }
 0x13a   :  { %6915 = vmatprep.subr.bf16.mxu1 %v9315_v9  ;;  %2797 = vmatprep.mubr.bf16.mxu1 %v6548_v23  ;;  %v4942_v23 = vshll.u32 %v9377_v53, 16 }
 0x13b   :  { %5311 = vmatmul.mubr.bf16.vlgmr.msra.gmra.mrb[0].mxu0 %v6751_v4  ;;  %v4916_v29 = vrot.slane %v4914_v56, 5  ;;  %v4953_v4 = vshrl.u32 %v9386_v59, 16  ;;  %v4958_v56 = vrot.slane %v4956_v50, 5 }
 0x13c   :  { %5872 = vmatpush1.bf16.msra.mxu0 %v9248_v46  ;;  %5320 = vmatprep.mubr.bf16.mxu0 %v6754_v18  ;;  %v9360_v46 = vsel %vm8031_vm4, %v4876_v63, %v4880_v54  ;;  %v9407_v18 = vsel %vm8031_vm4, %v4890_v7, %v4894_v55  ;;  %v4941_v63 = vrot.slane %v4939_v0, 4  ;;  %v4944_v28 = vrot.slane %v4942_v23, 5  ;;  %v4791_v55 = vld [vmem:[#allocation2 + $0x108] sm:$0x11] }
 0x13d   :  { %5873 = vmatprep.subr.bf16.mxu0 %v9262_v22  ;;  %6931 = vmatpush1.bf16.msra.mxu1 %v9324_v14  ;;  %v9368_v22 = vld [vmem:[%s9879_s3 + $0x854] ss:$8 sps:$4 sm:$0xff]   ;;  %v6756_v30 = vcombine.high %v9356_v21, %v9360_v46  ;;  %v4917_v61 = vor.u32 %v4916_v29, %v4913_v45  ;;  %v6755_v58 = vcombine.low %v9356_v21, %v9360_v46  ;;  %v4955_v38 = vrot.slane %v4953_v4, 4  ;;  %v9483_v29 = vld [vmem:[%s9879_s3 + $0x890] ss:$8 sps:$4 sm:$0xff]  }
 0x13e   :  { %6916 = vmatprep.subr.bf16.mxu1 %v9338_v39  ;;  %v4948_v21 = vshll.u32 %v4787_v11, 16  ;;  %v9457_v46 = vsel %vm8031_vm4, %v4932_v44, %v4936_v1  ;;  %v4945_v25 = vor.u32 %v4944_v28, %v4941_v63  ;;  %v4976_v23 = vshll.u32 %v4791_v55, 16  ;;  %v4795_v11 = vld [vmem:[#allocation2 + $0x128] sm:$0x11] }
 0x13f   :  { %v4918_v15 = vrot.slane %v4917_v61, 4  ;;  %v5011_v28 = vrot.slane %v5009_v34, 4  ;;  %v9607_v34 = vld [vmem:[%s9879_s3 + $0x8f4] ss:$8 sps:$4 sm:$0xff]  }
 0x140   :  { %5874 = vmatpush1.bf16.msra.mxu0 %v9279_v40  ;;  %2798 = vmatmul.mubr.bf16.gmra.mrb[8].mxu1 %v6547_v20  ;;  %v4908_v40 = vrot.slane %v4906_v12, 5  ;;  %v9444_v20 = vld [vmem:[#allocation2 + $0x100] sm:$0xff]  ;;  %v4959_v12 = vor.u32 %v4958_v56, %v4955_v38  ;;  %v4950_v48 = vrot.slane %v4948_v21, 5 }
 0x141   :  { %5875 = vmatprep.subr.bf16.mxu0 %v9286_v33  ;;  %6932 = vmatpush1.bf16.msra.mxu1 %v9350_v24  ;;  %v4920_v33 = vshll.u32 %v4783_v26, 16  ;;  %v4967_v49 = vshrl.u32 %v9444_v20, 16  ;;  %v4984_v26 = vshll.u32 %v9446_v17, 16  ;;  %v9542_v56 = vld [vmem:[%s9879_s3 + $0x8c4] ss:$8 sps:$4 sm:$0xff]   ;;  %v6555_v21 = vcombine.low %v9386_v59, %v9444_v20 }
 0x142   :  { %6917 = vmatprep.subr.bf16.mxu1 %v9368_v22  ;;  %2807 = vmatprep.mubr.bf16.mxu1 %v6550_v43  ;;  %v4981_v43 = vshrl.u32 %v9446_v17, 16  ;;  %v4960_v7 = vrot.slane %v4959_v12, 4  ;;  %v5004_v12 = vshll.u32 %v4795_v11, 16  ;;  %v5514_v11 = vld [vmem:[#allocation2 + $0x118] sm:$0x11] }
 0x143   :  { %5321 = vmatmul.mubr.bf16.gmra.mrb[4].mxu0 %v6753_v47  ;;  %v4922_v6 = vrot.slane %v4920_v33, 5  ;;  %v9464_v47 = vld [vmem:[%s9879_s3 + $0x880] ss:$8 sps:$4 sm:$0xff]   ;;  %v4986_v61 = vrot.slane %v4984_v26, 5 }
 0x144   :  { %5876 = vmatpush1.bf16.msra.mxu0 %v9309_v37  ;;  %5330 = vmatprep.mubr.bf16.mxu0 %v6756_v30  ;;  %v9411_v37 = vsel %vm8031_vm4, %v4904_v52, %v4908_v40  ;;  %v4946_v30 = vrot.slane %v4945_v25, 4  ;;  %v4793_v52 = vld [vmem:[#allocation2 + $0x118] sm:$0x11]  ;;  %v4969_v40 = vrot.slane %v4967_v49, 4  ;;  %v4983_v8 = vrot.slane %v4981_v43, 4 }
 0x145   :  { %5877 = vmatprep.subr.bf16.mxu0 %v9315_v9  ;;  %6933 = vmatpush1.bf16.msra.mxu1 %v9384_v10  ;;  %v9424_v9 = vld [vmem:[%s9879_s3 + $0x874] ss:$8 sps:$4 sm:$0xff]   ;;  %v6758_v54 = vcombine.high %v9407_v18, %v9411_v37  ;;  %v6757_v45 = vcombine.low %v9407_v18, %v9411_v37  ;;  %v4990_v4 = vshll.u32 %v4793_v52, 16  ;;  %v9510_v50 = vsel %vm8031_vm4, %v4960_v7, %v4964_v51  ;;  %v9515_v18 = vld [vmem:[%s9879_s3 + $0x8a0] ss:$8 sps:$4 sm:$0xff]  }
 0x146   :  { %6918 = vmatprep.subr.bf16.mxu1 %v9392_v3  ;;  %v9502_v0 = vsel %vm8031_vm4, %v4946_v30, %v4950_v48  ;;  %v6807_v43 = vrot.slane %v5503_v19, 9  ;;  %v5006_v7 = vrot.slane %v5004_v12, 5  ;;  %v5492_v19 = vld [vmem:[#allocation2 + $0x48] sm:$0x11]  ;;  %v5605_v12 = vrot.slane %v5514_v11, 5 }
 0x147   :  { %v4992_v44 = vrot.slane %v4990_v4, 5 }
 0x148   :  { %5878 = vmatpush1.bf16.msra.mxu0 %v9324_v14  ;;  %2808 = vmatmul.mubr.bf16.gmra.mrb[12].mxu1 %v6549_v2  ;;  %v9442_v14 = vld [vmem:[%s9879_s3 + $0x884] ss:$8 sps:$4 sm:$0xff]   ;;  %v6553_v2 = vcombine.low %v9330_v31, %v9377_v53  ;;  %v9522_v31 = vld [vmem:[%s9879_s3 + $0x8b4] ss:$8 sps:$4 sm:$0xff]   ;;  %v6556_v53 = vcombine.high %v9386_v59, %v9444_v20  ;;  %v9562_v59 = vld [vmem:[%s9879_s3 + $0x8c0] ss:$8 sps:$4 sm:$0xff]  }
 0x149   :  { %5879 = vmatprep.subr.bf16.mxu0 %v9338_v39  ;;  %6934 = vmatpush1.bf16.msra.mxu1 %v9416_v62  ;;  %v9450_v39 = vsel %vm8031_vm4, %v4918_v15, %v4922_v6  ;;  %v6762_v6 = vcombine.high %v9502_v0, %v9510_v50  ;;  %v4978_v15 = vrot.slane %v4976_v23, 5  ;;  %v5489_v23 = vld [vmem:[#allocation2 + $0x30] sm:$0xee] }
 0x14a   :  { %6919 = vmatprep.subr.bf16.mxu1 %v9424_v9  ;;  %2817 = vmatprep.mubr.bf16.mxu1 %v6552_v27  ;;  %v6760_v60 = vcombine.high %v9450_v39, %v9457_v46  ;;  %v4997_v27 = vrot.slane %v4995_v57, 4  ;;  %v6557_v57 = vcombine.low %v9446_v17, %v9193_v35 }
 0x14b   :  { %5331 = vmatmul.mubr.bf16.gmra.mrb[8].mxu0 %v6755_v58  ;;  %v5012_v58 = vshll.u32 %v9200_v41, 16  ;;  %v9534_v41 = vld [vmem:[%s9879_s3 + $0x8b0] ss:$8 sps:$4 sm:$0xff]  }
 0x14c   :  { %5880 = vmatpush1.bf16.msra.mxu0 %v9350_v24  ;;  %5340 = vmatprep.mubr.bf16.mxu0 %v6758_v54  ;;  %v4970_v24 = vshll.u32 %v9444_v20, 16 }
 0x14d   :  { %5881 = vmatprep.subr.bf16.mxu0 %v9368_v22  ;;  %6935 = vmatpush1.bf16.msra.mxu1 %v9436_v5  ;;  %v9474_v22 = vld [vmem:[%s9879_s3 + $0x894] ss:$8 sps:$4 sm:$0xff]   ;;  %v5014_v38 = vrot.slane %v5012_v58, 5 }
 0x14e   :  { %6920 = vmatprep.subr.bf16.mxu1 %v9442_v14  ;;  %v4972_v33 = vrot.slane %v4970_v24, 5  ;;  %v9568_v24 = vld [vmem:[%s9879_s3 + $0x8d4] ss:$8 sps:$4 sm:$0xff]  }
 0x14f   :  { %v5015_v20 = vor.u32 %v5014_v38, %v5011_v28 }
 0x150   :  { %5882 = vmatpush1.bf16.msra.mxu0 %v9384_v10  ;;  %2818 = vmatmul.mubr.bf16.gmra.mrb[16].mxu1 %v6551_v13  ;;  %v9494_v10 = vld [vmem:[%s9879_s3 + $0x8a4] ss:$8 sps:$4 sm:$0xff]   ;;  %v4973_v37 = vor.u32 %v4972_v33, %v4969_v40  ;;  %v5506_v13 = vld [vmem:[#allocation2 + $0xd8] sm:$0x11] }
 0x151   :  { %5883 = vmatprep.subr.bf16.mxu0 %v9392_v3  ;;  %6936 = vmatpush1.bf16.msra.mxu1 %v9464_v47  ;;  %v4998_v3 = vshll.u32 %v9193_v35, 16  ;;  %v5016_v51 = vrot.slane %v5015_v20, 4  ;;  %v5507_v33 = vld [vmem:[#allocation2 + $0xe0] sm:$0xee]  ;;  %v5561_v20 = vrot.slane %v5492_v19, 5 }
 0x152   :  { %6921 = vmatprep.subr.bf16.mxu1 %v9474_v22  ;;  %2827 = vmatprep.mubr.bf16.mxu1 %v6554_v32  ;;  %v4974_v63 = vrot.slane %v4973_v37, 4  ;;  %v5589_v32 = vrot.slane %v5506_v13, 5  ;;  %v5494_v13 = vld [vmem:[#allocation2 + $0x58] sm:$0x11] }
 0x153   :  { %5341 = vmatmul.mubr.bf16.gmra.mrb[12].mxu0 %v6757_v45  ;;  %v5000_v1 = vrot.slane %v4998_v3, 5  ;;  %v6761_v45 = vcombine.low %v9502_v0, %v9510_v50  ;;  %v9602_v3 = vld [vmem:[%s9879_s3 + $0x8e0] ss:$8 sps:$4 sm:$0xff]   ;;  %v5490_v50 = vld [vmem:[#allocation2 + $0x38] sm:$0x11] }
 0x154   :  { %5884 = vmatpush1.bf16.msra.mxu0 %v9416_v62  ;;  %5350 = vmatprep.mubr.bf16.mxu0 %v6760_v60  ;;  %v4987_v62 = vor.u32 %v4986_v61, %v4983_v8  ;;  %v9553_v42 = vsel %vm8031_vm4, %v4974_v63, %v4978_v15  ;;  %v9580_v60 = vld [vmem:[%s9879_s3 + $0x8d0] ss:$8 sps:$4 sm:$0xff]   ;;  %v5508_v8 = vld [vmem:[#allocation2 + $0xe8] sm:$0x11]  ;;  %v5557_v15 = vrot.slane %v5490_v50, 5 }
 0x155   :  { %5885 = vmatprep.subr.bf16.mxu0 %v9424_v9  ;;  %6937 = vmatpush1.bf16.msra.mxu1 %v9483_v29  ;;  %v6759_v9 = vcombine.low %v9450_v39, %v9457_v46  ;;  %v5504_v39 = vld [vmem:[#allocation2 + $0xc8] sm:$0x11]  ;;  %v6558_v46 = vcombine.high %v9446_v17, %v9193_v35  ;;  %v5001_v25 = vor.u32 %v5000_v1, %v4997_v27  ;;  %v5509_v61 = vld [vmem:[#allocation2 + $0xf0] sm:$0xee]  ;;  %v5487_v17 = vld [vmem:[#allocation2 + $0x20] sm:$0xee] }
 0x156   :  { %6922 = vmatprep.subr.bf16.mxu1 %v9494_v10  ;;  %v4988_v54 = vrot.slane %v4987_v62, 4  ;;  %v5585_v26 = vrot.slane %v5504_v39, 5  ;;  %v5593_v37 = vrot.slane %v5508_v8, 5  ;;  %v6810_v62 = vrot.slane %v5509_v61, 9  ;;  %v5511_v1 = vld [vmem:[#allocation2 + $0x100] sm:$0xee] }
 0x157   :  { %v5002_v30 = vrot.slane %v5001_v25, 4  ;;  %v5512_v63 = vld [vmem:[#allocation2 + $0x108] sm:$0x11]  ;;  %v5493_v39 = vld [vmem:[#allocation2 + $0x50] sm:$0xee] }
 0x158   :  { %5886 = vmatpush1.bf16.msra.mxu0 %v9436_v5  ;;  %2828 = vmatmul.mubr.bf16.gmra.mrb[20].mxu1 %v6553_v2  ;;  %v4797_v5 = vld [vmem:[#allocation2 + $0x138] sm:$0x11]  ;;  %v9590_v52 = vsel %vm8497_vm7, %v6807_v43, %v5585_v26  ;;  %v5488_v2 = vld [vmem:[#allocation2 + $0x28] sm:$0x11] }
 0x159   :  { %5887 = vmatprep.subr.bf16.mxu0 %v9442_v14  ;;  %6938 = vmatpush1.bf16.msra.mxu1 %v9515_v18  ;;  %v5505_v14 = vld [vmem:[#allocation2 + $0xd0] sm:$0xee]  ;;  %v5018_v49 = vshll.u32 %v4797_v5, 16  ;;  %v5007_v0 = vsel %vm8031_vm4, %v5002_v30, %v5006_v7  ;;  %v5553_v27 = vrot.slane %v5488_v2, 5  ;;  %v5491_v5 = vld [vmem:[#allocation2 + $0x40] sm:$0xee] }
 0x15a   :  { %6923 = vmatprep.subr.bf16.mxu1 %v9522_v31  ;;  %2837 = vmatprep.mubr.bf16.mxu1 %v6556_v53  ;;  %v9626_v53 = vld [vmem:[%s9879_s3 + $0x8f0] ss:$8 sps:$4 sm:$0xff]  }
 0x15b   :  { %5351 = vmatmul.mubr.bf16.gmra.mrb[16].mxu0 %v6759_v9  ;;  %v5020_v55 = vrot.slane %v5018_v49, 5  ;;  %v6799_v9 = vrot.slane %v5487_v17, 9  ;;  %v6802_v49 = vrot.slane %v5493_v39, 9 }
 0x15c   :  { %5888 = vmatpush1.bf16.msra.mxu0 %v9464_v47  ;;  %5360 = vmatprep.mubr.bf16.mxu0 %v6762_v6  ;;  %v9557_v47 = vsel %vm8031_vm4, %v4988_v54, %v4992_v44  ;;  %v6800_v6 = vrot.slane %v5489_v23, 9  ;;  %v5513_v54 = vld [vmem:[#allocation2 + $0x110] sm:$0xee] }
 0x15d   :  { %5889 = vmatprep.subr.bf16.mxu0 %v9474_v22  ;;  %6939 = vmatpush1.bf16.msra.mxu1 %v9534_v41  ;;  %v6808_v22 = vrot.slane %v5505_v14, 9  ;;  %v6764_v48 = vcombine.high %v9553_v42, %v9557_v47  ;;  %v5021_v35 = vsel %vm8031_vm4, %v5016_v51, %v5020_v55  ;;  %v5554_v38 = vsel %vm8497_vm7, %v6799_v9, %v5553_v27  ;;  %v5495_v51 = vld [vmem:[#allocation2 + $0x60] sm:$0xee]  ;;  %v5496_v55 = vld [vmem:[#allocation2 + $0x68] sm:$0x11] }
 0x15e   :  { %6924 = vmatprep.subr.bf16.mxu1 %v9542_v56  ;;  %v6766_v16 = vcombine.high %v5007_v0, %v5021_v35  ;;  %v6812_v25 = vrot.slane %v5513_v54, 9 }
 0x15f   :  { %v9594_v40 = vsel %vm8497_vm7, %v6808_v22, %v5589_v32  ;;  %v5515_v22 = vld [vmem:[#allocation2 + $0x120] sm:$0xee]  ;;  %v5516_v32 = vld [vmem:[#allocation2 + $0x128] sm:$0x11] }
 0x160   :  { %5890 = vmatpush1.bf16.msra.mxu0 %v9483_v29  ;;  %2838 = vmatmul.mubr.bf16.gmra.mrb[24].mxu1 %v6555_v21  ;;  %v9586_v29 = vld [vmem:[%s9879_s3 + $0x8e4] ss:$8 sps:$4 sm:$0xff]   ;;  %v6824_v4 = vcombine.high %v9590_v52, %v9594_v40  ;;  %v6823_v28 = vcombine.low %v9590_v52, %v9594_v40  ;;  %v6811_v21 = vrot.slane %v5511_v1, 9  ;;  %v5606_v26 = vsel %vm8497_vm7, %v6812_v25, %v5605_v12  ;;  %v5498_v40 = vld [vmem:[#allocation2 + $0x78] sm:$0x11] }
 0x161   :  { %5891 = vmatprep.subr.bf16.mxu0 %v9494_v10  ;;  %6940 = vmatpush1.bf16.msra.mxu1 %v9562_v59  ;;  %v5510_v10 = vld [vmem:[#allocation2 + $0xf8] sm:$0x11]  ;;  %v5609_v8 = vrot.slane %v5516_v32, 5  ;;  %v5573_v17 = vrot.slane %v5498_v40, 5 }
 0x162   :  { %6925 = vmatprep.subr.bf16.mxu1 %v9568_v24  ;;  %2847 = vmatprep.mubr.bf16.mxu1 %v6558_v46  ;;  %v5597_v58 = vrot.slane %v5510_v10, 5  ;;  %v5601_v46 = vrot.slane %v5512_v63, 5 }
 0x163   :  { %5361 = vmatmul.mubr.bf16.gmra.mrb[20].mxu0 %v6761_v45  ;;  %v5517_v45 = vld [vmem:[#allocation2 + $0x130] sm:$0xee] }
 0x164   :  { %5892 = vmatpush1.bf16.msra.mxu0 %v9515_v18  ;;  %5370 = vmatprep.mubr.bf16.mxu0 %v6764_v48  ;;  %v6809_v18 = vrot.slane %v5507_v33, 9  ;;  %v5598_v44 = vsel %vm8497_vm7, %v6810_v62, %v5597_v58  ;;  %v5602_v43 = vsel %vm8497_vm7, %v6811_v21, %v5601_v46  ;;  %v5518_v48 = vld [vmem:[#allocation2 + $0x138] sm:$0x11]  ;;  %v6813_v33 = vrot.slane %v5515_v22, 9  ;;  %v5500_v58 = vld [vmem:[#allocation2 + $0x88] sm:$0x11] }
 0x165   :  { %5893 = vmatprep.subr.bf16.mxu0 %v9522_v31  ;;  %6941 = vmatpush1.bf16.msra.mxu1 %v9580_v60  ;;  %v6763_v31 = vcombine.low %v9553_v42, %v9557_v47  ;;  %v6765_v42 = vcombine.low %v5007_v0, %v5021_v35  ;;  %v6828_v52 = vcombine.high %v5602_v43, %v5606_v26  ;;  %v6814_v61 = vrot.slane %v5517_v45, 9 }
 0x166   :  { %6926 = vmatprep.subr.bf16.mxu1 %v9586_v29  ;;  %v5613_v10 = vrot.slane %v5518_v48, 5  ;;  %v5569_v0 = vrot.slane %v5496_v55, 5  ;;  %v5610_v2 = vsel %vm8497_vm7, %v6813_v33, %v5609_v8 }
 0x168   :  { %5894 = vmatpush1.bf16.msra.mxu0 %v9534_v41  ;;  %2848 = vmatmul.mubr.bf16.gmra.mrb[28].mxu1 %v6557_v57  ;;  %v5594_v41 = vsel %vm8497_vm7, %v6809_v18, %v5593_v37  ;;  %v5614_v23 = vsel %vm8497_vm7, %v6814_v61, %v5613_v10  ;;  %v5499_v37 = vld [vmem:[#allocation2 + $0x80] sm:$0xee] }
 0x169   :  { %5895 = vmatprep.subr.bf16.mxu0 %v9542_v56  ;;  %6942 = vmatpush1.bf16.msra.mxu1 %v9602_v3  ;;  %v5558_v56 = vsel %vm8497_vm7, %v6800_v6, %v5557_v15  ;;  %v6826_v14 = vcombine.high %v5594_v41, %v5598_v44  ;;  %v6830_v62 = vcombine.high %v5610_v2, %v5614_v23  ;;  %v6805_v27 = vrot.slane %v5499_v37, 9 }
 0x16a   :  { %6927 = vmatprep.subr.bf16.mxu1 %v9607_v34  ;;  %5943 = vmatprep.mubr.bf16.mxu1 %v6824_v4  ;;  %v6816_v47 = vcombine.high %v5554_v38, %v5558_v56  ;;  %v6815_v57 = vcombine.low %v5554_v38, %v5558_v56  ;;  %v6827_v4 = vcombine.low %v5602_v43, %v5606_v26  ;;  %v5577_v6 = vrot.slane %v5500_v58, 5 }
 0x16b   :  { %5371 = vmatmul.mubr.bf16.gmra.mrb[24].mxu0 %v6763_v31  ;;  %v5501_v31 = vld [vmem:[#allocation2 + $0x90] sm:$0xee] }
 0x16c   :  { %5896 = vmatpush1.bf16.msra.mxu0 %v9562_v59  ;;  %5380 = vmatprep.mubr.bf16.mxu0 %v6766_v16  ;;  %v6801_v59 = vrot.slane %v5491_v5, 9  ;;  %v5502_v16 = vld [vmem:[#allocation2 + $0x98] sm:$0x11]  ;;  %v6806_v15 = vrot.slane %v5501_v31, 9  ;;  %v5578_v1 = vsel %vm8497_vm7, %v6805_v27, %v5577_v6 }
 0x16d   :  { %5897 = vmatprep.subr.bf16.mxu0 %v9568_v24  ;;  %6943 = vmatpush1.bf16.msra.mxu1 %v9626_v53  ;;  %v5565_v24 = vrot.slane %v5494_v13, 5 }
 0x16e   :  { %v5562_v30 = vsel %vm8497_vm7, %v6801_v59, %v5561_v20 }
 0x16f   :  { %v5566_v7 = vsel %vm8497_vm7, %v6802_v49, %v5565_v24 }
 0x170   :  { %5898 = vmatpush1.bf16.msra.mxu0 %v9580_v60  ;;  %5944 = vmatmul.mubr.bf16.vlgmr.msra.gmra.mrb[32].mxu1 %v6823_v28  ;;  %v6825_v60 = vcombine.low %v5594_v41, %v5598_v44  ;;  %v5581_v41 = vrot.slane %v5502_v16, 5  ;;  %v6829_v44 = vcombine.low %v5610_v2, %v5614_v23 }
 0x171   :  { %5899 = vmatprep.subr.bf16.mxu0 %v9586_v29  ;;  %5953 = vmatprep.mubr.bf16.mxu1 %v6826_v14  ;;  %v5497_v29 = vld [vmem:[#allocation2 + $0x70] sm:$0xee] }
 0x172   :  { %v6804_v35 = vrot.slane %v5497_v29, 9  ;;  %v5582_v63 = vsel %vm8497_vm7, %v6806_v15, %v5581_v41 }
 0x173   :  { %5381 = vmatmul.mubr.bf16.gmra.mrb[28].mxu0 %v6765_v42  ;;  %v6822_v11 = vcombine.high %v5578_v1, %v5582_v63  ;;  %v6821_v28 = vcombine.low %v5578_v1, %v5582_v63 }
 0x174   :  { %5900 = vmatpush1.bf16.msra.mxu0 %v9602_v3  ;;  %5903 = vmatprep.mubr.bf16.mxu0 %v6816_v47  ;;  %v6818_v3 = vcombine.high %v5562_v30, %v5566_v7  ;;  %v5574_v18 = vsel %vm8497_vm7, %v6804_v35, %v5573_v17 }
 0x175   :  { %5901 = vmatprep.subr.bf16.mxu0 %v9607_v34  ;;  %v6803_v34 = vrot.slane %v5495_v51, 9 }
 0x177   :  { %v5570_v50 = vsel %vm8497_vm7, %v6803_v34, %v5569_v0 }
 0x178   :  { %5902 = vmatpush1.bf16.msra.mxu0 %v9626_v53  ;;  %5954 = vmatmul.mubr.bf16.gmra.mrb[36].mxu1 %v6825_v60  ;;  %v6817_v53 = vcombine.low %v5562_v30, %v5566_v7  ;;  %v6820_v9 = vcombine.high %v5570_v50, %v5574_v18  ;;  %v6819_v54 = vcombine.low %v5570_v50, %v5574_v18 }
 0x179   :  { %5963 = vmatprep.mubr.bf16.mxu1 %v6828_v52 }
 0x17b   :  { %5904 = vmatmul.mubr.bf16.vlgmr.msra.gmra.mrb[0].mxu0 %v6815_v57 }
 0x17c   :  { %5913 = vmatprep.mubr.bf16.mxu0 %v6818_v3 }
 0x180   :  { %5964 = vmatmul.mubr.bf16.gmra.mrb[40].mxu1 %v6827_v4 }
 0x181   :  { %5973 = vmatprep.mubr.bf16.mxu1 %v6830_v62 }
 0x183   :  { %5914 = vmatmul.mubr.bf16.gmra.mrb[4].mxu0 %v6817_v53 }
 0x184   :  { %5923 = vmatprep.mubr.bf16.mxu0 %v6820_v9 }
 0x188   :  { %5974 = vmatmul.mubr.bf16.gmra.mrb[44].mxu1 %v6829_v44 }
 0x18b   :  { %5924 = vmatmul.mubr.bf16.gmra.mrb[8].mxu0 %v6819_v54 }
 0x18c   :  { %5933 = vmatprep.mubr.bf16.mxu0 %v6822_v11 }
 0x193   :  { %5934 = vmatmul.mubr.bf16.gmra.mrb[12].mxu0 %v6821_v28 }
 0x203   :  { %v9667_v38 = vpop.f32.mrb[0].mxu1 }
 0x204   :  { %v9669_v56 = vpop.f32.mrb[1].mxu1 }
 0x205   :  { %v9671_v5 = vpop.f32.mrb[2].mxu1 }
 0x206   :  { %v9673_v19 = vpop.f32.mrb[3].mxu1 }
 0x20b   :  { %v9675_v39 = vpop.f32.mrb[4].mxu1 }
 0x20c   :  { %v9677_v14 = vpop.f32.mrb[5].mxu1 }
 0x20d   :  { %v9679_v36 = vpop.f32.mrb[6].mxu1 }
 0x20e   :  { %v9681_v13 = vpop.f32.mrb[7].mxu1 }
 0x213   :  { %v9683_v21 = vpop.f32.mrb[8].mxu1 }
 0x214   :  { %v9685_v46 = vpop.f32.mrb[9].mxu1 }
 0x215   :  { %v9687_v25 = vpop.f32.mrb[10].mxu1 }
 0x216   :  { %v9689_v12 = vpop.f32.mrb[11].mxu1 }
 0x21b   :  { %v9691_v42 = vpop.f32.mrb[12].mxu1 }
 0x21c   :  { %v9693_v47 = vpop.f32.mrb[13].mxu1 }
 0x21d   :  { %v9695_v59 = vpop.f32.mrb[14].mxu1 }
 0x21e   :  { %v9697_v20 = vpop.f32.mrb[15].mxu1 }
 0x223   :  { %v2819_v49 = vpop.f32.mrb[16].mxu1 }
 0x224   :  { %v2821_v24 = vpop.f32.mrb[17].mxu1 }
 0x225   :  { %v2823_v43 = vpop.f32.mrb[18].mxu1 }
 0x226   :  { %v2825_v26 = vpop.f32.mrb[19].mxu1 }
 0x22b   :  { %v2829_v22 = vpop.f32.mrb[20].mxu1 }
 0x22c   :  { %v2831_v32 = vpop.f32.mrb[21].mxu1 }
 0x22d   :  { %v2833_v45 = vpop.f32.mrb[22].mxu1 }
 0x22e   :  { %v5352_v48 = vpop.f32.mrb[16].mxu0  ;;  %v2835_v60 = vpop.f32.mrb[23].mxu1 }
 0x22f   :  { %v6960_v30 = vadd.f32 %v5352_v48, %v2819_v49  ;;  %v5354_v7 = vpop.f32.mrb[17].mxu0 }
 0x230   :  { %v6962_v51 = vadd.f32 %v5354_v7, %v2821_v24  ;;  %v5356_v55 = vpop.f32.mrb[18].mxu0 }
 0x231   :  { %v6964_v29 = vadd.f32 %v5356_v55, %v2823_v43  ;;  %v5358_v52 = vpop.f32.mrb[19].mxu0 }
 0x232   :  { %v6966_v40 = vadd.f32 %v5358_v52, %v2825_v26 }
 0x233   :  { %v2839_v33 = vpop.f32.mrb[24].mxu1 }
 0x234   :  { %v2841_v8 = vpop.f32.mrb[25].mxu1 }
 0x235   :  { %v2843_v61 = vpop.f32.mrb[26].mxu1 }
 0x236   :  { %v5362_v10 = vpop.f32.mrb[20].mxu0  ;;  %v2845_v57 = vpop.f32.mrb[27].mxu1 }
 0x237   :  { %v6968_v3 = vadd.f32 %v5362_v10, %v2829_v22  ;;  %v5364_v34 = vpop.f32.mrb[21].mxu0 }
 0x238   :  { %v6970_v0 = vadd.f32 %v5364_v34, %v2831_v32  ;;  %v5366_v35 = vpop.f32.mrb[22].mxu0 }
 0x239   :  { %v6972_v17 = vadd.f32 %v5366_v35, %v2833_v45  ;;  %v5368_v2 = vpop.f32.mrb[23].mxu0 }
 0x23a   :  { %v6974_v23 = vadd.f32 %v5368_v2, %v2835_v60 }
 0x23b   :  { %v2849_v4 = vpop.f32.mrb[28].mxu1 }
 0x23c   :  { %v2851_v50 = vpop.f32.mrb[29].mxu1 }
 0x23d   :  { %v2853_v18 = vpop.f32.mrb[30].mxu1 }
 0x23e   :  { %v5372_v37 = vpop.f32.mrb[24].mxu0  ;;  %v2855_v62 = vpop.f32.mrb[31].mxu1 }
 0x23f   :  { %v6976_v58 = vadd.f32 %v5372_v37, %v2839_v33  ;;  %v5374_v31 = vpop.f32.mrb[25].mxu0 }
 0x240   :  { %v6978_v16 = vadd.f32 %v5374_v31, %v2841_v8  ;;  %v5376_v53 = vpop.f32.mrb[26].mxu0 }
 0x241   :  { %v6980_v9 = vadd.f32 %v5376_v53, %v2843_v61  ;;  %v5378_v27 = vpop.f32.mrb[27].mxu0 }
 0x242   :  { %v9699_v6 = vadd.f32 %v5378_v27, %v2845_v57 }
 0x243   :  { %v5945_v15 = vpop.f32.mrb[32].mxu1 }
 0x244   :  { %v9701_v41 = vadd.f32 %v6960_v30, %v5945_v15  ;;  %v5947_v44 = vpop.f32.mrb[33].mxu1 }
 0x245   :  { %v9703_v1 = vadd.f32 %v6962_v51, %v5947_v44  ;;  %v5949_v63 = vpop.f32.mrb[34].mxu1 }
 0x246   :  { %v5382_v54 = vpop.f32.mrb[28].mxu0  ;;  %v9705_v11 = vadd.f32 %v6964_v29, %v5949_v63  ;;  %v5951_v28 = vpop.f32.mrb[35].mxu1 }
 0x247   :  { %v9707_v49 = vadd.f32 %v5382_v54, %v2849_v4  ;;  %v5384_v24 = vpop.f32.mrb[29].mxu0  ;;  %v6904_v43 = vpack.c.bf16 %v9703_v1, %v9701_v41  ;;  %v9711_v26 = vadd.f32 %v6966_v40, %v5951_v28 }
 0x248   :  { %v9713_v22 = vadd.f32 %v5384_v24, %v2851_v50  ;;  %v5386_v32 = vpop.f32.mrb[30].mxu0 }
 0x249   :  { %v9715_v45 = vadd.f32 %v5386_v32, %v2853_v18  ;;  %v5388_v48 = vpop.f32.mrb[31].mxu0  ;;  %6216 = vst [vmem:[%s9883_s4 + $0x40] sm:$0xff] %v6904_v43  ;;  %v6905_v60 = vpack.c.bf16 %v9711_v26, %v9705_v11 }
 0x24a   :  { %v9722_v30 = vadd.f32 %v5388_v48, %v2855_v62 }
 0x24b   :  { %6217 = vst [vmem:[%s9883_s4 + $0x48] sm:$0xff] %v6905_v60  ;;  %v5955_v7 = vpop.f32.mrb[36].mxu1 }
 0x24c   :  { %v9727_v51 = vadd.f32 %v6968_v3, %v5955_v7  ;;  %v5957_v55 = vpop.f32.mrb[37].mxu1 }
 0x24d   :  { %v9729_v29 = vadd.f32 %v6970_v0, %v5957_v55  ;;  %v5959_v52 = vpop.f32.mrb[38].mxu1 }
 0x24e   :  { %v5905_v40 = vpop.f32.mrb[0].mxu0  ;;  %v9731_v33 = vadd.f32 %v6972_v17, %v5959_v52  ;;  %v5961_v8 = vpop.f32.mrb[39].mxu1 }
 0x24f   :  { %v6944_v61 = vadd.f32 %v5905_v40, %v9667_v38  ;;  %v5907_v10 = vpop.f32.mrb[1].mxu0  ;;  %v6906_v57 = vpack.c.bf16 %v9729_v29, %v9727_v51  ;;  %v9736_v34 = vadd.f32 %v6974_v23, %v5961_v8 }
 0x250   :  { %v6945_v35 = vadd.f32 %v5907_v10, %v9669_v56  ;;  %v5909_v3 = vpop.f32.mrb[2].mxu0 }
 0x251   :  { %v6946_v2 = vadd.f32 %v5909_v3, %v9671_v5  ;;  %v5911_v0 = vpop.f32.mrb[3].mxu0  ;;  %6218 = vst [vmem:[%s9883_s4 + $0x50] sm:$0xff] %v6906_v57  ;;  %v6907_v17 = vpack.c.bf16 %v9736_v34, %v9731_v33  ;;  %v6268_v50 = vmul.f32 %v6944_v61, %v6944_v61 }
 0x252   :  { %v6896_v38 = vpack.c.bf16 %v6945_v35, %v6944_v61  ;;  %v6947_v4 = vadd.f32 %v5911_v0, %v9673_v19  ;;  %v6269_v18 = vmul.f32 %v6945_v35, %v6945_v35 }
 0x253   :  { %v6224_v23 = vadd.f32 %v6946_v2, %v6944_v61  ;;  %v6270_v37 = vmul.f32 %v6946_v2, %v6946_v2  ;;  %6219 = vst [vmem:[%s9883_s4 + $0x58] sm:$0xff] %v6907_v17  ;;  %v5965_v56 = vpop.f32.mrb[40].mxu1 }
 0x254   :  { %6208 = vst [vmem:[%s9883_s4] sm:$0xff] %v6896_v38  ;;  %v6897_v5 = vpack.c.bf16 %v6947_v4, %v6946_v2  ;;  %v6245_v62 = vadd.f32 %v6947_v4, %v6945_v35  ;;  %v6271_v31 = vmul.f32 %v6947_v4, %v6947_v4  ;;  %v9752_v53 = vadd.f32 %v6976_v58, %v5965_v56  ;;  %v5967_v27 = vpop.f32.mrb[41].mxu1 }
 0x255   :  { %v6300_v19 = vadd.f32 %v6270_v37, %v6268_v50  ;;  %v9754_v15 = vadd.f32 %v6978_v16, %v5967_v27  ;;  %v5969_v44 = vpop.f32.mrb[42].mxu1 }
 0x256   :  { %6209 = vst [vmem:[%s9883_s4 + $0x8] sm:$0xff] %v6897_v5  ;;  %v6321_v63 = vadd.f32 %v6271_v31, %v6269_v18  ;;  %v5915_v54 = vpop.f32.mrb[4].mxu0  ;;  %v9759_v28 = vadd.f32 %v6980_v9, %v5969_v44  ;;  %v5971_v24 = vpop.f32.mrb[43].mxu1 }
 0x257   :  { %v6948_v43 = vadd.f32 %v5915_v54, %v9675_v39  ;;  %v5917_v32 = vpop.f32.mrb[5].mxu0  ;;  %v6908_v58 = vpack.c.bf16 %v9754_v15, %v9752_v53  ;;  %v9765_v48 = vadd.f32 %v9699_v6, %v5971_v24 }
 0x258   :  { %v6949_v16 = vadd.f32 %v5917_v32, %v9677_v14  ;;  %v5919_v60 = vpop.f32.mrb[6].mxu0 }
 0x259   :  { %v6225_v7 = vadd.f32 %v6948_v43, %v6224_v23  ;;  %v6272_v55 = vmul.f32 %v6948_v43, %v6948_v43  ;;  %v6950_v52 = vadd.f32 %v5919_v60, %v9679_v36  ;;  %v5921_v40 = vpop.f32.mrb[7].mxu0  ;;  %6220 = vst [vmem:[%s9883_s4 + $0x60] sm:$0xff] %v6908_v58  ;;  %v6909_v39 = vpack.c.bf16 %v9765_v48, %v9759_v28 }
 0x25a   :  { %v6898_v9 = vpack.c.bf16 %v6949_v16, %v6948_v43  ;;  %v6246_v8 = vadd.f32 %v6949_v16, %v6245_v62  ;;  %v6273_v61 = vmul.f32 %v6949_v16, %v6949_v16  ;;  %v6951_v6 = vadd.f32 %v5921_v40, %v9681_v13 }
 0x25b   :  { %v6301_v10 = vadd.f32 %v6300_v19, %v6272_v55  ;;  %v6226_v14 = vadd.f32 %v6950_v52, %v6225_v7  ;;  %v6274_v57 = vmul.f32 %v6950_v52, %v6950_v52  ;;  %6221 = vst [vmem:[%s9883_s4 + $0x68] sm:$0xff] %v6909_v39  ;;  %v5975_v36 = vpop.f32.mrb[44].mxu1 }
 0x25c   :  { %6210 = vst [vmem:[%s9883_s4 + $0x10] sm:$0xff] %v6898_v9  ;;  %v6322_v35 = vadd.f32 %v6321_v63, %v6273_v61  ;;  %v6899_v3 = vpack.c.bf16 %v6951_v6, %v6950_v52  ;;  %v6247_v2 = vadd.f32 %v6951_v6, %v6246_v8  ;;  %v6275_v0 = vmul.f32 %v6951_v6, %v6951_v6  ;;  %v5977_v17 = vpop.f32.mrb[45].mxu1 }
 0x25d   :  { %v6302_v38 = vadd.f32 %v6301_v10, %v6274_v57  ;;  %v9782_v13 = vadd.f32 %v9707_v49, %v5975_v36  ;;  %v9785_v4 = vadd.f32 %v9713_v22, %v5977_v17  ;;  %v5979_v50 = vpop.f32.mrb[46].mxu1 }
 0x25e   :  { %6211 = vst [vmem:[%s9883_s4 + $0x18] sm:$0xff] %v6899_v3  ;;  %v6323_v18 = vadd.f32 %v6322_v35, %v6275_v0  ;;  %v5925_v23 = vpop.f32.mrb[8].mxu0  ;;  %v9791_v37 = vadd.f32 %v9715_v45, %v5979_v50  ;;  %v5981_v56 = vpop.f32.mrb[47].mxu1 }
 0x25f   :  { %v6952_v5 = vadd.f32 %v5925_v23, %v9683_v21  ;;  %v5927_v62 = vpop.f32.mrb[9].mxu0  ;;  %v6910_v49 = vpack.c.bf16 %v9785_v4, %v9782_v13  ;;  %v9798_v27 = vadd.f32 %v9722_v30, %v5981_v56 }
 0x260   :  { %v6953_v22 = vadd.f32 %v5927_v62, %v9685_v46  ;;  %v5929_v31 = vpop.f32.mrb[10].mxu0  ;;  %v6286_v62 = vmul.f32 %v9705_v11, %v9705_v11 }
 0x261   :  { %v6227_v19 = vadd.f32 %v6952_v5, %v6226_v14  ;;  %v6276_v44 = vmul.f32 %v6952_v5, %v6952_v5  ;;  %v6954_v63 = vadd.f32 %v5929_v31, %v9687_v25  ;;  %v5931_v54 = vpop.f32.mrb[11].mxu0  ;;  %6222 = vst [vmem:[%s9883_s4 + $0x70] sm:$0xff] %v6910_v49  ;;  %v6911_v30 = vpack.c.bf16 %v9798_v27, %v9791_v37 }
 0x262   :  { %v6900_v21 = vpack.c.bf16 %v6953_v22, %v6952_v5  ;;  %v6248_v45 = vadd.f32 %v6953_v22, %v6247_v2  ;;  %v6277_v24 = vmul.f32 %v6953_v22, %v6953_v22  ;;  %v6955_v43 = vadd.f32 %v5931_v54, %v9689_v12 }
 0x263   :  { %v6303_v32 = vadd.f32 %v6302_v38, %v6276_v44  ;;  %v6228_v46 = vadd.f32 %v6954_v63, %v6227_v19  ;;  %v6278_v58 = vmul.f32 %v6954_v63, %v6954_v63  ;;  %6223 = vst [vmem:[%s9883_s4 + $0x78] sm:$0xff] %v6911_v30  ;;  %v6288_v44 = vmul.f32 %v9727_v51, %v9727_v51 }
 0x264   :  { %6212 = vst [vmem:[%s9883_s4 + $0x20] sm:$0xff] %v6900_v21  ;;  %v6324_v25 = vadd.f32 %v6323_v18, %v6277_v24  ;;  %v6901_v16 = vpack.c.bf16 %v6955_v43, %v6954_v63  ;;  %v6249_v60 = vadd.f32 %v6955_v43, %v6248_v45  ;;  %v6279_v7 = vmul.f32 %v6955_v43, %v6955_v43 }
 0x265   :  { %v6304_v55 = vadd.f32 %v6303_v32, %v6278_v58 }
 0x266   :  { %6213 = vst [vmem:[%s9883_s4 + $0x28] sm:$0xff] %v6901_v16  ;;  %v6325_v12 = vadd.f32 %v6324_v25, %v6279_v7  ;;  %v5935_v52 = vpop.f32.mrb[12].mxu0 }
 0x267   :  { %v6956_v40 = vadd.f32 %v5935_v52, %v9691_v42  ;;  %v5937_v39 = vpop.f32.mrb[13].mxu0 }
 0x268   :  { %v6957_v9 = vadd.f32 %v5937_v39, %v9693_v47  ;;  %v5939_v8 = vpop.f32.mrb[14].mxu0 }
 0x269   :  { %v6229_v61 = vadd.f32 %v6956_v40, %v6228_v46  ;;  %v6280_v6 = vmul.f32 %v6956_v40, %v6956_v40  ;;  %v6958_v10 = vadd.f32 %v5939_v8, %v9695_v59  ;;  %v5941_v14 = vpop.f32.mrb[15].mxu0  ;;  %v6284_v59 = vmul.f32 %v9701_v41, %v9701_v41 }
 0x26a   :  { %v6902_v57 = vpack.c.bf16 %v6957_v9, %v6956_v40  ;;  %v6250_v36 = vadd.f32 %v6957_v9, %v6249_v60  ;;  %v6281_v35 = vmul.f32 %v6957_v9, %v6957_v9  ;;  %v6959_v3 = vadd.f32 %v5941_v14, %v9697_v20 }
 0x26b   :  { %v6305_v2 = vadd.f32 %v6304_v55, %v6280_v6  ;;  %v6230_v0 = vadd.f32 %v6958_v10, %v6229_v61  ;;  %v6282_v17 = vmul.f32 %v6958_v10, %v6958_v10  ;;  %v6285_v20 = vmul.f32 %v9703_v1, %v9703_v1 }
 0x26c   :  { %6214 = vst [vmem:[%s9883_s4 + $0x30] sm:$0xff] %v6902_v57  ;;  %v6326_v42 = vadd.f32 %v6325_v12, %v6281_v35  ;;  %v6903_v47 = vpack.c.bf16 %v6959_v3, %v6958_v10  ;;  %v6251_v38 = vadd.f32 %v6959_v3, %v6250_v36  ;;  %v6283_v50 = vmul.f32 %v6959_v3, %v6959_v3 }
 0x26d   :  { %v6231_v18 = vadd.f32 %v9701_v41, %v6230_v0  ;;  %v6306_v23 = vadd.f32 %v6305_v2, %v6282_v17  ;;  %v6287_v41 = vmul.f32 %v9711_v26, %v9711_v26  ;;  %v6298_v8 = vmul.f32 %v9791_v37, %v9791_v37 }
 0x26e   :  { %6215 = vst [vmem:[%s9883_s4 + $0x38] sm:$0xff] %v6903_v47  ;;  %v6252_v56 = vadd.f32 %v9703_v1, %v6251_v38  ;;  %v6327_v5 = vadd.f32 %v6326_v42, %v6283_v50  ;;  %v6289_v1 = vmul.f32 %v9729_v29, %v9729_v29  ;;  %v6299_v6 = vmul.f32 %v9798_v27, %v9798_v27 }
 0x26f   :  { %v6232_v49 = vadd.f32 %v9705_v11, %v6231_v18  ;;  %v6307_v22 = vadd.f32 %v6306_v23, %v6284_v59  ;;  %v6290_v11 = vmul.f32 %v9731_v33, %v9731_v33 }
 0x270   :  { %v6253_v31 = vadd.f32 %v9711_v26, %v6252_v56  ;;  %v6328_v19 = vadd.f32 %v6327_v5, %v6285_v20  ;;  %v6291_v26 = vmul.f32 %v9736_v34, %v9736_v34 }
 0x271   :  { %v6233_v63 = vadd.f32 %v9727_v51, %v6232_v49  ;;  %v6308_v54 = vadd.f32 %v6307_v22, %v6286_v62  ;;  %v6292_v51 = vmul.f32 %v9752_v53, %v9752_v53 }
 0x272   :  { %v6254_v21 = vadd.f32 %v9729_v29, %v6253_v31  ;;  %v6329_v45 = vadd.f32 %v6328_v19, %v6287_v41  ;;  %v6293_v29 = vmul.f32 %v9754_v15, %v9754_v15 }
 0x273   :  { %v6309_v24 = vadd.f32 %v6308_v54, %v6288_v44  ;;  %v6234_v43 = vadd.f32 %v9731_v33, %v6233_v63  ;;  %v6294_v33 = vmul.f32 %v9759_v28, %v9759_v28 }
 0x274   :  { %v6330_v32 = vadd.f32 %v6329_v45, %v6289_v1  ;;  %v6255_v46 = vadd.f32 %v9736_v34, %v6254_v21  ;;  %v6295_v34 = vmul.f32 %v9765_v48, %v9765_v48 }
 0x275   :  { %v6235_v58 = vadd.f32 %v9752_v53, %v6234_v43  ;;  %v6310_v30 = vadd.f32 %v6309_v24, %v6290_v11  ;;  %v6296_v53 = vmul.f32 %v9782_v13, %v9782_v13 }
 0x276   :  { %v6256_v25 = vadd.f32 %v9754_v15, %v6255_v46  ;;  %v6331_v16 = vadd.f32 %v6330_v32, %v6291_v26  ;;  %v6297_v15 = vmul.f32 %v9785_v4, %v9785_v4 }
 0x277   :  { %v6236_v60 = vadd.f32 %v9759_v28, %v6235_v58  ;;  %v6311_v7 = vadd.f32 %v6310_v30, %v6292_v51 }
 0x278   :  { %v6257_v55 = vadd.f32 %v9765_v48, %v6256_v25  ;;  %v6332_v12 = vadd.f32 %v6331_v16, %v6293_v29 }
 0x279   :  { %v6237_v52 = vadd.f32 %v9782_v13, %v6236_v60  ;;  %v6312_v40 = vadd.f32 %v6311_v7, %v6294_v33 }
 0x27a   :  { %v6258_v39 = vadd.f32 %v9785_v4, %v6257_v55  ;;  %v6333_v9 = vadd.f32 %v6332_v12, %v6295_v34 }
 0x27b   :  { %v6238_v28 = vadd.f32 %v9791_v37, %v6237_v52  ;;  %v6313_v61 = vadd.f32 %v6312_v40, %v6296_v53 }
 0x27c   :  { %v6259_v48 = vadd.f32 %v9798_v27, %v6258_v39  ;;  %v6334_v10 = vadd.f32 %v6333_v9, %v6297_v15 }
 0x27d   :  { %v6239_v13 = vrot.slane %v6238_v28, 4  ;;  %v6314_v14 = vadd.f32 %v6313_v61, %v6298_v8 }
 0x27e   :  { %v6260_v57 = vrot.slane %v6259_v48, 4  ;;  %v6335_v36 = vadd.f32 %v6334_v10, %v6299_v6 }
 0x27f   :  { %v6240_v35 = vadd.f32 %v6239_v13, %v6238_v28  ;;  %v6315_v3 = vrot.slane %v6314_v14, 4 }
 0x280   :  { %v6261_v4 = vadd.f32 %v6260_v57, %v6259_v48  ;;  %v6336_v2 = vrot.slane %v6335_v36, 4 }
 0x281   :  { %v6241_v0 = vrot.slane %v6240_v35, 2  ;;  %v6316_v17 = vadd.f32 %v6315_v3, %v6314_v14 }
 0x282   :  { %v6262_v42 = vrot.slane %v6261_v4, 2  ;;  %v6337_v47 = vadd.f32 %v6336_v2, %v6335_v36 }
 0x283   :  { %v6242_v37 = vadd.f32 %v6241_v0, %v6240_v35  ;;  %v6317_v38 = vrot.slane %v6316_v17, 2 }
 0x284   :  { %v6263_v50 = vadd.f32 %v6262_v42, %v6261_v4  ;;  %v6338_v59 = vrot.slane %v6337_v47, 2 }
 0x285   :  { %v6243_v18 = vrot.slane %v6242_v37, 1  ;;  %v6318_v23 = vadd.f32 %v6317_v38, %v6316_v17 }
 0x286   :  { %v6264_v27 = vrot.slane %v6263_v50, 1  ;;  %v6339_v20 = vadd.f32 %v6338_v59, %v6337_v47 }
 0x287   :  { %v6319_v56 = vrot.slane %v6318_v23, 1  ;;  %v6244_v62 = vadd.f32 %v6243_v18, %v6242_v37 }
 0x288   :  { %v6340_v5 = vrot.slane %v6339_v20, 1  ;;  %v6265_v22 = vadd.f32 %v6264_v27, %v6263_v50 }
 0x289   :  { %v6320_v49 = vadd.f32 %v6319_v56, %v6318_v23 }
 0x28a   :  { %v6341_v41 = vadd.f32 %v6340_v5, %v6339_v20 }
 0x28b   :  { %v6345_v31 = vsel %vm29_vm1, %v6244_v62, %v6320_v49 }
 0x28c   :  { %v6346_v19 = vsel %vm29_vm1, %v6265_v22, %v6341_v41 }
 0x28d   :  { %v6349_v44 = vcombine.low %v6345_v31, %v6346_v19 }
 0x28f   :  { %6879 = vst.sshfl [vmem:[%s9884_s5] sm:$0x33 pattern:$0x76325410] %v6349_v44 }

// kernel: block_forward.3
= control target key start
LH: loop header
LB: loop body
LE: loop exit
PB: predicated region body
PF: predicated region fallthrough
CT: control target
= control target key end

     0   :  { %9 = vsyncpa [#allocation5], 0  ;;  %s8612_s0 = inlined_call_operand.hbm [shape: f32[2,8,8,256], index: 0, kind: input, shape index: {}]   ;;  %s8613_s1 = inlined_call_operand.hbm [shape: bf16[2304,256], index: 1, kind: input, shape index: {}]   ;;  %s8614_s2 = inlined_call_operand.vmem [shape: bf16[128,256], index: 2, kind: output, shape index: {0}]   ;;  %s8615_s3 = inlined_call_operand.vmem [shape: f32[1,2,256], index: 3, kind: output, shape index: {1}]  }
   0x1   :  { %10 = vsyncpa [#allocation7], 0  ;;  %s7606_s12 = smov [#allocation4]   ;;  %s7558_s16 = scalar_lea.hbm %s8612_s0, 4096 }
   0x2   :  { %s16_s13 = sshll.u32 %s7606_s12, 4  ;;  %p7559_p0 = scmp.ne.s32.totalorder %s8612_s0, %s7558_s16  ;;  %s17_s13 = int_to_ptr.vmem [resolvable:$true] %s16_s13 }
   0x3   :  { %p7562_p1 = scmp.lt.u32.totalorder %s7558_s16, %s8612_s0 }
   0x5   :  { %p7564_p2 = pnand %p7562_p1, %p7559_p0 }
   0x7   :  { %7567 = shalt.err (!%p7564_p2)
}
   0x8   :  { %s7568_s21 = scalar_lea.vmem %s17_s13, 4096  ;;  %p7573_p4 = scmp.lt.s32.totalorder %s17_s13, %s17_s13 }
   0x9   :  { %p7569_p3 = scmp.ne.s32.totalorder %s17_s13, %s7568_s21  ;;  %p7574_p5 = scmp.lt.s32.totalorder %s7568_s21, %s7568_s21 }
   0xb   :  { %p7575_p6 = por %p7574_p5, %p7573_p4 }
   0xd   :  { %p7576_p7 = pnand %p7575_p6, %p7569_p3 }
   0xf   :  { %7579 = shalt.err (!%p7576_p7)
}
  0x10   :  { %s7607_s22 = smov 256   ;;  %s7608_s23 = smov 16  }
  0x11   :  { %22 = dma.hbm_to_vmem [thread:$0]  %s8612_s0, 4096, %s17_s13, [#allocation5], %s7607_s22, %s7607_s22, %s7608_s23  }
  0x12   :  { %s7609_s26 = smov [#allocation6]   ;;  %s7580_s30 = scalar_lea.hbm %s8613_s1, 36864 }
  0x13   :  { %s28_s27 = sshll.u32 %s7609_s26, 4  ;;  %p7581_p8 = scmp.ne.s32.totalorder %s8613_s1, %s7580_s30  ;;  %s29_s27 = int_to_ptr.vmem [resolvable:$true] %s28_s27 }
  0x14   :  { %p7584_p9 = scmp.lt.u32.totalorder %s7580_s30, %s8613_s1 }
  0x16   :  { %p7586_p10 = pnand %p7584_p9, %p7581_p8 }
  0x18   :  { %7589 = shalt.err (!%p7586_p10)
}
  0x19   :  { %s7590_s8 = scalar_lea.vmem %s29_s27, 36864  ;;  %p7595_p12 = scmp.lt.s32.totalorder %s29_s27, %s29_s27 }
  0x1a   :  { %p7591_p11 = scmp.ne.s32.totalorder %s29_s27, %s7590_s8  ;;  %p7596_p13 = scmp.lt.s32.totalorder %s7590_s8, %s7590_s8 }
  0x1c   :  { %p7597_p0 = por %p7596_p13, %p7595_p12 }
  0x1e   :  { %p7598_p1 = pnand %p7597_p0, %p7591_p11 }
  0x20   :  { %7601 = shalt.err (!%p7598_p1)
}
  0x21   :  { %s7610_s0 = smov 128   ;;  %s7611_s9 = smov 8  }
  0x22   :  { %34 = dma.hbm_to_vmem [thread:$0]  %s8613_s1, 36864, %s29_s27, [#allocation7], %s7610_s0, %s7610_s0, %s7611_s9  }
  0x23   :  { %7602 = dma.done.wait [#allocation5], 4096  }
  0x24   :  { %7603 = vsyncadd [#allocation5], 4294963200 }
  0x25   :  { %7604 = dma.done.wait [#allocation7], 36864  }
  0x26   :  { %7605 = vsyncadd [#allocation7], 4294930432  ;;  %v7612_v0 = vmov 0   ;;  %v7094_v1 = vld [vmem:[#allocation6 + $0x4] ss:$8 sps:$4 sm:$0xff]   ;;  %vm51_vm1 = vcmask 1040384  }
  0x27   :  { %42 = vst [vmem:[#allocation2] sm:$0xff] %v7612_v0  ;;  %43 = vst [vmem:[#allocation2 + $0x8] sm:$0x11] %v7612_v0  ;;  %v7096_v2 = vld [vmem:[#allocation6 + $0x404] ss:$8 sps:$4 sm:$0xff]   ;;  %877 = vmatprep.subr.bf16.mxu1 %v7094_v1  ;;  %vm54_vm5 = vcmask 1044484  }
  0x28   :  { %44 = vst [vmem:[#allocation2 + $0xa0] sm:$0xff] %v7612_v0  ;;  %45 = vst [vmem:[#allocation2 + $0xa8] sm:$0x11] %v7612_v0  ;;  %v7098_v3 = vld [vmem:[#allocation6] ss:$8 sps:$4 sm:$0xff]   ;;  %3351 = vmatprep.subr.bf16.mxu0 %v7096_v2  ;;  %vm488_vm12 = vcmask 1043456  }
  0x29   :  { %47 = vst [vmem:[#allocation2 + $0x90] sm:$0xff] %v7612_v0  ;;  %48 = vst [vmem:[#allocation2 + $0x98] sm:$0x11] %v7612_v0  ;;  %v7099_v4 = vld [vmem:[#allocation6 + $0x400] ss:$8 sps:$4 sm:$0xff]   ;;  %878 = vmatpush1.bf16.msra.mxu1 %v7098_v3  ;;  %vm490_vm13 = vcmask 1047556  }
  0x2a   :  { %49 = vst [vmem:[#allocation2 + $0x130] sm:$0xff] %v7612_v0  ;;  %50 = vst [vmem:[#allocation2 + $0x138] sm:$0x11] %v7612_v0  ;;  %v7100_v5 = vld [vmem:[#allocation6 + $0x14] ss:$8 sps:$4 sm:$0xff]   ;;  %3352 = vmatpush1.bf16.msra.mxu0 %v7099_v4  ;;  %v183_v59 = vld [vmem:[#allocation4] sm:$0xff] }
  0x2b   :  { %v7102_v6 = vld [vmem:[#allocation6 + $0x414] ss:$8 sps:$4 sm:$0xff]   ;;  %v7104_v7 = vld [vmem:[#allocation6 + $0x10] ss:$8 sps:$4 sm:$0xff]   ;;  %879 = vmatprep.subr.bf16.mxu1 %v7100_v5  ;;  %v7106_v9 = vld [vmem:[#allocation6 + $0x24] ss:$8 sps:$4 sm:$0xff]  }
  0x2c   :  { %v7105_v8 = vld [vmem:[#allocation6 + $0x410] ss:$8 sps:$4 sm:$0xff]   ;;  %3353 = vmatprep.subr.bf16.mxu0 %v7102_v6  ;;  %v7108_v10 = vld [vmem:[#allocation6 + $0x424] ss:$8 sps:$4 sm:$0xff]   ;;  %v7110_v11 = vld [vmem:[#allocation6 + $0x20] ss:$8 sps:$4 sm:$0xff]  }
  0x2d   :  { %v7111_v12 = vld [vmem:[#allocation6 + $0x420] ss:$8 sps:$4 sm:$0xff]   ;;  %880 = vmatpush1.bf16.msra.mxu1 %v7104_v7  ;;  %v7112_v13 = vld [vmem:[#allocation6 + $0x34] ss:$8 sps:$4 sm:$0xff]   ;;  %v7116_v15 = vld [vmem:[#allocation6 + $0x30] ss:$8 sps:$4 sm:$0xff]  }
  0x2e   :  { %3354 = vmatpush1.bf16.msra.mxu0 %v7105_v8  ;;  %881 = vmatprep.subr.bf16.mxu1 %v7106_v9  ;;  %v7114_v14 = vld [vmem:[#allocation6 + $0x434] ss:$8 sps:$4 sm:$0xff]   ;;  %v7117_v16 = vld [vmem:[#allocation6 + $0x430] ss:$8 sps:$4 sm:$0xff]   ;;  %v7118_v17 = vld [vmem:[#allocation6 + $0x44] ss:$8 sps:$4 sm:$0xff]  }
  0x2f   :  { %3355 = vmatprep.subr.bf16.mxu0 %v7108_v10  ;;  %v7120_v18 = vld [vmem:[#allocation6 + $0x444] ss:$8 sps:$4 sm:$0xff]   ;;  %v7122_v19 = vld [vmem:[#allocation6 + $0x40] ss:$8 sps:$4 sm:$0xff]   ;;  %v7124_v21 = vld [vmem:[#allocation6 + $0x54] ss:$8 sps:$4 sm:$0xff]  }
  0x30   :  { %v7123_v20 = vld [vmem:[#allocation6 + $0x440] ss:$8 sps:$4 sm:$0xff]   ;;  %v7126_v22 = vld [vmem:[#allocation6 + $0x454] ss:$8 sps:$4 sm:$0xff]   ;;  %v7128_v23 = vld [vmem:[#allocation6 + $0x50] ss:$8 sps:$4 sm:$0xff]  }
  0x31   :  { %882 = vmatpush1.bf16.msra.mxu1 %v7110_v11  ;;  %v7129_v24 = vld [vmem:[#allocation6 + $0x450] ss:$8 sps:$4 sm:$0xff]   ;;  %v7130_v25 = vld [vmem:[#allocation6 + $0x64] ss:$8 sps:$4 sm:$0xff]   ;;  %v7134_v27 = vld [vmem:[#allocation6 + $0x60] ss:$8 sps:$4 sm:$0xff]  }
  0x32   :  { %3356 = vmatpush1.bf16.msra.mxu0 %v7111_v12  ;;  %883 = vmatprep.subr.bf16.mxu1 %v7112_v13  ;;  %v7132_v26 = vld [vmem:[#allocation6 + $0x464] ss:$8 sps:$4 sm:$0xff]   ;;  %v7135_v28 = vld [vmem:[#allocation6 + $0x460] ss:$8 sps:$4 sm:$0xff]   ;;  %v7136_v29 = vld [vmem:[#allocation6 + $0x74] ss:$8 sps:$4 sm:$0xff]  }
  0x33   :  { %3357 = vmatprep.subr.bf16.mxu0 %v7114_v14  ;;  %vm52_vm0 = vsmask.f32 256  ;;  %v7138_v30 = vld [vmem:[#allocation6 + $0x474] ss:$8 sps:$4 sm:$0xff]   ;;  %vm55_vm2 = vsmask.f32 4352 }
  0x34   :  { %v7140_v31 = vld [vmem:[#allocation6 + $0x70] ss:$8 sps:$4 sm:$0xff]   ;;  %vm7658_vm3 = vmand %vm51_vm1, %vm52_vm0  ;;  %vm118_vm4 = vsmask.f32 7938  ;;  %v7142_v34 = vld [vmem:[#allocation6 + $0x84] ss:$8 sps:$4 sm:$0xff]  }
  0x35   :  { %884 = vmatpush1.bf16.msra.mxu1 %v7116_v15  ;;  %v7141_v33 = vld [vmem:[#allocation6 + $0x470] ss:$8 sps:$4 sm:$0xff]   ;;  %v7144_v35 = vld [vmem:[#allocation6 + $0x484] ss:$8 sps:$4 sm:$0xff]   ;;  %vm7662_vm6 = vmand %vm54_vm5, %vm55_vm2  ;;  %vm120_vm8 = vsmask.f32 7954 }
  0x36   :  { %3358 = vmatpush1.bf16.msra.mxu0 %v7117_v16  ;;  %885 = vmatprep.subr.bf16.mxu1 %v7118_v17  ;;  %v7146_v37 = vld [vmem:[#allocation6 + $0x80] ss:$8 sps:$4 sm:$0xff]   ;;  %vm7668_vm7 = vmand %vm51_vm1, %vm118_vm4  ;;  %v7148_v40 = vld [vmem:[#allocation6 + $0x94] ss:$8 sps:$4 sm:$0xff]   ;;  %vm1054_vm2 = vsmask.f32 3328 }
  0x37   :  { %3359 = vmatprep.subr.bf16.mxu0 %v7120_v18  ;;  %v7147_v38 = vld [vmem:[#allocation6 + $0x480] ss:$8 sps:$4 sm:$0xff]   ;;  %v7150_v41 = vld [vmem:[#allocation6 + $0x494] ss:$8 sps:$4 sm:$0xff]   ;;  %vm121_vm9 = vmand %vm54_vm5, %vm120_vm8  ;;  %vm1810_vm5 = vcmask 1042432  }
  0x38   :  { %v7152_v42 = vld [vmem:[#allocation6 + $0x90] ss:$8 sps:$4 sm:$0xff]   ;;  %v7154_v44 = vld [vmem:[#allocation6 + $0xa4] ss:$8 sps:$4 sm:$0xff]   ;;  %vm7677_vm10 = vmor %vm7662_vm6, %vm7658_vm3  ;;  %vm1055_vm3 = vsmask.f32 7440 }
  0x39   :  { %886 = vmatpush1.bf16.msra.mxu1 %v7122_v19  ;;  %v7153_v43 = vld [vmem:[#allocation6 + $0x490] ss:$8 sps:$4 sm:$0xff]   ;;  %v7156_v45 = vld [vmem:[#allocation6 + $0x4a4] ss:$8 sps:$4 sm:$0xff]   ;;  %v7158_v47 = vld [vmem:[#allocation6 + $0xa0] ss:$8 sps:$4 sm:$0xff]  }
  0x3a   :  { %3360 = vmatpush1.bf16.msra.mxu0 %v7123_v20  ;;  %887 = vmatprep.subr.bf16.mxu1 %v7124_v21  ;;  %v7159_v48 = vld [vmem:[#allocation6 + $0x4a0] ss:$8 sps:$4 sm:$0xff]   ;;  %vm7683_vm11 = vmor %vm121_vm9, %vm7668_vm7  ;;  %v7160_v50 = vld [vmem:[#allocation6 + $0xb4] ss:$8 sps:$4 sm:$0xff]   ;;  %vm1811_vm6 = vcmask 1046532  }
  0x3b   :  { %3361 = vmatprep.subr.bf16.mxu0 %v7126_v22  ;;  %v7162_v51 = vld [vmem:[#allocation6 + $0x4b4] ss:$8 sps:$4 sm:$0xff]   ;;  %v7164_v52 = vld [vmem:[#allocation6 + $0xb0] ss:$8 sps:$4 sm:$0xff]   ;;  %v58_v54 = vld [vmem:[#allocation2] sm:$0x11] }
  0x3c   :  { %v7165_v53 = vld [vmem:[#allocation6 + $0x4b0] ss:$8 sps:$4 sm:$0xff]   ;;  %v7166_v55 = vld [vmem:[#allocation6 + $0xc4] ss:$8 sps:$4 sm:$0xff]   ;;  %v59_v57 = vsel %vm7677_vm10, 0, %v58_v54  ;;  %vm7697_vm14 = vmand %vm488_vm12, %vm118_vm4 }
  0x3d   :  { %888 = vmatpush1.bf16.msra.mxu1 %v7128_v23  ;;  %v7168_v56 = vld [vmem:[#allocation6 + $0x4c4] ss:$8 sps:$4 sm:$0xff]   ;;  %v61_v58 = vld [vmem:[#allocation2 + $0x10] sm:$0x11]  ;;  %60 = vst [vmem:[#allocation2] sm:$0x11] %v59_v57  ;;  %vm7705_vm15 = vmand %vm490_vm13, %vm120_vm8 }
  0x3e   :  { %3362 = vmatpush1.bf16.msra.mxu0 %v7129_v24  ;;  %889 = vmatprep.subr.bf16.mxu1 %v7130_v25  ;;  %v184_v60 = vld [vmem:[#allocation4 + $0x8] sm:$0xff]  ;;  %v62_v61 = vsel %vm7677_vm10, 0, %v61_v58  ;;  %v64_v63 = vld [vmem:[#allocation2 + $0x20] sm:$0x11]  ;;  %v126_v0 = vld [vmem:[#allocation2 + $0x18] sm:$0x11] }
  0x3f   :  { %3363 = vmatprep.subr.bf16.mxu0 %v7132_v26  ;;  %v6767_v62 = vpack.c.bf16 %v184_v60, %v183_v59  ;;  %63 = vst [vmem:[#allocation2 + $0x10] sm:$0x11] %v62_v61  ;;  %v65_v1 = vsel %vm7677_vm10, 0, %v64_v63  ;;  %v127_v2 = vsel %vm7683_vm11, 0, %v126_v0  ;;  %v129_v3 = vld [vmem:[#allocation2 + $0x28] sm:$0x11]  ;;  %vm7713_vm0 = vmor %vm7705_vm15, %vm7697_vm14 }
  0x40   :  { %v185_v4 = vld [vmem:[#allocation4 + $0x10] sm:$0xff]  ;;  %66 = vst [vmem:[#allocation2 + $0x20] sm:$0x11] %v65_v1  ;;  %128 = vst [vmem:[#allocation2 + $0x18] sm:$0x11] %v127_v2  ;;  %v130_v8 = vsel %vm7683_vm11, 0, %v129_v3 }
  0x41   :  { %890 = vmatpush1.bf16.msra.mxu1 %v7134_v27  ;;  %v328_v5 = vshrl.u32 %v6767_v62, 16  ;;  %v331_v6 = vshll.u32 %v6767_v62, 16  ;;  %v186_v9 = vld [vmem:[#allocation4 + $0x18] sm:$0xff]  ;;  %v7170_v10 = vld [vmem:[#allocation6 + $0xc0] ss:$8 sps:$4 sm:$0xff]   ;;  %vm7751_vm4 = vmor %vm1054_vm2, %vm1055_vm3 }
  0x42   :  { %3364 = vmatpush1.bf16.msra.mxu0 %v7135_v28  ;;  %891 = vmatprep.subr.bf16.mxu1 %v7136_v29  ;;  %131 = vst [vmem:[#allocation2 + $0x28] sm:$0x11] %v130_v8  ;;  %v6768_v12 = vpack.c.bf16 %v186_v9, %v185_v4  ;;  %v7171_v13 = vld [vmem:[#allocation6 + $0x4c0] ss:$8 sps:$4 sm:$0xff]   ;;  %v7172_v15 = vld [vmem:[#allocation6 + $0xd4] ss:$8 sps:$4 sm:$0xff]   ;;  %vm7949_vm7 = vmor %vm1810_vm5, %vm1811_vm6 }
  0x43   :  { %3365 = vmatprep.subr.bf16.mxu0 %v7138_v30  ;;  %v330_v14 = vrot.slane %v328_v5, 7  ;;  %v7174_v16 = vld [vmem:[#allocation6 + $0x4d4] ss:$8 sps:$4 sm:$0xff]   ;;  %v7176_v19 = vld [vmem:[#allocation6 + $0xd0] ss:$8 sps:$4 sm:$0xff]  }
  0x44   :  { %v336_v17 = vshrl.u32 %v6768_v12, 16  ;;  %v339_v18 = vshll.u32 %v6768_v12, 16  ;;  %v7177_v23 = vld [vmem:[#allocation6 + $0x4d0] ss:$8 sps:$4 sm:$0xff]   ;;  %v7717_v24 = vld [vmem:[#allocation2] sm:$0xff] }
  0x45   :  { %892 = vmatpush1.bf16.msra.mxu1 %v7140_v31  ;;  %v333_v20 = vor.u32 %v331_v6, %v330_v14  ;;  %v334_v21 = vrot.slane %v330_v14, 4  ;;  %v7178_v26 = vld [vmem:[#allocation6 + $0xe4] ss:$8 sps:$4 sm:$0xff]   ;;  %v132_v57 = vld [vmem:[#allocation2 + $0x38] sm:$0x11] }
  0x46   :  { %3366 = vmatpush1.bf16.msra.mxu0 %v7141_v33  ;;  %893 = vmatprep.subr.bf16.mxu1 %v7142_v34  ;;  %v338_v25 = vrot.slane %v336_v17, 7  ;;  %v493_v27 = vld [vmem:[#allocation2 + $0x10] sm:$0xff]  ;;  %v7180_v28 = vld [vmem:[#allocation6 + $0x4e4] ss:$8 sps:$4 sm:$0xff]   ;;  %v7182_v34 = vld [vmem:[#allocation6 + $0xe0] ss:$8 sps:$4 sm:$0xff]  }
  0x47   :  { %3367 = vmatprep.subr.bf16.mxu0 %v7144_v35  ;;  %v7721_v29 = vsel %vm7713_vm0, %v333_v20, %v493_v27  ;;  %v496_v32 = vld [vmem:[#allocation2 + $0x18] sm:$0x11]  ;;  %v499_v33 = vld [vmem:[#allocation2 + $0x20] sm:$0xff]  ;;  %v133_v61 = vsel %vm7683_vm11, 0, %v132_v57  ;;  %v135_v62 = vld [vmem:[#allocation2 + $0x48] sm:$0x11] }
  0x48   :  { %v341_v30 = vor.u32 %v339_v18, %v338_v25  ;;  %v342_v31 = vrot.slane %v338_v25, 4  ;;  %v7183_v35 = vld [vmem:[#allocation6 + $0x4e0] ss:$8 sps:$4 sm:$0xff]   ;;  %495 = vst [vmem:[#allocation2 + $0x10] sm:$0xff] %v7721_v29  ;;  %v6271_v36 = vcombine.high %v7717_v24, %v7721_v29  ;;  %v2872_v39 = vshrl.u32 %v7721_v29, 16  ;;  %v190_v58 = vld [vmem:[#allocation4 + $0x38] sm:$0xff] }
  0x49   :  { %894 = vmatpush1.bf16.msra.mxu1 %v7146_v37  ;;  %v497_v37 = vsel %vm7677_vm10, %v334_v21, %v496_v32  ;;  %134 = vst [vmem:[#allocation2 + $0x38] sm:$0x11] %v133_v61  ;;  %v7188_v4 = vld [vmem:[#allocation6 + $0xf0] ss:$8 sps:$4 sm:$0xff]   ;;  %v136_v6 = vsel %vm7683_vm11, 0, %v135_v62 }
  0x4a   :  { %3368 = vmatpush1.bf16.msra.mxu0 %v7147_v38  ;;  %895 = vmatprep.subr.bf16.mxu1 %v7148_v40  ;;  %v502_v38 = vld [vmem:[#allocation2 + $0x28] sm:$0x11]  ;;  %v67_v40 = vld [vmem:[#allocation2 + $0x30] sm:$0x11]  ;;  %498 = vst [vmem:[#allocation2 + $0x18] sm:$0x11] %v497_v37 }
  0x4b   :  { %3369 = vmatprep.subr.bf16.mxu0 %v7150_v41  ;;  %v187_v41 = vld [vmem:[#allocation4 + $0x20] sm:$0xff]  ;;  %909 = vmatprep.mubr.bf16.mxu1 %v6271_v36  ;;  %v7189_v9 = vld [vmem:[#allocation6 + $0x4f0] ss:$8 sps:$4 sm:$0xff]   ;;  %137 = vst [vmem:[#allocation2 + $0x48] sm:$0x11] %v136_v6 }
  0x4c   :  { %v7192_v11 = vld [vmem:[#allocation6 + $0x104] ss:$8 sps:$4 sm:$0xff]   ;;  %v138_v61 = vld [vmem:[#allocation2 + $0x58] sm:$0x11] }
  0x4d   :  { %896 = vmatpush1.bf16.msra.mxu1 %v7152_v42  ;;  %v7184_v42 = vld [vmem:[#allocation6 + $0xf4] ss:$8 sps:$4 sm:$0xff]  }
  0x4e   :  { %3370 = vmatpush1.bf16.msra.mxu0 %v7153_v43  ;;  %897 = vmatprep.subr.bf16.mxu1 %v7154_v44  ;;  %v7186_v43 = vld [vmem:[#allocation6 + $0x4f4] ss:$8 sps:$4 sm:$0xff]   ;;  %v7731_v44 = vsel %vm7713_vm0, %v341_v30, %v499_v33 }
  0x4f   :  { %3371 = vmatprep.subr.bf16.mxu0 %v7156_v45  ;;  %v503_v45 = vsel %vm7677_vm10, %v342_v31, %v502_v38  ;;  %501 = vst [vmem:[#allocation2 + $0x20] sm:$0xff] %v7731_v44  ;;  %v2886_v54 = vshrl.u32 %v7731_v44, 16  ;;  %v7198_v31 = vld [vmem:[#allocation6 + $0x114] ss:$8 sps:$4 sm:$0xff]  }
  0x50   :  { %504 = vst [vmem:[#allocation2 + $0x28] sm:$0x11] %v503_v45  ;;  %v192_v45 = vld [vmem:[#allocation4 + $0x48] sm:$0xff] }
  0x51   :  { %898 = vmatpush1.bf16.msra.mxu1 %v7158_v47  ;;  %v2875_v47 = vshll.u32 %v7721_v29, 16  ;;  %v2888_v0 = vrot.slane %v2886_v54, 4  ;;  %v7204_v54 = vld [vmem:[#allocation6 + $0x124] ss:$8 sps:$4 sm:$0xff]  }
  0x52   :  { %3372 = vmatpush1.bf16.msra.mxu0 %v7159_v48  ;;  %899 = vmatprep.subr.bf16.mxu1 %v7160_v50  ;;  %v68_v48 = vsel %vm7677_vm10, 0, %v67_v40  ;;  %v188_v50 = vld [vmem:[#allocation4 + $0x28] sm:$0xff] }
  0x53   :  { %3373 = vmatprep.subr.bf16.mxu0 %v7162_v51  ;;  %v70_v51 = vld [vmem:[#allocation2 + $0x40] sm:$0x11]  ;;  %69 = vst [vmem:[#allocation2 + $0x30] sm:$0x11] %v68_v48  ;;  %v2877_v59 = vrot.slane %v2875_v47, 5 }
  0x54   :  { %v71_v60 = vsel %vm7677_vm10, 0, %v70_v51  ;;  %v7193_v48 = vld [vmem:[#allocation6 + $0x500] ss:$8 sps:$4 sm:$0xff]  }
  0x55   :  { %900 = vmatpush1.bf16.msra.mxu1 %v7164_v52  ;;  %v189_v52 = vld [vmem:[#allocation4 + $0x30] sm:$0xff]  ;;  %72 = vst [vmem:[#allocation2 + $0x40] sm:$0x11] %v71_v60  ;;  %v76_v60 = vld [vmem:[#allocation2 + $0x60] sm:$0x11] }
  0x56   :  { %3374 = vmatpush1.bf16.msra.mxu0 %v7165_v53  ;;  %901 = vmatprep.subr.bf16.mxu1 %v7166_v55  ;;  %v2874_v53 = vrot.slane %v2872_v39, 4  ;;  %v2889_v55 = vshll.u32 %v7731_v44, 16  ;;  %v6770_v63 = vpack.c.bf16 %v190_v58, %v189_v52  ;;  %v7196_v39 = vld [vmem:[#allocation6 + $0x110] ss:$8 sps:$4 sm:$0xff]   ;;  %v77_v6 = vsel %vm7677_vm10, 0, %v76_v60 }
  0x57   :  { %3375 = vmatprep.subr.bf16.mxu0 %v7168_v56  ;;  %v6769_v56 = vpack.c.bf16 %v188_v50, %v187_v41  ;;  %v2842_v20 = vld [vmem:[#allocation2 + $0x28] sm:$0x11]  ;;  %78 = vst [vmem:[#allocation2 + $0x60] sm:$0x11] %v77_v6  ;;  %v198_v6 = vld [vmem:[#allocation4 + $0x78] sm:$0xff] }
  0x58   :  { %v2891_v1 = vrot.slane %v2889_v55, 5  ;;  %v2878_v5 = vor.u32 %v2877_v59, %v2874_v53  ;;  %v352_v7 = vshrl.u32 %v6770_v63, 16  ;;  %v355_v8 = vshll.u32 %v6770_v63, 16  ;;  %v514_v50 = vld [vmem:[#allocation2 + $0x48] sm:$0x11]  ;;  %v193_v55 = vld [vmem:[#allocation4 + $0x50] sm:$0xff] }
  0x59   :  { %902 = vmatpush1.bf16.msra.mxu1 %v7170_v10  ;;  %v344_v2 = vshrl.u32 %v6769_v56, 16  ;;  %v347_v3 = vshll.u32 %v6769_v56, 16  ;;  %v2895_v30 = vshll.u32 %v2842_v20, 16 }
  0x5a   :  { %3376 = vmatpush1.bf16.msra.mxu0 %v7171_v13  ;;  %903 = vmatprep.subr.bf16.mxu1 %v7172_v15  ;;  %v2892_v10 = vor.u32 %v2891_v1, %v2888_v0  ;;  %v7195_v13 = vld [vmem:[#allocation6 + $0x504] ss:$8 sps:$4 sm:$0xff]   ;;  %v354_v14 = vrot.slane %v352_v7, 7  ;;  %v2840_v15 = vld [vmem:[#allocation2 + $0x18] sm:$0x11]  ;;  %v2879_v21 = vrot.slane %v2878_v5, 4 }
  0x5b   :  { %3377 = vmatprep.subr.bf16.mxu0 %v7174_v16  ;;  %v346_v12 = vrot.slane %v344_v2, 7  ;;  %v7190_v16 = vld [vmem:[#allocation6 + $0x100] ss:$8 sps:$4 sm:$0xff]   ;;  %v505_v25 = vld [vmem:[#allocation2 + $0x30] sm:$0xff]  ;;  %v2897_v38 = vrot.slane %v2895_v30, 5  ;;  %v194_v2 = vld [vmem:[#allocation4 + $0x58] sm:$0xff] }
  0x5c   :  { %v141_v1 = vld [vmem:[#allocation2 + $0x68] sm:$0x11]  ;;  %v139_v7 = vsel %vm7683_vm11, 0, %v138_v61 }
  0x5d   :  { %904 = vmatpush1.bf16.msra.mxu1 %v7176_v19  ;;  %v349_v17 = vor.u32 %v347_v3, %v346_v12  ;;  %v350_v18 = vrot.slane %v346_v12, 4  ;;  %v6270_v19 = vcombine.low %v7717_v24, %v7721_v29  ;;  %v358_v24 = vrot.slane %v354_v14, 4  ;;  %v7201_v3 = vld [vmem:[#allocation6 + $0x514] ss:$8 sps:$4 sm:$0xff]   ;;  %140 = vst [vmem:[#allocation2 + $0x58] sm:$0x11] %v139_v7 }
  0x5e   :  { %3378 = vmatpush1.bf16.msra.mxu0 %v7177_v23  ;;  %905 = vmatprep.subr.bf16.mxu1 %v7178_v26  ;;  %v2881_v23 = vshll.u32 %v2840_v15, 16  ;;  %v357_v26 = vor.u32 %v355_v8, %v354_v14  ;;  %v7199_v8 = vld [vmem:[#allocation6 + $0x510] ss:$8 sps:$4 sm:$0xff]   ;;  %v6772_v12 = vpack.c.bf16 %v194_v2, %v193_v55  ;;  %v7202_v14 = vld [vmem:[#allocation6 + $0x120] ss:$8 sps:$4 sm:$0xff]  }
  0x5f   :  { %3379 = vmatprep.subr.bf16.mxu0 %v7180_v28  ;;  %v2893_v28 = vrot.slane %v2892_v10, 4  ;;  %v7757_v32 = vsel %vm7713_vm0, %v349_v17, %v505_v25  ;;  %v515_v57 = vsel %vm7677_vm10, %v358_v24, %v514_v50  ;;  %v7207_v15 = vld [vmem:[#allocation6 + $0x524] ss:$8 sps:$4 sm:$0xff]   ;;  %v7213_v24 = vld [vmem:[#allocation6 + $0x534] ss:$8 sps:$4 sm:$0xff]  }
  0x60   :  { %v2883_v29 = vrot.slane %v2881_v23, 5  ;;  %507 = vst [vmem:[#allocation2 + $0x30] sm:$0xff] %v7757_v32  ;;  %v6273_v33 = vcombine.high %v7731_v44, %v7757_v32  ;;  %v2900_v36 = vshrl.u32 %v7757_v32, 16  ;;  %v2903_v37 = vshll.u32 %v7757_v32, 16  ;;  %516 = vst [vmem:[#allocation2 + $0x48] sm:$0x11] %v515_v57 }
  0x61   :  { %906 = vmatpush1.bf16.msra.mxu1 %v7182_v34  ;;  %v508_v34 = vld [vmem:[#allocation2 + $0x38] sm:$0x11]  ;;  %v2898_v56 = vsel %vm7751_vm4, %v2893_v28, %v2897_v38  ;;  %v6272_v10 = vcombine.low %v7731_v44, %v7757_v32  ;;  %v371_v20 = vshll.u32 %v6772_v12, 16  ;;  %v7205_v28 = vld [vmem:[#allocation6 + $0x520] ss:$8 sps:$4 sm:$0xff]  }
  0x62   :  { %3380 = vmatpush1.bf16.msra.mxu0 %v7183_v35  ;;  %907 = vmatprep.subr.bf16.mxu1 %v7184_v42  ;;  %v511_v35 = vld [vmem:[#allocation2 + $0x40] sm:$0xff]  ;;  %v509_v40 = vsel %vm7677_vm10, %v350_v18, %v508_v34  ;;  %v73_v42 = vld [vmem:[#allocation2 + $0x50] sm:$0x11]  ;;  %v2884_v47 = vsel %vm7751_vm4, %v2879_v21, %v2883_v29  ;;  %v2902_v51 = vrot.slane %v2900_v36, 4  ;;  %v2905_v52 = vrot.slane %v2903_v37, 5 }
  0x63   :  { %3381 = vmatprep.subr.bf16.mxu0 %v7186_v43  ;;  %v7768_v41 = vsel %vm7713_vm0, %v357_v26, %v511_v35  ;;  %v191_v43 = vld [vmem:[#allocation4 + $0x40] sm:$0xff]  ;;  %510 = vst [vmem:[#allocation2 + $0x38] sm:$0x11] %v509_v40  ;;  %v74_v59 = vsel %vm7677_vm10, 0, %v73_v42  ;;  %v6478_v62 = vcombine.low %v2884_v47, %v2898_v56  ;;  %v6479_v63 = vcombine.high %v2884_v47, %v2898_v56  ;;  %v7210_v18 = vld [vmem:[#allocation6 + $0x134] ss:$8 sps:$4 sm:$0xff]  }
  0x64   :  { %513 = vst [vmem:[#allocation2 + $0x40] sm:$0xff] %v7768_v41  ;;  %v2914_v53 = vshrl.u32 %v7768_v41, 16  ;;  %v2917_v58 = vshll.u32 %v7768_v41, 16  ;;  %75 = vst [vmem:[#allocation2 + $0x50] sm:$0x11] %v74_v59  ;;  %v6771_v5 = vpack.c.bf16 %v192_v45, %v191_v43  ;;  %v523_v45 = vld [vmem:[#allocation2 + $0x60] sm:$0xff] }
  0x65   :  { %908 = vmatpush1.bf16.msra.mxu1 %v7188_v4  ;;  %3383 = vmatprep.mubr.bf16.mxu0 %v6479_v63  ;;  %v7208_v21 = vld [vmem:[#allocation6 + $0x130] ss:$8 sps:$4 sm:$0xff]   ;;  %v7216_v35 = vld [vmem:[#allocation6 + $0x144] ss:$8 sps:$4 sm:$0xff]   ;;  %v7214_v47 = vld [vmem:[#allocation6 + $0x140] ss:$8 sps:$4 sm:$0xff]  }
  0x66   :  { %3382 = vmatpush1.bf16.msra.mxu0 %v7189_v9  ;;  %1537 = vmatprep.subr.bf16.mxu1 %v7192_v11  ;;  %v2916_v0 = vrot.slane %v2914_v53, 4  ;;  %v2919_v4 = vrot.slane %v2917_v58, 5  ;;  %v2906_v9 = vor.u32 %v2905_v52, %v2902_v51  ;;  %v142_v11 = vsel %vm7683_vm11, 0, %v141_v1  ;;  %v79_v40 = vld [vmem:[#allocation2 + $0x70] sm:$0x11]  ;;  %v195_v50 = vld [vmem:[#allocation4 + $0x60] sm:$0xff] }
  0x67   :  { %3944 = vmatprep.subr.bf16.mxu0 %v7195_v13  ;;  %v363_v17 = vshll.u32 %v6771_v5, 16  ;;  %143 = vst [vmem:[#allocation2 + $0x68] sm:$0x11] %v142_v11  ;;  %v520_v43 = vld [vmem:[#allocation2 + $0x58] sm:$0x11]  ;;  %v196_v51 = vld [vmem:[#allocation4 + $0x68] sm:$0xff] }
  0x68   :  { %910 = vmatmul.mubr.bf16.vlgmr.msra.gmra.mrb[0].mxu1 %v6270_v19  ;;  %v2920_v13 = vor.u32 %v2919_v4, %v2916_v0  ;;  %v368_v19 = vshrl.u32 %v6772_v12, 16  ;;  %v2907_v25 = vrot.slane %v2906_v9, 4  ;;  %v7222_v57 = vld [vmem:[#allocation6 + $0x154] ss:$8 sps:$4 sm:$0xff]   ;;  %v82_v58 = vld [vmem:[#allocation2 + $0x80] sm:$0x11] }
  0x69   :  { %1538 = vmatpush1.bf16.msra.mxu1 %v7190_v16  ;;  %919 = vmatprep.mubr.bf16.mxu1 %v6273_v33  ;;  %v360_v16 = vshrl.u32 %v6771_v5, 16  ;;  %v197_v59 = vld [vmem:[#allocation4 + $0x70] sm:$0xff]  ;;  %v144_v0 = vld [vmem:[#allocation2 + $0x78] sm:$0x11]  ;;  %v147_v1 = vld [vmem:[#allocation2 + $0x88] sm:$0x11] }
  0x6a   :  { %1539 = vmatprep.subr.bf16.mxu1 %v7198_v31  ;;  %3384 = vmatmul.mubr.bf16.vlgmr.msra.gmra.mrb[0].mxu0 %v6478_v62  ;;  %v2844_v44 = vld [vmem:[#allocation2 + $0x38] sm:$0x11]  ;;  %v370_v30 = vrot.slane %v368_v19, 7  ;;  %v2846_v31 = vld [vmem:[#allocation2 + $0x48] sm:$0x11]  ;;  %v2921_v32 = vrot.slane %v2920_v13, 4 }
  0x6b   :  { %3945 = vmatpush1.bf16.msra.mxu0 %v7193_v48  ;;  %v362_v23 = vrot.slane %v360_v16, 7  ;;  %v2909_v26 = vshll.u32 %v2844_v44, 16  ;;  %v517_v34 = vld [vmem:[#allocation2 + $0x50] sm:$0xff]  ;;  %v2923_v37 = vshll.u32 %v2846_v31, 16  ;;  %v80_v48 = vsel %vm7677_vm10, 0, %v79_v40  ;;  %v199_v40 = vld [vmem:[#allocation4 + $0x80] sm:$0xff] }
  0x6c   :  { %3946 = vmatprep.subr.bf16.mxu0 %v7201_v3  ;;  %v373_v38 = vor.u32 %v371_v20, %v370_v30  ;;  %81 = vst [vmem:[#allocation2 + $0x70] sm:$0x11] %v80_v48  ;;  %v7211_v9 = vld [vmem:[#allocation6 + $0x530] ss:$8 sps:$4 sm:$0xff]   ;;  %v7219_v12 = vld [vmem:[#allocation6 + $0x544] ss:$8 sps:$4 sm:$0xff]   ;;  %v6774_v44 = vpack.c.bf16 %v198_v6, %v197_v59 }
  0x6d   :  { %1540 = vmatpush1.bf16.msra.mxu1 %v7196_v39  ;;  %v365_v29 = vor.u32 %v363_v17, %v362_v23  ;;  %v366_v33 = vrot.slane %v362_v23, 4  ;;  %v2911_v36 = vrot.slane %v2909_v26, 5  ;;  %v374_v39 = vrot.slane %v370_v30, 4  ;;  %v7225_v23 = vld [vmem:[#allocation6 + $0x554] ss:$8 sps:$4 sm:$0xff]  }
  0x6e   :  { %1541 = vmatprep.subr.bf16.mxu1 %v7204_v54  ;;  %v2925_v53 = vrot.slane %v2923_v37, 5  ;;  %v526_v56 = vld [vmem:[#allocation2 + $0x68] sm:$0x11]  ;;  %v7800_v60 = vsel %vm7713_vm0, %v373_v38, %v523_v45  ;;  %v83_v16 = vsel %vm7677_vm10, 0, %v82_v58  ;;  %v145_v19 = vsel %vm7683_vm11, 0, %v144_v0 }
  0x6f   :  { %3947 = vmatpush1.bf16.msra.mxu0 %v7199_v8  ;;  %v518_v42 = vsel %vm7713_vm0, %v365_v29, %v517_v34  ;;  %v2912_v52 = vsel %vm7751_vm4, %v2907_v25, %v2911_v36  ;;  %v521_v55 = vsel %vm7677_vm10, %v366_v33, %v520_v43  ;;  %v527_v61 = vsel %vm7677_vm10, %v374_v39, %v526_v56  ;;  %v7234_v34 = vld [vmem:[#allocation6 + $0x174] ss:$8 sps:$4 sm:$0xff]   ;;  %v7223_v37 = vld [vmem:[#allocation6 + $0x550] ss:$8 sps:$4 sm:$0xff]   ;;  %v7231_v48 = vld [vmem:[#allocation6 + $0x564] ss:$8 sps:$4 sm:$0xff]  }
  0x70   :  { %920 = vmatmul.mubr.bf16.gmra.mrb[4].mxu1 %v6272_v10  ;;  %3948 = vmatprep.subr.bf16.mxu0 %v7207_v15  ;;  %519 = vst [vmem:[#allocation2 + $0x50] sm:$0xff] %v518_v42  ;;  %v6275_v54 = vcombine.high %v7768_v41, %v518_v42  ;;  %522 = vst [vmem:[#allocation2 + $0x58] sm:$0x11] %v521_v55  ;;  %v2928_v62 = vshrl.u32 %v518_v42, 16  ;;  %v2931_v63 = vshll.u32 %v518_v42, 16  ;;  %v2942_v3 = vshrl.u32 %v7800_v60, 16 }
  0x71   :  { %1542 = vmatpush1.bf16.msra.mxu1 %v7202_v14  ;;  %v2926_v2 = vsel %vm7751_vm4, %v2921_v32, %v2925_v53  ;;  %525 = vst [vmem:[#allocation2 + $0x60] sm:$0xff] %v7800_v60  ;;  %528 = vst [vmem:[#allocation2 + $0x68] sm:$0x11] %v527_v61  ;;  %v2945_v4 = vshll.u32 %v7800_v60, 16  ;;  %v6274_v5 = vcombine.low %v7768_v41, %v518_v42  ;;  %v7220_v41 = vld [vmem:[#allocation6 + $0x150] ss:$8 sps:$4 sm:$0xff]  }
  0x72   :  { %1543 = vmatprep.subr.bf16.mxu1 %v7210_v18  ;;  %929 = vmatprep.mubr.bf16.mxu1 %v6275_v54  ;;  %v6481_v7 = vcombine.high %v2912_v52, %v2926_v2  ;;  %v6480_v8 = vcombine.low %v2912_v52, %v2926_v2  ;;  %v2930_v10 = vrot.slane %v2928_v62, 4  ;;  %v2933_v11 = vrot.slane %v2931_v63, 5  ;;  %v7217_v18 = vld [vmem:[#allocation6 + $0x540] ss:$8 sps:$4 sm:$0xff]   ;;  %84 = vst [vmem:[#allocation2 + $0x80] sm:$0x11] %v83_v16 }
  0x73   :  { %3949 = vmatpush1.bf16.msra.mxu0 %v7205_v28  ;;  %v2944_v13 = vrot.slane %v2942_v3, 4  ;;  %v2947_v14 = vrot.slane %v2945_v4, 5  ;;  %v6773_v15 = vpack.c.bf16 %v196_v51, %v195_v50  ;;  %v148_v20 = vsel %vm7683_vm11, 0, %v147_v1  ;;  %146 = vst [vmem:[#allocation2 + $0x78] sm:$0x11] %v145_v19  ;;  %v529_v38 = vld [vmem:[#allocation2 + $0x70] sm:$0xff] }
  0x74   :  { %3950 = vmatprep.subr.bf16.mxu0 %v7213_v24  ;;  %3393 = vmatprep.mubr.bf16.mxu0 %v6481_v7  ;;  %v2934_v17 = vor.u32 %v2933_v11, %v2930_v10  ;;  %149 = vst [vmem:[#allocation2 + $0x88] sm:$0x11] %v148_v20  ;;  %v7228_v28 = vld [vmem:[#allocation6 + $0x164] ss:$8 sps:$4 sm:$0xff]   ;;  %v384_v31 = vshrl.u32 %v6774_v44, 16  ;;  %v387_v32 = vshll.u32 %v6774_v44, 16 }
  0x75   :  { %1544 = vmatpush1.bf16.msra.mxu1 %v7208_v21  ;;  %3394 = vmatmul.mubr.bf16.gmra.mrb[4].mxu0 %v6480_v8  ;;  %v2948_v21 = vor.u32 %v2947_v14, %v2944_v13  ;;  %v376_v25 = vshrl.u32 %v6773_v15, 16  ;;  %v379_v26 = vshll.u32 %v6773_v15, 16  ;;  %v7226_v24 = vld [vmem:[#allocation6 + $0x160] ss:$8 sps:$4 sm:$0xff]   ;;  %v7232_v54 = vld [vmem:[#allocation6 + $0x170] ss:$8 sps:$4 sm:$0xff]  }
  0x76   :  { %1545 = vmatprep.subr.bf16.mxu1 %v7216_v35  ;;  %v2935_v30 = vrot.slane %v2934_v17, 4  ;;  %v386_v39 = vrot.slane %v384_v31, 7  ;;  %v88_v50 = vld [vmem:[#allocation2 + $0xa0] sm:$0x11]  ;;  %v91_v56 = vld [vmem:[#allocation2 + $0xb0] sm:$0x11] }
  0x77   :  { %3951 = vmatpush1.bf16.msra.mxu0 %v7211_v9  ;;  %v2848_v29 = vld [vmem:[#allocation2 + $0x58] sm:$0x11]  ;;  %v378_v33 = vrot.slane %v376_v25, 7  ;;  %v2949_v42 = vrot.slane %v2948_v21, 4  ;;  %v89_v55 = vsel %vm7677_vm10, 0, %v88_v50  ;;  %v92_v62 = vsel %vm7677_vm10, 0, %v91_v56 }
  0x78   :  { %930 = vmatmul.mubr.bf16.gmra.mrb[8].mxu1 %v6274_v5  ;;  %3952 = vmatprep.subr.bf16.mxu0 %v7219_v12  ;;  %v2850_v35 = vld [vmem:[#allocation2 + $0x68] sm:$0x11]  ;;  %v2937_v36 = vshll.u32 %v2848_v29, 16  ;;  %v389_v52 = vor.u32 %v387_v32, %v386_v39  ;;  %v390_v53 = vrot.slane %v386_v39, 4  ;;  %90 = vst [vmem:[#allocation2 + $0xa0] sm:$0x11] %v89_v55 }
  0x79   :  { %1546 = vmatpush1.bf16.msra.mxu1 %v7214_v47  ;;  %v2951_v43 = vshll.u32 %v2850_v35, 16  ;;  %v381_v45 = vor.u32 %v379_v26, %v378_v33  ;;  %v382_v47 = vrot.slane %v378_v33, 4  ;;  %v535_v61 = vld [vmem:[#allocation2 + $0x80] sm:$0xff]  ;;  %93 = vst [vmem:[#allocation2 + $0xb0] sm:$0x11] %v92_v62  ;;  %v201_v14 = vld [vmem:[#allocation4 + $0x90] sm:$0xff] }
  0x7a   :  { %1547 = vmatprep.subr.bf16.mxu1 %v7222_v57  ;;  %v2939_v51 = vrot.slane %v2937_v36, 5  ;;  %v200_v57 = vld [vmem:[#allocation4 + $0x88] sm:$0xff]  ;;  %v94_v0 = vld [vmem:[#allocation2 + $0xc0] sm:$0x11]  ;;  %v532_v3 = vld [vmem:[#allocation2 + $0x78] sm:$0x11]  ;;  %v536_v4 = vsel %vm7713_vm0, %v389_v52, %v535_v61 }
  0x7b   :  { %3953 = vmatpush1.bf16.msra.mxu0 %v7217_v18  ;;  %v2953_v58 = vrot.slane %v2951_v43, 5  ;;  %v530_v59 = vsel %vm7713_vm0, %v381_v45, %v529_v38  ;;  %v7822_v63 = vpack.c.bf16 %v200_v57, %v199_v40  ;;  %v538_v5 = vld [vmem:[#allocation2 + $0x88] sm:$0x11]  ;;  %v533_v9 = vsel %vm7677_vm10, %v382_v47, %v532_v3  ;;  %537 = vst [vmem:[#allocation2 + $0x80] sm:$0xff] %v536_v4  ;;  %v7237_v12 = vld [vmem:[#allocation6 + $0x574] ss:$8 sps:$4 sm:$0xff]  }
  0x7c   :  { %3954 = vmatprep.subr.bf16.mxu0 %v7225_v23  ;;  %v2940_v1 = vsel %vm7751_vm4, %v2935_v30, %v2939_v51  ;;  %531 = vst [vmem:[#allocation2 + $0x70] sm:$0xff] %v530_v59  ;;  %v6277_v2 = vcombine.high %v7800_v60, %v530_v59  ;;  %v2956_v6 = vshrl.u32 %v530_v59, 16  ;;  %v7229_v7 = vld [vmem:[#allocation6 + $0x560] ss:$8 sps:$4 sm:$0xff]   ;;  %v539_v10 = vsel %vm7677_vm10, %v390_v53, %v538_v5  ;;  %v156_v13 = vld [vmem:[#allocation2 + $0xb8] sm:$0x11] }
  0x7d   :  { %1548 = vmatpush1.bf16.msra.mxu1 %v7220_v41  ;;  %v2954_v8 = vsel %vm7751_vm4, %v2949_v42, %v2953_v58  ;;  %v2959_v11 = vshll.u32 %v530_v59, 16  ;;  %v202_v15 = vld [vmem:[#allocation4 + $0x98] sm:$0xff]  ;;  %534 = vst [vmem:[#allocation2 + $0x78] sm:$0x11] %v533_v9  ;;  %540 = vst [vmem:[#allocation2 + $0x88] sm:$0x11] %v539_v10  ;;  %v6276_v21 = vcombine.low %v7800_v60, %v530_v59 }
  0x7e   :  { %1549 = vmatprep.subr.bf16.mxu1 %v7228_v28  ;;  %v6483_v16 = vcombine.high %v2940_v1, %v2954_v8  ;;  %v6482_v17 = vcombine.low %v2940_v1, %v2954_v8  ;;  %939 = vmatprep.mubr.bf16.mxu1 %v6277_v2  ;;  %v2958_v18 = vrot.slane %v2956_v6, 4  ;;  %v2970_v41 = vshrl.u32 %v536_v4, 16  ;;  %v159_v19 = vld [vmem:[#allocation2 + $0xc8] sm:$0x11]  ;;  %v7235_v28 = vld [vmem:[#allocation6 + $0x570] ss:$8 sps:$4 sm:$0xff]  }
  0x7f   :  { %3955 = vmatpush1.bf16.msra.mxu0 %v7223_v37  ;;  %v2961_v20 = vrot.slane %v2959_v11, 5  ;;  %v2973_v44 = vshll.u32 %v536_v4, 16  ;;  %v392_v23 = vshrl.u32 %v7822_v63, 16  ;;  %v7240_v25 = vld [vmem:[#allocation6 + $0x184] ss:$8 sps:$4 sm:$0xff]   ;;  %v395_v30 = vshll.u32 %v7822_v63, 16 }
  0x80   :  { %3956 = vmatprep.subr.bf16.mxu0 %v7231_v48  ;;  %3403 = vmatprep.mubr.bf16.mxu0 %v6483_v16  ;;  %v2972_v26 = vrot.slane %v2970_v41, 4  ;;  %v95_v31 = vsel %vm7677_vm10, 0, %v94_v0  ;;  %v157_v32 = vsel %vm7683_vm11, 0, %v156_v13  ;;  %v7243_v35 = vld [vmem:[#allocation6 + $0x584] ss:$8 sps:$4 sm:$0xff]   ;;  %v6776_v37 = vpack.c.bf16 %v202_v15, %v201_v14  ;;  %v541_v42 = vld [vmem:[#allocation2 + $0xb0] sm:$0xff] }
  0x81   :  { %1550 = vmatpush1.bf16.msra.mxu1 %v7226_v24  ;;  %v7238_v24 = vld [vmem:[#allocation6 + $0x180] ss:$8 sps:$4 sm:$0xff]   ;;  %3404 = vmatmul.mubr.bf16.gmra.mrb[8].mxu0 %v6482_v17  ;;  %v2962_v29 = vor.u32 %v2961_v20, %v2958_v18  ;;  %v2975_v60 = vrot.slane %v2973_v44, 5  ;;  %v394_v33 = vrot.slane %v392_v23, 7  ;;  %96 = vst [vmem:[#allocation2 + $0xc0] sm:$0x11] %v95_v31 }
  0x82   :  { %1551 = vmatprep.subr.bf16.mxu1 %v7234_v34  ;;  %940 = vmatmul.mubr.bf16.gmra.mrb[12].mxu1 %v6276_v21  ;;  %158 = vst [vmem:[#allocation2 + $0xb8] sm:$0x11] %v157_v32  ;;  %v160_v34 = vsel %vm7683_vm11, 0, %v159_v19  ;;  %v597_v36 = vld [vmem:[#allocation2 + $0xa0] sm:$0xff]  ;;  %v7244_v38 = vld [vmem:[#allocation6 + $0x190] ss:$8 sps:$4 sm:$0xff]  }
  0x83   :  { %3957 = vmatpush1.bf16.msra.mxu0 %v7229_v7  ;;  %161 = vst [vmem:[#allocation2 + $0xc8] sm:$0x11] %v160_v34  ;;  %v2976_v39 = vor.u32 %v2975_v60, %v2972_v26  ;;  %v397_v40 = vor.u32 %v395_v30, %v394_v33  ;;  %v7246_v43 = vld [vmem:[#allocation6 + $0x194] ss:$8 sps:$4 sm:$0xff]   ;;  %v2963_v45 = vrot.slane %v2962_v29, 4  ;;  %v398_v47 = vrot.slane %v394_v33, 4 }
  0x84   :  { %3958 = vmatprep.subr.bf16.mxu0 %v7237_v12  ;;  %v400_v48 = vshrl.u32 %v6776_v37, 16  ;;  %v403_v50 = vshll.u32 %v6776_v37, 16  ;;  %v7241_v51 = vld [vmem:[#allocation6 + $0x580] ss:$8 sps:$4 sm:$0xff]   ;;  %v2852_v53 = vld [vmem:[#allocation2 + $0x78] sm:$0x11] }
  0x85   :  { %1552 = vmatpush1.bf16.msra.mxu1 %v7232_v54  ;;  %v203_v52 = vld [vmem:[#allocation4 + $0xa0] sm:$0xff]  ;;  %v2854_v54 = vld [vmem:[#allocation2 + $0x88] sm:$0x11]  ;;  %v2977_v55 = vrot.slane %v2976_v39, 4  ;;  %v542_v56 = vsel %vm7713_vm0, %v397_v40, %v541_v42  ;;  %v2965_v58 = vshll.u32 %v2852_v53, 16  ;;  %v205_v18 = vld [vmem:[#allocation4 + $0xb0] sm:$0xff] }
  0x86   :  { %1553 = vmatprep.subr.bf16.mxu1 %v7240_v25  ;;  %v204_v57 = vld [vmem:[#allocation4 + $0xa8] sm:$0xff]  ;;  %v2979_v59 = vshll.u32 %v2854_v54, 16  ;;  %543 = vst [vmem:[#allocation2 + $0xb0] sm:$0xff] %v542_v56  ;;  %v6279_v61 = vcombine.high %v597_v36, %v542_v56  ;;  %v402_v62 = vrot.slane %v400_v48, 7  ;;  %v7249_v63 = vld [vmem:[#allocation6 + $0x594] ss:$8 sps:$4 sm:$0xff]   ;;  %v6278_v2 = vcombine.low %v597_v36, %v542_v56 }
  0x87   :  { %3959 = vmatpush1.bf16.msra.mxu0 %v7235_v28  ;;  %v2984_v0 = vshrl.u32 %v542_v56, 16  ;;  %v2987_v1 = vshll.u32 %v542_v56, 16  ;;  %v97_v3 = vld [vmem:[#allocation2 + $0xd0] sm:$0x11]  ;;  %v6777_v4 = vpack.c.bf16 %v204_v57, %v203_v52  ;;  %v100_v5 = vld [vmem:[#allocation2 + $0xe0] sm:$0x11] }
  0x88   :  { %3960 = vmatprep.subr.bf16.mxu0 %v7243_v35  ;;  %v2967_v6 = vrot.slane %v2965_v58, 5  ;;  %v2981_v7 = vrot.slane %v2979_v59, 5  ;;  %949 = vmatprep.mubr.bf16.mxu1 %v6279_v61  ;;  %v405_v8 = vor.u32 %v403_v50, %v402_v62  ;;  %v406_v9 = vrot.slane %v402_v62, 4  ;;  %v547_v11 = vld [vmem:[#allocation2 + $0xc0] sm:$0xff]  ;;  %v7247_v16 = vld [vmem:[#allocation6 + $0x590] ss:$8 sps:$4 sm:$0xff]  }
  0x89   :  { %1554 = vmatpush1.bf16.msra.mxu1 %v7238_v24  ;;  %v544_v10 = vld [vmem:[#allocation2 + $0xb8] sm:$0x11]  ;;  %v2986_v14 = vrot.slane %v2984_v0, 4  ;;  %v2989_v15 = vrot.slane %v2987_v1, 5  ;;  %v98_v17 = vsel %vm7677_vm10, 0, %v97_v3  ;;  %v408_v60 = vshrl.u32 %v6777_v4, 16 }
  0x8a   :  { %1555 = vmatprep.subr.bf16.mxu1 %v7246_v43  ;;  %v545_v12 = vsel %vm7677_vm10, %v398_v47, %v544_v10  ;;  %v550_v13 = vld [vmem:[#allocation2 + $0xc8] sm:$0x11]  ;;  %950 = vmatmul.mubr.bf16.gmra.mrb[16].mxu1 %v6278_v2  ;;  %v206_v41 = vld [vmem:[#allocation4 + $0xb8] sm:$0xff]  ;;  %v2968_v19 = vsel %vm7751_vm4, %v2963_v45, %v2967_v6  ;;  %v2982_v20 = vsel %vm7751_vm4, %v2977_v55, %v2981_v7  ;;  %v411_v33 = vshll.u32 %v6777_v4, 16  ;;  %v207_v54 = vld [vmem:[#allocation4 + $0xc0] sm:$0xff] }
  0x8b   :  { %546 = vst [vmem:[#allocation2 + $0xb8] sm:$0x11] %v545_v12  ;;  %v7856_v44 = vsel %vm7713_vm0, %v405_v8, %v547_v11  ;;  %v551_v21 = vsel %vm7677_vm10, %v406_v9, %v550_v13  ;;  %3961 = vmatpush1.bf16.msra.mxu0 %v7241_v51  ;;  %99 = vst [vmem:[#allocation2 + $0xd0] sm:$0x11] %v98_v17  ;;  %v162_v23 = vld [vmem:[#allocation2 + $0xd8] sm:$0x11]  ;;  %v6485_v26 = vcombine.high %v2968_v19, %v2982_v20 }
  0x8c   :  { %v165_v25 = vld [vmem:[#allocation2 + $0xe8] sm:$0x11]  ;;  %v6484_v28 = vcombine.low %v2968_v19, %v2982_v20  ;;  %549 = vst [vmem:[#allocation2 + $0xc0] sm:$0xff] %v7856_v44  ;;  %552 = vst [vmem:[#allocation2 + $0xc8] sm:$0x11] %v551_v21  ;;  %v2990_v30 = vor.u32 %v2989_v15, %v2986_v14  ;;  %v2998_v31 = vshrl.u32 %v7856_v44, 16  ;;  %3962 = vmatprep.subr.bf16.mxu0 %v7249_v63 }
  0x8d   :  { %1556 = vmatpush1.bf16.msra.mxu1 %v7244_v38  ;;  %v7250_v32 = vld [vmem:[#allocation6 + $0x1a0] ss:$8 sps:$4 sm:$0xff]   ;;  %v7252_v24 = vld [vmem:[#allocation6 + $0x1a4] ss:$8 sps:$4 sm:$0xff]   ;;  %v3001_v29 = vshll.u32 %v7856_v44, 16  ;;  %v101_v34 = vsel %vm7677_vm10, 0, %v100_v5  ;;  %3413 = vmatprep.mubr.bf16.mxu0 %v6485_v26  ;;  %v6778_v42 = vpack.c.bf16 %v206_v41, %v205_v18 }
  0x8e   :  { %v3000_v35 = vrot.slane %v2998_v31, 4  ;;  %102 = vst [vmem:[#allocation2 + $0xe0] sm:$0x11] %v101_v34  ;;  %v163_v36 = vsel %vm7683_vm11, 0, %v162_v23  ;;  %v166_v37 = vsel %vm7683_vm11, 0, %v165_v25  ;;  %1557 = vmatprep.subr.bf16.mxu1 %v7252_v24  ;;  %3414 = vmatmul.mubr.bf16.gmra.mrb[12].mxu0 %v6484_v28  ;;  %v410_v40 = vrot.slane %v408_v60, 7 }
  0x8f   :  { %v7253_v38 = vld [vmem:[#allocation6 + $0x5a0] ss:$8 sps:$4 sm:$0xff]   ;;  %v3003_v39 = vrot.slane %v3001_v29, 5  ;;  %164 = vst [vmem:[#allocation2 + $0xd8] sm:$0x11] %v163_v36  ;;  %v2991_v45 = vrot.slane %v2990_v30, 4  ;;  %3963 = vmatpush1.bf16.msra.mxu0 %v7247_v16 }
  0x90   :  { %167 = vst [vmem:[#allocation2 + $0xe8] sm:$0x11] %v166_v37  ;;  %v7255_v43 = vld [vmem:[#allocation6 + $0x5a4] ss:$8 sps:$4 sm:$0xff]   ;;  %v7256_v47 = vld [vmem:[#allocation6 + $0x1b0] ss:$8 sps:$4 sm:$0xff]   ;;  %v413_v51 = vor.u32 %v411_v33, %v410_v40 }
  0x91   :  { %1558 = vmatpush1.bf16.msra.mxu1 %v7250_v32  ;;  %v7258_v48 = vld [vmem:[#allocation6 + $0x1b4] ss:$8 sps:$4 sm:$0xff]   ;;  %v3004_v50 = vor.u32 %v3003_v39, %v3000_v35  ;;  %v414_v52 = vrot.slane %v410_v40, 4  ;;  %v416_v53 = vshrl.u32 %v6778_v42, 16  ;;  %3964 = vmatprep.subr.bf16.mxu0 %v7255_v43  ;;  %v419_v57 = vshll.u32 %v6778_v42, 16  ;;  %v208_v1 = vld [vmem:[#allocation4 + $0xc8] sm:$0xff] }
  0x92   :  { %v2856_v55 = vld [vmem:[#allocation2 + $0xb8] sm:$0x11]  ;;  %v553_v56 = vld [vmem:[#allocation2 + $0xd0] sm:$0xff]  ;;  %1559 = vmatprep.subr.bf16.mxu1 %v7258_v48  ;;  %v6779_v41 = vpack.c.bf16 %v208_v1, %v207_v54  ;;  %v106_v19 = vld [vmem:[#allocation2 + $0x100] sm:$0x11] }
  0x93   :  { %v7261_v58 = vld [vmem:[#allocation6 + $0x5b4] ss:$8 sps:$4 sm:$0xff]   ;;  %v2858_v59 = vld [vmem:[#allocation2 + $0xc8] sm:$0x11]  ;;  %v2993_v61 = vshll.u32 %v2856_v55, 16  ;;  %v3005_v62 = vrot.slane %v3004_v50, 4  ;;  %v554_v63 = vsel %vm7713_vm0, %v413_v51, %v553_v56  ;;  %3965 = vmatpush1.bf16.msra.mxu0 %v7253_v38 }
  0x94   :  { %v418_v0 = vrot.slane %v416_v53, 7  ;;  %v3007_v2 = vshll.u32 %v2858_v59, 16  ;;  %555 = vst [vmem:[#allocation2 + $0xd0] sm:$0xff] %v554_v63  ;;  %v6281_v3 = vcombine.high %v7856_v44, %v554_v63  ;;  %v3012_v4 = vshrl.u32 %v554_v63, 16  ;;  %v7259_v6 = vld [vmem:[#allocation6 + $0x5b0] ss:$8 sps:$4 sm:$0xff]   ;;  %3966 = vmatprep.subr.bf16.mxu0 %v7261_v58 }
  0x95   :  { %1560 = vmatpush1.bf16.msra.mxu1 %v7256_v47  ;;  %v3015_v5 = vshll.u32 %v554_v63, 16  ;;  %v209_v7 = vld [vmem:[#allocation4 + $0xd0] sm:$0xff]  ;;  %v2995_v8 = vrot.slane %v2993_v61, 5  ;;  %v559_v11 = vld [vmem:[#allocation2 + $0xe0] sm:$0xff]  ;;  %v6280_v12 = vcombine.low %v7856_v44, %v554_v63  ;;  %v210_v14 = vld [vmem:[#allocation4 + $0xd8] sm:$0xff]  ;;  %v424_v35 = vshrl.u32 %v6779_v41, 16 }
  0x96   :  { %v421_v9 = vor.u32 %v419_v57, %v418_v0  ;;  %v422_v10 = vrot.slane %v418_v0, 4  ;;  %v103_v13 = vld [vmem:[#allocation2 + $0xf0] sm:$0x11]  ;;  %v3009_v15 = vrot.slane %v3007_v2, 5  ;;  %959 = vmatprep.mubr.bf16.mxu1 %v6281_v3  ;;  %v556_v16 = vld [vmem:[#allocation2 + $0xd8] sm:$0x11]  ;;  %v6780_v20 = vpack.c.bf16 %v210_v14, %v209_v7 }
  0x97   :  { %v562_v17 = vld [vmem:[#allocation2 + $0xe8] sm:$0x11]  ;;  %v3014_v18 = vrot.slane %v3012_v4, 4  ;;  %v2996_v21 = vsel %vm7751_vm4, %v2991_v45, %v2995_v8  ;;  %v557_v23 = vsel %vm7677_vm10, %v414_v52, %v556_v16  ;;  %960 = vmatmul.mubr.bf16.gmra.mrb[20].mxu1 %v6280_v12  ;;  %v168_v26 = vld [vmem:[#allocation2 + $0xf8] sm:$0x11]  ;;  %v3017_v31 = vrot.slane %v3015_v5, 5  ;;  %3967 = vmatpush1.bf16.msra.mxu0 %v7259_v6 }
  0x98   :  { %v7879_v44 = vsel %vm7713_vm0, %v421_v9, %v559_v11  ;;  %v563_v25 = vsel %vm7677_vm10, %v422_v10, %v562_v17  ;;  %v171_v28 = vld [vmem:[#allocation2 + $0x108] sm:$0x11]  ;;  %v3010_v30 = vsel %vm7751_vm4, %v3005_v62, %v3009_v15  ;;  %558 = vst [vmem:[#allocation2 + $0xd8] sm:$0x11] %v557_v23  ;;  %v104_v34 = vsel %vm7677_vm10, 0, %v103_v13  ;;  %v211_v6 = vld [vmem:[#allocation4 + $0xe0] sm:$0xff] }
  0x99   :  { %561 = vst [vmem:[#allocation2 + $0xe0] sm:$0xff] %v7879_v44  ;;  %564 = vst [vmem:[#allocation2 + $0xe8] sm:$0x11] %v563_v25  ;;  %v3026_v32 = vshrl.u32 %v7879_v44, 16  ;;  %v3029_v24 = vshll.u32 %v7879_v44, 16  ;;  %v6487_v60 = vcombine.high %v2996_v21, %v3010_v30  ;;  %v6486_v33 = vcombine.low %v2996_v21, %v3010_v30  ;;  %v212_v7 = vld [vmem:[#allocation4 + $0xe8] sm:$0xff] }
  0x9a   :  { %v7262_v29 = vld [vmem:[#allocation6 + $0x1c0] ss:$8 sps:$4 sm:$0xff]   ;;  %v7264_v36 = vld [vmem:[#allocation6 + $0x1c4] ss:$8 sps:$4 sm:$0xff]   ;;  %v3018_v37 = vor.u32 %v3017_v31, %v3014_v18  ;;  %105 = vst [vmem:[#allocation2 + $0xf0] sm:$0x11] %v104_v34  ;;  %v7902_v12 = vpack.c.bf16 %v212_v7, %v211_v6 }
  0x9b   :  { %v3028_v38 = vrot.slane %v3026_v32, 4  ;;  %v3031_v39 = vrot.slane %v3029_v24, 5  ;;  %v427_v40 = vshll.u32 %v6779_v41, 16  ;;  %v7265_v42 = vld [vmem:[#allocation6 + $0x5c0] ss:$8 sps:$4 sm:$0xff]   ;;  %3423 = vmatprep.mubr.bf16.mxu0 %v6487_v60  ;;  %v7890_v43 = vrot.slane %v424_v35, 7  ;;  %1561 = vmatprep.subr.bf16.mxu1 %v7264_v36 }
  0x9c   :  { %v107_v45 = vsel %vm7677_vm10, 0, %v106_v19  ;;  %v169_v47 = vsel %vm7683_vm11, 0, %v168_v26  ;;  %v172_v48 = vsel %vm7683_vm11, 0, %v171_v28  ;;  %v7267_v50 = vld [vmem:[#allocation6 + $0x5c4] ss:$8 sps:$4 sm:$0xff]   ;;  %3424 = vmatmul.mubr.bf16.gmra.mrb[16].mxu0 %v6486_v33  ;;  %v432_v52 = vshrl.u32 %v6780_v20, 16  ;;  %1562 = vmatpush1.bf16.msra.mxu1 %v7262_v29 }
  0x9d   :  { %v3032_v51 = vor.u32 %v3031_v39, %v3028_v38  ;;  %108 = vst [vmem:[#allocation2 + $0x100] sm:$0x11] %v107_v45  ;;  %170 = vst [vmem:[#allocation2 + $0xf8] sm:$0x11] %v169_v47  ;;  %v435_v53 = vshll.u32 %v6780_v20, 16  ;;  %v3019_v55 = vrot.slane %v3018_v37, 4  ;;  %3968 = vmatprep.subr.bf16.mxu0 %v7267_v50  ;;  %v429_v57 = vor.u32 %v427_v40, %v7890_v43 }
  0x9e   :  { %173 = vst [vmem:[#allocation2 + $0x108] sm:$0x11] %v172_v48  ;;  %v7268_v54 = vld [vmem:[#allocation6 + $0x1d0] ss:$8 sps:$4 sm:$0xff]   ;;  %v7270_v56 = vld [vmem:[#allocation6 + $0x1d4] ss:$8 sps:$4 sm:$0xff]   ;;  %3969 = vmatpush1.bf16.msra.mxu0 %v7265_v42 }
  0x9f   :  { %v430_v58 = vrot.slane %v7890_v43, 4  ;;  %v434_v59 = vrot.slane %v432_v52, 7  ;;  %v7271_v61 = vld [vmem:[#allocation6 + $0x5d0] ss:$8 sps:$4 sm:$0xff]   ;;  %v7273_v62 = vld [vmem:[#allocation6 + $0x5d4] ss:$8 sps:$4 sm:$0xff]   ;;  %1563 = vmatprep.subr.bf16.mxu1 %v7270_v56 }
  0xa0   :  { %v2860_v63 = vld [vmem:[#allocation2 + $0xd8] sm:$0x11]  ;;  %v2862_v0 = vld [vmem:[#allocation2 + $0xe8] sm:$0x11]  ;;  %v109_v1 = vld [vmem:[#allocation2 + $0x110] sm:$0x11]  ;;  %3970 = vmatprep.subr.bf16.mxu0 %v7273_v62  ;;  %1564 = vmatpush1.bf16.msra.mxu1 %v7268_v54 }
  0xa1   :  { %v3021_v2 = vshll.u32 %v2860_v63, 16  ;;  %v3033_v3 = vrot.slane %v3032_v51, 4  ;;  %v3035_v4 = vshll.u32 %v2862_v0, 16  ;;  %v437_v5 = vor.u32 %v435_v53, %v434_v59  ;;  %v213_v8 = vld [vmem:[#allocation4 + $0xf0] sm:$0xff]  ;;  %v112_v13 = vld [vmem:[#allocation2 + $0x120] sm:$0x11] }
  0xa2   :  { %v565_v9 = vld [vmem:[#allocation2 + $0xf0] sm:$0xff]  ;;  %v438_v10 = vrot.slane %v434_v59, 4  ;;  %v110_v11 = vsel %vm7677_vm10, 0, %v109_v1  ;;  %3971 = vmatpush1.bf16.msra.mxu0 %v7271_v61  ;;  %v113_v17 = vsel %vm7677_vm10, 0, %v112_v13  ;;  %v174_v18 = vld [vmem:[#allocation2 + $0x118] sm:$0x11] }
  0xa3   :  { %v3023_v14 = vrot.slane %v3021_v2, 5  ;;  %v3037_v15 = vrot.slane %v3035_v4, 5  ;;  %v566_v16 = vsel %vm7713_vm0, %v429_v57, %v565_v9  ;;  %111 = vst [vmem:[#allocation2 + $0x110] sm:$0x11] %v110_v11  ;;  %v177_v41 = vld [vmem:[#allocation2 + $0x128] sm:$0x11] }
  0xa4   :  { %v214_v19 = vld [vmem:[#allocation4 + $0xf8] sm:$0xff]  ;;  %567 = vst [vmem:[#allocation2 + $0xf0] sm:$0xff] %v566_v16  ;;  %v6283_v20 = vcombine.high %v7879_v44, %v566_v16  ;;  %v571_v23 = vld [vmem:[#allocation2 + $0x100] sm:$0xff]  ;;  %v3040_v26 = vshrl.u32 %v566_v16, 16  ;;  %v6282_v28 = vcombine.low %v7879_v44, %v566_v16  ;;  %114 = vst [vmem:[#allocation2 + $0x120] sm:$0x11] %v113_v17 }
  0xa5   :  { %v568_v21 = vld [vmem:[#allocation2 + $0xf8] sm:$0x11]  ;;  %v574_v25 = vld [vmem:[#allocation2 + $0x108] sm:$0x11]  ;;  %v6782_v30 = vpack.c.bf16 %v214_v19, %v213_v8  ;;  %v3024_v31 = vsel %vm7751_vm4, %v3019_v55, %v3023_v14  ;;  %v3038_v32 = vsel %vm7751_vm4, %v3033_v3, %v3037_v15  ;;  %v7918_v29 = vsel %vm7713_vm0, %v437_v5, %v571_v23  ;;  %v1022_v15 = vld [vmem:[#allocation2] sm:$0xff] }
  0xa6   :  { %v569_v24 = vsel %vm7677_vm10, %v430_v58, %v568_v21  ;;  %v7274_v60 = vld [vmem:[#allocation6 + $0x1e0] ss:$8 sps:$4 sm:$0xff]   ;;  %v6489_v33 = vcombine.high %v3024_v31, %v3038_v32  ;;  %v6488_v34 = vcombine.low %v3024_v31, %v3038_v32  ;;  %969 = vmatprep.mubr.bf16.mxu1 %v6283_v20  ;;  %573 = vst [vmem:[#allocation2 + $0x100] sm:$0xff] %v7918_v29  ;;  %v3042_v35 = vrot.slane %v3040_v26, 4  ;;  %v7276_v36 = vld [vmem:[#allocation6 + $0x1e4] ss:$8 sps:$4 sm:$0xff]  }
  0xa7   :  { %570 = vst [vmem:[#allocation2 + $0xf8] sm:$0x11] %v569_v24  ;;  %v575_v44 = vsel %vm7677_vm10, %v438_v10, %v574_v25  ;;  %v3043_v37 = vshll.u32 %v566_v16, 16  ;;  %v3054_v38 = vshrl.u32 %v7918_v29, 16  ;;  %v3057_v39 = vshll.u32 %v7918_v29, 16  ;;  %970 = vmatmul.mubr.bf16.gmra.mrb[24].mxu1 %v6282_v28  ;;  %1565 = vmatprep.subr.bf16.mxu1 %v7276_v36  ;;  %v1024_v32 = vld [vmem:[#allocation2 + $0x10] sm:$0xff] }
  0xa8   :  { %576 = vst [vmem:[#allocation2 + $0x108] sm:$0x11] %v575_v44  ;;  %v440_v40 = vshrl.u32 %v7902_v12, 16  ;;  %v7277_v42 = vld [vmem:[#allocation6 + $0x5e0] ss:$8 sps:$4 sm:$0xff]   ;;  %3433 = vmatprep.mubr.bf16.mxu0 %v6489_v33  ;;  %v443_v43 = vshll.u32 %v7902_v12, 16  ;;  %1566 = vmatpush1.bf16.msra.mxu1 %v7274_v60 }
  0xa9   :  { %v175_v45 = vsel %vm7683_vm11, 0, %v174_v18  ;;  %v178_v47 = vsel %vm7683_vm11, 0, %v177_v41  ;;  %v448_v48 = vshrl.u32 %v6782_v30, 16  ;;  %v7279_v50 = vld [vmem:[#allocation6 + $0x5e4] ss:$8 sps:$4 sm:$0xff]   ;;  %3434 = vmatmul.mubr.bf16.gmra.mrb[20].mxu0 %v6488_v34  ;;  %v3045_v51 = vrot.slane %v3043_v37, 5 }
  0xaa   :  { %v3056_v52 = vrot.slane %v3054_v38, 4  ;;  %v3059_v53 = vrot.slane %v3057_v39, 5  ;;  %v442_v54 = vrot.slane %v440_v40, 7  ;;  %176 = vst [vmem:[#allocation2 + $0x118] sm:$0x11] %v175_v45  ;;  %v577_v55 = vld [vmem:[#allocation2 + $0x110] sm:$0xff]  ;;  %3972 = vmatprep.subr.bf16.mxu0 %v7279_v50 }
  0xab   :  { %179 = vst [vmem:[#allocation2 + $0x128] sm:$0x11] %v178_v47  ;;  %v450_v56 = vrot.slane %v448_v48, 7  ;;  %v451_v57 = vshll.u32 %v6782_v30, 16  ;;  %v7280_v58 = vld [vmem:[#allocation6 + $0x1f0] ss:$8 sps:$4 sm:$0xff]   ;;  %v3046_v59 = vor.u32 %v3045_v51, %v3042_v35  ;;  %3973 = vmatpush1.bf16.msra.mxu0 %v7277_v42 }
  0xac   :  { %v3060_v61 = vor.u32 %v3059_v53, %v3056_v52  ;;  %v445_v62 = vor.u32 %v443_v43, %v442_v54  ;;  %v583_v63 = vld [vmem:[#allocation2 + $0x120] sm:$0xff]  ;;  %v7282_v0 = vld [vmem:[#allocation6 + $0x1f4] ss:$8 sps:$4 sm:$0xff]   ;;  %v446_v1 = vrot.slane %v442_v54, 4  ;;  %v7283_v3 = vld [vmem:[#allocation6 + $0x5f0] ss:$8 sps:$4 sm:$0xff]  }
  0xad   :  { %v453_v2 = vor.u32 %v451_v57, %v450_v56  ;;  %v7285_v4 = vld [vmem:[#allocation6 + $0x5f4] ss:$8 sps:$4 sm:$0xff]   ;;  %v3047_v6 = vrot.slane %v3046_v59, 4  ;;  %v454_v9 = vrot.slane %v450_v56, 4  ;;  %1567 = vmatprep.subr.bf16.mxu1 %v7282_v0  ;;  %v123_v19 = vld [vmem:[#allocation2 + $0x8] sm:$0x11] }
  0xae   :  { %v2864_v5 = vld [vmem:[#allocation2 + $0xf8] sm:$0x11]  ;;  %v3061_v7 = vrot.slane %v3060_v61, 4  ;;  %v578_v8 = vsel %vm7713_vm0, %v445_v62, %v577_v55  ;;  %3974 = vmatprep.subr.bf16.mxu0 %v7285_v4  ;;  %1568 = vmatpush1.bf16.msra.mxu1 %v7280_v58  ;;  %v3560_v44 = vld [vmem:[#allocation2 + $0x10] sm:$0xee]  ;;  %v1058_v36 = vshrl.u32 %v1022_v15, 16 }
  0xaf   :  { %v2866_v10 = vld [vmem:[#allocation2 + $0x108] sm:$0x11]  ;;  %v3049_v11 = vshll.u32 %v2864_v5, 16  ;;  %579 = vst [vmem:[#allocation2 + $0x110] sm:$0xff] %v578_v8  ;;  %v6285_v12 = vcombine.high %v7918_v29, %v578_v8  ;;  %v584_v13 = vsel %vm7713_vm0, %v453_v2, %v583_v63  ;;  %v3068_v14 = vshrl.u32 %v578_v8, 16  ;;  %3975 = vmatpush1.bf16.msra.mxu0 %v7283_v3 }
  0xb0   :  { %v3063_v16 = vshll.u32 %v2866_v10, 16  ;;  %585 = vst [vmem:[#allocation2 + $0x120] sm:$0xff] %v584_v13  ;;  %v3071_v17 = vshll.u32 %v578_v8, 16  ;;  %v3082_v18 = vshrl.u32 %v584_v13, 16  ;;  %v3085_v41 = vshll.u32 %v584_v13, 16 }
  0xb1   :  { %v3051_v20 = vrot.slane %v3049_v11, 5  ;;  %979 = vmatprep.mubr.bf16.mxu1 %v6285_v12  ;;  %v580_v21 = vld [vmem:[#allocation2 + $0x118] sm:$0x11]  ;;  %v3070_v25 = vrot.slane %v3068_v14, 4  ;;  %v6284_v26 = vcombine.low %v7918_v29, %v578_v8  ;;  %v124_v29 = vsel %vm7683_vm11, 0, %v123_v19 }
  0xb2   :  { %v586_v23 = vld [vmem:[#allocation2 + $0x128] sm:$0x11]  ;;  %v3065_v22 = vrot.slane %v3063_v16, 5  ;;  %v581_v28 = vsel %vm7677_vm10, %v446_v1, %v580_v21  ;;  %v3073_v31 = vrot.slane %v3071_v17, 5  ;;  %v1025_v24 = vld [vmem:[#allocation2 + $0x18] sm:$0x11] }
  0xb3   :  { %v587_v30 = vsel %vm7677_vm10, %v454_v9, %v586_v23  ;;  %v3052_v60 = vsel %vm7751_vm4, %v3047_v6, %v3051_v20  ;;  %582 = vst [vmem:[#allocation2 + $0x118] sm:$0x11] %v581_v28  ;;  %v3084_v33 = vrot.slane %v3082_v18, 4  ;;  %v3087_v34 = vrot.slane %v3085_v41, 5  ;;  %980 = vmatmul.mubr.bf16.gmra.mrb[28].mxu1 %v6284_v26  ;;  %125 = vst [vmem:[#allocation2 + $0x8] sm:$0x11] %v124_v29 }
  0xb4   :  { %588 = vst [vmem:[#allocation2 + $0x128] sm:$0x11] %v587_v30  ;;  %v3066_v35 = vsel %vm7751_vm4, %v3061_v7, %v3065_v22  ;;  %v1061_v37 = vshll.u32 %v1022_v15, 16  ;;  %v3561_v38 = vld [vmem:[#allocation2 + $0x18] sm:$0x11]  ;;  %v3074_v43 = vor.u32 %v3073_v31, %v3070_v25  ;;  %v1072_v45 = vshrl.u32 %v1024_v32, 16 }
  0xb5   :  { %v3562_v39 = vld [vmem:[#allocation2 + $0x20] sm:$0xee]  ;;  %v6491_v40 = vcombine.high %v3052_v60, %v3066_v35  ;;  %v6490_v42 = vcombine.low %v3052_v60, %v3066_v35  ;;  %v1060_v48 = vrot.slane %v1058_v36, 4  ;;  %v1075_v51 = vshll.u32 %v1024_v32, 16  ;;  %v3563_v52 = vld [vmem:[#allocation2 + $0x28] sm:$0x11] }
  0xb6   :  { %v7288_v47 = vld [vmem:[#allocation6 + $0x204] ss:$8 sps:$4 sm:$0xff]   ;;  %v1063_v50 = vrot.slane %v1061_v37, 5  ;;  %v3088_v53 = vor.u32 %v3087_v34, %v3084_v33  ;;  %v1074_v54 = vrot.slane %v1072_v45, 4  ;;  %v1081_v55 = vshll.u32 %v1025_v24, 16  ;;  %v7965_v17 = vld [vmem:[#allocation2 + $0x30] sm:$0xff] }
  0xb7   :  { %3443 = vmatprep.mubr.bf16.mxu0 %v6491_v40  ;;  %v6526_v57 = vrot.slane %v3560_v44, 9  ;;  %2133 = vmatprep.subr.bf16.mxu1 %v7288_v47  ;;  %v7291_v58 = vld [vmem:[#allocation6 + $0x604] ss:$8 sps:$4 sm:$0xff]   ;;  %v1077_v61 = vrot.slane %v1075_v51, 5  ;;  %v3626_v62 = vrot.slane %v3561_v38, 5  ;;  %v6527_v63 = vrot.slane %v3562_v39, 9 }
  0xb8   :  { %3444 = vmatmul.mubr.bf16.gmra.mrb[24].mxu0 %v6490_v42  ;;  %v1064_v59 = vor.u32 %v1063_v50, %v1060_v48  ;;  %v3075_v0 = vrot.slane %v3074_v43, 4  ;;  %v3630_v1 = vrot.slane %v3563_v52, 5  ;;  %4442 = vmatprep.subr.bf16.mxu0 %v7291_v58  ;;  %v1083_v5 = vrot.slane %v1081_v55, 5  ;;  %v7963_v16 = vld [vmem:[#allocation2 + $0x20] sm:$0xff]  ;;  %v1027_v19 = vld [vmem:[#allocation2 + $0x28] sm:$0x11] }
  0xb9   :  { %v1078_v4 = vor.u32 %v1077_v61, %v1074_v54  ;;  %v7955_v6 = vsel %vm7949_vm7, %v6526_v57, %v3626_v62  ;;  %v3089_v8 = vrot.slane %v3088_v53, 4  ;;  %v6590_v20 = vcombine.low %v7963_v16, %v7965_v17  ;;  %v1029_v26 = vld [vmem:[#allocation2 + $0x38] sm:$0x11]  ;;  %v3564_v60 = vld [vmem:[#allocation2 + $0x30] sm:$0xee] }
  0xba   :  { %v2868_v2 = vld [vmem:[#allocation2 + $0x118] sm:$0x11]  ;;  %v1023_v10 = vld [vmem:[#allocation2 + $0x8] sm:$0x11]  ;;  %v7959_v11 = vsel %vm7949_vm7, %v6527_v63, %v3630_v1  ;;  %v1065_v12 = vrot.slane %v1064_v59, 4  ;;  %v6591_v21 = vcombine.high %v7963_v16, %v7965_v17  ;;  %v1086_v22 = vshrl.u32 %v7963_v16, 16 }
  0xbb   :  { %v2870_v3 = vld [vmem:[#allocation2 + $0x128] sm:$0x11]  ;;  %v3077_v7 = vshll.u32 %v2868_v2, 16  ;;  %v1067_v13 = vshll.u32 %v1023_v10, 16  ;;  %v1079_v14 = vrot.slane %v1078_v4, 4  ;;  %v6543_v15 = vcombine.high %v7955_v6, %v7959_v11  ;;  %v7999_v10 = vld [vmem:[#allocation2 + $0x50] sm:$0xff] }
  0xbc   :  { %v3091_v9 = vshll.u32 %v2870_v3, 16  ;;  %v1089_v28 = vshll.u32 %v7963_v16, 16  ;;  %v1095_v32 = vshll.u32 %v1027_v19, 16  ;;  %v1100_v24 = vshrl.u32 %v7965_v17, 16  ;;  %v3565_v33 = vld [vmem:[#allocation2 + $0x38] sm:$0x11] }
  0xbd   :  { %v3079_v18 = vrot.slane %v3077_v7, 5  ;;  %v1069_v23 = vrot.slane %v1067_v13, 5  ;;  %v1084_v25 = vsel %vm7751_vm4, %v1079_v14, %v1083_v5  ;;  %v1088_v35 = vrot.slane %v1086_v22, 4  ;;  %v3566_v36 = vld [vmem:[#allocation2 + $0x40] sm:$0xee] }
  0xbe   :  { %v3093_v41 = vrot.slane %v3091_v9, 5  ;;  %v3567_v37 = vld [vmem:[#allocation2 + $0x48] sm:$0x11]  ;;  %v1091_v42 = vrot.slane %v1089_v28, 5  ;;  %v1097_v43 = vrot.slane %v1095_v32, 5  ;;  %v1102_v47 = vrot.slane %v1100_v24, 4 }
  0xbf   :  { %v3080_v30 = vsel %vm7751_vm4, %v3075_v0, %v3079_v18  ;;  %v1070_v44 = vsel %vm7751_vm4, %v1065_v12, %v1069_v23  ;;  %v7286_v40 = vld [vmem:[#allocation6 + $0x200] ss:$8 sps:$4 sm:$0xff]   ;;  %v7294_v45 = vld [vmem:[#allocation6 + $0x214] ss:$8 sps:$4 sm:$0xff]   ;;  %v1103_v48 = vshll.u32 %v7965_v17, 16  ;;  %v1109_v50 = vshll.u32 %v1029_v26, 16 }
  0xc0   :  { %v3094_v31 = vsel %vm7751_vm4, %v3089_v8, %v3093_v41  ;;  %v6318_v38 = vcombine.low %v1070_v44, %v1084_v25  ;;  %v6319_v39 = vcombine.high %v1070_v44, %v1084_v25  ;;  %v6528_v51 = vrot.slane %v3564_v60, 9  ;;  %v7292_v58 = vld [vmem:[#allocation6 + $0x210] ss:$8 sps:$4 sm:$0xff]   ;;  %v7289_v0 = vld [vmem:[#allocation6 + $0x600] ss:$8 sps:$4 sm:$0xff]  }
  0xc1   :  { %v6493_v34 = vcombine.high %v3080_v30, %v3094_v31  ;;  %v6492_v29 = vcombine.low %v3080_v30, %v3094_v31  ;;  %v1092_v52 = vor.u32 %v1091_v42, %v1088_v35  ;;  %v3634_v53 = vrot.slane %v3565_v33, 5  ;;  %v7300_v4 = vld [vmem:[#allocation6 + $0x224] ss:$8 sps:$4 sm:$0xff]   ;;  %v7297_v8 = vld [vmem:[#allocation6 + $0x614] ss:$8 sps:$4 sm:$0xff]  }
  0xc2   :  { %1569 = vmatprep.mubr.bf16.mxu1 %v6319_v39  ;;  %v6529_v54 = vrot.slane %v3566_v36, 9  ;;  %v3638_v55 = vrot.slane %v3567_v37, 5  ;;  %v1105_v57 = vrot.slane %v1103_v48, 5  ;;  %v6542_v63 = vcombine.low %v7955_v6, %v7959_v11  ;;  %v7995_v5 = vld [vmem:[#allocation2 + $0x40] sm:$0xff]  ;;  %v1031_v7 = vld [vmem:[#allocation2 + $0x48] sm:$0x11] }
  0xc3   :  { %3453 = vmatprep.mubr.bf16.mxu0 %v6493_v34  ;;  %1570 = vmatmul.mubr.bf16.vlgmr.msra.gmra.mrb[0].mxu1 %v6318_v38  ;;  %v1093_v59 = vrot.slane %v1092_v52, 4  ;;  %v7985_v61 = vsel %vm7949_vm7, %v6528_v51, %v3634_v53  ;;  %v1111_v2 = vrot.slane %v1109_v50, 5  ;;  %v1033_v12 = vld [vmem:[#allocation2 + $0x58] sm:$0x11]  ;;  %v1114_v6 = vshrl.u32 %v7995_v5, 16 }
  0xc4   :  { %3454 = vmatmul.mubr.bf16.gmra.mrb[28].mxu0 %v6492_v29  ;;  %2134 = vmatpush1.bf16.msra.mxu1 %v7286_v40  ;;  %v7989_v62 = vsel %vm7949_vm7, %v6529_v54, %v3638_v55  ;;  %v1106_v1 = vor.u32 %v1105_v57, %v1102_v47  ;;  %v1117_v11 = vshll.u32 %v7995_v5, 16  ;;  %v1123_v13 = vshll.u32 %v1031_v7, 16  ;;  %v3568_v19 = vld [vmem:[#allocation2 + $0x50] sm:$0xee]  ;;  %v3569_v22 = vld [vmem:[#allocation2 + $0x58] sm:$0x11] }
  0xc5   :  { %3976 = vmatprep.mubr.bf16.mxu0 %v6543_v15  ;;  %2135 = vmatprep.subr.bf16.mxu1 %v7294_v45  ;;  %v6545_v3 = vcombine.high %v7985_v61, %v7989_v62  ;;  %v1098_v9 = vsel %vm7751_vm4, %v1093_v59, %v1097_v43  ;;  %v1128_v15 = vshrl.u32 %v7999_v10, 16  ;;  %v1131_v18 = vshll.u32 %v7999_v10, 16  ;;  %v7295_v30 = vld [vmem:[#allocation6 + $0x610] ss:$8 sps:$4 sm:$0xff]   ;;  %v3570_v33 = vld [vmem:[#allocation2 + $0x60] sm:$0xee] }
  0xc6   :  { %v1107_v14 = vrot.slane %v1106_v1, 4  ;;  %v1137_v41 = vshll.u32 %v1033_v12, 16  ;;  %v1116_v23 = vrot.slane %v1114_v6, 4  ;;  %v1119_v25 = vrot.slane %v1117_v11, 5  ;;  %v7298_v44 = vld [vmem:[#allocation6 + $0x220] ss:$8 sps:$4 sm:$0xff]  }
  0xc7   :  { %v1125_v26 = vrot.slane %v1123_v13, 5  ;;  %v6530_v28 = vrot.slane %v3568_v19, 9  ;;  %v1130_v32 = vrot.slane %v1128_v15, 4  ;;  %v1133_v24 = vrot.slane %v1131_v18, 5  ;;  %v3571_v36 = vld [vmem:[#allocation2 + $0x68] sm:$0x11] }
  0xc8   :  { %2136 = vmatpush1.bf16.msra.mxu1 %v7292_v58  ;;  %v1112_v31 = vsel %vm7751_vm4, %v1107_v14, %v1111_v2  ;;  %v1139_v60 = vrot.slane %v1137_v41, 5  ;;  %v1120_v35 = vor.u32 %v1119_v25, %v1116_v23  ;;  %v3642_v37 = vrot.slane %v3569_v22, 5  ;;  %v7306_v38 = vld [vmem:[#allocation6 + $0x234] ss:$8 sps:$4 sm:$0xff]   ;;  %v7303_v45 = vld [vmem:[#allocation6 + $0x624] ss:$8 sps:$4 sm:$0xff]  }
  0xc9   :  { %2137 = vmatprep.subr.bf16.mxu1 %v7300_v4  ;;  %v6321_v34 = vcombine.high %v1098_v9, %v1112_v31  ;;  %v6320_v29 = vcombine.low %v1098_v9, %v1112_v31  ;;  %v1134_v39 = vor.u32 %v1133_v24, %v1130_v32  ;;  %v6531_v40 = vrot.slane %v3570_v33, 9  ;;  %v7301_v51 = vld [vmem:[#allocation6 + $0x620] ss:$8 sps:$4 sm:$0xff]   ;;  %v7304_v52 = vld [vmem:[#allocation6 + $0x230] ss:$8 sps:$4 sm:$0xff]  }
  0xca   :  { %v3646_v42 = vrot.slane %v3571_v36, 5  ;;  %v6593_v43 = vcombine.high %v7995_v5, %v7999_v10  ;;  %v1121_v47 = vrot.slane %v1120_v35, 4  ;;  %v8011_v48 = vsel %vm7949_vm7, %v6530_v28, %v3642_v37  ;;  %v7309_v57 = vld [vmem:[#allocation6 + $0x634] ss:$8 sps:$4 sm:$0xff]   ;;  %v8027_v1 = vld [vmem:[#allocation2 + $0x60] sm:$0xff] }
  0xcb   :  { %1579 = vmatprep.mubr.bf16.mxu1 %v6321_v34  ;;  %v6592_v50 = vcombine.low %v7995_v5, %v7999_v10  ;;  %v1135_v53 = vrot.slane %v1134_v39, 4  ;;  %v6544_v55 = vcombine.low %v7985_v61, %v7989_v62  ;;  %v1035_v2 = vld [vmem:[#allocation2 + $0x68] sm:$0x11]  ;;  %v8029_v4 = vld [vmem:[#allocation2 + $0x70] sm:$0xff]  ;;  %v1037_v7 = vld [vmem:[#allocation2 + $0x78] sm:$0x11] }
  0xcc   :  { %3977 = vmatmul.mubr.bf16.vlgmr.msra.gmra.mrb[0].mxu0 %v6542_v63  ;;  %1580 = vmatmul.mubr.bf16.gmra.mrb[4].mxu1 %v6320_v29  ;;  %v8017_v54 = vsel %vm7949_vm7, %v6531_v40, %v3646_v42  ;;  %v1126_v58 = vsel %vm7751_vm4, %v1121_v47, %v1125_v26  ;;  %v7310_v62 = vld [vmem:[#allocation6 + $0x240] ss:$8 sps:$4 sm:$0xff]   ;;  %v1145_v9 = vshll.u32 %v8027_v1, 16  ;;  %v7307_v12 = vld [vmem:[#allocation6 + $0x630] ss:$8 sps:$4 sm:$0xff]   ;;  %v1151_v11 = vshll.u32 %v1035_v2, 16 }
  0xcd   :  { %4443 = vmatpush1.bf16.msra.mxu0 %v7289_v0  ;;  %3986 = vmatprep.mubr.bf16.mxu0 %v6545_v3  ;;  %v1140_v59 = vsel %vm7751_vm4, %v1135_v53, %v1139_v60  ;;  %v6547_v63 = vcombine.high %v8011_v48, %v8017_v54  ;;  %v7312_v0 = vld [vmem:[#allocation6 + $0x244] ss:$8 sps:$4 sm:$0xff]   ;;  %v7318_v6 = vld [vmem:[#allocation6 + $0x254] ss:$8 sps:$4 sm:$0xff]   ;;  %v1156_v13 = vshrl.u32 %v8029_v4, 16  ;;  %v1159_v14 = vshll.u32 %v8029_v4, 16 }
  0xce   :  { %4444 = vmatprep.subr.bf16.mxu0 %v7297_v8  ;;  %2138 = vmatpush1.bf16.msra.mxu1 %v7298_v44  ;;  %v6323_v3 = vcombine.high %v1126_v58, %v1140_v59  ;;  %v6322_v61 = vcombine.low %v1126_v58, %v1140_v59  ;;  %v1142_v8 = vshrl.u32 %v8027_v1, 16  ;;  %v1165_v15 = vshll.u32 %v1037_v7, 16  ;;  %v3572_v18 = vld [vmem:[#allocation2 + $0x70] sm:$0xee]  ;;  %v3573_v23 = vld [vmem:[#allocation2 + $0x78] sm:$0x11] }
  0xcf   :  { %2139 = vmatprep.subr.bf16.mxu1 %v7306_v38  ;;  %v1147_v19 = vrot.slane %v1145_v9, 5  ;;  %v3574_v25 = vld [vmem:[#allocation2 + $0x80] sm:$0xee]  ;;  %v6595_v26 = vcombine.high %v8027_v1, %v8029_v4  ;;  %v6594_v22 = vcombine.low %v8027_v1, %v8029_v4  ;;  %v1153_v28 = vrot.slane %v1151_v11, 5  ;;  %v3575_v32 = vld [vmem:[#allocation2 + $0x88] sm:$0x11] }
  0xd0   :  { %v1144_v41 = vrot.slane %v1142_v8, 4  ;;  %1589 = vmatprep.mubr.bf16.mxu1 %v6323_v3  ;;  %v1161_v31 = vrot.slane %v1159_v14, 5  ;;  %v7315_v24 = vld [vmem:[#allocation6 + $0x644] ss:$8 sps:$4 sm:$0xff]   ;;  %v6532_v33 = vrot.slane %v3572_v18, 9  ;;  %v3650_v34 = vrot.slane %v3573_v23, 5 }
  0xd1   :  { %4445 = vmatpush1.bf16.msra.mxu0 %v7295_v30  ;;  %v1158_v30 = vrot.slane %v1156_v13, 4  ;;  %v6533_v29 = vrot.slane %v3574_v25, 9  ;;  %v1167_v35 = vrot.slane %v1165_v15, 5  ;;  %v3654_v36 = vrot.slane %v3575_v32, 5  ;;  %v7316_v38 = vld [vmem:[#allocation6 + $0x250] ss:$8 sps:$4 sm:$0xff]  }
  0xd2   :  { %4446 = vmatprep.subr.bf16.mxu0 %v7303_v45  ;;  %2140 = vmatpush1.bf16.msra.mxu1 %v7304_v52  ;;  %v1148_v60 = vor.u32 %v1147_v19, %v1144_v41  ;;  %v6546_v37 = vcombine.low %v8011_v48, %v8017_v54  ;;  %v8043_v40 = vsel %vm7949_vm7, %v6532_v33, %v3650_v34  ;;  %v7313_v42 = vld [vmem:[#allocation6 + $0x640] ss:$8 sps:$4 sm:$0xff]   ;;  %v7321_v45 = vld [vmem:[#allocation6 + $0x654] ss:$8 sps:$4 sm:$0xff]   ;;  %v7324_v54 = vld [vmem:[#allocation6 + $0x264] ss:$8 sps:$4 sm:$0xff]  }
  0xd3   :  { %2141 = vmatprep.subr.bf16.mxu1 %v7312_v0  ;;  %v1162_v44 = vor.u32 %v1161_v31, %v1158_v30  ;;  %v7322_v53 = vld [vmem:[#allocation6 + $0x260] ss:$8 sps:$4 sm:$0xff]   ;;  %v7330_v58 = vld [vmem:[#allocation6 + $0x274] ss:$8 sps:$4 sm:$0xff]   ;;  %v7327_v3 = vld [vmem:[#allocation6 + $0x664] ss:$8 sps:$4 sm:$0xff]  }
  0xd4   :  { %3987 = vmatmul.mubr.bf16.gmra.mrb[4].mxu0 %v6544_v55  ;;  %1590 = vmatmul.mubr.bf16.gmra.mrb[8].mxu1 %v6322_v61  ;;  %v1149_v39 = vrot.slane %v1148_v60, 4  ;;  %v7319_v55 = vld [vmem:[#allocation6 + $0x650] ss:$8 sps:$4 sm:$0xff]   ;;  %v153_v59 = vld [vmem:[#allocation2 + $0xa8] sm:$0x11] }
  0xd5   :  { %4447 = vmatpush1.bf16.msra.mxu0 %v7301_v51  ;;  %3996 = vmatprep.mubr.bf16.mxu0 %v6547_v63  ;;  %v1163_v47 = vrot.slane %v1162_v44, 4  ;;  %v3655_v51 = vsel %vm7949_vm7, %v6533_v29, %v3654_v36  ;;  %v1038_v63 = vld [vmem:[#allocation2 + $0xa0] sm:$0xff]  ;;  %v154_v61 = vsel %vm7683_vm11, 0, %v153_v59  ;;  %v1041_v7 = vld [vmem:[#allocation2 + $0xb8] sm:$0x11] }
  0xd6   :  { %4448 = vmatprep.subr.bf16.mxu0 %v7309_v57  ;;  %2142 = vmatpush1.bf16.msra.mxu1 %v7310_v62  ;;  %v1154_v52 = vsel %vm7751_vm4, %v1149_v39, %v1153_v28  ;;  %v6549_v48 = vcombine.high %v8043_v40, %v3655_v51  ;;  %v1040_v62 = vld [vmem:[#allocation2 + $0xb0] sm:$0xff]  ;;  %v1170_v8 = vshrl.u32 %v1038_v63, 16  ;;  %155 = vst [vmem:[#allocation2 + $0xa8] sm:$0x11] %v154_v61  ;;  %v1173_v9 = vshll.u32 %v1038_v63, 16 }
  0xd7   :  { %2143 = vmatprep.subr.bf16.mxu1 %v7318_v6  ;;  %v1168_v57 = vsel %vm7751_vm4, %v1163_v47, %v1167_v35  ;;  %v1187_v6 = vshll.u32 %v1040_v62, 16  ;;  %v1193_v11 = vshll.u32 %v1041_v7, 16  ;;  %v3576_v13 = vld [vmem:[#allocation2 + $0xb0] sm:$0xee]  ;;  %v3577_v15 = vld [vmem:[#allocation2 + $0xb8] sm:$0x11]  ;;  %v6548_v30 = vcombine.low %v8043_v40, %v3655_v51 }
  0xd8   :  { %v6325_v0 = vcombine.high %v1154_v52, %v1168_v57  ;;  %v6324_v2 = vcombine.low %v1154_v52, %v1168_v57  ;;  %v1172_v14 = vrot.slane %v1170_v8, 4  ;;  %v3578_v18 = vld [vmem:[#allocation2 + $0xc0] sm:$0xee]  ;;  %v6534_v41 = vrot.slane %v3576_v13, 9  ;;  %v3579_v28 = vld [vmem:[#allocation2 + $0xc8] sm:$0x11] }
  0xd9   :  { %4449 = vmatpush1.bf16.msra.mxu0 %v7307_v12  ;;  %v1184_v12 = vshrl.u32 %v1040_v62, 16  ;;  %v1175_v19 = vrot.slane %v1173_v9, 5  ;;  %v1189_v25 = vrot.slane %v1187_v6, 5  ;;  %v7328_v31 = vld [vmem:[#allocation6 + $0x270] ss:$8 sps:$4 sm:$0xff]   ;;  %v3658_v32 = vrot.slane %v3577_v15, 5 }
  0xda   :  { %4450 = vmatprep.subr.bf16.mxu0 %v7315_v24  ;;  %2144 = vmatpush1.bf16.msra.mxu1 %v7316_v38  ;;  %v6535_v24 = vrot.slane %v3578_v18, 9  ;;  %v3662_v60 = vrot.slane %v3579_v28, 5  ;;  %v7325_v33 = vld [vmem:[#allocation6 + $0x660] ss:$8 sps:$4 sm:$0xff]   ;;  %v7333_v44 = vld [vmem:[#allocation6 + $0x674] ss:$8 sps:$4 sm:$0xff]  }
  0xdb   :  { %1599 = vmatprep.mubr.bf16.mxu1 %v6325_v0  ;;  %2145 = vmatprep.subr.bf16.mxu1 %v7324_v54  ;;  %v1186_v23 = vrot.slane %v1184_v12, 4  ;;  %v1176_v34 = vor.u32 %v1175_v19, %v1172_v14  ;;  %v1195_v35 = vrot.slane %v1193_v11, 5  ;;  %v3659_v36 = vsel %vm7949_vm7, %v6534_v41, %v3658_v32  ;;  %v7336_v38 = vld [vmem:[#allocation6 + $0x284] ss:$8 sps:$4 sm:$0xff]   ;;  %v7331_v39 = vld [vmem:[#allocation6 + $0x670] ss:$8 sps:$4 sm:$0xff]  }
  0xdc   :  { %3997 = vmatmul.mubr.bf16.gmra.mrb[8].mxu0 %v6546_v37  ;;  %1600 = vmatmul.mubr.bf16.gmra.mrb[12].mxu1 %v6324_v2  ;;  %v3663_v37 = vsel %vm7949_vm7, %v6535_v24, %v3662_v60  ;;  %v7339_v51 = vld [vmem:[#allocation6 + $0x684] ss:$8 sps:$4 sm:$0xff]   ;;  %v1045_v59 = vld [vmem:[#allocation2 + $0xd8] sm:$0x11]  ;;  %v7337_v2 = vld [vmem:[#allocation6 + $0x680] ss:$8 sps:$4 sm:$0xff]  }
  0xdd   :  { %4451 = vmatpush1.bf16.msra.mxu0 %v7313_v42  ;;  %4006 = vmatprep.mubr.bf16.mxu0 %v6549_v48  ;;  %v1190_v29 = vor.u32 %v1189_v25, %v1186_v23  ;;  %v6551_v42 = vcombine.high %v3659_v36, %v3663_v37  ;;  %v1039_v47 = vld [vmem:[#allocation2 + $0xa8] sm:$0x11]  ;;  %v1177_v52 = vrot.slane %v1176_v34, 4  ;;  %v8059_v54 = vld [vmem:[#allocation2 + $0xc0] sm:$0xff]  ;;  %v3580_v7 = vld [vmem:[#allocation2 + $0xd0] sm:$0xee]  ;;  %v6550_v8 = vcombine.low %v3659_v36, %v3663_v37 }
  0xde   :  { %4452 = vmatprep.subr.bf16.mxu0 %v7321_v45  ;;  %2146 = vmatpush1.bf16.msra.mxu1 %v7322_v53  ;;  %v7334_v45 = vld [vmem:[#allocation6 + $0x280] ss:$8 sps:$4 sm:$0xff]   ;;  %v1179_v48 = vshll.u32 %v1039_v47, 16  ;;  %v7342_v53 = vld [vmem:[#allocation6 + $0x294] ss:$8 sps:$4 sm:$0xff]   ;;  %v1198_v63 = vshrl.u32 %v8059_v54, 16 }
  0xdf   :  { %2147 = vmatprep.subr.bf16.mxu1 %v7330_v58  ;;  %v1191_v40 = vrot.slane %v1190_v29, 4  ;;  %v1043_v57 = vld [vmem:[#allocation2 + $0xc8] sm:$0x11]  ;;  %v8063_v58 = vld [vmem:[#allocation2 + $0xd0] sm:$0xff]  ;;  %v1221_v13 = vshll.u32 %v1045_v59, 16  ;;  %v6536_v23 = vrot.slane %v3580_v7, 9 }
  0xe0   :  { %v1181_v0 = vrot.slane %v1179_v48, 5  ;;  %v1207_v61 = vshll.u32 %v1043_v57, 16  ;;  %v1212_v62 = vshrl.u32 %v8063_v58, 16  ;;  %v7340_v9 = vld [vmem:[#allocation6 + $0x290] ss:$8 sps:$4 sm:$0xff]   ;;  %v1200_v6 = vrot.slane %v1198_v63, 4 }
  0xe1   :  { %4453 = vmatpush1.bf16.msra.mxu0 %v7319_v55  ;;  %v1196_v55 = vsel %vm7751_vm4, %v1191_v40, %v1195_v35  ;;  %v7345_v12 = vld [vmem:[#allocation6 + $0x694] ss:$8 sps:$4 sm:$0xff]   ;;  %v1215_v11 = vshll.u32 %v8063_v58, 16  ;;  %v3582_v19 = vld [vmem:[#allocation2 + $0xe0] sm:$0xee]  ;;  %v1223_v35 = vrot.slane %v1221_v13, 5  ;;  %v6599_v37 = vcombine.high %v8059_v54, %v8063_v58 }
  0xe2   :  { %4454 = vmatprep.subr.bf16.mxu0 %v7327_v3  ;;  %2148 = vmatpush1.bf16.msra.mxu1 %v7328_v31  ;;  %v1201_v3 = vshll.u32 %v8059_v54, 16  ;;  %v3581_v14 = vld [vmem:[#allocation2 + $0xd8] sm:$0x11]  ;;  %v1182_v15 = vsel %vm7751_vm4, %v1177_v52, %v1181_v0  ;;  %v1214_v41 = vrot.slane %v1212_v62, 4  ;;  %v3583_v32 = vld [vmem:[#allocation2 + $0xe8] sm:$0x11] }
  0xe3   :  { %2149 = vmatprep.subr.bf16.mxu1 %v7336_v38  ;;  %v6327_v25 = vcombine.high %v1182_v15, %v1196_v55  ;;  %v6326_v28 = vcombine.low %v1182_v15, %v1196_v55  ;;  %v1217_v31 = vrot.slane %v1215_v11, 5  ;;  %v3666_v60 = vrot.slane %v3581_v14, 5  ;;  %v7343_v29 = vld [vmem:[#allocation6 + $0x690] ss:$8 sps:$4 sm:$0xff]   ;;  %v7348_v36 = vld [vmem:[#allocation6 + $0x2a4] ss:$8 sps:$4 sm:$0xff]  }
  0xe4   :  { %4007 = vmatmul.mubr.bf16.gmra.mrb[12].mxu0 %v6548_v30  ;;  %v1203_v18 = vrot.slane %v1201_v3, 5  ;;  %v1209_v30 = vrot.slane %v1207_v61, 5  ;;  %v3670_v34 = vrot.slane %v3583_v32, 5  ;;  %v6598_v38 = vcombine.low %v8059_v54, %v8063_v58  ;;  %v7351_v52 = vld [vmem:[#allocation6 + $0x6a4] ss:$8 sps:$4 sm:$0xff]   ;;  %v8085_v61 = vld [vmem:[#allocation2 + $0xf0] sm:$0xff] }
  0xe5   :  { %4455 = vmatpush1.bf16.msra.mxu0 %v7325_v33  ;;  %4016 = vmatprep.mubr.bf16.mxu0 %v6551_v42  ;;  %v6537_v33 = vrot.slane %v3582_v19, 9  ;;  %v3667_v40 = vsel %vm7949_vm7, %v6536_v23, %v3666_v60  ;;  %v7354_v55 = vld [vmem:[#allocation6 + $0x2b4] ss:$8 sps:$4 sm:$0xff]   ;;  %v8081_v57 = vld [vmem:[#allocation2 + $0xe0] sm:$0xff]  ;;  %v7352_v0 = vld [vmem:[#allocation6 + $0x2b0] ss:$8 sps:$4 sm:$0xff]  }
  0xe6   :  { %4456 = vmatprep.subr.bf16.mxu0 %v7333_v44  ;;  %2150 = vmatpush1.bf16.msra.mxu1 %v7334_v45  ;;  %v1204_v24 = vor.u32 %v1203_v18, %v1200_v6  ;;  %v1218_v44 = vor.u32 %v1217_v31, %v1214_v41  ;;  %v7346_v45 = vld [vmem:[#allocation6 + $0x2a0] ss:$8 sps:$4 sm:$0xff]   ;;  %v1049_v62 = vld [vmem:[#allocation2 + $0xf8] sm:$0x11]  ;;  %v1226_v7 = vshrl.u32 %v8081_v57, 16  ;;  %v1240_v15 = vshrl.u32 %v8085_v61, 16 }
  0xe7   :  { %2151 = vmatprep.subr.bf16.mxu1 %v7342_v53  ;;  %1609 = vmatprep.mubr.bf16.mxu1 %v6327_v25  ;;  %v3671_v42 = vsel %vm7949_vm7, %v6537_v33, %v3670_v34  ;;  %v7349_v53 = vld [vmem:[#allocation6 + $0x6a0] ss:$8 sps:$4 sm:$0xff]   ;;  %v3584_v11 = vld [vmem:[#allocation2 + $0xf0] sm:$0xee]  ;;  %v3585_v13 = vld [vmem:[#allocation2 + $0xf8] sm:$0x11] }
  0xe8   :  { %1610 = vmatmul.mubr.bf16.gmra.mrb[16].mxu1 %v6326_v28  ;;  %v1219_v47 = vrot.slane %v1218_v44, 4  ;;  %v6552_v63 = vcombine.low %v3667_v40, %v3671_v42  ;;  %v1047_v3 = vld [vmem:[#allocation2 + $0xe8] sm:$0x11]  ;;  %v1228_v14 = vrot.slane %v1226_v7, 4  ;;  %v1243_v18 = vshll.u32 %v8085_v61, 16 }
  0xe9   :  { %4457 = vmatpush1.bf16.msra.mxu0 %v7331_v39  ;;  %v1205_v39 = vrot.slane %v1204_v24, 4  ;;  %v1235_v6 = vshll.u32 %v1047_v3, 16  ;;  %v1249_v41 = vshll.u32 %v1049_v62, 16  ;;  %v3586_v19 = vld [vmem:[#allocation2 + $0x100] sm:$0xee]  ;;  %v3674_v31 = vrot.slane %v3585_v13, 5 }
  0xea   :  { %4458 = vmatprep.subr.bf16.mxu0 %v7339_v51  ;;  %2152 = vmatpush1.bf16.msra.mxu1 %v7340_v9  ;;  %v6553_v51 = vcombine.high %v3667_v40, %v3671_v42  ;;  %v1224_v59 = vsel %vm7751_vm4, %v1219_v47, %v1223_v35  ;;  %v7355_v23 = vld [vmem:[#allocation6 + $0x6b0] ss:$8 sps:$4 sm:$0xff]   ;;  %v3587_v28 = vld [vmem:[#allocation2 + $0x108] sm:$0x11]  ;;  %v1242_v32 = vrot.slane %v1240_v15, 4  ;;  %v1245_v24 = vrot.slane %v1243_v18, 5 }
  0xeb   :  { %v1210_v48 = vsel %vm7751_vm4, %v1205_v39, %v1209_v30  ;;  %2153 = vmatprep.subr.bf16.mxu1 %v7348_v36  ;;  %v6538_v30 = vrot.slane %v3584_v11, 9  ;;  %v6539_v60 = vrot.slane %v3586_v19, 9  ;;  %v1237_v34 = vrot.slane %v1235_v6, 5  ;;  %v7360_v35 = vld [vmem:[#allocation6 + $0x2c4] ss:$8 sps:$4 sm:$0xff]  }
  0xec   :  { %4017 = vmatmul.mubr.bf16.gmra.mrb[16].mxu0 %v6550_v8  ;;  %v6329_v8 = vcombine.high %v1210_v48, %v1224_v59  ;;  %v6328_v9 = vcombine.low %v1210_v48, %v1224_v59  ;;  %v3678_v44 = vrot.slane %v3587_v28, 5  ;;  %v1246_v36 = vor.u32 %v1245_v24, %v1242_v32  ;;  %v7358_v40 = vld [vmem:[#allocation6 + $0x2c0] ss:$8 sps:$4 sm:$0xff]   ;;  %v7363_v42 = vld [vmem:[#allocation6 + $0x6c4] ss:$8 sps:$4 sm:$0xff]  }
  0xed   :  { %4459 = vmatpush1.bf16.msra.mxu0 %v7337_v2  ;;  %4026 = vmatprep.mubr.bf16.mxu0 %v6553_v51  ;;  %v7357_v2 = vld [vmem:[#allocation6 + $0x6b4] ss:$8 sps:$4 sm:$0xff]   ;;  %v1251_v39 = vrot.slane %v1249_v41, 5  ;;  %v8099_v3 = vld [vmem:[#allocation2 + $0x100] sm:$0xff]  ;;  %v1051_v7 = vld [vmem:[#allocation2 + $0x108] sm:$0x11] }
  0xee   :  { %4460 = vmatprep.subr.bf16.mxu0 %v7345_v12  ;;  %v1229_v12 = vshll.u32 %v8081_v57, 16  ;;  %2154 = vmatpush1.bf16.msra.mxu1 %v7346_v45  ;;  %v6600_v45 = vcombine.low %v8081_v57, %v8085_v61  ;;  %v3679_v51 = vsel %vm7949_vm7, %v6539_v60, %v3678_v44  ;;  %v1247_v48 = vrot.slane %v1246_v36, 4  ;;  %v7366_v59 = vld [vmem:[#allocation6 + $0x2d4] ss:$8 sps:$4 sm:$0xff]   ;;  %v7367_v13 = vld [vmem:[#allocation6 + $0x6d0] ss:$8 sps:$4 sm:$0xff]  }
  0xef   :  { %1619 = vmatprep.mubr.bf16.mxu1 %v6329_v8  ;;  %2155 = vmatprep.subr.bf16.mxu1 %v7354_v55  ;;  %v8103_v8 = vld [vmem:[#allocation2 + $0x110] sm:$0xff]  ;;  %v1263_v15 = vshll.u32 %v1051_v7, 16  ;;  %v3589_v41 = vld [vmem:[#allocation2 + $0x118] sm:$0x11]  ;;  %v3591_v32 = vld [vmem:[#allocation2 + $0x128] sm:$0x11] }
  0xf0   :  { %v1231_v25 = vrot.slane %v1229_v12, 5  ;;  %1620 = vmatmul.mubr.bf16.gmra.mrb[20].mxu1 %v6328_v9  ;;  %v1252_v62 = vsel %vm7751_vm4, %v1247_v48, %v1251_v39  ;;  %v1053_v9 = vld [vmem:[#allocation2 + $0x118] sm:$0x11]  ;;  %v1254_v12 = vshrl.u32 %v8099_v3, 16  ;;  %v3588_v18 = vld [vmem:[#allocation2 + $0x110] sm:$0xee]  ;;  %v6602_v48 = vcombine.low %v8099_v3, %v8103_v8 }
  0xf1   :  { %4461 = vmatpush1.bf16.msra.mxu0 %v7343_v29  ;;  %v3675_v29 = vsel %vm7949_vm7, %v6538_v30, %v3674_v31  ;;  %v1277_v28 = vshll.u32 %v1053_v9, 16  ;;  %v3590_v30 = vld [vmem:[#allocation2 + $0x120] sm:$0xee]  ;;  %v6540_v24 = vrot.slane %v3588_v18, 9  ;;  %v3682_v60 = vrot.slane %v3589_v41, 5 }
  0xf2   :  { %4462 = vmatprep.subr.bf16.mxu0 %v7351_v52  ;;  %v1232_v33 = vor.u32 %v1231_v25, %v1228_v14  ;;  %2156 = vmatpush1.bf16.msra.mxu1 %v7352_v0  ;;  %v7361_v52 = vld [vmem:[#allocation6 + $0x6c0] ss:$8 sps:$4 sm:$0xff]   ;;  %v6554_v55 = vcombine.low %v3675_v29, %v3679_v51  ;;  %v7364_v0 = vld [vmem:[#allocation6 + $0x2d0] ss:$8 sps:$4 sm:$0xff]   ;;  %v1257_v14 = vshll.u32 %v8099_v3, 16  ;;  %v1256_v19 = vrot.slane %v1254_v12, 4 }
  0xf3   :  { %2157 = vmatprep.subr.bf16.mxu1 %v7360_v35  ;;  %v1271_v25 = vshll.u32 %v8103_v8, 16  ;;  %v6541_v44 = vrot.slane %v3590_v30, 9  ;;  %v3683_v36 = vsel %vm7949_vm7, %v6540_v24, %v3682_v60  ;;  %v3686_v39 = vrot.slane %v3591_v32, 5  ;;  %v7376_v9 = vld [vmem:[#allocation6 + $0x2f0] ss:$8 sps:$4 sm:$0xff]  }
  0xf4   :  { %4027 = vmatmul.mubr.bf16.gmra.mrb[20].mxu0 %v6552_v63  ;;  %v1233_v47 = vrot.slane %v1232_v33, 4  ;;  %v1259_v31 = vrot.slane %v1257_v14, 5  ;;  %v1265_v33 = vrot.slane %v1263_v15, 5  ;;  %v7381_v12 = vld [vmem:[#allocation6 + $0x6f4] ss:$8 sps:$4 sm:$0xff]  }
  0xf5   :  { %4463 = vmatpush1.bf16.msra.mxu0 %v7349_v53  ;;  %v6555_v53 = vcombine.high %v3675_v29, %v3679_v51  ;;  %v1273_v29 = vrot.slane %v1271_v25, 5  ;;  %v1279_v51 = vrot.slane %v1277_v28, 5  ;;  %v1748_v14 = vld [vmem:[#allocation2 + $0x10] sm:$0xee]  ;;  %v1749_v15 = vld [vmem:[#allocation2 + $0x18] sm:$0x11] }
  0xf6   :  { %4464 = vmatprep.subr.bf16.mxu0 %v7357_v2  ;;  %v1238_v63 = vsel %vm7751_vm4, %v1233_v47, %v1237_v34  ;;  %v7369_v2 = vld [vmem:[#allocation6 + $0x6d4] ss:$8 sps:$4 sm:$0xff]   ;;  %2158 = vmatpush1.bf16.msra.mxu1 %v7358_v40  ;;  %v1260_v35 = vor.u32 %v1259_v31, %v1256_v19  ;;  %v7370_v40 = vld [vmem:[#allocation6 + $0x2e0] ss:$8 sps:$4 sm:$0xff]   ;;  %v7379_v19 = vld [vmem:[#allocation6 + $0x6f0] ss:$8 sps:$4 sm:$0xff]  }
  0xf7   :  { %4036 = vmatprep.mubr.bf16.mxu0 %v6555_v53  ;;  %v6331_v6 = vcombine.high %v1238_v63, %v1252_v62  ;;  %v6330_v11 = vcombine.low %v1238_v63, %v1252_v62  ;;  %2159 = vmatprep.subr.bf16.mxu1 %v7366_v59  ;;  %v7373_v59 = vld [vmem:[#allocation6 + $0x6e0] ss:$8 sps:$4 sm:$0xff]   ;;  %v7378_v62 = vld [vmem:[#allocation6 + $0x2f4] ss:$8 sps:$4 sm:$0xff]   ;;  %v6367_v28 = vrot.slane %v1748_v14, 9  ;;  %v1819_v30 = vrot.slane %v1749_v15, 5 }
  0xf8   :  { %v1261_v53 = vrot.slane %v1260_v35, 4  ;;  %v7386_v31 = vld [vmem:[#allocation6 + $0x304] ss:$8 sps:$4 sm:$0xff]   ;;  %v7401_v17 = vld [vmem:[#allocation6 + $0x720] ss:$8 sps:$4 sm:$0xff]  }
  0xf9   :  { %4465 = vmatpush1.bf16.msra.mxu0 %v7355_v23  ;;  %v1268_v23 = vshrl.u32 %v8103_v8, 16  ;;  %1629 = vmatprep.mubr.bf16.mxu1 %v6331_v6  ;;  %v1746_v6 = vld [vmem:[#allocation2] sm:$0xee]  ;;  %v1820_v60 = vsel %vm7949_vm7, %v6367_v28, %v1819_v30  ;;  %v1751_v35 = vld [vmem:[#allocation2 + $0x28] sm:$0x11] }
  0xfa   :  { %4466 = vmatprep.subr.bf16.mxu0 %v7363_v42  ;;  %1630 = vmatmul.mubr.bf16.gmra.mrb[24].mxu1 %v6330_v11  ;;  %v7372_v42 = vld [vmem:[#allocation6 + $0x2e4] ss:$8 sps:$4 sm:$0xff]   ;;  %v1266_v7 = vsel %vm7751_vm4, %v1261_v53, %v1265_v33  ;;  %v7404_v30 = vld [vmem:[#allocation6 + $0x330] ss:$8 sps:$4 sm:$0xff]   ;;  %v7453_v58 = vld [vmem:[#allocation6 + $0x3a0] ss:$8 sps:$4 sm:$0xff]  }
  0xfb   :  { %v1270_v34 = vrot.slane %v1268_v23, 4  ;;  %2160 = vmatpush1.bf16.msra.mxu1 %v7364_v0  ;;  %v6366_v23 = vrot.slane %v1746_v6, 9  ;;  %v7389_v24 = vld [vmem:[#allocation6 + $0x704] ss:$8 sps:$4 sm:$0xff]  }
  0xfc   :  { %4037 = vmatmul.mubr.bf16.gmra.mrb[24].mxu0 %v6554_v55  ;;  %v3687_v55 = vsel %vm7949_vm7, %v6541_v44, %v3686_v39  ;;  %2161 = vmatprep.subr.bf16.mxu1 %v7372_v42  ;;  %v1750_v44 = vld [vmem:[#allocation2 + $0x20] sm:$0xee]  ;;  %v1759_v10 = vld [vmem:[#allocation2 + $0x68] sm:$0x11] }
  0xfd   :  { %4467 = vmatpush1.bf16.msra.mxu0 %v7361_v52  ;;  %v1274_v47 = vor.u32 %v1273_v29, %v1270_v34  ;;  %v7375_v52 = vld [vmem:[#allocation6 + $0x6e4] ss:$8 sps:$4 sm:$0xff]   ;;  %v6557_v0 = vcombine.high %v3683_v36, %v3687_v55  ;;  %v7387_v34 = vld [vmem:[#allocation6 + $0x700] ss:$8 sps:$4 sm:$0xff]   ;;  %v7395_v29 = vld [vmem:[#allocation6 + $0x714] ss:$8 sps:$4 sm:$0xff]  }
  0xfe   :  { %4468 = vmatprep.subr.bf16.mxu0 %v7369_v2  ;;  %v6556_v2 = vcombine.low %v3683_v36, %v3687_v55  ;;  %v1753_v36 = vld [vmem:[#allocation2 + $0x38] sm:$0x11]  ;;  %v6368_v39 = vrot.slane %v1750_v44, 9  ;;  %v7399_v16 = vld [vmem:[#allocation6 + $0x324] ss:$8 sps:$4 sm:$0xff]  }
  0xff   :  { %v1275_v63 = vrot.slane %v1274_v47, 4  ;;  %2162 = vmatpush1.bf16.msra.mxu1 %v7370_v40  ;;  %4046 = vmatprep.mubr.bf16.mxu0 %v6557_v0  ;;  %v1823_v40 = vrot.slane %v1751_v35, 5  ;;  %v7392_v55 = vld [vmem:[#allocation6 + $0x314] ss:$8 sps:$4 sm:$0xff]   ;;  %v7390_v0 = vld [vmem:[#allocation6 + $0x310] ss:$8 sps:$4 sm:$0xff]  }
 0x100   :  { %2163 = vmatprep.subr.bf16.mxu1 %v7378_v62  ;;  %v7403_v62 = vld [vmem:[#allocation6 + $0x724] ss:$8 sps:$4 sm:$0xff]   ;;  %v85_v35 = vld [vmem:[#allocation2 + $0x90] sm:$0x11] }
 0x101   :  { %4469 = vmatpush1.bf16.msra.mxu0 %v7367_v13  ;;  %v1280_v11 = vsel %vm7751_vm4, %v1275_v63, %v1279_v51  ;;  %v1747_v13 = vld [vmem:[#allocation2 + $0x8] sm:$0x11]  ;;  %v1827_v51 = vrot.slane %v1753_v36, 5  ;;  %v1824_v53 = vsel %vm7949_vm7, %v6368_v39, %v1823_v40  ;;  %v1758_v5 = vld [vmem:[#allocation2 + $0x60] sm:$0xee]  ;;  %v86_v36 = vsel %vm7677_vm10, 0, %v85_v35 }
 0x102   :  { %4470 = vmatprep.subr.bf16.mxu0 %v7375_v52  ;;  %v6333_v18 = vcombine.high %v1266_v7, %v1280_v11  ;;  %v6332_v41 = vcombine.low %v1266_v7, %v1280_v11  ;;  %v1815_v25 = vrot.slane %v1747_v13, 5  ;;  %v7384_v52 = vld [vmem:[#allocation6 + $0x300] ss:$8 sps:$4 sm:$0xff]   ;;  %v7409_v13 = vld [vmem:[#allocation6 + $0x734] ss:$8 sps:$4 sm:$0xff]  }
 0x103   :  { %2164 = vmatpush1.bf16.msra.mxu1 %v7376_v9  ;;  %v1755_v7 = vld [vmem:[#allocation2 + $0x48] sm:$0x11]  ;;  %v1756_v9 = vld [vmem:[#allocation2 + $0x50] sm:$0xee]  ;;  %87 = vst [vmem:[#allocation2 + $0x90] sm:$0x11] %v86_v36 }
 0x104   :  { %4047 = vmatmul.mubr.bf16.gmra.mrb[28].mxu0 %v6556_v2  ;;  %1639 = vmatprep.mubr.bf16.mxu1 %v6333_v18  ;;  %v1816_v32 = vsel %vm7949_vm7, %v6366_v23, %v1815_v25  ;;  %v1831_v11 = vrot.slane %v1755_v7, 5  ;;  %v7406_v23 = vld [vmem:[#allocation6 + $0x334] ss:$8 sps:$4 sm:$0xff]   ;;  %v7407_v25 = vld [vmem:[#allocation6 + $0x730] ss:$8 sps:$4 sm:$0xff]  }
 0x105   :  { %4471 = vmatpush1.bf16.msra.mxu0 %v7373_v59  ;;  %4474 = vmatprep.mubr.bf16.mxu0 %v6591_v21  ;;  %v6383_v33 = vcombine.high %v1816_v32, %v1820_v60  ;;  %v1752_v21 = vld [vmem:[#allocation2 + $0x30] sm:$0xee]  ;;  %v6382_v42 = vcombine.low %v1816_v32, %v1820_v60  ;;  %v7413_v32 = vld [vmem:[#allocation6 + $0x344] ss:$8 sps:$4 sm:$0xff]   ;;  %v1761_v60 = vld [vmem:[#allocation2 + $0x78] sm:$0x11] }
 0x106   :  { %4472 = vmatprep.subr.bf16.mxu0 %v7381_v12  ;;  %1640 = vmatmul.mubr.bf16.gmra.mrb[28].mxu1 %v6332_v41  ;;  %v6369_v47 = vrot.slane %v1752_v21, 9  ;;  %v7393_v59 = vld [vmem:[#allocation6 + $0x710] ss:$8 sps:$4 sm:$0xff]   ;;  %v7397_v41 = vld [vmem:[#allocation6 + $0x320] ss:$8 sps:$4 sm:$0xff]   ;;  %v1843_v44 = vrot.slane %v1761_v60, 5 }
 0x107   :  { %2630 = vmatprep.subr.bf16.mxu1 %v7386_v31  ;;  %2165 = vmatprep.mubr.bf16.mxu1 %v6383_v33  ;;  %v1757_v12 = vld [vmem:[#allocation2 + $0x58] sm:$0x11]  ;;  %v7417_v31 = vld [vmem:[#allocation6 + $0x744] ss:$8 sps:$4 sm:$0xff]   ;;  %v6372_v33 = vrot.slane %v1758_v5, 9 }
 0x108   :  { %v1828_v63 = vsel %vm7949_vm7, %v6369_v47, %v1827_v51  ;;  %v1835_v14 = vrot.slane %v1757_v12, 5  ;;  %v7423_v21 = vld [vmem:[#allocation6 + $0x754] ss:$8 sps:$4 sm:$0xff]   ;;  %v1770_v36 = vld [vmem:[#allocation2 + $0xe0] sm:$0xee] }
 0x109   :  { %4473 = vmatpush1.bf16.msra.mxu0 %v7379_v19  ;;  %v6385_v2 = vcombine.high %v1824_v53, %v1828_v63  ;;  %v6384_v15 = vcombine.low %v1824_v53, %v1828_v63  ;;  %v7420_v51 = vld [vmem:[#allocation6 + $0x354] ss:$8 sps:$4 sm:$0xff]   ;;  %v7418_v53 = vld [vmem:[#allocation6 + $0x350] ss:$8 sps:$4 sm:$0xff]   ;;  %v1762_v63 = vld [vmem:[#allocation2 + $0xa0] sm:$0xee] }
 0x10a   :  { %5163 = vmatprep.subr.bf16.mxu0 %v7389_v24  ;;  %v7415_v24 = vld [vmem:[#allocation6 + $0x740] ss:$8 sps:$4 sm:$0xff]   ;;  %v7451_v35 = vld [vmem:[#allocation6 + $0x794] ss:$8 sps:$4 sm:$0xff]   ;;  %v7455_v54 = vld [vmem:[#allocation6 + $0x3a4] ss:$8 sps:$4 sm:$0xff]  }
 0x10c   :  { %4475 = vmatmul.mubr.bf16.vlgmr.msra.gmra.mrb[0].mxu0 %v6590_v20  ;;  %v1754_v20 = vld [vmem:[#allocation2 + $0x40] sm:$0xee] }
 0x10d   :  { %5164 = vmatpush1.bf16.msra.mxu0 %v7387_v34  ;;  %4484 = vmatprep.mubr.bf16.mxu0 %v6593_v43  ;;  %v6370_v6 = vrot.slane %v1754_v20, 9  ;;  %v6371_v43 = vrot.slane %v1756_v9, 9  ;;  %v1839_v34 = vrot.slane %v1759_v10, 5  ;;  %v8157_v20 = vld [vmem:[#allocation2 + $0x90] sm:$0xff] }
 0x10e   :  { %5165 = vmatprep.subr.bf16.mxu0 %v7395_v29  ;;  %2166 = vmatmul.mubr.bf16.vlgmr.msra.gmra.mrb[0].mxu1 %v6382_v42  ;;  %v7411_v42 = vld [vmem:[#allocation6 + $0x340] ss:$8 sps:$4 sm:$0xff]  }
 0x10f   :  { %2631 = vmatpush1.bf16.msra.mxu1 %v7384_v52  ;;  %2175 = vmatprep.mubr.bf16.mxu1 %v6385_v2  ;;  %v1832_v18 = vsel %vm7949_vm7, %v6370_v6, %v1831_v11  ;;  %v1836_v19 = vsel %vm7949_vm7, %v6371_v43, %v1835_v14  ;;  %v7421_v52 = vld [vmem:[#allocation6 + $0x750] ss:$8 sps:$4 sm:$0xff]   ;;  %v7429_v11 = vld [vmem:[#allocation6 + $0x760] ss:$8 sps:$4 sm:$0xff]   ;;  %v7437_v14 = vld [vmem:[#allocation6 + $0x774] ss:$8 sps:$4 sm:$0xff]  }
 0x110   :  { %2632 = vmatprep.subr.bf16.mxu1 %v7392_v55  ;;  %v6387_v28 = vcombine.high %v1832_v18, %v1836_v19  ;;  %v6386_v39 = vcombine.low %v1832_v18, %v1836_v19  ;;  %v8155_v55 = vld [vmem:[#allocation2 + $0x80] sm:$0xff]  ;;  %v1764_v2 = vld [vmem:[#allocation2 + $0xb0] sm:$0xee] }
 0x111   :  { %5166 = vmatpush1.bf16.msra.mxu0 %v7393_v59  ;;  %v7431_v59 = vld [vmem:[#allocation6 + $0x764] ss:$8 sps:$4 sm:$0xff]   ;;  %v6375_v4 = vrot.slane %v1764_v2, 9  ;;  %v6597_v9 = vcombine.high %v8155_v55, %v8157_v20  ;;  %v6596_v6 = vcombine.low %v8155_v55, %v8157_v20  ;;  %v7425_v43 = vld [vmem:[#allocation6 + $0x360] ss:$8 sps:$4 sm:$0xff]  }
 0x112   :  { %5167 = vmatprep.subr.bf16.mxu0 %v7403_v62  ;;  %v1765_v62 = vld [vmem:[#allocation2 + $0xb8] sm:$0x11] }
 0x113   :  { %2633 = vmatpush1.bf16.msra.mxu1 %v7390_v0  ;;  %v1763_v0 = vld [vmem:[#allocation2 + $0xa8] sm:$0x11]  ;;  %v7435_v19 = vld [vmem:[#allocation6 + $0x770] ss:$8 sps:$4 sm:$0xff]  }
 0x114   :  { %4485 = vmatmul.mubr.bf16.gmra.mrb[4].mxu0 %v6592_v50  ;;  %2634 = vmatprep.subr.bf16.mxu1 %v7399_v16  ;;  %v1760_v50 = vld [vmem:[#allocation2 + $0x70] sm:$0xee]  ;;  %v6374_v16 = vrot.slane %v1762_v63, 9  ;;  %v1847_v1 = vrot.slane %v1763_v0, 5  ;;  %v7459_v0 = vld [vmem:[#allocation6 + $0x7a4] ss:$8 sps:$4 sm:$0xff]  }
 0x115   :  { %5168 = vmatpush1.bf16.msra.mxu0 %v7401_v17  ;;  %4494 = vmatprep.mubr.bf16.mxu0 %v6595_v26  ;;  %v6373_v29 = vrot.slane %v1760_v50, 9  ;;  %v1840_v26 = vsel %vm7949_vm7, %v6372_v33, %v1839_v34  ;;  %v1851_v17 = vrot.slane %v1765_v62, 5  ;;  %v7441_v50 = vld [vmem:[#allocation6 + $0x384] ss:$8 sps:$4 sm:$0xff]  }
 0x116   :  { %5169 = vmatprep.subr.bf16.mxu0 %v7409_v13  ;;  %2176 = vmatmul.mubr.bf16.gmra.mrb[4].mxu1 %v6384_v15  ;;  %v1848_v7 = vsel %vm7949_vm7, %v6374_v16, %v1847_v1  ;;  %v7434_v15 = vld [vmem:[#allocation6 + $0x374] ss:$8 sps:$4 sm:$0xff]  }
 0x117   :  { %2635 = vmatpush1.bf16.msra.mxu1 %v7397_v41  ;;  %2185 = vmatprep.mubr.bf16.mxu1 %v6387_v28  ;;  %v1844_v40 = vsel %vm7949_vm7, %v6373_v29, %v1843_v44  ;;  %v1852_v13 = vsel %vm7949_vm7, %v6375_v4, %v1851_v17  ;;  %v7432_v41 = vld [vmem:[#allocation6 + $0x370] ss:$8 sps:$4 sm:$0xff]   ;;  %v7439_v29 = vld [vmem:[#allocation6 + $0x380] ss:$8 sps:$4 sm:$0xff]   ;;  %v7462_v1 = vld [vmem:[#allocation6 + $0x3b4] ss:$8 sps:$4 sm:$0xff]  }
 0x118   :  { %2636 = vmatprep.subr.bf16.mxu1 %v7406_v23  ;;  %v6389_v47 = vcombine.high %v1840_v26, %v1844_v40  ;;  %v6388_v12 = vcombine.low %v1840_v26, %v1844_v40  ;;  %v6391_v18 = vcombine.high %v1848_v7, %v1852_v13  ;;  %v1766_v23 = vld [vmem:[#allocation2 + $0xc0] sm:$0xee]  ;;  %v1768_v28 = vld [vmem:[#allocation2 + $0xd0] sm:$0xee]  ;;  %v6390_v34 = vcombine.low %v1848_v7, %v1852_v13  ;;  %v1775_v17 = vld [vmem:[#allocation2 + $0x108] sm:$0x11] }
 0x119   :  { %5170 = vmatpush1.bf16.msra.mxu0 %v7407_v25  ;;  %v1767_v25 = vld [vmem:[#allocation2 + $0xc8] sm:$0x11]  ;;  %v6377_v5 = vrot.slane %v1768_v28, 9  ;;  %v6601_v40 = vcombine.high %v8081_v57, %v8085_v61  ;;  %v7465_v4 = vld [vmem:[#allocation6 + $0x7b4] ss:$8 sps:$4 sm:$0xff]   ;;  %v1871_v13 = vrot.slane %v1775_v17, 5 }
 0x11a   :  { %5171 = vmatprep.subr.bf16.mxu0 %v7417_v31  ;;  %v6376_v31 = vrot.slane %v1766_v23, 9  ;;  %v7443_v44 = vld [vmem:[#allocation6 + $0x780] ss:$8 sps:$4 sm:$0xff]   ;;  %v7473_v23 = vld [vmem:[#allocation6 + $0x7c4] ss:$8 sps:$4 sm:$0xff]   ;;  %v4768_v57 = vshrl.u32 %v8155_v55, 16 }
 0x11b   :  { %2637 = vmatpush1.bf16.msra.mxu1 %v7404_v30  ;;  %v1769_v30 = vld [vmem:[#allocation2 + $0xd8] sm:$0x11]  ;;  %v7469_v61 = vld [vmem:[#allocation6 + $0x3c4] ss:$8 sps:$4 sm:$0xff]  }
 0x11c   :  { %4495 = vmatmul.mubr.bf16.gmra.mrb[8].mxu0 %v6594_v22  ;;  %2638 = vmatprep.subr.bf16.mxu1 %v7413_v32  ;;  %v7427_v22 = vld [vmem:[#allocation6 + $0x364] ss:$8 sps:$4 sm:$0xff]   ;;  %v1855_v32 = vrot.slane %v1767_v25, 5  ;;  %v1859_v10 = vrot.slane %v1769_v30, 5  ;;  %v7471_v25 = vld [vmem:[#allocation6 + $0x7c0] ss:$8 sps:$4 sm:$0xff]  }
 0x11d   :  { %5172 = vmatpush1.bf16.msra.mxu0 %v7415_v24  ;;  %4504 = vmatprep.mubr.bf16.mxu0 %v6597_v9  ;;  %v7445_v24 = vld [vmem:[#allocation6 + $0x784] ss:$8 sps:$4 sm:$0xff]   ;;  %v1776_v9 = vld [vmem:[#allocation2 + $0x110] sm:$0xee]  ;;  %v4658_v17 = vld [vmem:[#allocation2 + $0x58] sm:$0x11] }
 0x11e   :  { %5173 = vmatprep.subr.bf16.mxu0 %v7423_v21  ;;  %2186 = vmatmul.mubr.bf16.gmra.mrb[8].mxu1 %v6386_v39  ;;  %v1856_v60 = vsel %vm7949_vm7, %v6376_v31, %v1855_v32  ;;  %v1860_v33 = vsel %vm7949_vm7, %v6377_v5, %v1859_v10  ;;  %v7448_v21 = vld [vmem:[#allocation6 + $0x394] ss:$8 sps:$4 sm:$0xff]   ;;  %v1771_v39 = vld [vmem:[#allocation2 + $0xe8] sm:$0x11]  ;;  %v8201_v5 = vld [vmem:[#allocation2 + $0x20] sm:$0xff] }
 0x11f   :  { %2639 = vmatpush1.bf16.msra.mxu1 %v7411_v42  ;;  %2195 = vmatprep.mubr.bf16.mxu1 %v6389_v47  ;;  %v6393_v26 = vcombine.high %v1856_v60, %v1860_v33  ;;  %v1772_v42 = vld [vmem:[#allocation2 + $0xf0] sm:$0xee]  ;;  %v1773_v47 = vld [vmem:[#allocation2 + $0xf8] sm:$0x11]  ;;  %v6392_v16 = vcombine.low %v1856_v60, %v1860_v33  ;;  %v4652_v10 = vld [vmem:[#allocation2 + $0x28] sm:$0x11] }
 0x120   :  { %2640 = vmatprep.subr.bf16.mxu1 %v7420_v51  ;;  %v6378_v51 = vrot.slane %v1770_v36, 9  ;;  %v1867_v63 = vrot.slane %v1773_v47, 5  ;;  %v7476_v31 = vld [vmem:[#allocation6 + $0x3d4] ss:$8 sps:$4 sm:$0xff]   ;;  %v4771_v60 = vshll.u32 %v8155_v55, 16 }
 0x121   :  { %5174 = vmatpush1.bf16.msra.mxu0 %v7421_v52  ;;  %v1863_v52 = vrot.slane %v1771_v39, 5  ;;  %v7479_v32 = vld [vmem:[#allocation6 + $0x7d4] ss:$8 sps:$4 sm:$0xff]  }
 0x122   :  { %5175 = vmatprep.subr.bf16.mxu0 %v7431_v59  ;;  %v6379_v59 = vrot.slane %v1772_v42, 9 }
 0x123   :  { %2641 = vmatpush1.bf16.msra.mxu1 %v7418_v53  ;;  %v7449_v53 = vld [vmem:[#allocation6 + $0x790] ss:$8 sps:$4 sm:$0xff]   ;;  %v1864_v2 = vsel %vm7949_vm7, %v6378_v51, %v1863_v52 }
 0x124   :  { %2642 = vmatprep.subr.bf16.mxu1 %v7427_v22  ;;  %4505 = vmatmul.mubr.bf16.gmra.mrb[12].mxu0 %v6596_v6  ;;  %v1868_v62 = vsel %vm7949_vm7, %v6379_v59, %v1867_v63  ;;  %v1774_v22 = vld [vmem:[#allocation2 + $0x100] sm:$0xee]  ;;  %v8223_v63 = vld [vmem:[#allocation2 + $0x10] sm:$0xff] }
 0x125   :  { %5176 = vmatpush1.bf16.msra.mxu0 %v7429_v11  ;;  %4514 = vmatprep.mubr.bf16.mxu0 %v6599_v37  ;;  %v7446_v37 = vld [vmem:[#allocation6 + $0x390] ss:$8 sps:$4 sm:$0xff]   ;;  %v6395_v7 = vcombine.high %v1864_v2, %v1868_v62  ;;  %v6380_v6 = vrot.slane %v1774_v22, 9  ;;  %v6603_v11 = vcombine.high %v8099_v3, %v8103_v8  ;;  %v6394_v30 = vcombine.low %v1864_v2, %v1868_v62  ;;  %v7483_v8 = vld [vmem:[#allocation6 + $0x3e4] ss:$8 sps:$4 sm:$0xff]  }
 0x126   :  { %2196 = vmatmul.mubr.bf16.gmra.mrb[12].mxu1 %v6388_v12  ;;  %5177 = vmatprep.subr.bf16.mxu0 %v7437_v14  ;;  %v1777_v12 = vld [vmem:[#allocation2 + $0x118] sm:$0x11]  ;;  %v7485_v59 = vld [vmem:[#allocation6 + $0x7e0] ss:$8 sps:$4 sm:$0xff]   ;;  %v8227_v62 = vld [vmem:[#allocation2 + $0x50] sm:$0xff] }
 0x127   :  { %2643 = vmatpush1.bf16.msra.mxu1 %v7425_v43  ;;  %2205 = vmatprep.mubr.bf16.mxu1 %v6391_v18  ;;  %v6381_v43 = vrot.slane %v1776_v9, 9  ;;  %v1875_v14 = vrot.slane %v1777_v12, 5  ;;  %v7460_v18 = vld [vmem:[#allocation6 + $0x3b0] ss:$8 sps:$4 sm:$0xff]   ;;  %v8193_v28 = vsel %vm7949_vm7, %v6380_v6, %v1871_v13  ;;  %v8225_v2 = vld [vmem:[#allocation2 + $0x40] sm:$0xff]  ;;  %v4726_v13 = vshrl.u32 %v8227_v62, 16 }
 0x128   :  { %2644 = vmatprep.subr.bf16.mxu1 %v7434_v15  ;;  %v115_v15 = vld [vmem:[#allocation2 + $0x130] sm:$0x11]  ;;  %v4656_v22 = vld [vmem:[#allocation2 + $0x48] sm:$0x11]  ;;  %v4715_v9 = vshll.u32 %v8225_v2, 16 }
 0x129   :  { %5178 = vmatpush1.bf16.msra.mxu0 %v7435_v19  ;;  %v116_v19 = vsel %vm7677_vm10, 0, %v115_v15  ;;  %v8197_v46 = vsel %vm7949_vm7, %v6381_v43, %v1875_v14  ;;  %v7493_v43 = vld [vmem:[#allocation6 + $0x7f4] ss:$8 sps:$4 sm:$0xff]  }
 0x12a   :  { %5179 = vmatprep.subr.bf16.mxu0 %v7445_v24  ;;  %117 = vst [vmem:[#allocation2 + $0x130] sm:$0x11] %v116_v19  ;;  %v8199_v24 = vld [vmem:[#allocation2 + $0x120] sm:$0xff]  ;;  %v6397_v33 = vcombine.high %v8193_v28, %v8197_v46  ;;  %v4717_v15 = vrot.slane %v4715_v9, 5  ;;  %v7490_v19 = vld [vmem:[#allocation6 + $0x3f4] ss:$8 sps:$4 sm:$0xff]  }
 0x12b   :  { %2645 = vmatpush1.bf16.msra.mxu1 %v7432_v41  ;;  %v7463_v41 = vld [vmem:[#allocation6 + $0x7b0] ss:$8 sps:$4 sm:$0xff]  }
 0x12c   :  { %2646 = vmatprep.subr.bf16.mxu1 %v7441_v50  ;;  %4515 = vmatmul.mubr.bf16.gmra.mrb[16].mxu0 %v6598_v38  ;;  %v7457_v38 = vld [vmem:[#allocation6 + $0x7a0] ss:$8 sps:$4 sm:$0xff]   ;;  %v8203_v50 = vrot.slane %v4768_v57, 4  ;;  %v7499_v9 = vld [vmem:[#allocation6 + $0x810] ss:$8 sps:$4 sm:$0xff]  }
 0x12d   :  { %5180 = vmatpush1.bf16.msra.mxu0 %v7443_v44  ;;  %4524 = vmatprep.mubr.bf16.mxu0 %v6601_v40  ;;  %v4684_v44 = vshrl.u32 %v8201_v5, 16  ;;  %v7477_v40 = vld [vmem:[#allocation6 + $0x7d0] ss:$8 sps:$4 sm:$0xff]  }
 0x12e   :  { %2206 = vmatmul.mubr.bf16.gmra.mrb[16].mxu1 %v6390_v34  ;;  %5181 = vmatprep.subr.bf16.mxu0 %v7451_v35  ;;  %v8208_v34 = vld [vmem:[#allocation2 + $0x30] sm:$0xff]  ;;  %v4687_v35 = vshll.u32 %v8201_v5, 16 }
 0x12f   :  { %2647 = vmatpush1.bf16.msra.mxu1 %v7439_v29  ;;  %2215 = vmatprep.mubr.bf16.mxu1 %v6393_v26  ;;  %v4654_v29 = vld [vmem:[#allocation2 + $0x38] sm:$0x11]  ;;  %v4693_v26 = vshll.u32 %v4652_v10, 16  ;;  %v4698_v36 = vshrl.u32 %v8208_v34, 16  ;;  %v4701_v39 = vshll.u32 %v8208_v34, 16  ;;  %v4686_v47 = vrot.slane %v4684_v44, 4 }
 0x130   :  { %2648 = vmatprep.subr.bf16.mxu1 %v7448_v21  ;;  %v7474_v21 = vld [vmem:[#allocation6 + $0x3d0] ss:$8 sps:$4 sm:$0xff]   ;;  %v4689_v51 = vrot.slane %v4687_v35, 5  ;;  %v4785_v35 = vshll.u32 %v8157_v20, 16 }
 0x131   :  { %5182 = vmatpush1.bf16.msra.mxu0 %v7449_v53  ;;  %v8217_v42 = vld [vmem:[#allocation2 + $0x130] sm:$0xff]  ;;  %v4700_v52 = vrot.slane %v4698_v36, 4  ;;  %v8221_v53 = vrot.slane %v4771_v60, 5 }
 0x132   :  { %5183 = vmatprep.subr.bf16.mxu0 %v7459_v0  ;;  %v6605_v3 = vcombine.high %v8199_v24, %v8217_v42  ;;  %v4690_v0 = vor.u32 %v4689_v51, %v4686_v47  ;;  %v8246_v44 = vld [vmem:[#allocation2 + $0x70] sm:$0xff] }
 0x133   :  { %2649 = vmatpush1.bf16.msra.mxu1 %v7446_v37  ;;  %v4707_v37 = vshll.u32 %v4654_v29, 16  ;;  %v4660_v29 = vld [vmem:[#allocation2 + $0x68] sm:$0x11] }
 0x134   :  { %2650 = vmatprep.subr.bf16.mxu1 %v7455_v54  ;;  %4525 = vmatmul.mubr.bf16.gmra.mrb[20].mxu0 %v6600_v45  ;;  %v7467_v45 = vld [vmem:[#allocation6 + $0x3c0] ss:$8 sps:$4 sm:$0xff]   ;;  %v4695_v54 = vrot.slane %v4693_v26, 5  ;;  %v4691_v12 = vrot.slane %v4690_v0, 4 }
 0x135   :  { %5184 = vmatpush1.bf16.msra.mxu0 %v7457_v38  ;;  %4534 = vmatprep.mubr.bf16.mxu0 %v6603_v11  ;;  %v4709_v38 = vrot.slane %v4707_v37, 5  ;;  %v4721_v11 = vshll.u32 %v4656_v22, 16  ;;  %v4662_v37 = vld [vmem:[#allocation2 + $0x78] sm:$0x11]  ;;  %v6433_v22 = vcombine.high %v8208_v34, %v8225_v2 }
 0x136   :  { %2216 = vmatmul.mubr.bf16.gmra.mrb[20].mxu1 %v6392_v16  ;;  %5185 = vmatprep.subr.bf16.mxu0 %v7465_v4  ;;  %v6396_v16 = vcombine.low %v8193_v28, %v8197_v46  ;;  %v6604_v4 = vcombine.low %v8199_v24, %v8217_v42  ;;  %v4696_v57 = vsel %vm7751_vm4, %v4691_v12, %v4695_v54  ;;  %v7491_v28 = vld [vmem:[#allocation6 + $0x7f0] ss:$8 sps:$4 sm:$0xff]   ;;  %v7498_v46 = vld [vmem:[#allocation6 + $0x804] ss:$8 sps:$4 sm:$0xff]  }
 0x137   :  { %2651 = vmatpush1.bf16.msra.mxu1 %v7453_v58  ;;  %2225 = vmatprep.mubr.bf16.mxu1 %v6395_v7  ;;  %v4703_v58 = vrot.slane %v4701_v39, 5  ;;  %v4712_v7 = vshrl.u32 %v8225_v2, 16  ;;  %v4723_v60 = vrot.slane %v4721_v11, 5 }
 0x138   :  { %2652 = vmatprep.subr.bf16.mxu1 %v7462_v1  ;;  %v7481_v1 = vld [vmem:[#allocation6 + $0x3e0] ss:$8 sps:$4 sm:$0xff]  }
 0x139   :  { %5186 = vmatpush1.bf16.msra.mxu0 %v7463_v41  ;;  %v4704_v6 = vor.u32 %v4703_v58, %v4700_v52  ;;  %v4714_v14 = vrot.slane %v4712_v7, 4  ;;  %v4735_v41 = vshll.u32 %v4658_v17, 16  ;;  %v4757_v52 = vshll.u32 %v8246_v44, 16  ;;  %v7501_v58 = vld [vmem:[#allocation6 + $0x814] ss:$8 sps:$4 sm:$0xff]  }
 0x13a   :  { %5187 = vmatprep.subr.bf16.mxu0 %v7473_v23  ;;  %v6431_v23 = vcombine.high %v8223_v63, %v8201_v5 }
 0x13b   :  { %2653 = vmatpush1.bf16.msra.mxu1 %v7460_v18  ;;  %v4729_v18 = vshll.u32 %v8227_v62, 16  ;;  %v4737_v39 = vrot.slane %v4735_v41, 5 }
 0x13c   :  { %2654 = vmatprep.subr.bf16.mxu1 %v7469_v61  ;;  %4535 = vmatmul.mubr.bf16.gmra.mrb[24].mxu0 %v6602_v48  ;;  %v7487_v48 = vld [vmem:[#allocation6 + $0x7e4] ss:$8 sps:$4 sm:$0xff]   ;;  %v4705_v61 = vrot.slane %v4704_v6, 4 }
 0x13d   :  { %5188 = vmatpush1.bf16.msra.mxu0 %v7471_v25  ;;  %4544 = vmatprep.mubr.bf16.mxu0 %v6605_v3  ;;  %v7488_v25 = vld [vmem:[#allocation6 + $0x3f0] ss:$8 sps:$4 sm:$0xff]  }
 0x13e   :  { %2226 = vmatmul.mubr.bf16.gmra.mrb[24].mxu1 %v6394_v30  ;;  %5189 = vmatprep.subr.bf16.mxu0 %v7479_v32  ;;  %v4718_v30 = vor.u32 %v4717_v15, %v4714_v14  ;;  %v4782_v32 = vshrl.u32 %v8157_v20, 16  ;;  %v4710_v10 = vsel %vm7751_vm4, %v4705_v61, %v4709_v38  ;;  %v4749_v20 = vshll.u32 %v4660_v29, 16  ;;  %v8267_v61 = vld [vmem:[#allocation2 + $0xd0] sm:$0xff] }
 0x13f   :  { %2655 = vmatpush1.bf16.msra.mxu1 %v7467_v45  ;;  %2235 = vmatprep.mubr.bf16.mxu1 %v6397_v33  ;;  %v4728_v45 = vrot.slane %v4726_v13, 4  ;;  %v8244_v33 = vld [vmem:[#allocation2 + $0x60] sm:$0xff]  ;;  %v6638_v47 = vcombine.low %v4696_v57, %v4710_v10  ;;  %v4787_v13 = vrot.slane %v4785_v35, 5  ;;  %v4668_v35 = vld [vmem:[#allocation2 + $0xc8] sm:$0x11] }
 0x140   :  { %2656 = vmatprep.subr.bf16.mxu1 %v7476_v31  ;;  %v4731_v31 = vrot.slane %v4729_v18, 5  ;;  %v4719_v26 = vrot.slane %v4718_v30, 4  ;;  %v4740_v51 = vshrl.u32 %v8244_v33, 16  ;;  %v4743_v3 = vshll.u32 %v8244_v33, 16  ;;  %v7506_v18 = vld [vmem:[#allocation6 + $0x824] ss:$8 sps:$4 sm:$0xff]  }
 0x141   :  { %5190 = vmatpush1.bf16.msra.mxu0 %v7477_v40  ;;  %v6430_v40 = vcombine.low %v8223_v63, %v8201_v5  ;;  %v4763_v63 = vshll.u32 %v4662_v37, 16  ;;  %v4784_v7 = vrot.slane %v4782_v32, 4  ;;  %v4751_v14 = vrot.slane %v4749_v20, 5 }
 0x142   :  { %5191 = vmatprep.subr.bf16.mxu0 %v7487_v48  ;;  %v4732_v36 = vor.u32 %v4731_v31, %v4728_v45  ;;  %v4754_v48 = vshrl.u32 %v8246_v44, 16  ;;  %v4724_v0 = vsel %vm7751_vm4, %v4719_v26, %v4723_v60  ;;  %v4742_v54 = vrot.slane %v4740_v51, 4  ;;  %v7504_v31 = vld [vmem:[#allocation6 + $0x820] ss:$8 sps:$4 sm:$0xff]   ;;  %v7509_v60 = vld [vmem:[#allocation6 + $0x834] ss:$8 sps:$4 sm:$0xff]  }
 0x143   :  { %2657 = vmatpush1.bf16.msra.mxu1 %v7474_v21  ;;  %v6639_v21 = vcombine.high %v4696_v57, %v4710_v10  ;;  %v4745_v5 = vrot.slane %v4743_v3, 5  ;;  %v4765_v15 = vrot.slane %v4763_v63, 5  ;;  %v8265_v57 = vld [vmem:[#allocation2 + $0xc0] sm:$0xff]  ;;  %v4810_v10 = vshrl.u32 %v8267_v61, 16  ;;  %v7507_v3 = vld [vmem:[#allocation6 + $0x830] ss:$8 sps:$4 sm:$0xff]  }
 0x144   :  { %2658 = vmatprep.subr.bf16.mxu1 %v7483_v8  ;;  %4545 = vmatmul.mubr.bf16.gmra.mrb[28].mxu0 %v6604_v4  ;;  %v4733_v8 = vrot.slane %v4732_v36, 4  ;;  %v150_v4 = vld [vmem:[#allocation2 + $0x98] sm:$0x11]  ;;  %v4796_v45 = vshrl.u32 %v8265_v57, 16  ;;  %v4799_v30 = vshll.u32 %v8265_v57, 16  ;;  %v8281_v51 = vld [vmem:[#allocation2 + $0xe0] sm:$0xff] }
 0x145   :  { %5192 = vmatpush1.bf16.msra.mxu0 %v7485_v59  ;;  %5195 = vmatprep.mubr.bf16.mxu0 %v6639_v21  ;;  %v7496_v59 = vld [vmem:[#allocation6 + $0x800] ss:$8 sps:$4 sm:$0xff]   ;;  %v4746_v17 = vor.u32 %v4745_v5, %v4742_v54  ;;  %v151_v11 = vsel %vm7683_vm11, 0, %v150_v4  ;;  %v4670_v21 = vld [vmem:[#allocation2 + $0xd8] sm:$0x11] }
 0x146   :  { %2236 = vmatmul.mubr.bf16.gmra.mrb[28].mxu1 %v6396_v16  ;;  %5193 = vmatprep.subr.bf16.mxu0 %v7493_v43  ;;  %v4738_v38 = vsel %vm7751_vm4, %v4733_v8, %v4737_v39  ;;  %v4756_v16 = vrot.slane %v4754_v48, 4  ;;  %152 = vst [vmem:[#allocation2 + $0x98] sm:$0x11] %v151_v11  ;;  %v4798_v26 = vrot.slane %v4796_v45, 4  ;;  %v4801_v36 = vrot.slane %v4799_v30, 5 }
 0x147   :  { %2659 = vmatpush1.bf16.msra.mxu1 %v7481_v1  ;;  %2662 = vmatprep.mubr.bf16.mxu1 %v6431_v23  ;;  %v4759_v1 = vrot.slane %v4757_v52, 5  ;;  %v6641_v12 = vcombine.high %v4724_v0, %v4738_v38  ;;  %v4747_v43 = vrot.slane %v4746_v17, 4  ;;  %v4774_v23 = vor.u32 %v8221_v53, %v8203_v50  ;;  %v8283_v52 = vld [vmem:[#allocation2 + $0xf0] sm:$0xff]  ;;  %v7522_v30 = vld [vmem:[#allocation6 + $0x864] ss:$8 sps:$4 sm:$0xff]  }
 0x148   :  { %2660 = vmatprep.subr.bf16.mxu1 %v7490_v19  ;;  %v4664_v19 = vld [vmem:[#allocation2 + $0x88] sm:$0x11]  ;;  %v4819_v54 = vshll.u32 %v4670_v21, 16  ;;  %v4802_v63 = vor.u32 %v4801_v36, %v4798_v26  ;;  %v4838_v4 = vshrl.u32 %v8283_v52, 16  ;;  %v6434_v17 = vcombine.low %v8227_v62, %v8244_v33 }
 0x149   :  { %5194 = vmatpush1.bf16.msra.mxu0 %v7491_v28  ;;  %v4760_v6 = vor.u32 %v4759_v1, %v4756_v16  ;;  %v6640_v28 = vcombine.low %v4724_v0, %v4738_v38  ;;  %v4752_v50 = vsel %vm7751_vm4, %v4747_v43, %v4751_v14  ;;  %v4777_v32 = vshll.u32 %v4664_v19, 16  ;;  %v4672_v43 = vld [vmem:[#allocation2 + $0xe8] sm:$0x11] }
 0x14a   :  { %5756 = vmatprep.subr.bf16.mxu0 %v7498_v46  ;;  %v4775_v29 = vrot.slane %v4774_v23, 4  ;;  %v4805_v0 = vshll.u32 %v4668_v35, 16  ;;  %v4827_v38 = vshll.u32 %v8281_v51, 16  ;;  %v6437_v14 = vcombine.high %v8246_v44, %v8155_v55  ;;  %v7520_v35 = vld [vmem:[#allocation6 + $0x860] ss:$8 sps:$4 sm:$0xff]  }
 0x14b   :  { %2661 = vmatpush1.bf16.msra.mxu1 %v7488_v25  ;;  %v4761_v41 = vrot.slane %v4760_v6, 4  ;;  %v6432_v25 = vcombine.low %v8208_v34, %v8225_v2  ;;  %v4813_v34 = vshll.u32 %v8267_v61, 16  ;;  %v6435_v2 = vcombine.high %v8227_v62, %v8244_v33 }
 0x14c   :  { %6799 = vmatprep.subr.bf16.mxu1 %v7498_v46  ;;  %5196 = vmatmul.mubr.bf16.vlgmr.msra.gmra.mrb[0].mxu0 %v6638_v47  ;;  %v4788_v46 = vor.u32 %v4787_v13, %v4784_v7  ;;  %v4779_v8 = vrot.slane %v4777_v32, 5  ;;  %v7512_v7 = vld [vmem:[#allocation6 + $0x840] ss:$8 sps:$4 sm:$0xff]   ;;  %v4807_v11 = vrot.slane %v4805_v0, 5  ;;  %v4821_v13 = vrot.slane %v4819_v54, 5 }
 0x14d   :  { %5757 = vmatpush1.bf16.msra.mxu0 %v7496_v59  ;;  %5205 = vmatprep.mubr.bf16.mxu0 %v6641_v12  ;;  %v4766_v53 = vsel %vm7751_vm4, %v4761_v41, %v4765_v15  ;;  %v4666_v37 = vld [vmem:[#allocation2 + $0x98] sm:$0x11]  ;;  %v4815_v47 = vrot.slane %v4813_v34, 5  ;;  %v4803_v15 = vrot.slane %v4802_v63, 4  ;;  %v4829_v33 = vrot.slane %v4827_v38, 5  ;;  %v8307_v34 = vld [vmem:[#allocation2 + $0xb0] sm:$0xff] }
 0x14e   :  { %2663 = vmatmul.mubr.bf16.vlgmr.msra.gmra.mrb[0].mxu1 %v6430_v40  ;;  %5758 = vmatprep.subr.bf16.mxu0 %v7501_v58  ;;  %v6643_v39 = vcombine.high %v4752_v50, %v4766_v53  ;;  %v4812_v40 = vrot.slane %v4810_v10, 4  ;;  %v4789_v20 = vrot.slane %v4788_v46, 4  ;;  %v4791_v48 = vshll.u32 %v4666_v37, 16  ;;  %v7525_v37 = vld [vmem:[#allocation6 + $0x874] ss:$8 sps:$4 sm:$0xff]  }
 0x14f   :  { %6815 = vmatpush1.bf16.msra.mxu1 %v7496_v59  ;;  %2672 = vmatprep.mubr.bf16.mxu1 %v6433_v22  ;;  %v7514_v59 = vld [vmem:[#allocation6 + $0x844] ss:$8 sps:$4 sm:$0xff]   ;;  %v6642_v16 = vcombine.low %v4752_v50, %v4766_v53  ;;  %v4841_v22 = vshll.u32 %v8283_v52, 16  ;;  %v4780_v12 = vsel %vm7751_vm4, %v4775_v29, %v4779_v8  ;;  %v4840_v23 = vrot.slane %v4838_v4, 4  ;;  %v4678_v54 = vld [vmem:[#allocation2 + $0x118] sm:$0x11] }
 0x150   :  { %6800 = vmatprep.subr.bf16.mxu1 %v7501_v58  ;;  %v4793_v5 = vrot.slane %v4791_v48, 5  ;;  %v4824_v58 = vshrl.u32 %v8281_v51, 16  ;;  %v4816_v1 = vor.u32 %v4815_v47, %v4812_v40  ;;  %v6436_v46 = vcombine.low %v8246_v44, %v8155_v55  ;;  %v7523_v40 = vld [vmem:[#allocation6 + $0x870] ss:$8 sps:$4 sm:$0xff]   ;;  %v7530_v38 = vld [vmem:[#allocation6 + $0x884] ss:$8 sps:$4 sm:$0xff]  }
 0x151   :  { %5759 = vmatpush1.bf16.msra.mxu0 %v7499_v9  ;;  %v4843_v45 = vrot.slane %v4841_v22, 5  ;;  %v8305_v50 = vsel %vm7751_vm4, %v4803_v15, %v4807_v11  ;;  %v4833_v32 = vshll.u32 %v4672_v43, 16  ;;  %v6439_v47 = vcombine.high %v8307_v34, %v8265_v57 }
 0x152   :  { %5760 = vmatprep.subr.bf16.mxu0 %v7506_v18  ;;  %v4794_v6 = vsel %vm7751_vm4, %v4789_v20, %v4793_v5  ;;  %v4826_v62 = vrot.slane %v4824_v58, 4  ;;  %v4817_v19 = vrot.slane %v4816_v1, 4  ;;  %v4880_v1 = vshrl.u32 %v8199_v24, 16 }
 0x153   :  { %6816 = vmatpush1.bf16.msra.mxu1 %v7499_v9  ;;  %v7517_v9 = vld [vmem:[#allocation6 + $0x854] ss:$8 sps:$4 sm:$0xff]   ;;  %v6645_v41 = vcombine.high %v4780_v12, %v4794_v6  ;;  %v6644_v29 = vcombine.low %v4780_v12, %v4794_v6  ;;  %v4844_v44 = vor.u32 %v4843_v45, %v4840_v23  ;;  %v4883_v4 = vshll.u32 %v8199_v24, 16  ;;  %v7528_v6 = vld [vmem:[#allocation6 + $0x880] ss:$8 sps:$4 sm:$0xff]  }
 0x154   :  { %6801 = vmatprep.subr.bf16.mxu1 %v7506_v18  ;;  %5206 = vmatmul.mubr.bf16.gmra.mrb[4].mxu0 %v6640_v28  ;;  %v4674_v18 = vld [vmem:[#allocation2 + $0xf8] sm:$0x11]  ;;  %v8297_v28 = vld [vmem:[#allocation2 + $0x100] sm:$0xff]  ;;  %v4830_v53 = vor.u32 %v4829_v33, %v4826_v62  ;;  %v4822_v55 = vsel %vm7751_vm4, %v4817_v19, %v4821_v13  ;;  %v4894_v22 = vshrl.u32 %v8217_v42, 16  ;;  %v4875_v12 = vshll.u32 %v4678_v54, 16 }
 0x155   :  { %5761 = vmatpush1.bf16.msra.mxu0 %v7504_v31  ;;  %5215 = vmatprep.mubr.bf16.mxu0 %v6643_v39  ;;  %v4847_v10 = vshll.u32 %v4674_v18, 16  ;;  %v4855_v21 = vshll.u32 %v8297_v28, 16  ;;  %v6647_v8 = vcombine.high %v8305_v50, %v4822_v55  ;;  %v4845_v49 = vrot.slane %v4844_v44, 4  ;;  %v7531_v62 = vld [vmem:[#allocation6 + $0x890] ss:$8 sps:$4 sm:$0xff]  }
 0x156   :  { %2673 = vmatmul.mubr.bf16.gmra.mrb[4].mxu1 %v6432_v25  ;;  %5762 = vmatprep.subr.bf16.mxu0 %v7509_v60  ;;  %v7515_v25 = vld [vmem:[#allocation6 + $0x850] ss:$8 sps:$4 sm:$0xff]   ;;  %v4831_v20 = vrot.slane %v4830_v53, 4  ;;  %v4897_v43 = vshll.u32 %v8217_v42, 16  ;;  %v6441_v15 = vcombine.high %v8267_v61, %v8281_v51  ;;  %v4882_v18 = vrot.slane %v4880_v1, 4 }
 0x157   :  { %6817 = vmatpush1.bf16.msra.mxu1 %v7504_v31  ;;  %2682 = vmatprep.mubr.bf16.mxu1 %v6435_v2  ;;  %v8301_v31 = vld [vmem:[#allocation2 + $0x110] sm:$0xff]  ;;  %v4852_v2 = vshrl.u32 %v8297_v28, 16  ;;  %v4849_v48 = vrot.slane %v4847_v10, 5  ;;  %v4857_v5 = vrot.slane %v4855_v21, 5  ;;  %v4885_v19 = vrot.slane %v4883_v4, 5 }
 0x158   :  { %6802 = vmatprep.subr.bf16.mxu1 %v7509_v60  ;;  %v180_v60 = vld [vmem:[#allocation2 + $0x138] sm:$0x11]  ;;  %v4866_v26 = vshrl.u32 %v8301_v31, 16  ;;  %v4869_v36 = vshll.u32 %v8301_v31, 16  ;;  %v4896_v23 = vrot.slane %v4894_v22, 4 }
 0x159   :  { %5763 = vmatpush1.bf16.msra.mxu0 %v7507_v3  ;;  %v181_v39 = vsel %vm7683_vm11, 0, %v180_v60  ;;  %v4854_v0 = vrot.slane %v4852_v2, 4  ;;  %v4850_v11 = vsel %vm7751_vm4, %v4845_v49, %v4849_v48  ;;  %v4680_v42 = vld [vmem:[#allocation2 + $0x128] sm:$0x11]  ;;  %v4886_v60 = vor.u32 %v4885_v19, %v4882_v18  ;;  %v7541_v21 = vld [vmem:[#allocation6 + $0x8b4] ss:$8 sps:$4 sm:$0xff]  }
 0x15a   :  { %5764 = vmatprep.subr.bf16.mxu0 %v7514_v59  ;;  %182 = vst [vmem:[#allocation2 + $0x138] sm:$0x11] %v181_v39  ;;  %v4868_v63 = vrot.slane %v4866_v26, 4  ;;  %v4871_v58 = vrot.slane %v4869_v36, 5  ;;  %v5372_v36 = vld [vmem:[#allocation2 + $0x20] sm:$0xee] }
 0x15b   :  { %6818 = vmatpush1.bf16.msra.mxu1 %v7507_v3  ;;  %v4835_v3 = vrot.slane %v4833_v32, 5  ;;  %v6440_v32 = vcombine.low %v8267_v61, %v8281_v51  ;;  %v6443_v61 = vcombine.high %v8283_v52, %v8297_v28  ;;  %v7539_v51 = vld [vmem:[#allocation6 + $0x8b0] ss:$8 sps:$4 sm:$0xff]   ;;  %v4887_v39 = vrot.slane %v4886_v60, 4  ;;  %v7544_v49 = vld [vmem:[#allocation6 + $0x8c0] ss:$8 sps:$4 sm:$0xff]  }
 0x15c   :  { %6803 = vmatprep.subr.bf16.mxu1 %v7514_v59  ;;  %5216 = vmatmul.mubr.bf16.gmra.mrb[8].mxu0 %v6642_v16  ;;  %v4676_v59 = vld [vmem:[#allocation2 + $0x108] sm:$0x11]  ;;  %v6438_v16 = vcombine.low %v8307_v34, %v8265_v57  ;;  %v4858_v57 = vor.u32 %v4857_v5, %v4854_v0  ;;  %v4872_v13 = vor.u32 %v4871_v58, %v4868_v63  ;;  %v5375_v48 = vld [vmem:[#allocation2 + $0x38] sm:$0x11]  ;;  %v6686_v54 = vrot.slane %v5372_v36, 9 }
 0x15d   :  { %5765 = vmatpush1.bf16.msra.mxu0 %v7512_v7  ;;  %5225 = vmatprep.mubr.bf16.mxu0 %v6645_v41  ;;  %v7536_v34 = vld [vmem:[#allocation6 + $0x8a0] ss:$8 sps:$4 sm:$0xff]   ;;  %v7549_v63 = vld [vmem:[#allocation6 + $0x8d4] ss:$8 sps:$4 sm:$0xff]   ;;  %v5442_v1 = vrot.slane %v5375_v48, 5 }
 0x15e   :  { %2683 = vmatmul.mubr.bf16.gmra.mrb[8].mxu1 %v6434_v17  ;;  %5766 = vmatprep.subr.bf16.mxu0 %v7517_v9  ;;  %v6646_v17 = vcombine.low %v8305_v50, %v4822_v55  ;;  %v4859_v45 = vrot.slane %v4858_v57, 4  ;;  %v7538_v50 = vld [vmem:[#allocation6 + $0x8a4] ss:$8 sps:$4 sm:$0xff]   ;;  %v5378_v18 = vld [vmem:[#allocation2 + $0x50] sm:$0xee] }
 0x15f   :  { %6819 = vmatpush1.bf16.msra.mxu1 %v7512_v7  ;;  %2692 = vmatprep.mubr.bf16.mxu1 %v6437_v14  ;;  %v4836_v7 = vsel %vm7751_vm4, %v4831_v20, %v4835_v3  ;;  %v7533_v14 = vld [vmem:[#allocation6 + $0x894] ss:$8 sps:$4 sm:$0xff]   ;;  %v5373_v3 = vld [vmem:[#allocation2 + $0x28] sm:$0x11]  ;;  %v5388_v4 = vld [vmem:[#allocation2 + $0xc0] sm:$0xee] }
 0x160   :  { %6804 = vmatprep.subr.bf16.mxu1 %v7517_v9  ;;  %v4861_v9 = vshll.u32 %v4676_v59, 16  ;;  %v6649_v33 = vcombine.high %v4836_v7, %v4850_v11  ;;  %v6648_v10 = vcombine.low %v4836_v7, %v4850_v11  ;;  %v5374_v20 = vld [vmem:[#allocation2 + $0x30] sm:$0xee]  ;;  %v6442_v59 = vcombine.low %v8283_v52, %v8297_v28  ;;  %v5389_v22 = vld [vmem:[#allocation2 + $0xc8] sm:$0x11] }
 0x161   :  { %5767 = vmatpush1.bf16.msra.mxu0 %v7515_v25  ;;  %v4682_v53 = vld [vmem:[#allocation2 + $0x138] sm:$0x11]  ;;  %v5438_v5 = vrot.slane %v5373_v3, 5  ;;  %v6445_v28 = vcombine.high %v8301_v31, %v8199_v24  ;;  %v5470_v27 = vrot.slane %v5389_v22, 5  ;;  %v7554_v57 = vld [vmem:[#allocation6 + $0x8e4] ss:$8 sps:$4 sm:$0xff]  }
 0x162   :  { %5768 = vmatprep.subr.bf16.mxu0 %v7522_v30  ;;  %v4863_v41 = vrot.slane %v4861_v9, 5  ;;  %v5391_v52 = vld [vmem:[#allocation2 + $0xd8] sm:$0x11]  ;;  %v5393_v19 = vld [vmem:[#allocation2 + $0xe8] sm:$0x11]  ;;  %v6689_v60 = vrot.slane %v5378_v18, 9 }
 0x163   :  { %6820 = vmatpush1.bf16.msra.mxu1 %v7515_v25  ;;  %v4873_v25 = vrot.slane %v4872_v13, 4  ;;  %v7547_v9 = vld [vmem:[#allocation6 + $0x8d0] ss:$8 sps:$4 sm:$0xff]   ;;  %v5474_v11 = vrot.slane %v5391_v52, 5  ;;  %v8351_v13 = vsel %vm7949_vm7, %v6686_v54, %v5438_v5  ;;  %v5397_v3 = vld [vmem:[#allocation2 + $0x108] sm:$0x11] }
 0x164   :  { %6805 = vmatprep.subr.bf16.mxu1 %v7522_v30  ;;  %5226 = vmatmul.mubr.bf16.gmra.mrb[12].mxu0 %v6644_v29  ;;  %v4899_v30 = vrot.slane %v4897_v43, 5  ;;  %v4889_v29 = vshll.u32 %v4680_v42, 16  ;;  %v4864_v55 = vsel %vm7751_vm4, %v4859_v45, %v4863_v41  ;;  %v5395_v45 = vld [vmem:[#allocation2 + $0xf8] sm:$0x11]  ;;  %v5385_v52 = vld [vmem:[#allocation2 + $0x88] sm:$0x11] }
 0x165   :  { %5769 = vmatpush1.bf16.msra.mxu0 %v7520_v35  ;;  %5235 = vmatprep.mubr.bf16.mxu0 %v6647_v8  ;;  %v7546_v8 = vld [vmem:[#allocation6 + $0x8c4] ss:$8 sps:$4 sm:$0xff]  }
 0x166   :  { %2693 = vmatmul.mubr.bf16.gmra.mrb[12].mxu1 %v6436_v46  ;;  %5770 = vmatprep.subr.bf16.mxu0 %v7525_v37  ;;  %v4877_v46 = vrot.slane %v4875_v12, 5  ;;  %v4900_v2 = vor.u32 %v4899_v30, %v4896_v23  ;;  %v6694_v12 = vrot.slane %v5388_v4, 9  ;;  %v5394_v23 = vld [vmem:[#allocation2 + $0xf0] sm:$0xee] }
 0x167   :  { %6821 = vmatpush1.bf16.msra.mxu1 %v7520_v35  ;;  %2702 = vmatprep.mubr.bf16.mxu1 %v6439_v47  ;;  %v4903_v35 = vshll.u32 %v4682_v53, 16  ;;  %v7557_v53 = vld [vmem:[#allocation6 + $0x8f4] ss:$8 sps:$4 sm:$0xff]  }
 0x168   :  { %6806 = vmatprep.subr.bf16.mxu1 %v7525_v37  ;;  %v4878_v44 = vsel %vm7751_vm4, %v4873_v25, %v4877_v46  ;;  %v4891_v37 = vrot.slane %v4889_v29, 5  ;;  %v6444_v25 = vcombine.low %v8301_v31, %v8199_v24  ;;  %v7552_v46 = vld [vmem:[#allocation6 + $0x8e0] ss:$8 sps:$4 sm:$0xff]   ;;  %v5471_v30 = vsel %vm7949_vm7, %v6694_v12, %v5470_v27  ;;  %v5387_v12 = vld [vmem:[#allocation2 + $0x98] sm:$0x11] }
 0x169   :  { %5771 = vmatpush1.bf16.msra.mxu0 %v7523_v40  ;;  %v6651_v26 = vcombine.high %v4864_v55, %v4878_v44  ;;  %v4905_v47 = vrot.slane %v4903_v35, 5  ;;  %v6650_v0 = vcombine.low %v4864_v55, %v4878_v44  ;;  %v5478_v24 = vrot.slane %v5393_v19, 5  ;;  %v5400_v27 = vld [vmem:[#allocation2 + $0x120] sm:$0xee] }
 0x16a   :  { %5772 = vmatprep.subr.bf16.mxu0 %v7530_v38  ;;  %v4892_v58 = vsel %vm7751_vm4, %v4887_v39, %v4891_v37  ;;  %v6697_v31 = vrot.slane %v5394_v23, 9  ;;  %v5482_v55 = vrot.slane %v5395_v45, 5  ;;  %v5382_v39 = vld [vmem:[#allocation2 + $0x70] sm:$0xee]  ;;  %v5383_v37 = vld [vmem:[#allocation2 + $0x78] sm:$0x11] }
 0x16b   :  { %6822 = vmatpush1.bf16.msra.mxu1 %v7523_v40  ;;  %v4901_v40 = vrot.slane %v4900_v2, 4  ;;  %v7555_v2 = vld [vmem:[#allocation6 + $0x8f0] ss:$8 sps:$4 sm:$0xff]   ;;  %v6691_v5 = vrot.slane %v5382_v39, 9  ;;  %v6700_v19 = vrot.slane %v5400_v27, 9 }
 0x16c   :  { %6807 = vmatprep.subr.bf16.mxu1 %v7530_v38  ;;  %5236 = vmatmul.mubr.bf16.gmra.mrb[16].mxu0 %v6646_v17  ;;  %v5390_v17 = vld [vmem:[#allocation2 + $0xd0] sm:$0xee]  ;;  %v5483_v36 = vsel %vm7949_vm7, %v6697_v31, %v5482_v55 }
 0x16d   :  { %5773 = vmatpush1.bf16.msra.mxu0 %v7528_v6  ;;  %5245 = vmatprep.mubr.bf16.mxu0 %v6649_v33  ;;  %v4906_v38 = vsel %vm7751_vm4, %v4901_v40, %v4905_v47  ;;  %v5392_v33 = vld [vmem:[#allocation2 + $0xe0] sm:$0xee] }
 0x16e   :  { %2703 = vmatmul.mubr.bf16.gmra.mrb[16].mxu1 %v6438_v16  ;;  %5774 = vmatprep.subr.bf16.mxu0 %v7533_v14  ;;  %v6687_v16 = vrot.slane %v5374_v20, 9  ;;  %v6653_v7 = vcombine.high %v4892_v58, %v4906_v38  ;;  %v6652_v41 = vcombine.low %v4892_v58, %v4906_v38  ;;  %v5396_v40 = vld [vmem:[#allocation2 + $0x100] sm:$0xee]  ;;  %v5399_v20 = vld [vmem:[#allocation2 + $0x118] sm:$0x11]  ;;  %v5486_v38 = vrot.slane %v5397_v3, 5 }
 0x16f   :  { %6823 = vmatpush1.bf16.msra.mxu1 %v7528_v6  ;;  %2712 = vmatprep.mubr.bf16.mxu1 %v6441_v15  ;;  %v6695_v6 = vrot.slane %v5390_v17, 9  ;;  %v5377_v15 = vld [vmem:[#allocation2 + $0x48] sm:$0x11]  ;;  %v6698_v58 = vrot.slane %v5396_v40, 9  ;;  %v5384_v17 = vld [vmem:[#allocation2 + $0x80] sm:$0xee] }
 0x170   :  { %6808 = vmatprep.subr.bf16.mxu1 %v7533_v14  ;;  %v8355_v43 = vsel %vm7949_vm7, %v6687_v16, %v5442_v1  ;;  %v5376_v14 = vld [vmem:[#allocation2 + $0x40] sm:$0xee]  ;;  %v5490_v1 = vrot.slane %v5399_v20, 5 }
 0x171   :  { %5775 = vmatpush1.bf16.msra.mxu0 %v7531_v62  ;;  %v6703_v42 = vcombine.high %v8351_v13, %v8355_v43  ;;  %v6702_v47 = vcombine.low %v8351_v13, %v8355_v43  ;;  %v5403_v13 = vld [vmem:[#allocation2 + $0x138] sm:$0x11] }
 0x172   :  { %5776 = vmatprep.subr.bf16.mxu0 %v7538_v50 }
 0x173   :  { %6824 = vmatpush1.bf16.msra.mxu1 %v7531_v62  ;;  %v5379_v62 = vld [vmem:[#allocation2 + $0x58] sm:$0x11] }
 0x174   :  { %6809 = vmatprep.subr.bf16.mxu1 %v7538_v50  ;;  %5246 = vmatmul.mubr.bf16.gmra.mrb[20].mxu0 %v6648_v10  ;;  %v5475_v50 = vsel %vm7949_vm7, %v6695_v6, %v5474_v11  ;;  %v5446_v10 = vrot.slane %v5377_v15, 5  ;;  %v5450_v29 = vrot.slane %v5379_v62, 5  ;;  %v5401_v11 = vld [vmem:[#allocation2 + $0x128] sm:$0x11]  ;;  %v6692_v15 = vrot.slane %v5384_v17, 9 }
 0x175   :  { %5777 = vmatpush1.bf16.msra.mxu0 %v7536_v34  ;;  %5255 = vmatprep.mubr.bf16.mxu0 %v6651_v26  ;;  %v6711_v44 = vcombine.high %v5471_v30, %v5475_v50  ;;  %v6710_v48 = vcombine.low %v5471_v30, %v5475_v50  ;;  %v5462_v62 = vrot.slane %v5385_v52, 5  ;;  %v5494_v23 = vrot.slane %v5401_v11, 5 }
 0x176   :  { %2713 = vmatmul.mubr.bf16.gmra.mrb[20].mxu1 %v6440_v32  ;;  %5778 = vmatprep.subr.bf16.mxu0 %v7541_v21  ;;  %v6688_v32 = vrot.slane %v5376_v14, 9 }
 0x177   :  { %6825 = vmatpush1.bf16.msra.mxu1 %v7536_v34  ;;  %2722 = vmatprep.mubr.bf16.mxu1 %v6443_v61  ;;  %v6696_v34 = vrot.slane %v5392_v33, 9  ;;  %v5380_v61 = vld [vmem:[#allocation2 + $0x60] sm:$0xee]  ;;  %v5495_v30 = vsel %vm7949_vm7, %v6700_v19, %v5494_v23 }
 0x178   :  { %6810 = vmatprep.subr.bf16.mxu1 %v7541_v21  ;;  %v5447_v35 = vsel %vm7949_vm7, %v6688_v32, %v5446_v10  ;;  %v5451_v21 = vsel %vm7949_vm7, %v6689_v60, %v5450_v29 }
 0x179   :  { %5779 = vmatpush1.bf16.msra.mxu0 %v7539_v51  ;;  %v5479_v26 = vsel %vm7949_vm7, %v6696_v34, %v5478_v24  ;;  %v6704_v6 = vcombine.low %v5447_v35, %v5451_v21 }
 0x17a   :  { %5780 = vmatprep.subr.bf16.mxu0 %v7546_v8  ;;  %v6712_v43 = vcombine.low %v5479_v26, %v5483_v36 }
 0x17b   :  { %6826 = vmatpush1.bf16.msra.mxu1 %v7539_v51  ;;  %v5381_v51 = vld [vmem:[#allocation2 + $0x68] sm:$0x11] }
 0x17c   :  { %6811 = vmatprep.subr.bf16.mxu1 %v7546_v8  ;;  %5256 = vmatmul.mubr.bf16.gmra.mrb[24].mxu0 %v6650_v0  ;;  %v5398_v8 = vld [vmem:[#allocation2 + $0x110] sm:$0xee]  ;;  %v6690_v0 = vrot.slane %v5380_v61, 9  ;;  %v5454_v54 = vrot.slane %v5381_v51, 5 }
 0x17d   :  { %5781 = vmatpush1.bf16.msra.mxu0 %v7544_v49  ;;  %5265 = vmatprep.mubr.bf16.mxu0 %v6653_v7  ;;  %v6699_v16 = vrot.slane %v5398_v8, 9 }
 0x17e   :  { %2723 = vmatmul.mubr.bf16.gmra.mrb[24].mxu1 %v6442_v59  ;;  %5782 = vmatprep.subr.bf16.mxu0 %v7549_v63  ;;  %v6705_v59 = vcombine.high %v5447_v35, %v5451_v21  ;;  %v5455_v4 = vsel %vm7949_vm7, %v6690_v0, %v5454_v54 }
 0x17f   :  { %6827 = vmatpush1.bf16.msra.mxu1 %v7544_v49  ;;  %2732 = vmatprep.mubr.bf16.mxu1 %v6445_v28  ;;  %v6713_v49 = vcombine.high %v5479_v26, %v5483_v36  ;;  %v5487_v28 = vsel %vm7949_vm7, %v6698_v58, %v5486_v38  ;;  %v5491_v7 = vsel %vm7949_vm7, %v6699_v16, %v5490_v1 }
 0x180   :  { %6812 = vmatprep.subr.bf16.mxu1 %v7549_v63  ;;  %v5458_v63 = vrot.slane %v5383_v37, 5  ;;  %v6715_v18 = vcombine.high %v5487_v28, %v5491_v7  ;;  %v6714_v32 = vcombine.low %v5487_v28, %v5491_v7 }
 0x181   :  { %5783 = vmatpush1.bf16.msra.mxu0 %v7547_v9 }
 0x182   :  { %5784 = vmatprep.subr.bf16.mxu0 %v7554_v57  ;;  %v5459_v22 = vsel %vm7949_vm7, %v6691_v5, %v5458_v63 }
 0x183   :  { %6828 = vmatpush1.bf16.msra.mxu1 %v7547_v9  ;;  %v5386_v9 = vld [vmem:[#allocation2 + $0x90] sm:$0xee]  ;;  %v6707_v14 = vcombine.high %v5455_v4, %v5459_v22 }
 0x184   :  { %6813 = vmatprep.subr.bf16.mxu1 %v7554_v57  ;;  %5266 = vmatmul.mubr.bf16.gmra.mrb[28].mxu0 %v6652_v41  ;;  %v5402_v57 = vld [vmem:[#allocation2 + $0x130] sm:$0xee]  ;;  %v6693_v33 = vrot.slane %v5386_v9, 9  ;;  %v5466_v41 = vrot.slane %v5387_v12, 5 }
 0x185   :  { %5785 = vmatpush1.bf16.msra.mxu0 %v7552_v46  ;;  %5788 = vmatprep.mubr.bf16.mxu0 %v6703_v42  ;;  %v6701_v45 = vrot.slane %v5402_v57, 9 }
 0x186   :  { %2733 = vmatmul.mubr.bf16.gmra.mrb[28].mxu1 %v6444_v25  ;;  %5786 = vmatprep.subr.bf16.mxu0 %v7557_v53  ;;  %v5498_v25 = vrot.slane %v5403_v13, 5  ;;  %v5467_v42 = vsel %vm7949_vm7, %v6693_v33, %v5466_v41 }
 0x187   :  { %6829 = vmatpush1.bf16.msra.mxu1 %v7552_v46  ;;  %5828 = vmatprep.mubr.bf16.mxu1 %v6711_v44  ;;  %v5463_v46 = vsel %vm7949_vm7, %v6692_v15, %v5462_v62 }
 0x188   :  { %6814 = vmatprep.subr.bf16.mxu1 %v7557_v53  ;;  %v5499_v50 = vsel %vm7949_vm7, %v6701_v45, %v5498_v25  ;;  %v6706_v53 = vcombine.low %v5455_v4, %v5459_v22  ;;  %v6709_v10 = vcombine.high %v5463_v46, %v5467_v42  ;;  %v6708_v29 = vcombine.low %v5463_v46, %v5467_v42 }
 0x189   :  { %5787 = vmatpush1.bf16.msra.mxu0 %v7555_v2  ;;  %v6717_v60 = vcombine.high %v5495_v30, %v5499_v50  ;;  %v6716_v34 = vcombine.low %v5495_v30, %v5499_v50 }
 0x18b   :  { %6830 = vmatpush1.bf16.msra.mxu1 %v7555_v2 }
 0x18c   :  { %5789 = vmatmul.mubr.bf16.vlgmr.msra.gmra.mrb[0].mxu0 %v6702_v47 }
 0x18d   :  { %5798 = vmatprep.mubr.bf16.mxu0 %v6705_v59 }
 0x18e   :  { %5829 = vmatmul.mubr.bf16.vlgmr.msra.gmra.mrb[32].mxu1 %v6710_v48 }
 0x18f   :  { %5838 = vmatprep.mubr.bf16.mxu1 %v6713_v49 }
 0x194   :  { %5799 = vmatmul.mubr.bf16.gmra.mrb[4].mxu0 %v6704_v6 }
 0x195   :  { %5808 = vmatprep.mubr.bf16.mxu0 %v6707_v14 }
 0x196   :  { %5839 = vmatmul.mubr.bf16.gmra.mrb[36].mxu1 %v6712_v43 }
 0x197   :  { %5848 = vmatprep.mubr.bf16.mxu1 %v6715_v18 }
 0x19c   :  { %5809 = vmatmul.mubr.bf16.gmra.mrb[8].mxu0 %v6706_v53 }
 0x19d   :  { %5818 = vmatprep.mubr.bf16.mxu0 %v6709_v10 }
 0x19e   :  { %5849 = vmatmul.mubr.bf16.gmra.mrb[40].mxu1 %v6714_v32 }
 0x19f   :  { %5858 = vmatprep.mubr.bf16.mxu1 %v6717_v60 }
 0x1a4   :  { %5819 = vmatmul.mubr.bf16.gmra.mrb[12].mxu0 %v6708_v29 }
 0x1a6   :  { %5859 = vmatmul.mubr.bf16.gmra.mrb[44].mxu1 %v6716_v34 }
 0x221   :  { %v8391_v24 = vpop.f32.mrb[0].mxu1 }
 0x222   :  { %v8393_v31 = vpop.f32.mrb[1].mxu1 }
 0x223   :  { %v8395_v55 = vpop.f32.mrb[2].mxu1 }
 0x224   :  { %v8397_v56 = vpop.f32.mrb[3].mxu1 }
 0x229   :  { %v8399_v44 = vpop.f32.mrb[4].mxu1 }
 0x22a   :  { %v8401_v2 = vpop.f32.mrb[5].mxu1 }
 0x22b   :  { %v8403_v35 = vpop.f32.mrb[6].mxu1 }
 0x22c   :  { %v8405_v21 = vpop.f32.mrb[7].mxu1 }
 0x231   :  { %v8407_v61 = vpop.f32.mrb[8].mxu1 }
 0x232   :  { %v8409_v51 = vpop.f32.mrb[9].mxu1 }
 0x233   :  { %v8411_v26 = vpop.f32.mrb[10].mxu1 }
 0x234   :  { %v8413_v36 = vpop.f32.mrb[11].mxu1 }
 0x239   :  { %v8415_v39 = vpop.f32.mrb[12].mxu1 }
 0x23a   :  { %v8417_v37 = vpop.f32.mrb[13].mxu1 }
 0x23b   :  { %v8419_v40 = vpop.f32.mrb[14].mxu1 }
 0x23c   :  { %v8421_v47 = vpop.f32.mrb[15].mxu1 }
 0x23f   :  { %v5237_v3 = vpop.f32.mrb[16].mxu0 }
 0x240   :  { %v5239_v20 = vpop.f32.mrb[17].mxu0 }
 0x241   :  { %v2704_v8 = vpop.f32.mrb[16].mxu1  ;;  %v5241_v0 = vpop.f32.mrb[18].mxu0 }
 0x242   :  { %v6847_v48 = vadd.f32 %v5237_v3, %v2704_v8  ;;  %v2706_v59 = vpop.f32.mrb[17].mxu1  ;;  %v5243_v5 = vpop.f32.mrb[19].mxu0 }
 0x243   :  { %v6849_v49 = vadd.f32 %v5239_v20, %v2706_v59  ;;  %v2708_v54 = vpop.f32.mrb[18].mxu1 }
 0x244   :  { %v6851_v63 = vadd.f32 %v5241_v0, %v2708_v54  ;;  %v2710_v58 = vpop.f32.mrb[19].mxu1 }
 0x245   :  { %v6853_v38 = vadd.f32 %v5243_v5, %v2710_v58 }
 0x247   :  { %v5247_v16 = vpop.f32.mrb[20].mxu0 }
 0x248   :  { %v5249_v4 = vpop.f32.mrb[21].mxu0 }
 0x249   :  { %v2714_v1 = vpop.f32.mrb[20].mxu1  ;;  %v5251_v52 = vpop.f32.mrb[22].mxu0 }
 0x24a   :  { %v8423_v22 = vadd.f32 %v5247_v16, %v2714_v1  ;;  %v2716_v17 = vpop.f32.mrb[21].mxu1  ;;  %v5253_v9 = vpop.f32.mrb[23].mxu0 }
 0x24b   :  { %v8425_v28 = vadd.f32 %v5249_v4, %v2716_v17  ;;  %v2718_v7 = vpop.f32.mrb[22].mxu1 }
 0x24c   :  { %v8427_v12 = vadd.f32 %v5251_v52, %v2718_v7  ;;  %v2720_v27 = vpop.f32.mrb[23].mxu1 }
 0x24d   :  { %v8429_v6 = vadd.f32 %v5253_v9, %v2720_v27 }
 0x24f   :  { %v5257_v11 = vpop.f32.mrb[24].mxu0 }
 0x250   :  { %v5259_v13 = vpop.f32.mrb[25].mxu0 }
 0x251   :  { %v2724_v57 = vpop.f32.mrb[24].mxu1  ;;  %v5261_v15 = vpop.f32.mrb[26].mxu0 }
 0x252   :  { %v8431_v43 = vadd.f32 %v5257_v11, %v2724_v57  ;;  %v2726_v14 = vpop.f32.mrb[25].mxu1  ;;  %v5263_v33 = vpop.f32.mrb[27].mxu0 }
 0x253   :  { %v8433_v18 = vadd.f32 %v5259_v13, %v2726_v14  ;;  %v2728_v62 = vpop.f32.mrb[26].mxu1 }
 0x254   :  { %v8435_v41 = vadd.f32 %v5261_v15, %v2728_v62  ;;  %v2730_v19 = vpop.f32.mrb[27].mxu1 }
 0x255   :  { %v8437_v23 = vadd.f32 %v5263_v33, %v2730_v19 }
 0x257   :  { %v5267_v45 = vpop.f32.mrb[28].mxu0 }
 0x258   :  { %v5269_v46 = vpop.f32.mrb[29].mxu0 }
 0x259   :  { %v2734_v25 = vpop.f32.mrb[28].mxu1  ;;  %v5271_v50 = vpop.f32.mrb[30].mxu0 }
 0x25a   :  { %v8439_v42 = vadd.f32 %v5267_v45, %v2734_v25  ;;  %v2736_v30 = vpop.f32.mrb[29].mxu1  ;;  %v5273_v10 = vpop.f32.mrb[31].mxu0 }
 0x25b   :  { %v8441_v53 = vadd.f32 %v5269_v46, %v2736_v30  ;;  %v2738_v32 = vpop.f32.mrb[30].mxu1 }
 0x25c   :  { %v8443_v60 = vadd.f32 %v5271_v50, %v2738_v32  ;;  %v2740_v29 = vpop.f32.mrb[31].mxu1 }
 0x25d   :  { %v8445_v34 = vadd.f32 %v5273_v10, %v2740_v29 }
 0x25f   :  { %v5790_v3 = vpop.f32.mrb[0].mxu0 }
 0x260   :  { %v6831_v8 = vadd.f32 %v5790_v3, %v8391_v24  ;;  %v5792_v59 = vpop.f32.mrb[1].mxu0 }
 0x261   :  { %v5830_v20 = vpop.f32.mrb[32].mxu1  ;;  %v6832_v54 = vadd.f32 %v5792_v59, %v8393_v31  ;;  %v5794_v58 = vpop.f32.mrb[2].mxu0 }
 0x262   :  { %v8448_v0 = vadd.f32 %v6847_v48, %v5830_v20  ;;  %v5832_v5 = vpop.f32.mrb[33].mxu1  ;;  %v6833_v1 = vadd.f32 %v5794_v58, %v8395_v55  ;;  %v5796_v17 = vpop.f32.mrb[3].mxu0  ;;  %v6153_v27 = vmul.f32 %v6831_v8, %v6831_v8 }
 0x263   :  { %v8451_v16 = vadd.f32 %v6849_v49, %v5832_v5  ;;  %v5834_v4 = vpop.f32.mrb[34].mxu1  ;;  %v6783_v52 = vpack.c.bf16 %v6832_v54, %v6831_v8  ;;  %v6834_v31 = vadd.f32 %v5796_v17, %v8397_v56  ;;  %v6154_v55 = vmul.f32 %v6832_v54, %v6832_v54 }
 0x264   :  { %v8454_v7 = vadd.f32 %v6851_v63, %v5834_v4  ;;  %v5836_v9 = vpop.f32.mrb[35].mxu1  ;;  %v6109_v48 = vadd.f32 %v6833_v1, %v6831_v8  ;;  %v6155_v11 = vmul.f32 %v6833_v1, %v6833_v1 }
 0x265   :  { %v6791_v24 = vpack.c.bf16 %v8451_v16, %v8448_v0  ;;  %6093 = vst [vmem:[%s8614_s2] sm:$0xff] %v6783_v52  ;;  %v8462_v49 = vadd.f32 %v6853_v38, %v5836_v9  ;;  %v6784_v57 = vpack.c.bf16 %v6834_v31, %v6833_v1  ;;  %v6130_v13 = vadd.f32 %v6834_v31, %v6832_v54 }
 0x266   :  { %v6185_v63 = vadd.f32 %v6155_v11, %v6153_v27  ;;  %v6156_v14 = vmul.f32 %v6834_v31, %v6834_v31 }
 0x267   :  { %6101 = vst [vmem:[%s8614_s2 + $0x40] sm:$0xff] %v6791_v24  ;;  %v6792_v15 = vpack.c.bf16 %v8462_v49, %v8454_v7  ;;  %v5800_v62 = vpop.f32.mrb[4].mxu0  ;;  %6094 = vst [vmem:[%s8614_s2 + $0x8] sm:$0xff] %v6784_v57 }
 0x268   :  { %v6835_v33 = vadd.f32 %v5800_v62, %v8399_v44  ;;  %v5802_v45 = vpop.f32.mrb[5].mxu0  ;;  %v6206_v56 = vadd.f32 %v6156_v14, %v6154_v55 }
 0x269   :  { %v5840_v19 = vpop.f32.mrb[36].mxu1  ;;  %6102 = vst [vmem:[%s8614_s2 + $0x48] sm:$0xff] %v6792_v15  ;;  %v6836_v25 = vadd.f32 %v5802_v45, %v8401_v2  ;;  %v5804_v30 = vpop.f32.mrb[6].mxu0 }
 0x26a   :  { %v8477_v38 = vadd.f32 %v8423_v22, %v5840_v19  ;;  %v5842_v46 = vpop.f32.mrb[37].mxu1  ;;  %v6110_v50 = vadd.f32 %v6835_v33, %v6109_v48  ;;  %v6157_v44 = vmul.f32 %v6835_v33, %v6835_v33  ;;  %v6837_v10 = vadd.f32 %v5804_v30, %v8403_v35  ;;  %v5806_v3 = vpop.f32.mrb[7].mxu0 }
 0x26b   :  { %v8481_v32 = vadd.f32 %v8425_v28, %v5842_v46  ;;  %v5844_v29 = vpop.f32.mrb[38].mxu1  ;;  %v6785_v8 = vpack.c.bf16 %v6836_v25, %v6835_v33  ;;  %v6131_v20 = vadd.f32 %v6836_v25, %v6130_v13  ;;  %v6158_v59 = vmul.f32 %v6836_v25, %v6836_v25 }
 0x26c   :  { %v5846_v54 = vpop.f32.mrb[39].mxu1  ;;  %v6186_v5 = vadd.f32 %v6185_v63, %v6157_v44  ;;  %v6111_v2 = vadd.f32 %v6837_v10, %v6110_v50  ;;  %v6159_v28 = vmul.f32 %v6837_v10, %v6837_v10  ;;  %v8490_v1 = vadd.f32 %v8427_v12, %v5844_v29 }
 0x26d   :  { %v6793_v22 = vpack.c.bf16 %v8481_v32, %v8477_v38  ;;  %6095 = vst [vmem:[%s8614_s2 + $0x10] sm:$0xff] %v6785_v8  ;;  %v6207_v58 = vadd.f32 %v6206_v56, %v6158_v59  ;;  %v6838_v35 = vadd.f32 %v5806_v3, %v8405_v21  ;;  %v8497_v4 = vadd.f32 %v8429_v6, %v5846_v54 }
 0x26e   :  { %v6187_v17 = vadd.f32 %v6186_v5, %v6159_v28 }
 0x26f   :  { %6103 = vst [vmem:[%s8614_s2 + $0x50] sm:$0xff] %v6793_v22  ;;  %v6786_v52 = vpack.c.bf16 %v6838_v35, %v6837_v10  ;;  %v6132_v9 = vadd.f32 %v6838_v35, %v6131_v20  ;;  %v5810_v27 = vpop.f32.mrb[8].mxu0  ;;  %v6160_v24 = vmul.f32 %v6838_v35, %v6838_v35  ;;  %v6794_v48 = vpack.c.bf16 %v8497_v4, %v8490_v1 }
 0x270   :  { %v6839_v12 = vadd.f32 %v5810_v27, %v8407_v61  ;;  %v5812_v31 = vpop.f32.mrb[9].mxu0 }
 0x271   :  { %v5850_v11 = vpop.f32.mrb[40].mxu1  ;;  %6096 = vst [vmem:[%s8614_s2 + $0x18] sm:$0xff] %v6786_v52  ;;  %v6840_v6 = vadd.f32 %v5812_v31, %v8409_v51  ;;  %v5814_v63 = vpop.f32.mrb[10].mxu0  ;;  %v6208_v57 = vadd.f32 %v6207_v58, %v6160_v24  ;;  %6104 = vst [vmem:[%s8614_s2 + $0x58] sm:$0xff] %v6794_v48 }
 0x272   :  { %v8506_v21 = vadd.f32 %v8431_v43, %v5850_v11  ;;  %v5852_v55 = vpop.f32.mrb[41].mxu1  ;;  %v6112_v13 = vadd.f32 %v6839_v12, %v6111_v2  ;;  %v6161_v61 = vmul.f32 %v6839_v12, %v6839_v12  ;;  %v5816_v62 = vpop.f32.mrb[11].mxu0  ;;  %v6841_v25 = vadd.f32 %v5814_v63, %v8411_v26 }
 0x273   :  { %v8513_v14 = vadd.f32 %v8433_v18, %v5852_v55  ;;  %v5854_v15 = vpop.f32.mrb[42].mxu1  ;;  %v6787_v33 = vpack.c.bf16 %v6840_v6, %v6839_v12  ;;  %v6133_v19 = vadd.f32 %v6840_v6, %v6132_v9  ;;  %v6162_v43 = vmul.f32 %v6840_v6, %v6840_v6 }
 0x274   :  { %v5856_v45 = vpop.f32.mrb[43].mxu1  ;;  %v6188_v56 = vadd.f32 %v6187_v17, %v6161_v61  ;;  %v8522_v18 = vadd.f32 %v8435_v41, %v5854_v15  ;;  %v6842_v30 = vadd.f32 %v5816_v62, %v8413_v36  ;;  %v6113_v44 = vadd.f32 %v6841_v25, %v6112_v13 }
 0x275   :  { %v6795_v51 = vpack.c.bf16 %v8513_v14, %v8506_v21  ;;  %6097 = vst [vmem:[%s8614_s2 + $0x20] sm:$0xff] %v6787_v33  ;;  %v6209_v46 = vadd.f32 %v6208_v57, %v6162_v43  ;;  %v8526_v50 = vadd.f32 %v8437_v23, %v5856_v45  ;;  %v6163_v10 = vmul.f32 %v6841_v25, %v6841_v25 }
 0x276   :  { %v6788_v26 = vpack.c.bf16 %v6842_v30, %v6841_v25  ;;  %v6134_v29 = vadd.f32 %v6842_v30, %v6133_v19  ;;  %v6164_v3 = vmul.f32 %v6842_v30, %v6842_v30  ;;  %v6169_v57 = vmul.f32 %v8448_v0, %v8448_v0 }
 0x277   :  { %6105 = vst [vmem:[%s8614_s2 + $0x60] sm:$0xff] %v6795_v51  ;;  %v5820_v8 = vpop.f32.mrb[12].mxu0  ;;  %v6189_v20 = vadd.f32 %v6188_v56, %v6163_v10  ;;  %v6796_v41 = vpack.c.bf16 %v8526_v50, %v8522_v18  ;;  %v6172_v25 = vmul.f32 %v8462_v49, %v8462_v49 }
 0x278   :  { %v6843_v59 = vadd.f32 %v5820_v8, %v8415_v39  ;;  %v5822_v54 = vpop.f32.mrb[13].mxu0  ;;  %6098 = vst [vmem:[%s8614_s2 + $0x28] sm:$0xff] %v6788_v26  ;;  %v6210_v23 = vadd.f32 %v6209_v46, %v6164_v3  ;;  %v6174_v26 = vmul.f32 %v8481_v32, %v8481_v32  ;;  %v6177_v3 = vmul.f32 %v8506_v21, %v8506_v21 }
 0x279   :  { %v5860_v36 = vpop.f32.mrb[44].mxu1  ;;  %v6844_v22 = vadd.f32 %v5822_v54, %v8417_v37  ;;  %v5824_v58 = vpop.f32.mrb[14].mxu0  ;;  %6106 = vst [vmem:[%s8614_s2 + $0x68] sm:$0xff] %v6796_v41  ;;  %v6178_v54 = vmul.f32 %v8513_v14, %v8513_v14 }
 0x27a   :  { %v8538_v5 = vadd.f32 %v8439_v42, %v5860_v36  ;;  %v5862_v2 = vpop.f32.mrb[45].mxu1  ;;  %v6114_v28 = vadd.f32 %v6843_v59, %v6113_v44  ;;  %v6165_v39 = vmul.f32 %v6843_v59, %v6843_v59  ;;  %v6845_v17 = vadd.f32 %v5824_v58, %v8419_v40  ;;  %v5826_v9 = vpop.f32.mrb[15].mxu0 }
 0x27b   :  { %v8545_v35 = vadd.f32 %v8441_v53, %v5862_v2  ;;  %v5864_v52 = vpop.f32.mrb[46].mxu1  ;;  %v6789_v27 = vpack.c.bf16 %v6844_v22, %v6843_v59  ;;  %v6135_v42 = vadd.f32 %v6844_v22, %v6134_v29  ;;  %v6166_v24 = vmul.f32 %v6844_v22, %v6844_v22 }
 0x27c   :  { %v5866_v48 = vpop.f32.mrb[47].mxu1  ;;  %v6190_v37 = vadd.f32 %v6189_v20, %v6165_v39  ;;  %v6115_v11 = vadd.f32 %v6845_v17, %v6114_v28  ;;  %v6167_v53 = vmul.f32 %v6845_v17, %v6845_v17  ;;  %v6876_v6 = vadd.f32 %v8443_v60, %v5864_v52 }
 0x27d   :  { %v6797_v12 = vpack.c.bf16 %v8545_v35, %v8538_v5  ;;  %6099 = vst [vmem:[%s8614_s2 + $0x30] sm:$0xff] %v6789_v27  ;;  %v6211_v31 = vadd.f32 %v6210_v23, %v6166_v24  ;;  %v6846_v40 = vadd.f32 %v5826_v9, %v8421_v47  ;;  %v6878_v63 = vadd.f32 %v8445_v34, %v5866_v48 }
 0x27e   :  { %v6116_v55 = vadd.f32 %v8448_v0, %v6115_v11  ;;  %v6191_v13 = vadd.f32 %v6190_v37, %v6167_v53  ;;  %v6171_v47 = vmul.f32 %v8454_v7, %v8454_v7  ;;  %v6170_v0 = vmul.f32 %v8451_v16, %v8451_v16 }
 0x27f   :  { %6107 = vst [vmem:[%s8614_s2 + $0x70] sm:$0xff] %v6797_v12  ;;  %v6790_v61 = vpack.c.bf16 %v6846_v40, %v6845_v17  ;;  %v6136_v15 = vadd.f32 %v6846_v40, %v6135_v42  ;;  %v6168_v33 = vmul.f32 %v6846_v40, %v6846_v40  ;;  %v6798_v60 = vpack.c.bf16 %v6878_v63, %v6876_v6 }
 0x280   :  { %v6117_v62 = vadd.f32 %v8454_v7, %v6116_v55  ;;  %v6192_v19 = vadd.f32 %v6191_v13, %v6169_v57  ;;  %v6173_v7 = vmul.f32 %v8477_v38, %v8477_v38  ;;  %v6176_v20 = vmul.f32 %v8497_v4, %v8497_v4 }
 0x281   :  { %6100 = vst [vmem:[%s8614_s2 + $0x38] sm:$0xff] %v6790_v61  ;;  %v6137_v34 = vadd.f32 %v8451_v16, %v6136_v15  ;;  %v6212_v45 = vadd.f32 %v6211_v31, %v6168_v33  ;;  %6108 = vst [vmem:[%s8614_s2 + $0x78] sm:$0xff] %v6798_v60  ;;  %v6175_v16 = vmul.f32 %v8490_v1, %v8490_v1 }
 0x282   :  { %v6118_v43 = vadd.f32 %v8477_v38, %v6117_v62  ;;  %v6193_v56 = vadd.f32 %v6192_v19, %v6171_v47  ;;  %v6179_v59 = vmul.f32 %v8522_v18, %v8522_v18  ;;  %v6181_v22 = vmul.f32 %v8538_v5, %v8538_v5 }
 0x283   :  { %v6138_v51 = vadd.f32 %v8462_v49, %v6137_v34  ;;  %v6213_v30 = vadd.f32 %v6212_v45, %v6170_v0  ;;  %v6180_v58 = vmul.f32 %v8526_v50, %v8526_v50  ;;  %v6183_v39 = vmul.f32 %v6876_v6, %v6876_v6 }
 0x284   :  { %v6119_v46 = vadd.f32 %v8490_v1, %v6118_v43  ;;  %v6194_v44 = vadd.f32 %v6193_v56, %v6173_v7  ;;  %v6184_v48 = vmul.f32 %v6878_v63, %v6878_v63 }
 0x285   :  { %v6139_v10 = vadd.f32 %v8481_v32, %v6138_v51  ;;  %v6214_v29 = vadd.f32 %v6213_v30, %v6172_v25 }
 0x286   :  { %v6120_v38 = vadd.f32 %v8506_v21, %v6119_v46  ;;  %v6195_v8 = vadd.f32 %v6194_v44, %v6175_v16 }
 0x287   :  { %v6140_v49 = vadd.f32 %v8497_v4, %v6139_v10  ;;  %v6215_v41 = vadd.f32 %v6214_v29, %v6174_v26 }
 0x288   :  { %v6121_v1 = vadd.f32 %v8522_v18, %v6120_v38  ;;  %v6196_v36 = vadd.f32 %v6195_v8, %v6177_v3 }
 0x289   :  { %v6141_v32 = vadd.f32 %v8513_v14, %v6140_v49  ;;  %v6216_v23 = vadd.f32 %v6215_v41, %v6176_v20  ;;  %v6182_v14 = vmul.f32 %v8545_v35, %v8545_v35 }
 0x28a   :  { %v6122_v21 = vadd.f32 %v8538_v5, %v6121_v1  ;;  %v6197_v2 = vadd.f32 %v6196_v36, %v6179_v59 }
 0x28b   :  { %v6142_v4 = vadd.f32 %v8526_v50, %v6141_v32  ;;  %v6217_v18 = vadd.f32 %v6216_v23, %v6178_v54 }
 0x28c   :  { %v6123_v28 = vadd.f32 %v6876_v6, %v6122_v21  ;;  %v6198_v17 = vadd.f32 %v6197_v2, %v6181_v22 }
 0x28d   :  { %v6143_v52 = vadd.f32 %v8545_v35, %v6142_v4  ;;  %v6218_v27 = vadd.f32 %v6217_v18, %v6180_v58 }
 0x28e   :  { %v6124_v9 = vrot.slane %v6123_v28, 4  ;;  %v6199_v42 = vadd.f32 %v6198_v17, %v6183_v39 }
 0x28f   :  { %v6144_v24 = vadd.f32 %v6878_v63, %v6143_v52  ;;  %v6219_v37 = vadd.f32 %v6218_v27, %v6182_v14 }
 0x290   :  { %v6125_v5 = vadd.f32 %v6124_v9, %v6123_v28  ;;  %v6200_v12 = vrot.slane %v6199_v42, 4 }
 0x291   :  { %v6145_v11 = vrot.slane %v6144_v24, 4  ;;  %v6220_v50 = vadd.f32 %v6219_v37, %v6184_v48 }
 0x292   :  { %v6126_v31 = vrot.slane %v6125_v5, 2  ;;  %v6201_v53 = vadd.f32 %v6200_v12, %v6199_v42 }
 0x293   :  { %v6146_v40 = vadd.f32 %v6145_v11, %v6144_v24  ;;  %v6221_v55 = vrot.slane %v6220_v50, 4 }
 0x294   :  { %v6127_v6 = vadd.f32 %v6126_v31, %v6125_v5  ;;  %v6202_v57 = vrot.slane %v6201_v53, 2 }
 0x295   :  { %v6147_v13 = vrot.slane %v6146_v40, 2  ;;  %v6222_v61 = vadd.f32 %v6221_v55, %v6220_v50 }
 0x296   :  { %v6128_v15 = vrot.slane %v6127_v6, 1  ;;  %v6203_v35 = vadd.f32 %v6202_v57, %v6201_v53 }
 0x297   :  { %v6148_v62 = vadd.f32 %v6147_v13, %v6146_v40  ;;  %v6223_v33 = vrot.slane %v6222_v61, 2 }
 0x298   :  { %v6204_v60 = vrot.slane %v6203_v35, 1  ;;  %v6129_v63 = vadd.f32 %v6128_v15, %v6127_v6 }
 0x299   :  { %v6149_v47 = vrot.slane %v6148_v62, 1  ;;  %v6224_v19 = vadd.f32 %v6223_v33, %v6222_v61 }
 0x29a   :  { %v6205_v34 = vadd.f32 %v6204_v60, %v6203_v35 }
 0x29b   :  { %v6225_v0 = vrot.slane %v6224_v19, 1  ;;  %v6150_v45 = vadd.f32 %v6149_v47, %v6148_v62 }
 0x29c   :  { %v6230_v43 = vsel %vm51_vm1, %v6129_v63, %v6205_v34 }
 0x29d   :  { %v6226_v7 = vadd.f32 %v6225_v0, %v6224_v19 }
 0x29f   :  { %v6231_v56 = vsel %vm51_vm1, %v6150_v45, %v6226_v7 }
 0x2a0   :  { %v6234_v51 = vcombine.low %v6230_v43, %v6231_v56 }
 0x2a2   :  { %6766 = vst.sshfl [vmem:[%s8615_s3] sm:$0x33 pattern:$0x76325410] %v6234_v51 }
 0x2a3   :  { %6252 = vsyncpa [#allocation5], 1 }
 0x2a4   :  { %6253 = vsyncpa [#allocation7], 1 }

</bundles_post_ra>
